<compile_context>
chip_gen: v6e
topology: v6e:2x2x1
jax: 0.10.0
libtpu: 0.0.40
codegen_flags: <defaults>
</compile_context>

<pallas_src>
import functools

import jax
import jax.numpy as jnp
from jax import lax
from jax.experimental import pallas as pl
from jax.experimental.pallas import tpu as pltpu

# Left zero-margin (in pixels) for the in-VMEM padded image.  8 keeps the
# interior store sublane-aligned for f32; the 3x3 taps then read at column
# offsets _LPAD-1 .. _LPAD+1 (unaligned reads are cheap and well supported).
_LPAD = 8


# ----------------------------------------------------------------------------
# In-kernel helpers
# ----------------------------------------------------------------------------
def _accum_conv3x3(pad_ref, w_ref, acc_ref, H, W):
    """acc_ref += 3x3 conv (stride 1) of the zero-padded image in `pad_ref`.

    pad_ref : (H+2, W+_LPAD+1, Cin) f32 scratch; image interior at rows [1, H],
              cols [_LPAD, _LPAD+W).
    w_ref   : (9, Cin, Cout) bf16 tap weights, tap index = kh*3 + kw.
    acc_ref : (H*W, Cout) f32 accumulator scratch.
    """
    cin = w_ref.shape[1]
    for kh in range(3):
        for kw in range(3):
            col0 = _LPAD - 1 + kw
            xs = pad_ref[kh:kh + H, col0:col0 + W, :]
            xs = xs.reshape(H * W, cin).astype(w_ref.dtype)  # bf16 for the MXU
            acc_ref[...] += jnp.dot(xs, w_ref[kh * 3 + kw],
                                    preferred_element_type=jnp.float32)


# ----------------------------------------------------------------------------
# Kernels
# ----------------------------------------------------------------------------
def _fused_block_kernel(x_ref, w1_ref, s1_ref, b1_ref, w2_ref, s2_ref, b2_ref,
                        out_ref, xpad, y1pad, acc, *, H, W):
    """stride=1 BasicBlock: conv1+BN+ReLU -> conv2+BN -> +x -> ReLU, fully fused."""
    cout = w1_ref.shape[2]

    # Zero-padded input built in VMEM (no wrapper jnp.pad, no extra HBM pass).
    xpad[...] = jnp.zeros_like(xpad)
    xpad[1:H + 1, _LPAD:_LPAD + W, :] = x_ref[0].astype(xpad.dtype)

    # conv1 -> BN -> ReLU; y1 never leaves VMEM.
    acc[...] = jnp.zeros_like(acc)
    _accum_conv3x3(xpad, w1_ref, acc, H, W)
    y1 = jnp.maximum(acc[...] * s1_ref[0] + b1_ref[0], 0.0)
    y1pad[...] = jnp.zeros_like(y1pad)
    y1pad[1:H + 1, _LPAD:_LPAD + W, :] = y1.reshape(H, W, cout)

    # conv2 -> BN -> +residual -> ReLU -> single HBM store.
    acc[...] = jnp.zeros_like(acc)
    _accum_conv3x3(y1pad, w2_ref, acc, H, W)
    y2 = acc[...] * s2_ref[0] + b2_ref[0]
    res = x_ref[0].astype(jnp.float32).reshape(H * W, cout)
    out = jnp.maximum(y2 + res, 0.0)
    out_ref[0] = out.reshape(H, W, cout).astype(out_ref.dtype)


def _conv_bn_relu_kernel(x_ref, w_ref, s_ref, b_ref, out_ref, xpad, acc, *, H, W):
    """conv3x3(pad=1, stride=1) -> BN(affine) -> ReLU (stride-2 path, stage 1)."""
    cout = w_ref.shape[2]
    xpad[...] = jnp.zeros_like(xpad)
    xpad[1:H + 1, _LPAD:_LPAD + W, :] = x_ref[0].astype(xpad.dtype)
    acc[...] = jnp.zeros_like(acc)
    _accum_conv3x3(xpad, w_ref, acc, H, W)
    y = jnp.maximum(acc[...] * s_ref[0] + b_ref[0], 0.0)
    out_ref[0] = y.reshape(H, W, cout).astype(out_ref.dtype)


def _conv_bn_shortcut_relu_kernel(y_ref, w2_ref, s2_ref, b2_ref,
                                  xs_ref, wd_ref, bd_ref, out_ref,
                                  ypad, acc, *, H, W):
    """conv3x3+BN, fused 1x1 shortcut (with bias), add, ReLU (stride-2, stage 2)."""
    cout = w2_ref.shape[2]
    cin = wd_ref.shape[0]
    ypad[...] = jnp.zeros_like(ypad)
    ypad[1:H + 1, _LPAD:_LPAD + W, :] = y_ref[0].astype(ypad.dtype)
    acc[...] = jnp.zeros_like(acc)
    _accum_conv3x3(ypad, w2_ref, acc, H, W)
    y2 = acc[...] * s2_ref[0] + b2_ref[0]
    # Fused 1x1 stride-2 shortcut (input already spatially subsampled):
    xs = xs_ref[0].astype(jnp.float32).reshape(H * W, cin).astype(wd_ref.dtype)
    res = jnp.dot(xs, wd_ref[...], preferred_element_type=jnp.float32) + bd_ref[0]
    out = jnp.maximum(y2 + res, 0.0)
    out_ref[0] = out.reshape(H, W, cout).astype(out_ref.dtype)


# ----------------------------------------------------------------------------
# pallas_call wrappers
# ----------------------------------------------------------------------------
def _padded_scratch(H, W, C):
    return pltpu.VMEM((H + 2, W + _LPAD + 1, C), jnp.float32)


_CPARAMS = pltpu.CompilerParams(dimension_semantics=("parallel",))


def _call_fused_block(x, w1, s1, b1, w2, s2, b2):
    B, H, W, cin = x.shape
    cout = w1.shape[2]
    kernel = functools.partial(_fused_block_kernel, H=H, W=W)
    return pl.pallas_call(
        kernel,
        out_shape=jax.ShapeDtypeStruct((B, H, W, cout), jnp.float32),
        grid=(B,),
        in_specs=[
            pl.BlockSpec((1, H, W, cin), lambda b: (b, 0, 0, 0)),
            pl.BlockSpec((9, cin, cout), lambda b: (0, 0, 0)),
            pl.BlockSpec((1, cout), lambda b: (0, 0)),
            pl.BlockSpec((1, cout), lambda b: (0, 0)),
            pl.BlockSpec((9, cout, cout), lambda b: (0, 0, 0)),
            pl.BlockSpec((1, cout), lambda b: (0, 0)),
            pl.BlockSpec((1, cout), lambda b: (0, 0)),
        ],
        out_specs=pl.BlockSpec((1, H, W, cout), lambda b: (b, 0, 0, 0)),
        scratch_shapes=[
            _padded_scratch(H, W, cin),               # padded input
            _padded_scratch(H, W, cout),              # padded y1 (stays in VMEM)
            pltpu.VMEM((H * W, cout), jnp.float32),   # f32 accumulator
        ],
        compiler_params=_CPARAMS,
    )(x, w1, s1, b1, w2, s2, b2)


def _call_conv_bn_relu(x, w, s, b):
    B, H, W, cin = x.shape
    cout = w.shape[2]
    kernel = functools.partial(_conv_bn_relu_kernel, H=H, W=W)
    return pl.pallas_call(
        kernel,
        out_shape=jax.ShapeDtypeStruct((B, H, W, cout), jnp.bfloat16),
        grid=(B,),
        in_specs=[
            pl.BlockSpec((1, H, W, cin), lambda b: (b, 0, 0, 0)),
            pl.BlockSpec((9, cin, cout), lambda b: (0, 0, 0)),
            pl.BlockSpec((1, cout), lambda b: (0, 0)),
            pl.BlockSpec((1, cout), lambda b: (0, 0)),
        ],
        out_specs=pl.BlockSpec((1, H, W, cout), lambda b: (b, 0, 0, 0)),
        scratch_shapes=[
            _padded_scratch(H, W, cin),
            pltpu.VMEM((H * W, cout), jnp.float32),
        ],
        compiler_params=_CPARAMS,
    )(x, w, s, b)


def _call_conv_bn_shortcut_relu(y1s, w2, s2, b2, xs, wd, bd):
    B, H, W, cout = y1s.shape
    cin = xs.shape[3]
    kernel = functools.partial(_conv_bn_shortcut_relu_kernel, H=H, W=W)
    return pl.pallas_call(
        kernel,
        out_shape=jax.ShapeDtypeStruct((B, H, W, cout), jnp.float32),
        grid=(B,),
        in_specs=[
            pl.BlockSpec((1, H, W, cout), lambda b: (b, 0, 0, 0)),
            pl.BlockSpec((9, cout, cout), lambda b: (0, 0, 0)),
            pl.BlockSpec((1, cout), lambda b: (0, 0)),
            pl.BlockSpec((1, cout), lambda b: (0, 0)),
            pl.BlockSpec((1, H, W, cin), lambda b: (b, 0, 0, 0)),
            pl.BlockSpec((cin, cout), lambda b: (0, 0)),
            pl.BlockSpec((1, cout), lambda b: (0, 0)),
        ],
        out_specs=pl.BlockSpec((1, H, W, cout), lambda b: (b, 0, 0, 0)),
        scratch_shapes=[
            _padded_scratch(H, W, cout),
            pltpu.VMEM((H * W, cout), jnp.float32),
        ],
        compiler_params=_CPARAMS,
    )(y1s, w2, s2, b2, xs, wd, bd)


# ----------------------------------------------------------------------------
# BasicBlock forward
# ----------------------------------------------------------------------------
def basic_block_nhwc(x_nhwc, params, stride=1):
    """BasicBlock forward on NHWC input; returns NHWC float32 output."""
    x = x_nhwc.astype(jnp.bfloat16)
    w1, w2 = params["w1"], params["w2"]
    s1, b1 = params["bn1_scale"], params["bn1_bias"]
    s2, b2 = params["bn2_scale"], params["bn2_bias"]

    if stride == 1:
        assert w1.shape[1] == w1.shape[2], "stride=1 requires cin == cout"
        return _call_fused_block(x, w1, s1, b1, w2, s2, b2)

    # stride == 2
    y1 = _call_conv_bn_relu(x, w1, s1, b1)      # full-res conv1+BN+ReLU (bf16)
    y1s = y1[:, ::2, ::2, :]                    # stride-2 subsample
    xs = x[:, ::2, ::2, :]                      # shortcut's strided input
    return _call_conv_bn_shortcut_relu(y1s, w2, s2, b2, xs,
                                       params["wd"], params["bd"])


def basic_block(x_nchw, params, stride=1):
    """PyTorch-layout wrapper: NCHW in / NCHW out.

    If the surrounding model can stay in NHWC, call basic_block_nhwc directly
    and skip these two full-tensor layout passes.
    """
    x = jnp.transpose(x_nchw.astype(jnp.bfloat16), (0, 2, 3, 1))
    out = basic_block_nhwc(x, params, stride)
    return jnp.transpose(out, (0, 3, 1, 2))


# ----------------------------------------------------------------------------
# Parameters (conv weights + eval-mode folded BatchNorm2d(cout, eps=0.8))
# ----------------------------------------------------------------------------
def _to_tap_layout(w_oihw):
    # (Cout, Cin, 3, 3) -> (9, Cin, Cout), tap index = kh*3 + kw
    cout, cin = w_oihw.shape[0], w_oihw.shape[1]
    return jnp.transpose(w_oihw, (2, 3, 1, 0)).reshape(9, cin, cout)


def init_params(key, cin, cout, stride=1, eps=0.8):
    keys = jax.random.split(key, 8)
    w1 = jax.random.normal(keys[0], (cout, cin, 3, 3), jnp.float32) * 0.1
    w2 = jax.random.normal(keys[1], (cout, cout, 3, 3), jnp.float32) * 0.1

    def bn_affine(kg, kb):
        # Eval-mode BatchNorm folded to y = x*scale + bias.  Random gamma/beta
        # (as if loaded from a checkpoint) exercise the per-channel broadcast.
        gamma = 1.0 + 0.2 * jax.random.normal(kg, (cout,), jnp.float32)
        beta = 0.1 * jax.random.normal(kb, (cout,), jnp.float32)
        rmean = jnp.zeros((cout,), jnp.float32)
        rvar = jnp.ones((cout,), jnp.float32)
        scale = gamma / jnp.sqrt(rvar + eps)
        bias = beta - rmean * scale
        return scale.reshape(1, cout), bias.reshape(1, cout)

    s1, b1 = bn_affine(keys[2], keys[3])
    s2, b2 = bn_affine(keys[4], keys[5])
    p = dict(
        w1_oihw=w1, w2_oihw=w2,
        w1=_to_tap_layout(w1).astype(jnp.bfloat16),
        w2=_to_tap_layout(w2).astype(jnp.bfloat16),
        bn1_scale=s1, bn1_bias=b1, bn2_scale=s2, bn2_bias=b2,
    )
    if stride == 2:
        wd = jax.random.normal(keys[6], (cout, cin, 1, 1), jnp.float32) * 0.1
        bd = jax.random.normal(keys[7], (cout,), jnp.float32) * 0.1
        p["wd_oihw"] = wd
        p["wd"] = jnp.transpose(wd[:, :, 0, 0], (1, 0)).astype(jnp.bfloat16)
        p["bd"] = bd.reshape(1, cout)
    return p


# ----------------------------------------------------------------------------
# Pure-JAX reference (float32) for correctness checking
# ----------------------------------------------------------------------------
def _ref_basic_block(x_nchw, p, stride=1):
    def conv(x, w, s, pad):
        return lax.conv_general_dilated(
            x, w, (s, s), [(pad, pad), (pad, pad)],
            dimension_numbers=("NCHW", "OIHW", "NCHW"))

    def bn(x, scale, bias):
        return x * scale.reshape(1, -1, 1, 1) + bias.reshape(1, -1, 1, 1)

    y = conv(x_nchw, p["w1_oihw"], stride, 1)
    y = jnp.maximum(bn(y, p["bn1_scale"], p["bn1_bias"]), 0.0)
    y = conv(y, p["w2_oihw"], 1, 1)
    y = bn(y, p["bn2_scale"], p["bn2_bias"])
    if stride == 2:
        res = conv(x_nchw, p["wd_oihw"], 2, 0) + p["bd"].reshape(1, -1, 1, 1)
    else:
        res = x_nchw
    return jnp.maximum(res + y, 0.0)


if __name__ == "__main__":
    key = jax.random.PRNGKey(0)
    kx1, kp1, kx2, kp2 = jax.random.split(key, 4)

    # Case 1: stride=1, in_features == out_features (fully fused single kernel).
    B, C, H, W = 2, 8, 16, 16
    x1 = jax.random.normal(kx1, (B, C, H, W), jnp.float32)
    params1 = init_params(kp1, C, C, stride=1)
    out1 = jax.block_until_ready(basic_block(x1, params1, stride=1))
    ref1 = _ref_basic_block(x1, params1, stride=1)
    assert out1.shape == ref1.shape == (B, C, H, W)
    if not bool(jnp.allclose(out1, ref1, atol=5e-2, rtol=5e-2)):
        raise SystemExit("stride=1 Pallas output does not match JAX reference")

    # Case 2: stride=2 downsampling block with channel expansion.
    Cin2, Cout2 = 8, 16
    x2 = jax.random.normal(kx2, (B, Cin2, H, W), jnp.float32)
    params2 = init_params(kp2, Cin2, Cout2, stride=2)
    out2 = jax.block_until_ready(basic_block(x2, params2, stride=2))
    ref2 = _ref_basic_block(x2, params2, stride=2)
    assert out2.shape == ref2.shape == (B, Cout2, H // 2, W // 2)
    if not bool(jnp.allclose(out2, ref2, atol=5e-2, rtol=5e-2)):
        raise SystemExit("stride=2 Pallas output does not match JAX reference")

    print("KERNEL_OK")
</pallas_src>

<mosaic_0001>
module attributes {stable_mosaic.version = 11 : i64} {
  func.func @_fused_block_kernel(%arg0: i32, %arg1: memref<1x16x16x8xbf16, #tpu.memory_space<vmem>>, %arg2: memref<9x8x8xbf16, #tpu.memory_space<vmem>>, %arg3: memref<1x8xf32, #tpu.memory_space<vmem>>, %arg4: memref<1x8xf32, #tpu.memory_space<vmem>>, %arg5: memref<9x8x8xbf16, #tpu.memory_space<vmem>>, %arg6: memref<1x8xf32, #tpu.memory_space<vmem>>, %arg7: memref<1x8xf32, #tpu.memory_space<vmem>>, %arg8: memref<1x16x16x8xf32, #tpu.memory_space<vmem>>, %arg9: memref<18x25x8xf32, #tpu.memory_space<vmem>>, %arg10: memref<18x25x8xf32, #tpu.memory_space<vmem>>, %arg11: memref<256x8xf32, #tpu.memory_space<vmem>>) attributes {dimension_semantics = [#tpu.dimension_semantics<parallel>], iteration_bounds = array<i64: 2>, scalar_prefetch = 0 : i64, scratch_operands = 3 : i64, tpu.core_type = #tpu.core_type<tc>, window_params = [{transform_indices = @transform_0, window_bounds = array<i64: 1, 16, 16, 8>}, {pipeline_mode = #tpu.pipeline_mode<synchronous>, transform_indices = @transform_1, window_bounds = array<i64: 9, 8, 8>}, {pipeline_mode = #tpu.pipeline_mode<synchronous>, transform_indices = @transform_2, window_bounds = array<i64: 1, 8>}, {pipeline_mode = #tpu.pipeline_mode<synchronous>, transform_indices = @transform_3, window_bounds = array<i64: 1, 8>}, {pipeline_mode = #tpu.pipeline_mode<synchronous>, transform_indices = @transform_4, window_bounds = array<i64: 9, 8, 8>}, {pipeline_mode = #tpu.pipeline_mode<synchronous>, transform_indices = @transform_5, window_bounds = array<i64: 1, 8>}, {pipeline_mode = #tpu.pipeline_mode<synchronous>, transform_indices = @transform_6, window_bounds = array<i64: 1, 8>}, {transform_indices = @transform_7, window_bounds = array<i64: 1, 16, 16, 8>}]} {
    %cst = arith.constant 0.000000e+00 : f32
    %0 = vector.broadcast %cst : f32 to vector<18x25x8xf32>
    %c0 = arith.constant 0 : index
    %c0_0 = arith.constant 0 : index
    %c0_1 = arith.constant 0 : index
    %1 = vector.load %arg9[%c0, %c0_0, %c0_1] : memref<18x25x8xf32, #tpu.memory_space<vmem>>, vector<18x25x8xf32>
    tpu.vector_store %arg9[%c0, %c0_0, %c0_1], %0 {strides = array<i32>} : memref<18x25x8xf32, #tpu.memory_space<vmem>>, vector<18x25x8xf32>,
    %c0_2 = arith.constant 0 : index
    %c0_3 = arith.constant 0 : index
    %c0_4 = arith.constant 0 : index
    %c0_5 = arith.constant 0 : index
    %2 = vector.load %arg1[%c0_2, %c0_3, %c0_4, %c0_5] : memref<1x16x16x8xbf16, #tpu.memory_space<vmem>>, vector<1x16x16x8xbf16>
    %3 = vector.shape_cast %2 : vector<1x16x16x8xbf16> to vector<16x16x8xbf16>
    %4 = arith.extf %3 : vector<16x16x8xbf16> to vector<16x16x8xf32>
    %c1 = arith.constant 1 : index
    %c8 = arith.constant 8 : index
    %c0_6 = arith.constant 0 : index
    %5 = vector.load %arg9[%c1, %c8, %c0_6] : memref<18x25x8xf32, #tpu.memory_space<vmem>>, vector<16x16x8xf32>
    tpu.vector_store %arg9[%c1, %c8, %c0_6], %4 {strides = array<i32>} : memref<18x25x8xf32, #tpu.memory_space<vmem>>, vector<16x16x8xf32>,
    %cst_7 = arith.constant 0.000000e+00 : f32
    %6 = vector.broadcast %cst_7 : f32 to vector<256x8xf32>
    %c0_8 = arith.constant 0 : index
    %c0_9 = arith.constant 0 : index
    %7 = vector.load %arg11[%c0_8, %c0_9] : memref<256x8xf32, #tpu.memory_space<vmem>>, vector<256x8xf32>
    tpu.vector_store %arg11[%c0_8, %c0_9], %6 {strides = array<i32>} : memref<256x8xf32, #tpu.memory_space<vmem>>, vector<256x8xf32>,
    %c0_10 = arith.constant 0 : index
    %c7 = arith.constant 7 : index
    %c0_11 = arith.constant 0 : index
    %8 = vector.load %arg9[%c0_10, %c7, %c0_11] : memref<18x25x8xf32, #tpu.memory_space<vmem>>, vector<16x16x8xf32>
    %9 = vector.shape_cast %8 : vector<16x16x8xf32> to vector<256x8xf32>
    %10 = arith.truncf %9 : vector<256x8xf32> to vector<256x8xbf16>
    %c0_12 = arith.constant 0 : index
    %c0_13 = arith.constant 0 : index
    %11 = vector.load %arg11[%c0_12, %c0_13] : memref<256x8xf32, #tpu.memory_space<vmem>>, vector<256x8xf32>
    %c0_14 = arith.constant 0 : index
    %c0_15 = arith.constant 0 : index
    %c0_16 = arith.constant 0 : index
    %12 = vector.load %arg2[%c0_14, %c0_15, %c0_16] : memref<9x8x8xbf16, #tpu.memory_space<vmem>>, vector<1x8x8xbf16>
    %13 = vector.shape_cast %12 : vector<1x8x8xbf16> to vector<8x8xbf16>
    %cst_17 = arith.constant dense<0.000000e+00> : vector<256x8xf32>
    %14 = tpu.matmul %10, %13, %cst_17 {dimension_numbers = #tpu.dot_dimension_numbers<[1], [0], [0], [1], [0, 0, 1, 1], [], []>} : vector<256x8xbf16>, vector<8x8xbf16>, vector<256x8xf32> -> vector<256x8xf32>
    %15 = arith.addf %11, %14 : vector<256x8xf32>
    %c0_18 = arith.constant 0 : index
    %c0_19 = arith.constant 0 : index
    %16 = vector.load %arg11[%c0_18, %c0_19] : memref<256x8xf32, #tpu.memory_space<vmem>>, vector<256x8xf32>
    tpu.vector_store %arg11[%c0_18, %c0_19], %15 {strides = array<i32>} : memref<256x8xf32, #tpu.memory_space<vmem>>, vector<256x8xf32>,
    %c0_20 = arith.constant 0 : index
    %c8_21 = arith.constant 8 : index
    %c0_22 = arith.constant 0 : index
    %17 = vector.load %arg9[%c0_20, %c8_21, %c0_22] : memref<18x25x8xf32, #tpu.memory_space<vmem>>, vector<16x16x8xf32>
    %18 = vector.shape_cast %17 : vector<16x16x8xf32> to vector<256x8xf32>
    %19 = arith.truncf %18 : vector<256x8xf32> to vector<256x8xbf16>
    %c0_23 = arith.constant 0 : index
    %c0_24 = arith.constant 0 : index
    %20 = vector.load %arg11[%c0_23, %c0_24] : memref<256x8xf32, #tpu.memory_space<vmem>>, vector<256x8xf32>
    %c1_25 = arith.constant 1 : index
    %c0_26 = arith.constant 0 : index
    %c0_27 = arith.constant 0 : index
    %21 = vector.load %arg2[%c1_25, %c0_26, %c0_27] : memref<9x8x8xbf16, #tpu.memory_space<vmem>>, vector<1x8x8xbf16>
    %22 = vector.shape_cast %21 : vector<1x8x8xbf16> to vector<8x8xbf16>
    %cst_28 = arith.constant dense<0.000000e+00> : vector<256x8xf32>
    %23 = tpu.matmul %19, %22, %cst_28 {dimension_numbers = #tpu.dot_dimension_numbers<[1], [0], [0], [1], [0, 0, 1, 1], [], []>} : vector<256x8xbf16>, vector<8x8xbf16>, vector<256x8xf32> -> vector<256x8xf32>
    %24 = arith.addf %20, %23 : vector<256x8xf32>
    %c0_29 = arith.constant 0 : index
    %c0_30 = arith.constant 0 : index
    %25 = vector.load %arg11[%c0_29, %c0_30] : memref<256x8xf32, #tpu.memory_space<vmem>>, vector<256x8xf32>
    tpu.vector_store %arg11[%c0_29, %c0_30], %24 {strides = array<i32>} : memref<256x8xf32, #tpu.memory_space<vmem>>, vector<256x8xf32>,
    %c0_31 = arith.constant 0 : index
    %c9 = arith.constant 9 : index
    %c0_32 = arith.constant 0 : index
    %26 = vector.load %arg9[%c0_31, %c9, %c0_32] : memref<18x25x8xf32, #tpu.memory_space<vmem>>, vector<16x16x8xf32>
    %27 = vector.shape_cast %26 : vector<16x16x8xf32> to vector<256x8xf32>
    %28 = arith.truncf %27 : vector<256x8xf32> to vector<256x8xbf16>
    %c0_33 = arith.constant 0 : index
    %c0_34 = arith.constant 0 : index
    %29 = vector.load %arg11[%c0_33, %c0_34] : memref<256x8xf32, #tpu.memory_space<vmem>>, vector<256x8xf32>
    %c2 = arith.constant 2 : index
    %c0_35 = arith.constant 0 : index
    %c0_36 = arith.constant 0 : index
    %30 = vector.load %arg2[%c2, %c0_35, %c0_36] : memref<9x8x8xbf16, #tpu.memory_space<vmem>>, vector<1x8x8xbf16>
    %31 = vector.shape_cast %30 : vector<1x8x8xbf16> to vector<8x8xbf16>
    %cst_37 = arith.constant dense<0.000000e+00> : vector<256x8xf32>
    %32 = tpu.matmul %28, %31, %cst_37 {dimension_numbers = #tpu.dot_dimension_numbers<[1], [0], [0], [1], [0, 0, 1, 1], [], []>} : vector<256x8xbf16>, vector<8x8xbf16>, vector<256x8xf32> -> vector<256x8xf32>
    %33 = arith.addf %29, %32 : vector<256x8xf32>
    %c0_38 = arith.constant 0 : index
    %c0_39 = arith.constant 0 : index
    %34 = vector.load %arg11[%c0_38, %c0_39] : memref<256x8xf32, #tpu.memory_space<vmem>>, vector<256x8xf32>
    tpu.vector_store %arg11[%c0_38, %c0_39], %33 {strides = array<i32>} : memref<256x8xf32, #tpu.memory_space<vmem>>, vector<256x8xf32>,
    %c1_40 = arith.constant 1 : index
    %c7_41 = arith.constant 7 : index
    %c0_42 = arith.constant 0 : index
    %35 = vector.load %arg9[%c1_40, %c7_41, %c0_42] : memref<18x25x8xf32, #tpu.memory_space<vmem>>, vector<16x16x8xf32>
    %36 = vector.shape_cast %35 : vector<16x16x8xf32> to vector<256x8xf32>
    %37 = arith.truncf %36 : vector<256x8xf32> to vector<256x8xbf16>
    %c0_43 = arith.constant 0 : index
    %c0_44 = arith.constant 0 : index
    %38 = vector.load %arg11[%c0_43, %c0_44] : memref<256x8xf32, #tpu.memory_space<vmem>>, vector<256x8xf32>
    %c3 = arith.constant 3 : index
    %c0_45 = arith.constant 0 : index
    %c0_46 = arith.constant 0 : index
    %39 = vector.load %arg2[%c3, %c0_45, %c0_46] : memref<9x8x8xbf16, #tpu.memory_space<vmem>>, vector<1x8x8xbf16>
    %40 = vector.shape_cast %39 : vector<1x8x8xbf16> to vector<8x8xbf16>
    %cst_47 = arith.constant dense<0.000000e+00> : vector<256x8xf32>
    %41 = tpu.matmul %37, %40, %cst_47 {dimension_numbers = #tpu.dot_dimension_numbers<[1], [0], [0], [1], [0, 0, 1, 1], [], []>} : vector<256x8xbf16>, vector<8x8xbf16>, vector<256x8xf32> -> vector<256x8xf32>
    %42 = arith.addf %38, %41 : vector<256x8xf32>
    %c0_48 = arith.constant 0 : index
    %c0_49 = arith.constant 0 : index
    %43 = vector.load %arg11[%c0_48, %c0_49] : memref<256x8xf32, #tpu.memory_space<vmem>>, vector<256x8xf32>
    tpu.vector_store %arg11[%c0_48, %c0_49], %42 {strides = array<i32>} : memref<256x8xf32, #tpu.memory_space<vmem>>, vector<256x8xf32>,
    %c1_50 = arith.constant 1 : index
    %c8_51 = arith.constant 8 : index
    %c0_52 = arith.constant 0 : index
    %44 = vector.load %arg9[%c1_50, %c8_51, %c0_52] : memref<18x25x8xf32, #tpu.memory_space<vmem>>, vector<16x16x8xf32>
    %45 = vector.shape_cast %44 : vector<16x16x8xf32> to vector<256x8xf32>
    %46 = arith.truncf %45 : vector<256x8xf32> to vector<256x8xbf16>
    %c0_53 = arith.constant 0 : index
    %c0_54 = arith.constant 0 : index
    %47 = vector.load %arg11[%c0_53, %c0_54] : memref<256x8xf32, #tpu.memory_space<vmem>>, vector<256x8xf32>
    %c4 = arith.constant 4 : index
    %c0_55 = arith.constant 0 : index
    %c0_56 = arith.constant 0 : index
    %48 = vector.load %arg2[%c4, %c0_55, %c0_56] : memref<9x8x8xbf16, #tpu.memory_space<vmem>>, vector<1x8x8xbf16>
    %49 = vector.shape_cast %48 : vector<1x8x8xbf16> to vector<8x8xbf16>
    %cst_57 = arith.constant dense<0.000000e+00> : vector<256x8xf32>
    %50 = tpu.matmul %46, %49, %cst_57 {dimension_numbers = #tpu.dot_dimension_numbers<[1], [0], [0], [1], [0, 0, 1, 1], [], []>} : vector<256x8xbf16>, vector<8x8xbf16>, vector<256x8xf32> -> vector<256x8xf32>
    %51 = arith.addf %47, %50 : vector<256x8xf32>
    %c0_58 = arith.constant 0 : index
    %c0_59 = arith.constant 0 : index
    %52 = vector.load %arg11[%c0_58, %c0_59] : memref<256x8xf32, #tpu.memory_space<vmem>>, vector<256x8xf32>
    tpu.vector_store %arg11[%c0_58, %c0_59], %51 {strides = array<i32>} : memref<256x8xf32, #tpu.memory_space<vmem>>, vector<256x8xf32>,
    %c1_60 = arith.constant 1 : index
    %c9_61 = arith.constant 9 : index
    %c0_62 = arith.constant 0 : index
    %53 = vector.load %arg9[%c1_60, %c9_61, %c0_62] : memref<18x25x8xf32, #tpu.memory_space<vmem>>, vector<16x16x8xf32>
    %54 = vector.shape_cast %53 : vector<16x16x8xf32> to vector<256x8xf32>
    %55 = arith.truncf %54 : vector<256x8xf32> to vector<256x8xbf16>
    %c0_63 = arith.constant 0 : index
    %c0_64 = arith.constant 0 : index
    %56 = vector.load %arg11[%c0_63, %c0_64] : memref<256x8xf32, #tpu.memory_space<vmem>>, vector<256x8xf32>
    %c5 = arith.constant 5 : index
    %c0_65 = arith.constant 0 : index
    %c0_66 = arith.constant 0 : index
    %57 = vector.load %arg2[%c5, %c0_65, %c0_66] : memref<9x8x8xbf16, #tpu.memory_space<vmem>>, vector<1x8x8xbf16>
    %58 = vector.shape_cast %57 : vector<1x8x8xbf16> to vector<8x8xbf16>
    %cst_67 = arith.constant dense<0.000000e+00> : vector<256x8xf32>
    %59 = tpu.matmul %55, %58, %cst_67 {dimension_numbers = #tpu.dot_dimension_numbers<[1], [0], [0], [1], [0, 0, 1, 1], [], []>} : vector<256x8xbf16>, vector<8x8xbf16>, vector<256x8xf32> -> vector<256x8xf32>
    %60 = arith.addf %56, %59 : vector<256x8xf32>
    %c0_68 = arith.constant 0 : index
    %c0_69 = arith.constant 0 : index
    %61 = vector.load %arg11[%c0_68, %c0_69] : memref<256x8xf32, #tpu.memory_space<vmem>>, vector<256x8xf32>
    tpu.vector_store %arg11[%c0_68, %c0_69], %60 {strides = array<i32>} : memref<256x8xf32, #tpu.memory_space<vmem>>, vector<256x8xf32>,
    %c2_70 = arith.constant 2 : index
    %c7_71 = arith.constant 7 : index
    %c0_72 = arith.constant 0 : index
    %62 = vector.load %arg9[%c2_70, %c7_71, %c0_72] : memref<18x25x8xf32, #tpu.memory_space<vmem>>, vector<16x16x8xf32>
    %63 = vector.shape_cast %62 : vector<16x16x8xf32> to vector<256x8xf32>
    %64 = arith.truncf %63 : vector<256x8xf32> to vector<256x8xbf16>
    %c0_73 = arith.constant 0 : index
    %c0_74 = arith.constant 0 : index
    %65 = vector.load %arg11[%c0_73, %c0_74] : memref<256x8xf32, #tpu.memory_space<vmem>>, vector<256x8xf32>
    %c6 = arith.constant 6 : index
    %c0_75 = arith.constant 0 : index
    %c0_76 = arith.constant 0 : index
    %66 = vector.load %arg2[%c6, %c0_75, %c0_76] : memref<9x8x8xbf16, #tpu.memory_space<vmem>>, vector<1x8x8xbf16>
    %67 = vector.shape_cast %66 : vector<1x8x8xbf16> to vector<8x8xbf16>
    %cst_77 = arith.constant dense<0.000000e+00> : vector<256x8xf32>
    %68 = tpu.matmul %64, %67, %cst_77 {dimension_numbers = #tpu.dot_dimension_numbers<[1], [0], [0], [1], [0, 0, 1, 1], [], []>} : vector<256x8xbf16>, vector<8x8xbf16>, vector<256x8xf32> -> vector<256x8xf32>
    %69 = arith.addf %65, %68 : vector<256x8xf32>
    %c0_78 = arith.constant 0 : index
    %c0_79 = arith.constant 0 : index
    %70 = vector.load %arg11[%c0_78, %c0_79] : memref<256x8xf32, #tpu.memory_space<vmem>>, vector<256x8xf32>
    tpu.vector_store %arg11[%c0_78, %c0_79], %69 {strides = array<i32>} : memref<256x8xf32, #tpu.memory_space<vmem>>, vector<256x8xf32>,
    %c2_80 = arith.constant 2 : index
    %c8_81 = arith.constant 8 : index
    %c0_82 = arith.constant 0 : index
    %71 = vector.load %arg9[%c2_80, %c8_81, %c0_82] : memref<18x25x8xf32, #tpu.memory_space<vmem>>, vector<16x16x8xf32>
    %72 = vector.shape_cast %71 : vector<16x16x8xf32> to vector<256x8xf32>
    %73 = arith.truncf %72 : vector<256x8xf32> to vector<256x8xbf16>
    %c0_83 = arith.constant 0 : index
    %c0_84 = arith.constant 0 : index
    %74 = vector.load %arg11[%c0_83, %c0_84] : memref<256x8xf32, #tpu.memory_space<vmem>>, vector<256x8xf32>
    %c7_85 = arith.constant 7 : index
    %c0_86 = arith.constant 0 : index
    %c0_87 = arith.constant 0 : index
    %75 = vector.load %arg2[%c7_85, %c0_86, %c0_87] : memref<9x8x8xbf16, #tpu.memory_space<vmem>>, vector<1x8x8xbf16>
    %76 = vector.shape_cast %75 : vector<1x8x8xbf16> to vector<8x8xbf16>
    %cst_88 = arith.constant dense<0.000000e+00> : vector<256x8xf32>
    %77 = tpu.matmul %73, %76, %cst_88 {dimension_numbers = #tpu.dot_dimension_numbers<[1], [0], [0], [1], [0, 0, 1, 1], [], []>} : vector<256x8xbf16>, vector<8x8xbf16>, vector<256x8xf32> -> vector<256x8xf32>
    %78 = arith.addf %74, %77 : vector<256x8xf32>
    %c0_89 = arith.constant 0 : index
    %c0_90 = arith.constant 0 : index
    %79 = vector.load %arg11[%c0_89, %c0_90] : memref<256x8xf32, #tpu.memory_space<vmem>>, vector<256x8xf32>
    tpu.vector_store %arg11[%c0_89, %c0_90], %78 {strides = array<i32>} : memref<256x8xf32, #tpu.memory_space<vmem>>, vector<256x8xf32>,
    %c2_91 = arith.constant 2 : index
    %c9_92 = arith.constant 9 : index
    %c0_93 = arith.constant 0 : index
    %80 = vector.load %arg9[%c2_91, %c9_92, %c0_93] : memref<18x25x8xf32, #tpu.memory_space<vmem>>, vector<16x16x8xf32>
    %81 = vector.shape_cast %80 : vector<16x16x8xf32> to vector<256x8xf32>
    %82 = arith.truncf %81 : vector<256x8xf32> to vector<256x8xbf16>
    %c0_94 = arith.constant 0 : index
    %c0_95 = arith.constant 0 : index
    %83 = vector.load %arg11[%c0_94, %c0_95] : memref<256x8xf32, #tpu.memory_space<vmem>>, vector<256x8xf32>
    %c8_96 = arith.constant 8 : index
    %c0_97 = arith.constant 0 : index
    %c0_98 = arith.constant 0 : index
    %84 = vector.load %arg2[%c8_96, %c0_97, %c0_98] : memref<9x8x8xbf16, #tpu.memory_space<vmem>>, vector<1x8x8xbf16>
    %85 = vector.shape_cast %84 : vector<1x8x8xbf16> to vector<8x8xbf16>
    %cst_99 = arith.constant dense<0.000000e+00> : vector<256x8xf32>
    %86 = tpu.matmul %82, %85, %cst_99 {dimension_numbers = #tpu.dot_dimension_numbers<[1], [0], [0], [1], [0, 0, 1, 1], [], []>} : vector<256x8xbf16>, vector<8x8xbf16>, vector<256x8xf32> -> vector<256x8xf32>
    %87 = arith.addf %83, %86 : vector<256x8xf32>
    %c0_100 = arith.constant 0 : index
    %c0_101 = arith.constant 0 : index
    %88 = vector.load %arg11[%c0_100, %c0_101] : memref<256x8xf32, #tpu.memory_space<vmem>>, vector<256x8xf32>
    tpu.vector_store %arg11[%c0_100, %c0_101], %87 {strides = array<i32>} : memref<256x8xf32, #tpu.memory_space<vmem>>, vector<256x8xf32>,
    %c0_102 = arith.constant 0 : index
    %c0_103 = arith.constant 0 : index
    %89 = vector.load %arg11[%c0_102, %c0_103] : memref<256x8xf32, #tpu.memory_space<vmem>>, vector<256x8xf32>
    %c0_104 = arith.constant 0 : index
    %c0_105 = arith.constant 0 : index
    %90 = vector.load %arg3[%c0_104, %c0_105] : memref<1x8xf32, #tpu.memory_space<vmem>>, vector<1x8xf32>
    %91 = vector.shape_cast %90 : vector<1x8xf32> to vector<8xf32>
    %92 = vector.shape_cast %91 : vector<8xf32> to vector<1x8xf32>
    %93 = vector.broadcast %92 : vector<1x8xf32> to vector<256x8xf32>
    %94 = arith.mulf %89, %93 : vector<256x8xf32>
    %c0_106 = arith.constant 0 : index
    %c0_107 = arith.constant 0 : index
    %95 = vector.load %arg4[%c0_106, %c0_107] : memref<1x8xf32, #tpu.memory_space<vmem>>, vector<1x8xf32>
    %96 = vector.shape_cast %95 : vector<1x8xf32> to vector<8xf32>
    %97 = vector.shape_cast %96 : vector<8xf32> to vector<1x8xf32>
    %98 = vector.broadcast %97 : vector<1x8xf32> to vector<256x8xf32>
    %99 = arith.addf %94, %98 : vector<256x8xf32>
    %cst_108 = arith.constant 0.000000e+00 : f32
    %100 = vector.broadcast %cst_108 : f32 to vector<256x8xf32>
    %101 = arith.maximumf %99, %100 : vector<256x8xf32>
    %cst_109 = arith.constant 0.000000e+00 : f32
    %102 = vector.broadcast %cst_109 : f32 to vector<18x25x8xf32>
    %c0_110 = arith.constant 0 : index
    %c0_111 = arith.constant 0 : index
    %c0_112 = arith.constant 0 : index
    %103 = vector.load %arg10[%c0_110, %c0_111, %c0_112] : memref<18x25x8xf32, #tpu.memory_space<vmem>>, vector<18x25x8xf32>
    tpu.vector_store %arg10[%c0_110, %c0_111, %c0_112], %102 {strides = array<i32>} : memref<18x25x8xf32, #tpu.memory_space<vmem>>, vector<18x25x8xf32>,
    %104 = vector.shape_cast %101 : vector<256x8xf32> to vector<16x16x8xf32>
    %c1_113 = arith.constant 1 : index
    %c8_114 = arith.constant 8 : index
    %c0_115 = arith.constant 0 : index
    %105 = vector.load %arg10[%c1_113, %c8_114, %c0_115] : memref<18x25x8xf32, #tpu.memory_space<vmem>>, vector<16x16x8xf32>
    tpu.vector_store %arg10[%c1_113, %c8_114, %c0_115], %104 {strides = array<i32>} : memref<18x25x8xf32, #tpu.memory_space<vmem>>, vector<16x16x8xf32>,
    %cst_116 = arith.constant 0.000000e+00 : f32
    %106 = vector.broadcast %cst_116 : f32 to vector<256x8xf32>
    %c0_117 = arith.constant 0 : index
    %c0_118 = arith.constant 0 : index
    %107 = vector.load %arg11[%c0_117, %c0_118] : memref<256x8xf32, #tpu.memory_space<vmem>>, vector<256x8xf32>
    tpu.vector_store %arg11[%c0_117, %c0_118], %106 {strides = array<i32>} : memref<256x8xf32, #tpu.memory_space<vmem>>, vector<256x8xf32>,
    %c0_119 = arith.constant 0 : index
    %c7_120 = arith.constant 7 : index
    %c0_121 = arith.constant 0 : index
    %108 = vector.load %arg10[%c0_119, %c7_120, %c0_121] : memref<18x25x8xf32, #tpu.memory_space<vmem>>, vector<16x16x8xf32>
    %109 = vector.shape_cast %108 : vector<16x16x8xf32> to vector<256x8xf32>
    %110 = arith.truncf %109 : vector<256x8xf32> to vector<256x8xbf16>
    %c0_122 = arith.constant 0 : index
    %c0_123 = arith.constant 0 : index
    %111 = vector.load %arg11[%c0_122, %c0_123] : memref<256x8xf32, #tpu.memory_space<vmem>>, vector<256x8xf32>
    %c0_124 = arith.constant 0 : index
    %c0_125 = arith.constant 0 : index
    %c0_126 = arith.constant 0 : index
    %112 = vector.load %arg5[%c0_124, %c0_125, %c0_126] : memref<9x8x8xbf16, #tpu.memory_space<vmem>>, vector<1x8x8xbf16>
    %113 = vector.shape_cast %112 : vector<1x8x8xbf16> to vector<8x8xbf16>
    %cst_127 = arith.constant dense<0.000000e+00> : vector<256x8xf32>
    %114 = tpu.matmul %110, %113, %cst_127 {dimension_numbers = #tpu.dot_dimension_numbers<[1], [0], [0], [1], [0, 0, 1, 1], [], []>} : vector<256x8xbf16>, vector<8x8xbf16>, vector<256x8xf32> -> vector<256x8xf32>
    %115 = arith.addf %111, %114 : vector<256x8xf32>
    %c0_128 = arith.constant 0 : index
    %c0_129 = arith.constant 0 : index
    %116 = vector.load %arg11[%c0_128, %c0_129] : memref<256x8xf32, #tpu.memory_space<vmem>>, vector<256x8xf32>
    tpu.vector_store %arg11[%c0_128, %c0_129], %115 {strides = array<i32>} : memref<256x8xf32, #tpu.memory_space<vmem>>, vector<256x8xf32>,
    %c0_130 = arith.constant 0 : index
    %c8_131 = arith.constant 8 : index
    %c0_132 = arith.constant 0 : index
    %117 = vector.load %arg10[%c0_130, %c8_131, %c0_132] : memref<18x25x8xf32, #tpu.memory_space<vmem>>, vector<16x16x8xf32>
    %118 = vector.shape_cast %117 : vector<16x16x8xf32> to vector<256x8xf32>
    %119 = arith.truncf %118 : vector<256x8xf32> to vector<256x8xbf16>
    %c0_133 = arith.constant 0 : index
    %c0_134 = arith.constant 0 : index
    %120 = vector.load %arg11[%c0_133, %c0_134] : memref<256x8xf32, #tpu.memory_space<vmem>>, vector<256x8xf32>
    %c1_135 = arith.constant 1 : index
    %c0_136 = arith.constant 0 : index
    %c0_137 = arith.constant 0 : index
    %121 = vector.load %arg5[%c1_135, %c0_136, %c0_137] : memref<9x8x8xbf16, #tpu.memory_space<vmem>>, vector<1x8x8xbf16>
    %122 = vector.shape_cast %121 : vector<1x8x8xbf16> to vector<8x8xbf16>
    %cst_138 = arith.constant dense<0.000000e+00> : vector<256x8xf32>
    %123 = tpu.matmul %119, %122, %cst_138 {dimension_numbers = #tpu.dot_dimension_numbers<[1], [0], [0], [1], [0, 0, 1, 1], [], []>} : vector<256x8xbf16>, vector<8x8xbf16>, vector<256x8xf32> -> vector<256x8xf32>
    %124 = arith.addf %120, %123 : vector<256x8xf32>
    %c0_139 = arith.constant 0 : index
    %c0_140 = arith.constant 0 : index
    %125 = vector.load %arg11[%c0_139, %c0_140] : memref<256x8xf32, #tpu.memory_space<vmem>>, vector<256x8xf32>
    tpu.vector_store %arg11[%c0_139, %c0_140], %124 {strides = array<i32>} : memref<256x8xf32, #tpu.memory_space<vmem>>, vector<256x8xf32>,
    %c0_141 = arith.constant 0 : index
    %c9_142 = arith.constant 9 : index
    %c0_143 = arith.constant 0 : index
    %126 = vector.load %arg10[%c0_141, %c9_142, %c0_143] : memref<18x25x8xf32, #tpu.memory_space<vmem>>, vector<16x16x8xf32>
    %127 = vector.shape_cast %126 : vector<16x16x8xf32> to vector<256x8xf32>
    %128 = arith.truncf %127 : vector<256x8xf32> to vector<256x8xbf16>
    %c0_144 = arith.constant 0 : index
    %c0_145 = arith.constant 0 : index
    %129 = vector.load %arg11[%c0_144, %c0_145] : memref<256x8xf32, #tpu.memory_space<vmem>>, vector<256x8xf32>
    %c2_146 = arith.constant 2 : index
    %c0_147 = arith.constant 0 : index
    %c0_148 = arith.constant 0 : index
    %130 = vector.load %arg5[%c2_146, %c0_147, %c0_148] : memref<9x8x8xbf16, #tpu.memory_space<vmem>>, vector<1x8x8xbf16>
    %131 = vector.shape_cast %130 : vector<1x8x8xbf16> to vector<8x8xbf16>
    %cst_149 = arith.constant dense<0.000000e+00> : vector<256x8xf32>
    %132 = tpu.matmul %128, %131, %cst_149 {dimension_numbers = #tpu.dot_dimension_numbers<[1], [0], [0], [1], [0, 0, 1, 1], [], []>} : vector<256x8xbf16>, vector<8x8xbf16>, vector<256x8xf32> -> vector<256x8xf32>
    %133 = arith.addf %129, %132 : vector<256x8xf32>
    %c0_150 = arith.constant 0 : index
    %c0_151 = arith.constant 0 : index
    %134 = vector.load %arg11[%c0_150, %c0_151] : memref<256x8xf32, #tpu.memory_space<vmem>>, vector<256x8xf32>
    tpu.vector_store %arg11[%c0_150, %c0_151], %133 {strides = array<i32>} : memref<256x8xf32, #tpu.memory_space<vmem>>, vector<256x8xf32>,
    %c1_152 = arith.constant 1 : index
    %c7_153 = arith.constant 7 : index
    %c0_154 = arith.constant 0 : index
    %135 = vector.load %arg10[%c1_152, %c7_153, %c0_154] : memref<18x25x8xf32, #tpu.memory_space<vmem>>, vector<16x16x8xf32>
    %136 = vector.shape_cast %135 : vector<16x16x8xf32> to vector<256x8xf32>
    %137 = arith.truncf %136 : vector<256x8xf32> to vector<256x8xbf16>
    %c0_155 = arith.constant 0 : index
    %c0_156 = arith.constant 0 : index
    %138 = vector.load %arg11[%c0_155, %c0_156] : memref<256x8xf32, #tpu.memory_space<vmem>>, vector<256x8xf32>
    %c3_157 = arith.constant 3 : index
    %c0_158 = arith.constant 0 : index
    %c0_159 = arith.constant 0 : index
    %139 = vector.load %arg5[%c3_157, %c0_158, %c0_159] : memref<9x8x8xbf16, #tpu.memory_space<vmem>>, vector<1x8x8xbf16>
    %140 = vector.shape_cast %139 : vector<1x8x8xbf16> to vector<8x8xbf16>
    %cst_160 = arith.constant dense<0.000000e+00> : vector<256x8xf32>
    %141 = tpu.matmul %137, %140, %cst_160 {dimension_numbers = #tpu.dot_dimension_numbers<[1], [0], [0], [1], [0, 0, 1, 1], [], []>} : vector<256x8xbf16>, vector<8x8xbf16>, vector<256x8xf32> -> vector<256x8xf32>
    %142 = arith.addf %138, %141 : vector<256x8xf32>
    %c0_161 = arith.constant 0 : index
    %c0_162 = arith.constant 0 : index
    %143 = vector.load %arg11[%c0_161, %c0_162] : memref<256x8xf32, #tpu.memory_space<vmem>>, vector<256x8xf32>
    tpu.vector_store %arg11[%c0_161, %c0_162], %142 {strides = array<i32>} : memref<256x8xf32, #tpu.memory_space<vmem>>, vector<256x8xf32>,
    %c1_163 = arith.constant 1 : index
    %c8_164 = arith.constant 8 : index
    %c0_165 = arith.constant 0 : index
    %144 = vector.load %arg10[%c1_163, %c8_164, %c0_165] : memref<18x25x8xf32, #tpu.memory_space<vmem>>, vector<16x16x8xf32>
    %145 = vector.shape_cast %144 : vector<16x16x8xf32> to vector<256x8xf32>
    %146 = arith.truncf %145 : vector<256x8xf32> to vector<256x8xbf16>
    %c0_166 = arith.constant 0 : index
    %c0_167 = arith.constant 0 : index
    %147 = vector.load %arg11[%c0_166, %c0_167] : memref<256x8xf32, #tpu.memory_space<vmem>>, vector<256x8xf32>
    %c4_168 = arith.constant 4 : index
    %c0_169 = arith.constant 0 : index
    %c0_170 = arith.constant 0 : index
    %148 = vector.load %arg5[%c4_168, %c0_169, %c0_170] : memref<9x8x8xbf16, #tpu.memory_space<vmem>>, vector<1x8x8xbf16>
    %149 = vector.shape_cast %148 : vector<1x8x8xbf16> to vector<8x8xbf16>
    %cst_171 = arith.constant dense<0.000000e+00> : vector<256x8xf32>
    %150 = tpu.matmul %146, %149, %cst_171 {dimension_numbers = #tpu.dot_dimension_numbers<[1], [0], [0], [1], [0, 0, 1, 1], [], []>} : vector<256x8xbf16>, vector<8x8xbf16>, vector<256x8xf32> -> vector<256x8xf32>
    %151 = arith.addf %147, %150 : vector<256x8xf32>
    %c0_172 = arith.constant 0 : index
    %c0_173 = arith.constant 0 : index
    %152 = vector.load %arg11[%c0_172, %c0_173] : memref<256x8xf32, #tpu.memory_space<vmem>>, vector<256x8xf32>
    tpu.vector_store %arg11[%c0_172, %c0_173], %151 {strides = array<i32>} : memref<256x8xf32, #tpu.memory_space<vmem>>, vector<256x8xf32>,
    %c1_174 = arith.constant 1 : index
    %c9_175 = arith.constant 9 : index
    %c0_176 = arith.constant 0 : index
    %153 = vector.load %arg10[%c1_174, %c9_175, %c0_176] : memref<18x25x8xf32, #tpu.memory_space<vmem>>, vector<16x16x8xf32>
    %154 = vector.shape_cast %153 : vector<16x16x8xf32> to vector<256x8xf32>
    %155 = arith.truncf %154 : vector<256x8xf32> to vector<256x8xbf16>
    %c0_177 = arith.constant 0 : index
    %c0_178 = arith.constant 0 : index
    %156 = vector.load %arg11[%c0_177, %c0_178] : memref<256x8xf32, #tpu.memory_space<vmem>>, vector<256x8xf32>
    %c5_179 = arith.constant 5 : index
    %c0_180 = arith.constant 0 : index
    %c0_181 = arith.constant 0 : index
    %157 = vector.load %arg5[%c5_179, %c0_180, %c0_181] : memref<9x8x8xbf16, #tpu.memory_space<vmem>>, vector<1x8x8xbf16>
    %158 = vector.shape_cast %157 : vector<1x8x8xbf16> to vector<8x8xbf16>
    %cst_182 = arith.constant dense<0.000000e+00> : vector<256x8xf32>
    %159 = tpu.matmul %155, %158, %cst_182 {dimension_numbers = #tpu.dot_dimension_numbers<[1], [0], [0], [1], [0, 0, 1, 1], [], []>} : vector<256x8xbf16>, vector<8x8xbf16>, vector<256x8xf32> -> vector<256x8xf32>
    %160 = arith.addf %156, %159 : vector<256x8xf32>
    %c0_183 = arith.constant 0 : index
    %c0_184 = arith.constant 0 : index
    %161 = vector.load %arg11[%c0_183, %c0_184] : memref<256x8xf32, #tpu.memory_space<vmem>>, vector<256x8xf32>
    tpu.vector_store %arg11[%c0_183, %c0_184], %160 {strides = array<i32>} : memref<256x8xf32, #tpu.memory_space<vmem>>, vector<256x8xf32>,
    %c2_185 = arith.constant 2 : index
    %c7_186 = arith.constant 7 : index
    %c0_187 = arith.constant 0 : index
    %162 = vector.load %arg10[%c2_185, %c7_186, %c0_187] : memref<18x25x8xf32, #tpu.memory_space<vmem>>, vector<16x16x8xf32>
    %163 = vector.shape_cast %162 : vector<16x16x8xf32> to vector<256x8xf32>
    %164 = arith.truncf %163 : vector<256x8xf32> to vector<256x8xbf16>
    %c0_188 = arith.constant 0 : index
    %c0_189 = arith.constant 0 : index
    %165 = vector.load %arg11[%c0_188, %c0_189] : memref<256x8xf32, #tpu.memory_space<vmem>>, vector<256x8xf32>
    %c6_190 = arith.constant 6 : index
    %c0_191 = arith.constant 0 : index
    %c0_192 = arith.constant 0 : index
    %166 = vector.load %arg5[%c6_190, %c0_191, %c0_192] : memref<9x8x8xbf16, #tpu.memory_space<vmem>>, vector<1x8x8xbf16>
    %167 = vector.shape_cast %166 : vector<1x8x8xbf16> to vector<8x8xbf16>
    %cst_193 = arith.constant dense<0.000000e+00> : vector<256x8xf32>
    %168 = tpu.matmul %164, %167, %cst_193 {dimension_numbers = #tpu.dot_dimension_numbers<[1], [0], [0], [1], [0, 0, 1, 1], [], []>} : vector<256x8xbf16>, vector<8x8xbf16>, vector<256x8xf32> -> vector<256x8xf32>
    %169 = arith.addf %165, %168 : vector<256x8xf32>
    %c0_194 = arith.constant 0 : index
    %c0_195 = arith.constant 0 : index
    %170 = vector.load %arg11[%c0_194, %c0_195] : memref<256x8xf32, #tpu.memory_space<vmem>>, vector<256x8xf32>
    tpu.vector_store %arg11[%c0_194, %c0_195], %169 {strides = array<i32>} : memref<256x8xf32, #tpu.memory_space<vmem>>, vector<256x8xf32>,
    %c2_196 = arith.constant 2 : index
    %c8_197 = arith.constant 8 : index
    %c0_198 = arith.constant 0 : index
    %171 = vector.load %arg10[%c2_196, %c8_197, %c0_198] : memref<18x25x8xf32, #tpu.memory_space<vmem>>, vector<16x16x8xf32>
    %172 = vector.shape_cast %171 : vector<16x16x8xf32> to vector<256x8xf32>
    %173 = arith.truncf %172 : vector<256x8xf32> to vector<256x8xbf16>
    %c0_199 = arith.constant 0 : index
    %c0_200 = arith.constant 0 : index
    %174 = vector.load %arg11[%c0_199, %c0_200] : memref<256x8xf32, #tpu.memory_space<vmem>>, vector<256x8xf32>
    %c7_201 = arith.constant 7 : index
    %c0_202 = arith.constant 0 : index
    %c0_203 = arith.constant 0 : index
    %175 = vector.load %arg5[%c7_201, %c0_202, %c0_203] : memref<9x8x8xbf16, #tpu.memory_space<vmem>>, vector<1x8x8xbf16>
    %176 = vector.shape_cast %175 : vector<1x8x8xbf16> to vector<8x8xbf16>
    %cst_204 = arith.constant dense<0.000000e+00> : vector<256x8xf32>
    %177 = tpu.matmul %173, %176, %cst_204 {dimension_numbers = #tpu.dot_dimension_numbers<[1], [0], [0], [1], [0, 0, 1, 1], [], []>} : vector<256x8xbf16>, vector<8x8xbf16>, vector<256x8xf32> -> vector<256x8xf32>
    %178 = arith.addf %174, %177 : vector<256x8xf32>
    %c0_205 = arith.constant 0 : index
    %c0_206 = arith.constant 0 : index
    %179 = vector.load %arg11[%c0_205, %c0_206] : memref<256x8xf32, #tpu.memory_space<vmem>>, vector<256x8xf32>
    tpu.vector_store %arg11[%c0_205, %c0_206], %178 {strides = array<i32>} : memref<256x8xf32, #tpu.memory_space<vmem>>, vector<256x8xf32>,
    %c2_207 = arith.constant 2 : index
    %c9_208 = arith.constant 9 : index
    %c0_209 = arith.constant 0 : index
    %180 = vector.load %arg10[%c2_207, %c9_208, %c0_209] : memref<18x25x8xf32, #tpu.memory_space<vmem>>, vector<16x16x8xf32>
    %181 = vector.shape_cast %180 : vector<16x16x8xf32> to vector<256x8xf32>
    %182 = arith.truncf %181 : vector<256x8xf32> to vector<256x8xbf16>
    %c0_210 = arith.constant 0 : index
    %c0_211 = arith.constant 0 : index
    %183 = vector.load %arg11[%c0_210, %c0_211] : memref<256x8xf32, #tpu.memory_space<vmem>>, vector<256x8xf32>
    %c8_212 = arith.constant 8 : index
    %c0_213 = arith.constant 0 : index
    %c0_214 = arith.constant 0 : index
    %184 = vector.load %arg5[%c8_212, %c0_213, %c0_214] : memref<9x8x8xbf16, #tpu.memory_space<vmem>>, vector<1x8x8xbf16>
    %185 = vector.shape_cast %184 : vector<1x8x8xbf16> to vector<8x8xbf16>
    %cst_215 = arith.constant dense<0.000000e+00> : vector<256x8xf32>
    %186 = tpu.matmul %182, %185, %cst_215 {dimension_numbers = #tpu.dot_dimension_numbers<[1], [0], [0], [1], [0, 0, 1, 1], [], []>} : vector<256x8xbf16>, vector<8x8xbf16>, vector<256x8xf32> -> vector<256x8xf32>
    %187 = arith.addf %183, %186 : vector<256x8xf32>
    %c0_216 = arith.constant 0 : index
    %c0_217 = arith.constant 0 : index
    %188 = vector.load %arg11[%c0_216, %c0_217] : memref<256x8xf32, #tpu.memory_space<vmem>>, vector<256x8xf32>
    tpu.vector_store %arg11[%c0_216, %c0_217], %187 {strides = array<i32>} : memref<256x8xf32, #tpu.memory_space<vmem>>, vector<256x8xf32>,
    %c0_218 = arith.constant 0 : index
    %c0_219 = arith.constant 0 : index
    %189 = vector.load %arg11[%c0_218, %c0_219] : memref<256x8xf32, #tpu.memory_space<vmem>>, vector<256x8xf32>
    %c0_220 = arith.constant 0 : index
    %c0_221 = arith.constant 0 : index
    %190 = vector.load %arg6[%c0_220, %c0_221] : memref<1x8xf32, #tpu.memory_space<vmem>>, vector<1x8xf32>
    %191 = vector.shape_cast %190 : vector<1x8xf32> to vector<8xf32>
    %192 = vector.shape_cast %191 : vector<8xf32> to vector<1x8xf32>
    %193 = vector.broadcast %192 : vector<1x8xf32> to vector<256x8xf32>
    %194 = arith.mulf %189, %193 : vector<256x8xf32>
    %c0_222 = arith.constant 0 : index
    %c0_223 = arith.constant 0 : index
    %195 = vector.load %arg7[%c0_222, %c0_223] : memref<1x8xf32, #tpu.memory_space<vmem>>, vector<1x8xf32>
    %196 = vector.shape_cast %195 : vector<1x8xf32> to vector<8xf32>
    %197 = vector.shape_cast %196 : vector<8xf32> to vector<1x8xf32>
    %198 = vector.broadcast %197 : vector<1x8xf32> to vector<256x8xf32>
    %199 = arith.addf %194, %198 : vector<256x8xf32>
    %c0_224 = arith.constant 0 : index
    %c0_225 = arith.constant 0 : index
    %c0_226 = arith.constant 0 : index
    %c0_227 = arith.constant 0 : index
    %200 = vector.load %arg1[%c0_224, %c0_225, %c0_226, %c0_227] : memref<1x16x16x8xbf16, #tpu.memory_space<vmem>>, vector<1x16x16x8xbf16>
    %201 = vector.shape_cast %200 : vector<1x16x16x8xbf16> to vector<16x16x8xbf16>
    %202 = arith.extf %201 : vector<16x16x8xbf16> to vector<16x16x8xf32>
    %203 = vector.shape_cast %202 : vector<16x16x8xf32> to vector<256x8xf32>
    %204 = arith.addf %199, %203 : vector<256x8xf32>
    %cst_228 = arith.constant 0.000000e+00 : f32
    %205 = vector.broadcast %cst_228 : f32 to vector<256x8xf32>
    %206 = arith.maximumf %204, %205 : vector<256x8xf32>
    %207 = vector.shape_cast %206 : vector<256x8xf32> to vector<16x16x8xf32>
    %c0_229 = arith.constant 0 : index
    %c0_230 = arith.constant 0 : index
    %c0_231 = arith.constant 0 : index
    %c0_232 = arith.constant 0 : index
    %208 = vector.load %arg8[%c0_229, %c0_230, %c0_231, %c0_232] : memref<1x16x16x8xf32, #tpu.memory_space<vmem>>, vector<1x16x16x8xf32>
    %209 = vector.shape_cast %208 : vector<1x16x16x8xf32> to vector<16x16x8xf32>
    %210 = vector.shape_cast %207 : vector<16x16x8xf32> to vector<1x16x16x8xf32>
    tpu.vector_store %arg8[%c0_229, %c0_230, %c0_231, %c0_232], %210 {strides = array<i32>} : memref<1x16x16x8xf32, #tpu.memory_space<vmem>>, vector<1x16x16x8xf32>,
    return
  }
  func.func @transform_0(%arg0: i32) -> (i32, i32, i32, i32) {
    %c0_i32 = arith.constant 0 : i32
    %c0_i32_0 = arith.constant 0 : i32
    %c0_i32_1 = arith.constant 0 : i32
    %c0_i32_2 = arith.constant 0 : i32
    return %arg0, %c0_i32, %c0_i32_0, %c0_i32_1 : i32, i32, i32, i32
  }
  func.func @transform_1(%arg0: i32) -> (i32, i32, i32) {
    %c0_i32 = arith.constant 0 : i32
    %c0_i32_0 = arith.constant 0 : i32
    %c0_i32_1 = arith.constant 0 : i32
    %c0_i32_2 = arith.constant 0 : i32
    return %c0_i32, %c0_i32_0, %c0_i32_1 : i32, i32, i32
  }
  func.func @transform_2(%arg0: i32) -> (i32, i32) {
    %c0_i32 = arith.constant 0 : i32
    %c0_i32_0 = arith.constant 0 : i32
    %c0_i32_1 = arith.constant 0 : i32
    return %c0_i32, %c0_i32_0 : i32, i32
  }
  func.func @transform_3(%arg0: i32) -> (i32, i32) {
    %c0_i32 = arith.constant 0 : i32
    %c0_i32_0 = arith.constant 0 : i32
    %c0_i32_1 = arith.constant 0 : i32
    return %c0_i32, %c0_i32_0 : i32, i32
  }
  func.func @transform_4(%arg0: i32) -> (i32, i32, i32) {
    %c0_i32 = arith.constant 0 : i32
    %c0_i32_0 = arith.constant 0 : i32
    %c0_i32_1 = arith.constant 0 : i32
    %c0_i32_2 = arith.constant 0 : i32
    return %c0_i32, %c0_i32_0, %c0_i32_1 : i32, i32, i32
  }
  func.func @transform_5(%arg0: i32) -> (i32, i32) {
    %c0_i32 = arith.constant 0 : i32
    %c0_i32_0 = arith.constant 0 : i32
    %c0_i32_1 = arith.constant 0 : i32
    return %c0_i32, %c0_i32_0 : i32, i32
  }
  func.func @transform_6(%arg0: i32) -> (i32, i32) {
    %c0_i32 = arith.constant 0 : i32
    %c0_i32_0 = arith.constant 0 : i32
    %c0_i32_1 = arith.constant 0 : i32
    return %c0_i32, %c0_i32_0 : i32, i32
  }
  func.func @transform_7(%arg0: i32) -> (i32, i32, i32, i32) {
    %c0_i32 = arith.constant 0 : i32
    %c0_i32_0 = arith.constant 0 : i32
    %c0_i32_1 = arith.constant 0 : i32
    %c0_i32_2 = arith.constant 0 : i32
    return %arg0, %c0_i32, %c0_i32_0, %c0_i32_1 : i32, i32, i32, i32
  }
}

</mosaic_0001>

<bundles_post_ra>
// kernel: tpu_custom_call.1
= control target key start
LH: loop header
LB: loop body
LE: loop exit
PB: predicated region body
PF: predicated region fallthrough
CT: control target
= control target key end

     0   :  { %s9005_s24 = smov 0   ;;  %s11154_s0 = inlined_call_operand.vmem [shape: bf16[2,16,16,8], index: 0, kind: input, shape index: {}]   ;;  %s11155_s1 = inlined_call_operand.vmem [shape: bf16[9,8,8], index: 1, kind: input, shape index: {}]   ;;  %s11156_s2 = inlined_call_operand.vmem [shape: f32[1,8], index: 2, kind: input, shape index: {}]   ;;  %s11157_s3 = inlined_call_operand.vmem [shape: f32[1,8], index: 3, kind: input, shape index: {}]   ;;  %s11158_s4 = inlined_call_operand.vmem [shape: bf16[9,8,8], index: 4, kind: input, shape index: {}]   ;;  %s11159_s5 = inlined_call_operand.vmem [shape: f32[1,8], index: 5, kind: input, shape index: {}]   ;;  %s11160_s6 = inlined_call_operand.vmem [shape: f32[1,8], index: 6, kind: input, shape index: {}]   ;;  %s11161_s7 = inlined_call_operand.vmem [shape: f32[2,16,16,8], index: 7, kind: output, shape index: {}]  }
   0x1 LB: > { %s7532_s25 = sadd.s32 4294967295, %s8962_s24   ;;  %p7536_p0 = scmp.ge.s32.totalorder %s8962_s24, 1  ;;  %s8962_s24 = sphi %s9005_s24, %s17_s24  }
   0x2   : > { %p237_p1 = scmp.lt.s32.totalorder %s8962_s24, 3 }
   0x4   : > { %p238_p2 = pnand %p7536_p0, %p237_p1 }
   0x5   : > { %p9018_p3 = scmp.lt.s32.totalorder (!%p238_p2), %s7532_s25, 1 }
   0x6   : > { %241 = sbr.rel (%p238_p2) target bundleno = 1122 (0x462), region = 48 }
   0xb   : > { %v563_v0 = vld [vmem:[%s11155_s1] sm:$0xf]  ;;  %vm612_vm0 = vcmask 1043456   ;;  %vm280_vm1 = vcmask 64512   ;;  %v8964_v2 = vmov 0.0   ;;  %vm284_vm2 = vcmask 57344  }
   0xc   : > { %8929 = vmatprep.subr.msk.bf16.mxu0 %vm612_vm0, %v563_v0  ;;  %v9024_v1 = vsel %vm612_vm0, %v563_v0, 0  ;;  %281 = vst.msk [vmem:[#allocation2] sm:$0xff] %vm280_vm1, %v8964_v2  ;;  %282 = vst.msk [vmem:[#allocation2 + $0x8] sm:$0xff] %vm280_vm1, %v8964_v2  ;;  %v9309_v3 = vld [vmem:[%s11155_s1 + $0x8] sm:$0xf]  ;;  %s11164_s25 = smov (!%p9018_p3, %s7532_s25), 1 }
   0xd   : > { %283 = vst.msk [vmem:[#allocation2 + $0x10] sm:$0xff] %vm280_vm1, %v8964_v2  ;;  %286 = vst.msk [vmem:[#allocation2 + $0x20] sm:$0xff] %vm280_vm1, %v8964_v2  ;;  %v7557_v4 = vld [vmem:[%s11155_s1 + $0x4] sm:$0xf]  ;;  %8318 = vmatpush3.bf16.msra.mxu0 %v9024_v1  ;;  %v9326_v6 = vld [vmem:[%s11155_s1 + $0xc] sm:$0xf] }
   0xe   : > { %287 = vst.msk [vmem:[#allocation2 + $0x28] sm:$0xff] %vm280_vm1, %v8964_v2  ;;  %288 = vst.msk [vmem:[#allocation2 + $0x30] sm:$0xff] %vm280_vm1, %v8964_v2  ;;  %8930 = vmatprep.subr.msk.bf16.mxu1 %vm612_vm0, %v7557_v4  ;;  %v972_v5 = vsel %vm612_vm0, %v7557_v4, 0  ;;  %8931 = vmatprep.subr.msk.bf16.mxu0 %vm612_vm0, %v9309_v3  ;;  %s7851_s12 = sshll.u32 %s11164_s25, 7  ;;  %v1330_v1 = vsel %vm612_vm0, %v9309_v3, 0  ;;  %v1688_v3 = vsel %vm612_vm0, %v9326_v6, 0 }
   0xf   : > { %290 = vst.msk [vmem:[#allocation2 + $0x40] sm:$0xff] %vm280_vm1, %v8964_v2  ;;  %291 = vst.msk [vmem:[#allocation2 + $0x48] sm:$0xff] %vm280_vm1, %v8964_v2  ;;  %8352 = vmatpush3.bf16.msra.mxu1 %v972_v5  ;;  %s9408_s15 = scalar_lea.vmem %s11154_s0, %s7851_s12  ;;  %s7852_s11 = sshll.u32 %s11164_s25, 8 }
  0x10   : > { %292 = vst.msk [vmem:[#allocation2 + $0x50] sm:$0xff] %vm280_vm1, %v8964_v2  ;;  %294 = vst.msk [vmem:[#allocation2 + $0x60] sm:$0xff] %vm280_vm1, %v8964_v2  ;;  %8932 = vmatprep.subr.msk.bf16.mxu1 %vm612_vm0, %v9326_v6  ;;  %v7854_v7 = vld [vmem:[%s9408_s15] sm:$0xff]   ;;  %v7981_v8 = vld [vmem:[%s9408_s15 + $0x8] sm:$0xff]   ;;  %s10962_s13 = scalar_lea.vmem %s11161_s7, %s7852_s11 }
  0x11   : > { %295 = vst.msk [vmem:[#allocation2 + $0x68] sm:$0xff] %vm280_vm1, %v8964_v2  ;;  %296 = vst.msk [vmem:[#allocation2 + $0x70] sm:$0xff] %vm280_vm1, %v8964_v2  ;;  %v7982_v9 = vld [vmem:[%s9408_s15 + $0x10] sm:$0xff]   ;;  %v7855_v10 = vunpack.c.l.bf16 %v7854_v7  ;;  %v7856_v11 = vunpack.c.h.bf16 %v7854_v7  ;;  %v7859_v12 = vunpack.c.l.bf16 %v7981_v8  ;;  %v7860_v13 = vunpack.c.h.bf16 %v7981_v8  ;;  %v7983_v14 = vld [vmem:[%s9408_s15 + $0x18] sm:$0xff]  }
  0x12   : > { %298 = vst.msk [vmem:[#allocation2 + $0x80] sm:$0xff] %vm280_vm1, %v8964_v2  ;;  %299 = vst.msk [vmem:[#allocation2 + $0x88] sm:$0xff] %vm280_vm1, %v8964_v2  ;;  %v7984_v15 = vld [vmem:[%s9408_s15 + $0x20] sm:$0xff]   ;;  %v7985_v16 = vld [vmem:[%s9408_s15 + $0x28] sm:$0xff]   ;;  %v7863_v19 = vunpack.c.l.bf16 %v7982_v9  ;;  %v7864_v20 = vunpack.c.h.bf16 %v7982_v9  ;;  %v7867_v22 = vunpack.c.l.bf16 %v7983_v14  ;;  %v7868_v23 = vunpack.c.h.bf16 %v7983_v14 }
  0x13   : > { %300 = vst.msk [vmem:[#allocation2 + $0x90] sm:$0xff] %vm280_vm1, %v8964_v2  ;;  %302 = vst.msk [vmem:[#allocation2 + $0xa0] sm:$0xff] %vm280_vm1, %v8964_v2  ;;  %v483_v17 = vld [vmem:[#allocation2 + $0x7] sm:$0xff]  ;;  %v7871_v26 = vunpack.c.l.bf16 %v7984_v15  ;;  %v7872_v27 = vunpack.c.h.bf16 %v7984_v15  ;;  %v7875_v28 = vunpack.c.l.bf16 %v7985_v16  ;;  %v7986_v29 = vld [vmem:[%s9408_s15 + $0x30] sm:$0xff]   ;;  %v7876_v32 = vunpack.c.h.bf16 %v7985_v16 }
  0x14   : > { %303 = vst.msk [vmem:[#allocation2 + $0xa8] sm:$0xff] %vm280_vm1, %v8964_v2  ;;  %304 = vst.msk [vmem:[#allocation2 + $0xb0] sm:$0xff] %vm280_vm1, %v8964_v2  ;;  %v484_v18 = vld [vmem:[#allocation2 + $0xf] sm:$0xff]  ;;  %v7987_v30 = vld [vmem:[%s9408_s15 + $0x38] sm:$0xff]   ;;  %v7879_v33 = vunpack.c.l.bf16 %v7986_v29  ;;  %v7880_v34 = vunpack.c.h.bf16 %v7986_v29 }
  0x15   : > { %306 = vst.msk [vmem:[#allocation2 + $0xc0] sm:$0xff] %vm280_vm1, %v8964_v2  ;;  %307 = vst.msk [vmem:[#allocation2 + $0xc8] sm:$0xff] %vm280_vm1, %v8964_v2  ;;  %v841_v21 = vld [vmem:[#allocation2 + $0x8] sm:$0xff]  ;;  %v515_v24 = vpack.c.bf16 %v484_v18, %v483_v17  ;;  %v842_v25 = vld [vmem:[#allocation2 + $0x10] sm:$0xff]  ;;  %v7883_v38 = vunpack.c.l.bf16 %v7987_v30  ;;  %v7884_v39 = vunpack.c.h.bf16 %v7987_v30 }
  0x16   : > { %308 = vst.msk [vmem:[#allocation2 + $0xd0] sm:$0xff] %vm280_vm1, %v8964_v2  ;;  %310 = vst.msk [vmem:[#allocation2 + $0xe0] sm:$0xff] %vm280_vm1, %v8964_v2  ;;  %v873_v31 = vpack.c.bf16 %v842_v25, %v841_v21  ;;  %v7988_v35 = vld [vmem:[%s9408_s15 + $0x40] sm:$0xff]   ;;  %v7989_v36 = vld [vmem:[%s9408_s15 + $0x48] sm:$0xff]  }
  0x17   : > { %311 = vst.msk [vmem:[#allocation2 + $0xe8] sm:$0xff] %vm280_vm1, %v8964_v2  ;;  %312 = vst.msk [vmem:[#allocation2 + $0xf0] sm:$0xff] %vm280_vm1, %v8964_v2  ;;  %v7990_v37 = vld [vmem:[%s9408_s15 + $0x50] sm:$0xff]   ;;  %8319 = vmatprep.mubr.msk.bf16.mxu0 %vm280_vm1, %v515_v24  ;;  %v7887_v40 = vunpack.c.l.bf16 %v7988_v35  ;;  %v7888_v41 = vunpack.c.h.bf16 %v7988_v35  ;;  %v7991_v42 = vld [vmem:[%s9408_s15 + $0x58] sm:$0xff]   ;;  %v7891_v45 = vunpack.c.l.bf16 %v7989_v36  ;;  %v7892_v46 = vunpack.c.h.bf16 %v7989_v36 }
  0x18   : > { %314 = vst.msk [vmem:[#allocation2 + $0x100] sm:$0xff] %vm280_vm1, %v8964_v2  ;;  %315 = vst.msk [vmem:[#allocation2 + $0x108] sm:$0xff] %vm280_vm1, %v8964_v2  ;;  %v7992_v43 = vld [vmem:[%s9408_s15 + $0x60] sm:$0xff]   ;;  %v7993_v44 = vld [vmem:[%s9408_s15 + $0x68] sm:$0xff]   ;;  %8353 = vmatprep.mubr.msk.bf16.mxu1 %vm280_vm1, %v873_v31  ;;  %v7895_v47 = vunpack.c.l.bf16 %v7990_v37  ;;  %v7896_v48 = vunpack.c.h.bf16 %v7990_v37  ;;  %v7899_v50 = vunpack.c.l.bf16 %v7991_v42  ;;  %v7900_v51 = vunpack.c.h.bf16 %v7991_v42 }
  0x19   : > { %316 = vst.msk [vmem:[#allocation2 + $0x110] sm:$0xff] %vm280_vm1, %v8964_v2  ;;  %318 = vst.msk [vmem:[#allocation2 + $0x120] sm:$0xff] %vm280_vm1, %v8964_v2  ;;  %v7994_v49 = vld [vmem:[%s9408_s15 + $0x70] sm:$0xff]   ;;  %v7903_v52 = vunpack.c.l.bf16 %v7992_v43  ;;  %v7904_v53 = vunpack.c.h.bf16 %v7992_v43  ;;  %v7995_v54 = vld [vmem:[%s9408_s15 + $0x78] sm:$0xff]   ;;  %v7907_v55 = vunpack.c.l.bf16 %v7993_v44  ;;  %v7908_v56 = vunpack.c.h.bf16 %v7993_v44 }
  0x1a   : > { %319 = vst.msk [vmem:[#allocation2 + $0x128] sm:$0xff] %vm280_vm1, %v8964_v2  ;;  %320 = vst.msk [vmem:[#allocation2 + $0x130] sm:$0xff] %vm280_vm1, %v8964_v2  ;;  %v7911_v57 = vunpack.c.l.bf16 %v7994_v49  ;;  %v7912_v58 = vunpack.c.h.bf16 %v7994_v49  ;;  %v7915_v59 = vunpack.c.l.bf16 %v7995_v54  ;;  %v7916_v60 = vunpack.c.h.bf16 %v7995_v54  ;;  %v9469_v9 = vld [vmem:[%s11155_s1 + $0x10] sm:$0xf] }
  0x1b   : > { %322 = vst.msk [vmem:[#allocation2 + $0x140] sm:$0xff] %vm280_vm1, %v8964_v2  ;;  %323 = vst.msk [vmem:[#allocation2 + $0x148] sm:$0xff] %vm280_vm1, %v8964_v2 }
  0x1c   : > { %324 = vst.msk [vmem:[#allocation2 + $0x150] sm:$0xff] %vm280_vm1, %v8964_v2  ;;  %326 = vst.msk [vmem:[#allocation2 + $0x160] sm:$0xff] %vm280_vm1, %v8964_v2 }
  0x1d   : > { %327 = vst.msk [vmem:[#allocation2 + $0x168] sm:$0xff] %vm280_vm1, %v8964_v2  ;;  %328 = vst.msk [vmem:[#allocation2 + $0x170] sm:$0xff] %vm280_vm1, %v8964_v2 }
  0x1e   : > { %330 = vst.msk [vmem:[#allocation2 + $0x180] sm:$0xff] %vm280_vm1, %v8964_v2  ;;  %331 = vst.msk [vmem:[#allocation2 + $0x188] sm:$0xff] %vm280_vm1, %v8964_v2 }
  0x1f   : > { %332 = vst.msk [vmem:[#allocation2 + $0x190] sm:$0xff] %vm280_vm1, %v8964_v2  ;;  %334 = vst.msk [vmem:[#allocation2 + $0x1a0] sm:$0xff] %vm280_vm1, %v8964_v2 }
  0x20   : > { %335 = vst.msk [vmem:[#allocation2 + $0x1a8] sm:$0xff] %vm280_vm1, %v8964_v2  ;;  %336 = vst.msk [vmem:[#allocation2 + $0x1b0] sm:$0xff] %vm280_vm1, %v8964_v2 }
  0x21   : > { %338 = vst.msk [vmem:[#allocation2 + $0x1c0] sm:$0xff] %vm280_vm1, %v8964_v2  ;;  %339 = vst.msk [vmem:[#allocation2 + $0x1c8] sm:$0xff] %vm280_vm1, %v8964_v2 }
  0x22   : > { %340 = vst.msk [vmem:[#allocation2 + $0x1d0] sm:$0xff] %vm280_vm1, %v8964_v2  ;;  %342 = vst.msk [vmem:[#allocation2 + $0x1e0] sm:$0xff] %vm280_vm1, %v8964_v2 }
  0x23   : > { %343 = vst.msk [vmem:[#allocation2 + $0x1e8] sm:$0xff] %vm280_vm1, %v8964_v2  ;;  %344 = vst.msk [vmem:[#allocation2 + $0x1f0] sm:$0xff] %vm280_vm1, %v8964_v2 }
  0x24   : > { %346 = vst.msk [vmem:[#allocation2 + $0x200] sm:$0xff] %vm280_vm1, %v8964_v2  ;;  %347 = vst.msk [vmem:[#allocation2 + $0x208] sm:$0xff] %vm280_vm1, %v8964_v2 }
  0x25   : > { %348 = vst.msk [vmem:[#allocation2 + $0x210] sm:$0xff] %vm280_vm1, %v8964_v2  ;;  %350 = vst.msk [vmem:[#allocation2 + $0x220] sm:$0xff] %vm280_vm1, %v8964_v2 }
  0x26   : > { %351 = vst.msk [vmem:[#allocation2 + $0x228] sm:$0xff] %vm280_vm1, %v8964_v2  ;;  %352 = vst.msk [vmem:[#allocation2 + $0x230] sm:$0xff] %vm280_vm1, %v8964_v2 }
  0x27   : > { %451 = vst.msk [vmem:[#allocation4] sm:$0xff] %vm280_vm1, %v8964_v2  ;;  %452 = vst.msk [vmem:[#allocation4 + $0x8] sm:$0xff] %vm280_vm1, %v8964_v2 }
  0x28   : > { %453 = vst.msk [vmem:[#allocation4 + $0x10] sm:$0xff] %vm280_vm1, %v8964_v2  ;;  %454 = vst.msk [vmem:[#allocation4 + $0x18] sm:$0xff] %vm280_vm1, %v8964_v2 }
  0x29   : > { %455 = vst.msk [vmem:[#allocation4 + $0x20] sm:$0xff] %vm280_vm1, %v8964_v2  ;;  %456 = vst.msk [vmem:[#allocation4 + $0x28] sm:$0xff] %vm280_vm1, %v8964_v2 }
  0x2a   : > { %457 = vst.msk [vmem:[#allocation4 + $0x30] sm:$0xff] %vm280_vm1, %v8964_v2  ;;  %458 = vst.msk [vmem:[#allocation4 + $0x38] sm:$0xff] %vm280_vm1, %v8964_v2 }
  0x2b   : > { %459 = vst.msk [vmem:[#allocation4 + $0x40] sm:$0xff] %vm280_vm1, %v8964_v2  ;;  %460 = vst.msk [vmem:[#allocation4 + $0x48] sm:$0xff] %vm280_vm1, %v8964_v2 }
  0x2c   : > { %461 = vst.msk [vmem:[#allocation4 + $0x50] sm:$0xff] %vm280_vm1, %v8964_v2  ;;  %462 = vst.msk [vmem:[#allocation4 + $0x58] sm:$0xff] %vm280_vm1, %v8964_v2 }
  0x2d   : > { %463 = vst.msk [vmem:[#allocation4 + $0x60] sm:$0xff] %vm280_vm1, %v8964_v2  ;;  %464 = vst.msk [vmem:[#allocation4 + $0x68] sm:$0xff] %vm280_vm1, %v8964_v2 }
  0x2e   : > { %465 = vst.msk [vmem:[#allocation4 + $0x70] sm:$0xff] %vm280_vm1, %v8964_v2  ;;  %466 = vst.msk [vmem:[#allocation4 + $0x78] sm:$0xff] %vm280_vm1, %v8964_v2 }
  0x2f   : > { %467 = vst.msk [vmem:[#allocation4 + $0x80] sm:$0xff] %vm280_vm1, %v8964_v2  ;;  %468 = vst.msk [vmem:[#allocation4 + $0x88] sm:$0xff] %vm280_vm1, %v8964_v2 }
  0x30   : > { %469 = vst.msk [vmem:[#allocation4 + $0x90] sm:$0xff] %vm280_vm1, %v8964_v2  ;;  %470 = vst.msk [vmem:[#allocation4 + $0x98] sm:$0xff] %vm280_vm1, %v8964_v2 }
  0x31   : > { %471 = vst.msk [vmem:[#allocation4 + $0xa0] sm:$0xff] %vm280_vm1, %v8964_v2  ;;  %472 = vst.msk [vmem:[#allocation4 + $0xa8] sm:$0xff] %vm280_vm1, %v8964_v2 }
  0x32   : > { %473 = vst.msk [vmem:[#allocation4 + $0xb0] sm:$0xff] %vm280_vm1, %v8964_v2  ;;  %474 = vst.msk [vmem:[#allocation4 + $0xb8] sm:$0xff] %vm280_vm1, %v8964_v2 }
  0x33   : > { %475 = vst.msk [vmem:[#allocation4 + $0xc0] sm:$0xff] %vm280_vm1, %v8964_v2  ;;  %476 = vst.msk [vmem:[#allocation4 + $0xc8] sm:$0xff] %vm280_vm1, %v8964_v2 }
  0x34   : > { %477 = vst.msk [vmem:[#allocation4 + $0xd0] sm:$0xff] %vm280_vm1, %v8964_v2  ;;  %478 = vst.msk [vmem:[#allocation4 + $0xd8] sm:$0xff] %vm280_vm1, %v8964_v2 }
  0x35   : > { %479 = vst.msk [vmem:[#allocation4 + $0xe0] sm:$0xff] %vm280_vm1, %v8964_v2  ;;  %480 = vst.msk [vmem:[#allocation4 + $0xe8] sm:$0xff] %vm280_vm1, %v8964_v2 }
  0x36   : > { %481 = vst.msk [vmem:[#allocation4 + $0xf0] sm:$0xff] %vm280_vm1, %v8964_v2  ;;  %482 = vst.msk [vmem:[#allocation4 + $0xf8] sm:$0xff] %vm280_vm1, %v8964_v2 }
  0x37   : > { %3848 = vst.msk [vmem:[#allocation3] sm:$0xff] %vm280_vm1, %v8964_v2  ;;  %3849 = vst.msk [vmem:[#allocation3 + $0x8] sm:$0xff] %vm280_vm1, %v8964_v2 }
  0x38   : > { %3850 = vst.msk [vmem:[#allocation3 + $0x10] sm:$0xff] %vm280_vm1, %v8964_v2  ;;  %3852 = vst.msk [vmem:[#allocation3 + $0x20] sm:$0xff] %vm280_vm1, %v8964_v2 }
  0x39   : > { %3853 = vst.msk [vmem:[#allocation3 + $0x28] sm:$0xff] %vm280_vm1, %v8964_v2  ;;  %3854 = vst.msk [vmem:[#allocation3 + $0x30] sm:$0xff] %vm280_vm1, %v8964_v2 }
  0x3a   : > { %3856 = vst.msk [vmem:[#allocation3 + $0x40] sm:$0xff] %vm280_vm1, %v8964_v2  ;;  %3857 = vst.msk [vmem:[#allocation3 + $0x48] sm:$0xff] %vm280_vm1, %v8964_v2 }
  0x3b   : > { %3858 = vst.msk [vmem:[#allocation3 + $0x50] sm:$0xff] %vm280_vm1, %v8964_v2  ;;  %3860 = vst.msk [vmem:[#allocation3 + $0x60] sm:$0xff] %vm280_vm1, %v8964_v2 }
  0x3c   : > { %3861 = vst.msk [vmem:[#allocation3 + $0x68] sm:$0xff] %vm280_vm1, %v8964_v2  ;;  %3862 = vst.msk [vmem:[#allocation3 + $0x70] sm:$0xff] %vm280_vm1, %v8964_v2 }
  0x3d   : > { %3864 = vst.msk [vmem:[#allocation3 + $0x80] sm:$0xff] %vm280_vm1, %v8964_v2  ;;  %3865 = vst.msk [vmem:[#allocation3 + $0x88] sm:$0xff] %vm280_vm1, %v8964_v2 }
  0x3e   : > { %3866 = vst.msk [vmem:[#allocation3 + $0x90] sm:$0xff] %vm280_vm1, %v8964_v2  ;;  %3868 = vst.msk [vmem:[#allocation3 + $0xa0] sm:$0xff] %vm280_vm1, %v8964_v2 }
  0x3f   : > { %3869 = vst.msk [vmem:[#allocation3 + $0xa8] sm:$0xff] %vm280_vm1, %v8964_v2  ;;  %3870 = vst.msk [vmem:[#allocation3 + $0xb0] sm:$0xff] %vm280_vm1, %v8964_v2 }
  0x40   : > { %3872 = vst.msk [vmem:[#allocation3 + $0xc0] sm:$0xff] %vm280_vm1, %v8964_v2  ;;  %3873 = vst.msk [vmem:[#allocation3 + $0xc8] sm:$0xff] %vm280_vm1, %v8964_v2 }
  0x41   : > { %3874 = vst.msk [vmem:[#allocation3 + $0xd0] sm:$0xff] %vm280_vm1, %v8964_v2  ;;  %3876 = vst.msk [vmem:[#allocation3 + $0xe0] sm:$0xff] %vm280_vm1, %v8964_v2 }
  0x42   : > { %3877 = vst.msk [vmem:[#allocation3 + $0xe8] sm:$0xff] %vm280_vm1, %v8964_v2  ;;  %3878 = vst.msk [vmem:[#allocation3 + $0xf0] sm:$0xff] %vm280_vm1, %v8964_v2 }
  0x43   : > { %3880 = vst.msk [vmem:[#allocation3 + $0x100] sm:$0xff] %vm280_vm1, %v8964_v2  ;;  %3881 = vst.msk [vmem:[#allocation3 + $0x108] sm:$0xff] %vm280_vm1, %v8964_v2 }
  0x44   : > { %3882 = vst.msk [vmem:[#allocation3 + $0x110] sm:$0xff] %vm280_vm1, %v8964_v2  ;;  %3884 = vst.msk [vmem:[#allocation3 + $0x120] sm:$0xff] %vm280_vm1, %v8964_v2 }
  0x45   : > { %3885 = vst.msk [vmem:[#allocation3 + $0x128] sm:$0xff] %vm280_vm1, %v8964_v2  ;;  %3886 = vst.msk [vmem:[#allocation3 + $0x130] sm:$0xff] %vm280_vm1, %v8964_v2 }
  0x46   : > { %3888 = vst.msk [vmem:[#allocation3 + $0x140] sm:$0xff] %vm280_vm1, %v8964_v2  ;;  %3889 = vst.msk [vmem:[#allocation3 + $0x148] sm:$0xff] %vm280_vm1, %v8964_v2 }
  0x47   : > { %3890 = vst.msk [vmem:[#allocation3 + $0x150] sm:$0xff] %vm280_vm1, %v8964_v2  ;;  %3892 = vst.msk [vmem:[#allocation3 + $0x160] sm:$0xff] %vm280_vm1, %v8964_v2 }
  0x48   : > { %3893 = vst.msk [vmem:[#allocation3 + $0x168] sm:$0xff] %vm280_vm1, %v8964_v2  ;;  %3894 = vst.msk [vmem:[#allocation3 + $0x170] sm:$0xff] %vm280_vm1, %v8964_v2 }
  0x49   : > { %3896 = vst.msk [vmem:[#allocation3 + $0x180] sm:$0xff] %vm280_vm1, %v8964_v2  ;;  %3897 = vst.msk [vmem:[#allocation3 + $0x188] sm:$0xff] %vm280_vm1, %v8964_v2 }
  0x4a   : > { %3898 = vst.msk [vmem:[#allocation3 + $0x190] sm:$0xff] %vm280_vm1, %v8964_v2  ;;  %3900 = vst.msk [vmem:[#allocation3 + $0x1a0] sm:$0xff] %vm280_vm1, %v8964_v2 }
  0x4b   : > { %3901 = vst.msk [vmem:[#allocation3 + $0x1a8] sm:$0xff] %vm280_vm1, %v8964_v2  ;;  %3902 = vst.msk [vmem:[#allocation3 + $0x1b0] sm:$0xff] %vm280_vm1, %v8964_v2 }
  0x4c   : > { %3904 = vst.msk [vmem:[#allocation3 + $0x1c0] sm:$0xff] %vm280_vm1, %v8964_v2  ;;  %3905 = vst.msk [vmem:[#allocation3 + $0x1c8] sm:$0xff] %vm280_vm1, %v8964_v2 }
  0x4d   : > { %3906 = vst.msk [vmem:[#allocation3 + $0x1d0] sm:$0xff] %vm280_vm1, %v8964_v2  ;;  %3908 = vst.msk [vmem:[#allocation3 + $0x1e0] sm:$0xff] %vm280_vm1, %v8964_v2 }
  0x4e   : > { %3909 = vst.msk [vmem:[#allocation3 + $0x1e8] sm:$0xff] %vm280_vm1, %v8964_v2  ;;  %3910 = vst.msk [vmem:[#allocation3 + $0x1f0] sm:$0xff] %vm280_vm1, %v8964_v2 }
  0x4f   : > { %3912 = vst.msk [vmem:[#allocation3 + $0x200] sm:$0xff] %vm280_vm1, %v8964_v2  ;;  %3913 = vst.msk [vmem:[#allocation3 + $0x208] sm:$0xff] %vm280_vm1, %v8964_v2 }
  0x50   : > { %3914 = vst.msk [vmem:[#allocation3 + $0x210] sm:$0xff] %vm280_vm1, %v8964_v2  ;;  %3916 = vst.msk [vmem:[#allocation3 + $0x220] sm:$0xff] %vm280_vm1, %v8964_v2 }
  0x51   : > { %3917 = vst.msk [vmem:[#allocation3 + $0x228] sm:$0xff] %vm280_vm1, %v8964_v2  ;;  %3918 = vst.msk [vmem:[#allocation3 + $0x230] sm:$0xff] %vm280_vm1, %v8964_v2 }
  0x52   : > { %285 = vst.msk [vmem:[#allocation2 + $0x18] sm:$0x1] %vm284_vm2, %v8964_v2  ;;  %289 = vst.msk [vmem:[#allocation2 + $0x38] sm:$0x1] %vm284_vm2, %v8964_v2 }
  0x53   : > { %293 = vst.msk [vmem:[#allocation2 + $0x58] sm:$0x1] %vm284_vm2, %v8964_v2  ;;  %297 = vst.msk [vmem:[#allocation2 + $0x78] sm:$0x1] %vm284_vm2, %v8964_v2 }
  0x54   : > { %301 = vst.msk [vmem:[#allocation2 + $0x98] sm:$0x1] %vm284_vm2, %v8964_v2  ;;  %305 = vst.msk [vmem:[#allocation2 + $0xb8] sm:$0x1] %vm284_vm2, %v8964_v2 }
  0x55   : > { %309 = vst.msk [vmem:[#allocation2 + $0xd8] sm:$0x1] %vm284_vm2, %v8964_v2  ;;  %313 = vst.msk [vmem:[#allocation2 + $0xf8] sm:$0x1] %vm284_vm2, %v8964_v2 }
  0x56   : > { %317 = vst.msk [vmem:[#allocation2 + $0x118] sm:$0x1] %vm284_vm2, %v8964_v2  ;;  %321 = vst.msk [vmem:[#allocation2 + $0x138] sm:$0x1] %vm284_vm2, %v8964_v2 }
  0x57   : > { %325 = vst.msk [vmem:[#allocation2 + $0x158] sm:$0x1] %vm284_vm2, %v8964_v2  ;;  %329 = vst.msk [vmem:[#allocation2 + $0x178] sm:$0x1] %vm284_vm2, %v8964_v2 }
  0x58   : > { %333 = vst.msk [vmem:[#allocation2 + $0x198] sm:$0x1] %vm284_vm2, %v8964_v2  ;;  %337 = vst.msk [vmem:[#allocation2 + $0x1b8] sm:$0x1] %vm284_vm2, %v8964_v2 }
  0x59   : > { %341 = vst.msk [vmem:[#allocation2 + $0x1d8] sm:$0x1] %vm284_vm2, %v8964_v2  ;;  %345 = vst.msk [vmem:[#allocation2 + $0x1f8] sm:$0x1] %vm284_vm2, %v8964_v2 }
  0x5a   : > { %349 = vst.msk [vmem:[#allocation2 + $0x218] sm:$0x1] %vm284_vm2, %v8964_v2  ;;  %353 = vst.msk [vmem:[#allocation2 + $0x238] sm:$0x1] %vm284_vm2, %v8964_v2 }
  0x5b   : > { %3851 = vst.msk [vmem:[#allocation3 + $0x18] sm:$0x1] %vm284_vm2, %v8964_v2  ;;  %3855 = vst.msk [vmem:[#allocation3 + $0x38] sm:$0x1] %vm284_vm2, %v8964_v2 }
  0x5c   : > { %3859 = vst.msk [vmem:[#allocation3 + $0x58] sm:$0x1] %vm284_vm2, %v8964_v2  ;;  %3863 = vst.msk [vmem:[#allocation3 + $0x78] sm:$0x1] %vm284_vm2, %v8964_v2 }
  0x5d   : > { %3867 = vst.msk [vmem:[#allocation3 + $0x98] sm:$0x1] %vm284_vm2, %v8964_v2  ;;  %3871 = vst.msk [vmem:[#allocation3 + $0xb8] sm:$0x1] %vm284_vm2, %v8964_v2 }
  0x5e   : > { %3875 = vst.msk [vmem:[#allocation3 + $0xd8] sm:$0x1] %vm284_vm2, %v8964_v2  ;;  %3879 = vst.msk [vmem:[#allocation3 + $0xf8] sm:$0x1] %vm284_vm2, %v8964_v2 }
  0x5f   : > { %3883 = vst.msk [vmem:[#allocation3 + $0x118] sm:$0x1] %vm284_vm2, %v8964_v2  ;;  %3887 = vst.msk [vmem:[#allocation3 + $0x138] sm:$0x1] %vm284_vm2, %v8964_v2 }
  0x60   : > { %3891 = vst.msk [vmem:[#allocation3 + $0x158] sm:$0x1] %vm284_vm2, %v8964_v2  ;;  %3895 = vst.msk [vmem:[#allocation3 + $0x178] sm:$0x1] %vm284_vm2, %v8964_v2 }
  0x61   : > { %3899 = vst.msk [vmem:[#allocation3 + $0x198] sm:$0x1] %vm284_vm2, %v8964_v2  ;;  %3903 = vst.msk [vmem:[#allocation3 + $0x1b8] sm:$0x1] %vm284_vm2, %v8964_v2 }
  0x62   : > { %3907 = vst.msk [vmem:[#allocation3 + $0x1d8] sm:$0x1] %vm284_vm2, %v8964_v2  ;;  %3911 = vst.msk [vmem:[#allocation3 + $0x1f8] sm:$0x1] %vm284_vm2, %v8964_v2 }
  0x63   : > { %3915 = vst.msk [vmem:[#allocation3 + $0x218] sm:$0x1] %vm284_vm2, %v8964_v2  ;;  %3919 = vst.msk [vmem:[#allocation3 + $0x238] sm:$0x1] %vm284_vm2, %v8964_v2 }
  0x64   : > { %419 = vst.msk [vmem:[#allocation2 + $0x28] sm:$0xff] %vm280_vm1, %v7855_v10  ;;  %420 = vst.msk [vmem:[#allocation2 + $0x30] sm:$0xff] %vm280_vm1, %v7856_v11 }
  0x65   : > { %421 = vst.msk [vmem:[#allocation2 + $0x48] sm:$0xff] %vm280_vm1, %v7859_v12  ;;  %422 = vst.msk [vmem:[#allocation2 + $0x50] sm:$0xff] %vm280_vm1, %v7860_v13  ;;  %v9480_v12 = vld [vmem:[%s11155_s1 + $0x14] sm:$0xf] }
  0x66   : > { %423 = vst.msk [vmem:[#allocation2 + $0x68] sm:$0xff] %vm280_vm1, %v7863_v19  ;;  %424 = vst.msk [vmem:[#allocation2 + $0x70] sm:$0xff] %vm280_vm1, %v7864_v20 }
  0x67   : > { %425 = vst.msk [vmem:[#allocation2 + $0x88] sm:$0xff] %vm280_vm1, %v7867_v22  ;;  %426 = vst.msk [vmem:[#allocation2 + $0x90] sm:$0xff] %vm280_vm1, %v7868_v23 }
  0x68   : > { %427 = vst.msk [vmem:[#allocation2 + $0xa8] sm:$0xff] %vm280_vm1, %v7871_v26  ;;  %428 = vst.msk [vmem:[#allocation2 + $0xb0] sm:$0xff] %vm280_vm1, %v7872_v27 }
  0x69   : > { %429 = vst.msk [vmem:[#allocation2 + $0xc8] sm:$0xff] %vm280_vm1, %v7875_v28  ;;  %430 = vst.msk [vmem:[#allocation2 + $0xd0] sm:$0xff] %vm280_vm1, %v7876_v32 }
  0x6a   : > { %431 = vst.msk [vmem:[#allocation2 + $0xe8] sm:$0xff] %vm280_vm1, %v7879_v33  ;;  %432 = vst.msk [vmem:[#allocation2 + $0xf0] sm:$0xff] %vm280_vm1, %v7880_v34 }
  0x6b   : > { %433 = vst.msk [vmem:[#allocation2 + $0x108] sm:$0xff] %vm280_vm1, %v7883_v38  ;;  %434 = vst.msk [vmem:[#allocation2 + $0x110] sm:$0xff] %vm280_vm1, %v7884_v39  ;;  %v485_v61 = vld [vmem:[#allocation2 + $0x27] sm:$0xff]  ;;  %v486_v62 = vld [vmem:[#allocation2 + $0x2f] sm:$0xff] }
  0x6c   : > { %435 = vst.msk [vmem:[#allocation2 + $0x128] sm:$0xff] %vm280_vm1, %v7887_v40  ;;  %436 = vst.msk [vmem:[#allocation2 + $0x130] sm:$0xff] %vm280_vm1, %v7888_v41  ;;  %v487_v63 = vld [vmem:[#allocation2 + $0x47] sm:$0xff]  ;;  %v9458_v0 = vpack.c.bf16 %v486_v62, %v485_v61  ;;  %v488_v4 = vld [vmem:[#allocation2 + $0x4f] sm:$0xff] }
  0x6d   : > { %437 = vst.msk [vmem:[#allocation2 + $0x148] sm:$0xff] %vm280_vm1, %v7891_v45  ;;  %438 = vst.msk [vmem:[#allocation2 + $0x150] sm:$0xff] %vm280_vm1, %v7892_v46  ;;  %v9464_v5 = vpack.c.bf16 %v488_v4, %v487_v63  ;;  %v843_v7 = vld [vmem:[#allocation2 + $0x28] sm:$0xff]  ;;  %v844_v8 = vld [vmem:[#allocation2 + $0x30] sm:$0xff] }
  0x6e   : > { %439 = vst.msk [vmem:[#allocation2 + $0x168] sm:$0xff] %vm280_vm1, %v7895_v47  ;;  %440 = vst.msk [vmem:[#allocation2 + $0x170] sm:$0xff] %vm280_vm1, %v7896_v48  ;;  %8320 = vmatmul.mubr.msk.bf16.vlgmr.msra.gmra.mxu0 %vm280_vm1, %v9458_v0  ;;  %v489_v10 = vld [vmem:[#allocation2 + $0x67] sm:$0xff]  ;;  %v9473_v11 = vpack.c.bf16 %v844_v8, %v843_v7  ;;  %v490_v13 = vld [vmem:[#allocation2 + $0x6f] sm:$0xff] }
  0x6f   : > { %441 = vst.msk [vmem:[#allocation2 + $0x188] sm:$0xff] %vm280_vm1, %v7899_v50  ;;  %442 = vst.msk [vmem:[#allocation2 + $0x190] sm:$0xff] %vm280_vm1, %v7900_v51  ;;  %8386 = vmatpush3.bf16.msra.mxu0 %v1330_v1  ;;  %8323 = vmatprep.mubr.msk.bf16.mxu0 %vm280_vm1, %v9464_v5  ;;  %v845_v14 = vld [vmem:[#allocation2 + $0x48] sm:$0xff]  ;;  %v846_v15 = vld [vmem:[#allocation2 + $0x50] sm:$0xff]  ;;  %v9490_v20 = vpack.c.bf16 %v490_v13, %v489_v10 }
  0x70   : > { %443 = vst.msk [vmem:[#allocation2 + $0x1a8] sm:$0xff] %vm280_vm1, %v7903_v52  ;;  %444 = vst.msk [vmem:[#allocation2 + $0x1b0] sm:$0xff] %vm280_vm1, %v7904_v53  ;;  %8354 = vmatmul.mubr.msk.bf16.vlgmr.msra.gmra.mxu1 %vm280_vm1, %v9473_v11  ;;  %v491_v16 = vld [vmem:[#allocation2 + $0x87] sm:$0xff]  ;;  %v492_v17 = vld [vmem:[#allocation2 + $0x8f] sm:$0xff]  ;;  %v9486_v18 = vpack.c.bf16 %v846_v15, %v845_v14  ;;  %8933 = vmatprep.subr.msk.bf16.mxu0 %vm612_vm0, %v9469_v9 }
  0x71   : > { %445 = vst.msk [vmem:[#allocation2 + $0x1c8] sm:$0xff] %vm280_vm1, %v7907_v55  ;;  %446 = vst.msk [vmem:[#allocation2 + $0x1d0] sm:$0xff] %vm280_vm1, %v7908_v56  ;;  %v847_v6 = vld [vmem:[#allocation2 + $0x68] sm:$0xff]  ;;  %v848_v19 = vld [vmem:[#allocation2 + $0x70] sm:$0xff]  ;;  %8420 = vmatpush3.bf16.msra.mxu1 %v1688_v3  ;;  %v9496_v23 = vpack.c.bf16 %v492_v17, %v491_v16 }
  0x72   : > { %447 = vst.msk [vmem:[#allocation2 + $0x1e8] sm:$0xff] %vm280_vm1, %v7911_v57  ;;  %448 = vst.msk [vmem:[#allocation2 + $0x1f0] sm:$0xff] %vm280_vm1, %v7912_v58  ;;  %8357 = vmatprep.mubr.msk.bf16.mxu1 %vm280_vm1, %v9486_v18  ;;  %v849_v21 = vld [vmem:[#allocation2 + $0x88] sm:$0xff]  ;;  %v850_v22 = vld [vmem:[#allocation2 + $0x90] sm:$0xff]  ;;  %8934 = vmatprep.subr.msk.bf16.mxu1 %vm612_vm0, %v9480_v12  ;;  %v9498_v24 = vpack.c.bf16 %v848_v19, %v847_v6 }
  0x73   : > { %449 = vst.msk [vmem:[#allocation2 + $0x208] sm:$0xff] %vm280_vm1, %v7915_v59  ;;  %450 = vst.msk [vmem:[#allocation2 + $0x210] sm:$0xff] %vm280_vm1, %v7916_v60  ;;  %v9500_v25 = vpack.c.bf16 %v850_v22, %v849_v21  ;;  %v493_v26 = vld [vmem:[#allocation2 + $0xa7] sm:$0xff]  ;;  %v494_v27 = vld [vmem:[#allocation2 + $0xaf] sm:$0xff] }
  0x74   : > { %v495_v28 = vld [vmem:[#allocation2 + $0xc7] sm:$0xff]  ;;  %v496_v29 = vld [vmem:[#allocation2 + $0xcf] sm:$0xff]  ;;  %v9510_v32 = vpack.c.bf16 %v494_v27, %v493_v26 }
  0x75   : > { %v851_v30 = vld [vmem:[#allocation2 + $0xa8] sm:$0xff]  ;;  %v852_v31 = vld [vmem:[#allocation2 + $0xb0] sm:$0xff]  ;;  %v9512_v35 = vpack.c.bf16 %v496_v29, %v495_v28 }
  0x76   : > { %8324 = vmatmul.mubr.msk.bf16.gmra.mxu0 %vm280_vm1, %v9490_v20  ;;  %v853_v33 = vld [vmem:[#allocation2 + $0xc8] sm:$0xff]  ;;  %v854_v34 = vld [vmem:[#allocation2 + $0xd0] sm:$0xff]  ;;  %v9514_v36 = vpack.c.bf16 %v852_v31, %v851_v30 }
  0x77   : > { %8327 = vmatprep.mubr.msk.bf16.mxu0 %vm280_vm1, %v9496_v23  ;;  %v9516_v37 = vpack.c.bf16 %v854_v34, %v853_v33  ;;  %v497_v38 = vld [vmem:[#allocation2 + $0xe7] sm:$0xff]  ;;  %v498_v39 = vld [vmem:[#allocation2 + $0xef] sm:$0xff] }
  0x78   : > { %8358 = vmatmul.mubr.msk.bf16.gmra.mxu1 %vm280_vm1, %v9498_v24  ;;  %v499_v40 = vld [vmem:[#allocation2 + $0x107] sm:$0xff]  ;;  %v500_v41 = vld [vmem:[#allocation2 + $0x10f] sm:$0xff]  ;;  %v9526_v44 = vpack.c.bf16 %v498_v39, %v497_v38 }
  0x79   : > { %8361 = vmatprep.mubr.msk.bf16.mxu1 %vm280_vm1, %v9500_v25  ;;  %v855_v42 = vld [vmem:[#allocation2 + $0xe8] sm:$0xff]  ;;  %v856_v43 = vld [vmem:[#allocation2 + $0xf0] sm:$0xff]  ;;  %v9528_v47 = vpack.c.bf16 %v500_v41, %v499_v40 }
  0x7a   : > { %v857_v45 = vld [vmem:[#allocation2 + $0x108] sm:$0xff]  ;;  %v858_v46 = vld [vmem:[#allocation2 + $0x110] sm:$0xff]  ;;  %v9530_v48 = vpack.c.bf16 %v856_v43, %v855_v42 }
  0x7b   : > { %v9532_v49 = vpack.c.bf16 %v858_v46, %v857_v45  ;;  %v501_v50 = vld [vmem:[#allocation2 + $0x127] sm:$0xff]  ;;  %v502_v51 = vld [vmem:[#allocation2 + $0x12f] sm:$0xff] }
  0x7c   : > { %v503_v52 = vld [vmem:[#allocation2 + $0x147] sm:$0xff]  ;;  %v504_v53 = vld [vmem:[#allocation2 + $0x14f] sm:$0xff]  ;;  %v9542_v56 = vpack.c.bf16 %v502_v51, %v501_v50 }
  0x7d   : > { %v859_v54 = vld [vmem:[#allocation2 + $0x128] sm:$0xff]  ;;  %v860_v55 = vld [vmem:[#allocation2 + $0x130] sm:$0xff]  ;;  %v9544_v59 = vpack.c.bf16 %v504_v53, %v503_v52 }
  0x7e   : > { %8328 = vmatmul.mubr.msk.bf16.gmra.mxu0 %vm280_vm1, %v9510_v32  ;;  %v861_v57 = vld [vmem:[#allocation2 + $0x148] sm:$0xff]  ;;  %v862_v58 = vld [vmem:[#allocation2 + $0x150] sm:$0xff]  ;;  %v9546_v60 = vpack.c.bf16 %v860_v55, %v859_v54 }
  0x7f   : > { %8331 = vmatprep.mubr.msk.bf16.mxu0 %vm280_vm1, %v9512_v35  ;;  %v9548_v61 = vpack.c.bf16 %v862_v58, %v861_v57  ;;  %v505_v62 = vld [vmem:[#allocation2 + $0x167] sm:$0xff]  ;;  %v506_v63 = vld [vmem:[#allocation2 + $0x16f] sm:$0xff]  ;;  %v2046_v57 = vsel %vm612_vm0, %v9469_v9, 0  ;;  %v9610_v58 = vld [vmem:[%s11155_s1 + $0x18] sm:$0xf] }
  0x80   : > { %8362 = vmatmul.mubr.msk.bf16.gmra.mxu1 %vm280_vm1, %v9514_v36  ;;  %v507_v1 = vld [vmem:[#allocation2 + $0x187] sm:$0xff]  ;;  %v508_v4 = vld [vmem:[#allocation2 + $0x18f] sm:$0xff]  ;;  %v9558_v10 = vpack.c.bf16 %v506_v63, %v505_v62  ;;  %v2404_v62 = vsel %vm612_vm0, %v9480_v12, 0  ;;  %v9621_v9 = vld [vmem:[%s11155_s1 + $0x1c] sm:$0xf] }
  0x81   : > { %8365 = vmatprep.mubr.msk.bf16.mxu1 %vm280_vm1, %v9516_v37  ;;  %v863_v7 = vld [vmem:[#allocation2 + $0x168] sm:$0xff]  ;;  %v864_v8 = vld [vmem:[#allocation2 + $0x170] sm:$0xff]  ;;  %v9560_v14 = vpack.c.bf16 %v508_v4, %v507_v1 }
  0x82   : > { %v865_v3 = vld [vmem:[#allocation2 + $0x188] sm:$0xff]  ;;  %v866_v13 = vld [vmem:[#allocation2 + $0x190] sm:$0xff]  ;;  %v9562_v15 = vpack.c.bf16 %v864_v8, %v863_v7 }
  0x83   : > { %v9564_v16 = vpack.c.bf16 %v866_v13, %v865_v3  ;;  %v509_v17 = vld [vmem:[#allocation2 + $0x1a7] sm:$0xff]  ;;  %v510_v6 = vld [vmem:[#allocation2 + $0x1af] sm:$0xff] }
  0x84   : > { %v511_v19 = vld [vmem:[#allocation2 + $0x1c7] sm:$0xff]  ;;  %v512_v21 = vld [vmem:[#allocation2 + $0x1cf] sm:$0xff]  ;;  %v9574_v27 = vpack.c.bf16 %v510_v6, %v509_v17 }
  0x85   : > { %v867_v22 = vld [vmem:[#allocation2 + $0x1a8] sm:$0xff]  ;;  %v868_v26 = vld [vmem:[#allocation2 + $0x1b0] sm:$0xff]  ;;  %v9576_v30 = vpack.c.bf16 %v512_v21, %v511_v19 }
  0x86   : > { %8332 = vmatmul.mubr.msk.bf16.gmra.mxu0 %vm280_vm1, %v9526_v44  ;;  %v869_v28 = vld [vmem:[#allocation2 + $0x1c8] sm:$0xff]  ;;  %v870_v29 = vld [vmem:[#allocation2 + $0x1d0] sm:$0xff]  ;;  %v9578_v31 = vpack.c.bf16 %v868_v26, %v867_v22 }
  0x87   : > { %8335 = vmatprep.mubr.msk.bf16.mxu0 %vm280_vm1, %v9528_v47  ;;  %v9580_v33 = vpack.c.bf16 %v870_v29, %v869_v28  ;;  %v513_v34 = vld [vmem:[#allocation2 + $0x1e7] sm:$0xff]  ;;  %v514_v38 = vld [vmem:[#allocation2 + $0x1ef] sm:$0xff] }
  0x88   : > { %8366 = vmatmul.mubr.msk.bf16.gmra.mxu1 %vm280_vm1, %v9530_v48  ;;  %v1199_v39 = vld [vmem:[#allocation2 + $0x9] sm:$0xff]  ;;  %v1200_v40 = vld [vmem:[#allocation2 + $0x11] sm:$0xff]  ;;  %v9590_v43 = vpack.c.bf16 %v514_v38, %v513_v34 }
  0x89   : > { %8369 = vmatprep.mubr.msk.bf16.mxu1 %vm280_vm1, %v9532_v49  ;;  %v871_v41 = vld [vmem:[#allocation2 + $0x1e8] sm:$0xff]  ;;  %v872_v42 = vld [vmem:[#allocation2 + $0x1f0] sm:$0xff]  ;;  %v1231_v45 = vpack.c.bf16 %v1200_v40, %v1199_v39 }
  0x8a   : > { %v9592_v46 = vpack.c.bf16 %v872_v42, %v871_v41  ;;  %v1201_v50 = vld [vmem:[#allocation2 + $0x29] sm:$0xff]  ;;  %v1202_v51 = vld [vmem:[#allocation2 + $0x31] sm:$0xff] }
  0x8b   : > { %v1203_v52 = vld [vmem:[#allocation2 + $0x49] sm:$0xff]  ;;  %v1204_v53 = vld [vmem:[#allocation2 + $0x51] sm:$0xff]  ;;  %v9601_v54 = vpack.c.bf16 %v1202_v51, %v1201_v50 }
  0x8c   : > { %v9603_v55 = vpack.c.bf16 %v1204_v53, %v1203_v52  ;;  %v1206_v63 = vld [vmem:[#allocation2 + $0x71] sm:$0xff]  ;;  %v1207_v1 = vld [vmem:[#allocation2 + $0x89] sm:$0xff] }
  0x8d   : > { %v1208_v4 = vld [vmem:[#allocation2 + $0x91] sm:$0xff]  ;;  %v1209_v8 = vld [vmem:[#allocation2 + $0xa9] sm:$0xff] }
  0x8e   : > { %8336 = vmatmul.mubr.msk.bf16.gmra.mxu0 %vm280_vm1, %v9542_v56  ;;  %v9633_v7 = vpack.c.bf16 %v1208_v4, %v1207_v1  ;;  %v1210_v3 = vld [vmem:[#allocation2 + $0xb1] sm:$0xff]  ;;  %v1211_v13 = vld [vmem:[#allocation2 + $0xc9] sm:$0xff] }
  0x8f   : > { %8339 = vmatprep.mubr.msk.bf16.mxu0 %vm280_vm1, %v9544_v59  ;;  %v1212_v17 = vld [vmem:[#allocation2 + $0xd1] sm:$0xff]  ;;  %v9643_v6 = vpack.c.bf16 %v1210_v3, %v1209_v8  ;;  %v1213_v21 = vld [vmem:[#allocation2 + $0xe9] sm:$0xff] }
  0x90   : > { %8370 = vmatmul.mubr.msk.bf16.gmra.mxu1 %vm280_vm1, %v9546_v60  ;;  %v9645_v19 = vpack.c.bf16 %v1212_v17, %v1211_v13  ;;  %v1214_v22 = vld [vmem:[#allocation2 + $0xf1] sm:$0xff]  ;;  %v1215_v26 = vld [vmem:[#allocation2 + $0x109] sm:$0xff] }
  0x91   : > { %8373 = vmatprep.mubr.msk.bf16.mxu1 %vm280_vm1, %v9548_v61  ;;  %v1216_v28 = vld [vmem:[#allocation2 + $0x111] sm:$0xff]  ;;  %v9655_v29 = vpack.c.bf16 %v1214_v22, %v1213_v21  ;;  %v1217_v38 = vld [vmem:[#allocation2 + $0x129] sm:$0xff] }
  0x92   : > { %v9657_v34 = vpack.c.bf16 %v1216_v28, %v1215_v26  ;;  %v1218_v39 = vld [vmem:[#allocation2 + $0x131] sm:$0xff]  ;;  %v1221_v42 = vld [vmem:[#allocation2 + $0x169] sm:$0xff] }
  0x93   : > { %v1220_v40 = vld [vmem:[#allocation2 + $0x151] sm:$0xff]  ;;  %v1223_v50 = vld [vmem:[#allocation2 + $0x189] sm:$0xff] }
  0x94   : > { %v1224_v51 = vld [vmem:[#allocation2 + $0x191] sm:$0xff]  ;;  %v532_v13 = vld [vmem:[#allocation4 + $0x8] sm:$0xff] }
  0x95   : > { %v1243_v52 = vpack.c.bf16 %v1224_v51, %v1223_v50  ;;  %v1226_v53 = vld [vmem:[#allocation2 + $0x1b1] sm:$0xff] }
  0x96   : > { %8340 = vmatmul.mubr.msk.bf16.gmra.mxu0 %vm280_vm1, %v9558_v10  ;;  %v1588_v1 = vld [vmem:[#allocation2 + $0x20f] sm:$0xff] }
  0x97   : > { %8343 = vmatprep.mubr.msk.bf16.mxu0 %vm280_vm1, %v9560_v14 }
  0x98   : > { %8374 = vmatmul.mubr.msk.bf16.gmra.mxu1 %vm280_vm1, %v9562_v15 }
  0x99   : > { %8377 = vmatprep.mubr.msk.bf16.mxu1 %vm280_vm1, %v9564_v16 }
  0x9e   : > { %8344 = vmatmul.mubr.msk.bf16.gmra.mxu0 %vm280_vm1, %v9574_v27 }
  0x9f   : > { %8347 = vmatprep.mubr.msk.bf16.mxu0 %vm280_vm1, %v9576_v30 }
  0xa0   : > { %8378 = vmatmul.mubr.msk.bf16.gmra.mxu1 %vm280_vm1, %v9578_v31 }
  0xa1   : > { %8381 = vmatprep.mubr.msk.bf16.mxu1 %vm280_vm1, %v9580_v33 }
  0xa6   : > { %8348 = vmatmul.mubr.msk.bf16.gmra.mxu0 %vm280_vm1, %v9590_v43 }
  0xa7   : > { %8387 = vmatprep.mubr.msk.bf16.mxu0 %vm280_vm1, %v1231_v45  ;;  %v1222_v45 = vld [vmem:[#allocation2 + $0x171] sm:$0xff] }
  0xa8   : > { %8382 = vmatmul.mubr.msk.bf16.gmra.mxu1 %vm280_vm1, %v9592_v46 }
  0xa9   : > { %8421 = vmatprep.mubr.msk.bf16.mxu1 %vm280_vm1, %v9458_v0  ;;  %v1205_v0 = vld [vmem:[#allocation2 + $0x69] sm:$0xff] }
  0xaa   : > { %v9629_v12 = vpack.c.bf16 %v1206_v63, %v1205_v0  ;;  %v1230_v63 = vld [vmem:[#allocation2 + $0x1f1] sm:$0xff] }
  0xae   : > { %8388 = vmatmul.mubr.msk.bf16.vlgmr.msra.gmra.mxu0 %vm280_vm1, %v9601_v54 }
  0xaf   : > { %8454 = vmatpush3.bf16.msra.mxu0 %v2046_v57  ;;  %8391 = vmatprep.mubr.msk.bf16.mxu0 %vm280_vm1, %v9603_v55  ;;  %v1227_v57 = vld [vmem:[#allocation2 + $0x1c9] sm:$0xff] }
  0xb0   : > { %8422 = vmatmul.mubr.msk.bf16.vlgmr.msra.gmra.mxu1 %vm280_vm1, %v9464_v5  ;;  %8935 = vmatprep.subr.msk.bf16.mxu0 %vm612_vm0, %v9610_v58 }
  0xb1   : > { %8425 = vmatprep.mubr.msk.bf16.mxu1 %vm280_vm1, %v9490_v20  ;;  %8488 = vmatpush3.bf16.msra.mxu1 %v2404_v62  ;;  %v1228_v62 = vld [vmem:[#allocation2 + $0x1d1] sm:$0xff] }
  0xb2   : > { %8936 = vmatprep.subr.msk.bf16.mxu1 %vm612_vm0, %v9621_v9  ;;  %v1245_v0 = vpack.c.bf16 %v1228_v62, %v1227_v57  ;;  %v3000_v57 = vld [vmem:[#allocation2 + $0xe8] sm:$0xff]  ;;  %v3001_v62 = vld [vmem:[#allocation2 + $0xf0] sm:$0xff] }
  0xb6   : > { %8392 = vmatmul.mubr.msk.bf16.gmra.mxu0 %vm280_vm1, %v9629_v12 }
  0xb7   : > { %8395 = vmatprep.mubr.msk.bf16.mxu0 %vm280_vm1, %v9633_v7 }
  0xb8   : > { %8426 = vmatmul.mubr.msk.bf16.gmra.mxu1 %vm280_vm1, %v9496_v23 }
  0xb9   : > { %8429 = vmatprep.mubr.msk.bf16.mxu1 %vm280_vm1, %v9510_v32 }
  0xbe   : > { %8396 = vmatmul.mubr.msk.bf16.gmra.mxu0 %vm280_vm1, %v9643_v6 }
  0xbf   : > { %8399 = vmatprep.mubr.msk.bf16.mxu0 %vm280_vm1, %v9645_v19 }
  0xc0   : > { %8430 = vmatmul.mubr.msk.bf16.gmra.mxu1 %vm280_vm1, %v9512_v35  ;;  %v1219_v35 = vld [vmem:[#allocation2 + $0x149] sm:$0xff] }
  0xc1   : > { %8433 = vmatprep.mubr.msk.bf16.mxu1 %vm280_vm1, %v9526_v44  ;;  %v1240_v44 = vpack.c.bf16 %v1218_v39, %v1217_v38  ;;  %v1241_v41 = vpack.c.bf16 %v1220_v40, %v1219_v35  ;;  %v535_v39 = vld [vmem:[#allocation4 + $0x20] sm:$0xff] }
  0xc6   : > { %8400 = vmatmul.mubr.msk.bf16.gmra.mxu0 %vm280_vm1, %v9655_v29 }
  0xc7   : > { %8403 = vmatprep.mubr.msk.bf16.mxu0 %vm280_vm1, %v9657_v34 }
  0xc8   : > { %8434 = vmatmul.mubr.msk.bf16.gmra.mxu1 %vm280_vm1, %v9528_v47  ;;  %v1242_v47 = vpack.c.bf16 %v1222_v45, %v1221_v42  ;;  %v2643_v42 = vld [vmem:[#allocation2 + $0xef] sm:$0xff] }
  0xc9   : > { %8437 = vmatprep.mubr.msk.bf16.mxu1 %vm280_vm1, %v9542_v56  ;;  %v1225_v56 = vld [vmem:[#allocation2 + $0x1a9] sm:$0xff] }
  0xce   : > { %8404 = vmatmul.mubr.msk.bf16.gmra.mxu0 %vm280_vm1, %v1240_v44 }
  0xcf   : > { %8407 = vmatprep.mubr.msk.bf16.mxu0 %vm280_vm1, %v1241_v41 }
  0xd0   : > { %8438 = vmatmul.mubr.msk.bf16.gmra.mxu1 %vm280_vm1, %v9544_v59  ;;  %v1244_v59 = vpack.c.bf16 %v1226_v53, %v1225_v56  ;;  %v536_v53 = vld [vmem:[#allocation4 + $0x28] sm:$0xff] }
  0xd1   : > { %8441 = vmatprep.mubr.msk.bf16.mxu1 %vm280_vm1, %v9558_v10  ;;  %v1229_v10 = vld [vmem:[#allocation2 + $0x1e9] sm:$0xff] }
  0xd2   : > { %v1246_v4 = vpack.c.bf16 %v1230_v63, %v1229_v10 }
  0xd6   : > { %8408 = vmatmul.mubr.msk.bf16.gmra.mxu0 %vm280_vm1, %v1242_v47 }
  0xd7   : > { %8411 = vmatprep.mubr.msk.bf16.mxu0 %vm280_vm1, %v1243_v52 }
  0xd8   : > { %8442 = vmatmul.mubr.msk.bf16.gmra.mxu1 %vm280_vm1, %v9560_v14  ;;  %v1587_v14 = vld [vmem:[#allocation2 + $0x207] sm:$0xff] }
  0xd9   : > { %8445 = vmatprep.mubr.msk.bf16.mxu1 %vm280_vm1, %v9574_v27  ;;  %v9685_v8 = vpack.c.bf16 %v1588_v1, %v1587_v14  ;;  %v2763_v27 = vsel %vm612_vm0, %v9610_v58, 0  ;;  %v3002_v14 = vld [vmem:[#allocation2 + $0x108] sm:$0xff]  ;;  %v3003_v1 = vld [vmem:[#allocation2 + $0x110] sm:$0xff] }
  0xde   : > { %8412 = vmatmul.mubr.msk.bf16.gmra.mxu0 %vm280_vm1, %v1244_v59 }
  0xdf   : > { %8415 = vmatprep.mubr.msk.bf16.mxu0 %vm280_vm1, %v1245_v0 }
  0xe0   : > { %8446 = vmatmul.mubr.msk.bf16.gmra.mxu1 %vm280_vm1, %v9576_v30  ;;  %v7676_v30 = vld [vmem:[%s11155_s1 + $0x20] sm:$0xf] }
  0xe1   : > { %8449 = vmatprep.mubr.msk.bf16.mxu1 %vm280_vm1, %v9590_v43  ;;  %v3121_v43 = vsel %vm612_vm0, %v9621_v9, 0  ;;  %v2641_v9 = vld [vmem:[#allocation2 + $0xcf] sm:$0xff] }
  0xe6   : > { %8416 = vmatmul.mubr.msk.bf16.gmra.mxu0 %vm280_vm1, %v1246_v4 }
  0xe7   : > { %8455 = vmatprep.mubr.msk.bf16.mxu0 %vm280_vm1, %v9473_v11  ;;  %v1945_v11 = vld [vmem:[#allocation2 + $0x208] sm:$0xff] }
  0xe8   : > { %8450 = vmatmul.mubr.msk.bf16.gmra.mxu1 %vm280_vm1, %v9685_v8 }
  0xe9   : > { %8489 = vmatprep.mubr.msk.bf16.mxu1 %vm280_vm1, %v9601_v54 }
  0xee   : > { %8456 = vmatmul.mubr.msk.bf16.vlgmr.msra.gmra.mxu0 %vm280_vm1, %v9486_v18 }
  0xef   : > { %8522 = vmatpush3.bf16.msra.mxu0 %v2763_v27  ;;  %8459 = vmatprep.mubr.msk.bf16.mxu0 %vm280_vm1, %v9498_v24 }
  0xf0   : > { %8490 = vmatmul.mubr.msk.bf16.vlgmr.msra.gmra.mxu1 %vm280_vm1, %v9603_v55  ;;  %8937 = vmatprep.subr.msk.bf16.mxu0 %vm612_vm0, %v7676_v30  ;;  %v534_v55 = vld [vmem:[#allocation4 + $0x18] sm:$0xff] }
  0xf1   : > { %8493 = vmatprep.mubr.msk.bf16.mxu1 %vm280_vm1, %v9629_v12  ;;  %8556 = vmatpush3.bf16.msra.mxu1 %v3121_v43 }
  0xf6   : > { %8460 = vmatmul.mubr.msk.bf16.gmra.mxu0 %vm280_vm1, %v9500_v25  ;;  %v1946_v25 = vld [vmem:[#allocation2 + $0x210] sm:$0xff] }
  0xf7   : > { %8463 = vmatprep.mubr.msk.bf16.mxu0 %vm280_vm1, %v9514_v36  ;;  %v2303_v36 = vld [vmem:[#allocation2 + $0x209] sm:$0xff] }
  0xf8   : > { %8494 = vmatmul.mubr.msk.bf16.gmra.mxu1 %vm280_vm1, %v9633_v7  ;;  %v2997_v7 = vld [vmem:[#allocation2 + $0xb0] sm:$0xff] }
  0xf9   : > { %8497 = vmatprep.mubr.msk.bf16.mxu1 %vm280_vm1, %v9643_v6  ;;  %v2998_v6 = vld [vmem:[#allocation2 + $0xc8] sm:$0xff] }
  0xfe   : > { %8464 = vmatmul.mubr.msk.bf16.gmra.mxu0 %vm280_vm1, %v9516_v37  ;;  %v2304_v37 = vld [vmem:[#allocation2 + $0x211] sm:$0xff] }
  0xff   : > { %8467 = vmatprep.mubr.msk.bf16.mxu0 %vm280_vm1, %v9530_v48  ;;  %v9751_v48 = vpack.c.bf16 %v1946_v25, %v1945_v11  ;;  %v541_v25 = vld [vmem:[#allocation4 + $0x50] sm:$0xff] }
 0x100   : > { %8498 = vmatmul.mubr.msk.bf16.gmra.mxu1 %vm280_vm1, %v9645_v19 }
 0x101   : > { %8501 = vmatprep.mubr.msk.bf16.mxu1 %vm280_vm1, %v9655_v29 }
 0x106   : > { %8468 = vmatmul.mubr.msk.bf16.gmra.mxu0 %vm280_vm1, %v9532_v49  ;;  %v2320_v49 = vpack.c.bf16 %v2304_v37, %v2303_v36  ;;  %v3027_v37 = vpack.c.bf16 %v3001_v62, %v3000_v57  ;;  %v546_v57 = vld [vmem:[#allocation4 + $0x78] sm:$0xff]  ;;  %v2650_v62 = vld [vmem:[#allocation2 + $0x167] sm:$0xff] }
 0x107   : > { %8471 = vmatprep.mubr.msk.bf16.mxu0 %vm280_vm1, %v9546_v60  ;;  %v2994_v60 = vld [vmem:[#allocation2 + $0x88] sm:$0xff] }
 0x108   : > { %8502 = vmatmul.mubr.msk.bf16.gmra.mxu1 %vm280_vm1, %v9657_v34 }
 0x109   : > { %8505 = vmatprep.mubr.msk.bf16.mxu1 %vm280_vm1, %v1240_v44  ;;  %v538_v44 = vld [vmem:[#allocation4 + $0x38] sm:$0xff] }
 0x10e   : > { %8472 = vmatmul.mubr.msk.bf16.gmra.mxu0 %vm280_vm1, %v9548_v61  ;;  %v2995_v61 = vld [vmem:[#allocation2 + $0x90] sm:$0xff] }
 0x10f   : > { %8475 = vmatprep.mubr.msk.bf16.mxu0 %vm280_vm1, %v9562_v15  ;;  %v533_v15 = vld [vmem:[#allocation4 + $0x10] sm:$0xff] }
 0x110   : > { %8506 = vmatmul.mubr.msk.bf16.gmra.mxu1 %vm280_vm1, %v1241_v41  ;;  %v2642_v41 = vld [vmem:[#allocation2 + $0xe7] sm:$0xff] }
 0x111   : > { %8509 = vmatprep.mubr.msk.bf16.mxu1 %vm280_vm1, %v1242_v47  ;;  %v2644_v47 = vld [vmem:[#allocation2 + $0x107] sm:$0xff]  ;;  %v2669_v10 = vpack.c.bf16 %v2643_v42, %v2642_v41 }
 0x116   : > { %8476 = vmatmul.mubr.msk.bf16.gmra.mxu0 %vm280_vm1, %v9564_v16  ;;  %v3479_v16 = vsel %vm612_vm0, %v7676_v30, 0 }
 0x117   : > { %8479 = vmatprep.mubr.msk.bf16.mxu0 %vm280_vm1, %v9578_v31  ;;  %v3024_v31 = vpack.c.bf16 %v2995_v61, %v2994_v60  ;;  %v3028_v61 = vpack.c.bf16 %v3003_v1, %v3002_v14  ;;  %v2652_v14 = vld [vmem:[#allocation2 + $0x187] sm:$0xff]  ;;  %v2653_v1 = vld [vmem:[#allocation2 + $0x18f] sm:$0xff] }
 0x118   : > { %8510 = vmatmul.mubr.msk.bf16.gmra.mxu1 %vm280_vm1, %v1243_v52  ;;  %v2645_v52 = vld [vmem:[#allocation2 + $0x10f] sm:$0xff] }
 0x119   : > { %8513 = vmatprep.mubr.msk.bf16.mxu1 %vm280_vm1, %v1244_v59  ;;  %v2670_v30 = vpack.c.bf16 %v2645_v52, %v2644_v47  ;;  %v543_v52 = vld [vmem:[#allocation4 + $0x60] sm:$0xff] }
 0x11e   : > { %8480 = vmatmul.mubr.msk.bf16.gmra.mxu0 %vm280_vm1, %v9580_v33 }
 0x11f   : > { %8483 = vmatprep.mubr.msk.bf16.mxu0 %vm280_vm1, %v9592_v46  ;;  %v531_v46 = vld [vmem:[#allocation4] sm:$0xff] }
 0x120   : > { %8514 = vmatmul.mubr.msk.bf16.gmra.mxu1 %vm280_vm1, %v1245_v0 }
 0x121   : > { %8517 = vmatprep.mubr.msk.bf16.mxu1 %vm280_vm1, %v1246_v4 }
 0x126   : > { %8484 = vmatmul.mubr.msk.bf16.gmra.mxu0 %vm280_vm1, %v9751_v48 }
 0x127   : > { %8523 = vmatprep.mubr.msk.bf16.mxu0 %vm280_vm1, %v9464_v5 }
 0x128   : > { %8518 = vmatmul.mubr.msk.bf16.gmra.mxu1 %vm280_vm1, %v2320_v49 }
 0x129   : > { %8557 = vmatprep.mubr.msk.bf16.mxu1 %vm280_vm1, %v9486_v18  ;;  %v2640_v18 = vld [vmem:[#allocation2 + $0xc7] sm:$0xff] }
 0x12a   : > { %v2668_v21 = vpack.c.bf16 %v2641_v9, %v2640_v18 }
 0x12e   : > { %v8321_v33 = vpop.f32.mrf.mxu0  ;;  %8524 = vmatmul.mubr.msk.bf16.vlgmr.msra.gmra.mxu0 %vm280_vm1, %v9490_v20  ;;  %v2996_v20 = vld [vmem:[#allocation2 + $0xa8] sm:$0xff] }
 0x12f   : > { %v779_v54 = vadd.f32 %v8321_v33, %v533_v15  ;;  %8590 = vmatpush3.bf16.msra.mxu0 %v3479_v16  ;;  %8527 = vmatprep.mubr.msk.bf16.mxu0 %vm280_vm1, %v9496_v23  ;;  %v2999_v23 = vld [vmem:[#allocation2 + $0xd0] sm:$0xff]  ;;  %v3025_v28 = vpack.c.bf16 %v2997_v7, %v2996_v20  ;;  %v2648_v20 = vld [vmem:[#allocation2 + $0x147] sm:$0xff] }
 0x130   : > { %v650_v5 = vpop.f32.mrf.mxu0  ;;  %v8355_v58 = vpop.f32.mrf.mxu1  ;;  %8558 = vmatmul.mubr.msk.bf16.vlgmr.msra.gmra.mxu1 %vm280_vm1, %v9498_v24  ;;  %v537_v24 = vld [vmem:[#allocation4 + $0x30] sm:$0xff]  ;;  %v3026_v34 = vpack.c.bf16 %v2999_v23, %v2998_v6  ;;  %v3004_v6 = vld [vmem:[#allocation2 + $0x128] sm:$0xff] }
 0x131   : > { %811 = vst.msk [vmem:[#allocation4 + $0x10] sm:$0xff] %vm280_vm1, %v779_v54  ;;  %v777_v12 = vadd.f32 %v650_v5, %v531_v46  ;;  %8561 = vmatprep.mubr.msk.bf16.mxu1 %vm280_vm1, %v3024_v31  ;;  %v539_v31 = vld [vmem:[#allocation4 + $0x40] sm:$0xff]  ;;  %v542_v5 = vld [vmem:[#allocation4 + $0x58] sm:$0xff]  ;;  %v2649_v7 = vld [vmem:[#allocation2 + $0x14f] sm:$0xff] }
 0x132   : > { %v8322_v3 = vpop.f32.mrf.mxu0  ;;  %v1008_v17 = vpop.f32.mrf.mxu1  ;;  %v3005_v23 = vld [vmem:[#allocation2 + $0x130] sm:$0xff] }
 0x133   : > { %809 = vst.msk [vmem:[#allocation4] sm:$0xff] %vm280_vm1, %v777_v12  ;;  %v780_v19 = vadd.f32 %v8322_v3, %v534_v55  ;;  %v2646_v55 = vld [vmem:[#allocation2 + $0x127] sm:$0xff]  ;;  %v3029_v41 = vpack.c.bf16 %v3005_v23, %v3004_v6  ;;  %v550_v6 = vld [vmem:[#allocation4 + $0x98] sm:$0xff] }
 0x134   : > { %v653_v22 = vpop.f32.mrf.mxu0  ;;  %v8356_v26 = vpop.f32.mrf.mxu1  ;;  %v2654_v23 = vld [vmem:[#allocation2 + $0x1a7] sm:$0xff] }
 0x135   : > { %812 = vst.msk [vmem:[#allocation4 + $0x18] sm:$0xff] %vm280_vm1, %v780_v19  ;;  %v778_v29 = vadd.f32 %v653_v22, %v532_v13 }
 0x136   : > { %v8325_v38 = vpop.f32.mrf.mxu0  ;;  %8528 = vmatmul.mubr.msk.bf16.gmra.mxu0 %vm280_vm1, %v9510_v32  ;;  %v1011_v35 = vpop.f32.mrf.mxu1 }
 0x137   : > { %810 = vst.msk [vmem:[#allocation4 + $0x8] sm:$0xff] %vm280_vm1, %v778_v29  ;;  %v783_v40 = vadd.f32 %v8325_v38, %v537_v24  ;;  %8531 = vmatprep.mubr.msk.bf16.mxu0 %vm280_vm1, %v2668_v21  ;;  %v2672_v38 = vpack.c.bf16 %v2649_v7, %v2648_v20  ;;  %v547_v7 = vld [vmem:[#allocation4 + $0x80] sm:$0xff] }
 0x138   : > { %v666_v45 = vpop.f32.mrf.mxu0  ;;  %v891_v50 = vld [vmem:[#allocation4 + $0x10] sm:$0xff]  ;;  %v8359_v51 = vpop.f32.mrf.mxu1  ;;  %8562 = vmatmul.mubr.msk.bf16.gmra.mxu1 %vm280_vm1, %v3025_v28 }
 0x139   : > { %815 = vst.msk [vmem:[#allocation4 + $0x30] sm:$0xff] %vm280_vm1, %v783_v40  ;;  %v781_v32 = vadd.f32 %v666_v45, %v535_v39  ;;  %v1137_v56 = vadd.f32 %v8355_v58, %v891_v50  ;;  %8565 = vmatprep.mubr.msk.bf16.mxu1 %vm280_vm1, %v3026_v34  ;;  %v2647_v58 = vld [vmem:[#allocation2 + $0x12f] sm:$0xff] }
 0x13a   : > { %v8326_v59 = vpop.f32.mrf.mxu0  ;;  %v889_v0 = vld [vmem:[#allocation4] sm:$0xff]  ;;  %v1024_v63 = vpop.f32.mrf.mxu1  ;;  %v2671_v22 = vpack.c.bf16 %v2647_v58, %v2646_v55  ;;  %v3007_v28 = vld [vmem:[#allocation2 + $0x150] sm:$0xff] }
 0x13b   : > { %813 = vst.msk [vmem:[#allocation4 + $0x20] sm:$0xff] %vm280_vm1, %v781_v32  ;;  %1169 = vst.msk [vmem:[#allocation4 + $0x10] sm:$0xff] %vm280_vm1, %v1137_v56  ;;  %v784_v4 = vadd.f32 %v8326_v59, %v538_v44  ;;  %v1135_v27 = vadd.f32 %v1008_v17, %v889_v0  ;;  %v540_v17 = vld [vmem:[#allocation4 + $0x48] sm:$0xff]  ;;  %v545_v40 = vld [vmem:[#allocation4 + $0x70] sm:$0xff] }
 0x13c   : > { %v669_v43 = vpop.f32.mrf.mxu0  ;;  %v892_v11 = vld [vmem:[#allocation4 + $0x18] sm:$0xff]  ;;  %v8360_v36 = vpop.f32.mrf.mxu1  ;;  %v2651_v59 = vld [vmem:[#allocation2 + $0x16f] sm:$0xff] }
 0x13d   : > { %816 = vst.msk [vmem:[#allocation4 + $0x38] sm:$0xff] %vm280_vm1, %v784_v4  ;;  %1167 = vst.msk [vmem:[#allocation4] sm:$0xff] %vm280_vm1, %v1135_v27  ;;  %v782_v49 = vadd.f32 %v669_v43, %v536_v53  ;;  %v1138_v60 = vadd.f32 %v8356_v26, %v892_v11  ;;  %v3006_v26 = vld [vmem:[#allocation2 + $0x148] sm:$0xff]  ;;  %v3009_v11 = vld [vmem:[#allocation2 + $0x170] sm:$0xff] }
 0x13e   : > { %v8329_v15 = vpop.f32.mrf.mxu0  ;;  %v890_v16 = vld [vmem:[#allocation4 + $0x8] sm:$0xff]  ;;  %8532 = vmatmul.mubr.msk.bf16.gmra.mxu0 %vm280_vm1, %v2669_v10  ;;  %v1027_v33 = vpop.f32.mrf.mxu1  ;;  %v3030_v50 = vpack.c.bf16 %v3007_v28, %v3006_v26 }
 0x13f   : > { %814 = vst.msk [vmem:[#allocation4 + $0x28] sm:$0xff] %vm280_vm1, %v782_v49  ;;  %1170 = vst.msk [vmem:[#allocation4 + $0x18] sm:$0xff] %vm280_vm1, %v1138_v60  ;;  %v787_v46 = vadd.f32 %v8329_v15, %v541_v25  ;;  %v1136_v54 = vadd.f32 %v1011_v35, %v890_v16  ;;  %8535 = vmatprep.mubr.msk.bf16.mxu0 %vm280_vm1, %v2670_v30  ;;  %v544_v30 = vld [vmem:[#allocation4 + $0x68] sm:$0xff] }
 0x140   : > { %v682_v18 = vpop.f32.mrf.mxu0  ;;  %v895_v9 = vld [vmem:[#allocation4 + $0x30] sm:$0xff]  ;;  %v8363_v12 = vpop.f32.mrf.mxu1  ;;  %8566 = vmatmul.mubr.msk.bf16.gmra.mxu1 %vm280_vm1, %v3027_v37  ;;  %v3008_v43 = vld [vmem:[#allocation2 + $0x168] sm:$0xff]  ;;  %v2673_v37 = vpack.c.bf16 %v2651_v59, %v2650_v62 }
 0x141   : > { %819 = vst.msk [vmem:[#allocation4 + $0x50] sm:$0xff] %vm280_vm1, %v787_v46  ;;  %1168 = vst.msk [vmem:[#allocation4 + $0x8] sm:$0xff] %vm280_vm1, %v1136_v54  ;;  %v785_v3 = vadd.f32 %v682_v18, %v539_v31  ;;  %v1141_v13 = vadd.f32 %v8359_v51, %v895_v9  ;;  %8569 = vmatprep.mubr.msk.bf16.mxu1 %vm280_vm1, %v3028_v61  ;;  %v3010_v60 = vld [vmem:[#allocation2 + $0x188] sm:$0xff]  ;;  %v3011_v61 = vld [vmem:[#allocation2 + $0x190] sm:$0xff]  ;;  %v2674_v31 = vpack.c.bf16 %v2653_v1, %v2652_v14 }
 0x142   : > { %v8330_v19 = vpop.f32.mrf.mxu0  ;;  %v893_v21 = vld [vmem:[#allocation4 + $0x20] sm:$0xff]  ;;  %v1040_v24 = vpop.f32.mrf.mxu1  ;;  %v549_v54 = vld [vmem:[#allocation4 + $0x90] sm:$0xff]  ;;  %v3031_v55 = vpack.c.bf16 %v3009_v11, %v3008_v43  ;;  %v3032_v9 = vpack.c.bf16 %v3011_v61, %v3010_v60 }
 0x143   : > { %817 = vst.msk [vmem:[#allocation4 + $0x40] sm:$0xff] %vm280_vm1, %v785_v3  ;;  %1173 = vst.msk [vmem:[#allocation4 + $0x30] sm:$0xff] %vm280_vm1, %v1141_v13  ;;  %v788_v29 = vadd.f32 %v8330_v19, %v542_v5  ;;  %v1139_v34 = vadd.f32 %v1024_v63, %v893_v21  ;;  %v2655_v19 = vld [vmem:[#allocation2 + $0x1af] sm:$0xff]  ;;  %v2656_v26 = vld [vmem:[#allocation2 + $0x1c7] sm:$0xff] }
 0x144   : > { %v685_v39 = vpop.f32.mrf.mxu0  ;;  %v896_v35 = vld [vmem:[#allocation4 + $0x38] sm:$0xff]  ;;  %v8364_v44 = vpop.f32.mrf.mxu1  ;;  %v2657_v28 = vld [vmem:[#allocation2 + $0x1cf] sm:$0xff]  ;;  %v551_v1 = vld [vmem:[#allocation4 + $0xa0] sm:$0xff] }
 0x145   : > { %820 = vst.msk [vmem:[#allocation4 + $0x58] sm:$0xff] %vm280_vm1, %v788_v29  ;;  %1171 = vst.msk [vmem:[#allocation4 + $0x20] sm:$0xff] %vm280_vm1, %v1139_v34  ;;  %v786_v42 = vadd.f32 %v685_v39, %v540_v17  ;;  %v1142_v45 = vadd.f32 %v8360_v36, %v896_v35  ;;  %v3012_v39 = vld [vmem:[#allocation2 + $0x1a8] sm:$0xff]  ;;  %v3013_v35 = vld [vmem:[#allocation2 + $0x1b0] sm:$0xff] }
 0x146   : > { %v8333_v51 = vpop.f32.mrf.mxu0  ;;  %v894_v47 = vld [vmem:[#allocation4 + $0x28] sm:$0xff]  ;;  %8536 = vmatmul.mubr.msk.bf16.gmra.mxu0 %vm280_vm1, %v2671_v22  ;;  %v1043_v32 = vpop.f32.mrf.mxu1  ;;  %v3033_v62 = vpack.c.bf16 %v3013_v35, %v3012_v39  ;;  %v3349_v35 = vld [vmem:[#allocation2 + $0x51] sm:$0xff] }
 0x147   : > { %818 = vst.msk [vmem:[#allocation4 + $0x48] sm:$0xff] %vm280_vm1, %v786_v42  ;;  %1174 = vst.msk [vmem:[#allocation4 + $0x38] sm:$0xff] %vm280_vm1, %v1142_v45  ;;  %v791_v56 = vadd.f32 %v8333_v51, %v545_v40  ;;  %v1140_v53 = vadd.f32 %v1027_v33, %v894_v47  ;;  %8539 = vmatprep.mubr.msk.bf16.mxu0 %vm280_vm1, %v2672_v38  ;;  %v548_v38 = vld [vmem:[#allocation4 + $0x88] sm:$0xff] }
 0x148   : > { %v698_v0 = vpop.f32.mrf.mxu0  ;;  %v899_v10 = vld [vmem:[#allocation4 + $0x50] sm:$0xff]  ;;  %v8367_v63 = vpop.f32.mrf.mxu1  ;;  %8570 = vmatmul.mubr.msk.bf16.gmra.mxu1 %vm280_vm1, %v3029_v41  ;;  %v2675_v41 = vpack.c.bf16 %v2655_v19, %v2654_v23  ;;  %v3014_v45 = vld [vmem:[#allocation2 + $0x1c8] sm:$0xff]  ;;  %v555_v23 = vld [vmem:[#allocation4 + $0xc0] sm:$0xff] }
 0x149   : > { %823 = vst.msk [vmem:[#allocation4 + $0x70] sm:$0xff] %vm280_vm1, %v791_v56  ;;  %1172 = vst.msk [vmem:[#allocation4 + $0x28] sm:$0xff] %vm280_vm1, %v1140_v53  ;;  %v789_v4 = vadd.f32 %v698_v0, %v543_v52  ;;  %v1145_v27 = vadd.f32 %v8363_v12, %v899_v10  ;;  %8573 = vmatprep.mubr.msk.bf16.mxu1 %vm280_vm1, %v3030_v50  ;;  %v3015_v50 = vld [vmem:[#allocation2 + $0x1d0] sm:$0xff]  ;;  %v2676_v52 = vpack.c.bf16 %v2657_v28, %v2656_v26  ;;  %v2658_v43 = vld [vmem:[#allocation2 + $0x1e7] sm:$0xff] }
 0x14a   : > { %v8334_v25 = vpop.f32.mrf.mxu0  ;;  %v897_v36 = vld [vmem:[#allocation4 + $0x40] sm:$0xff]  ;;  %v1056_v49 = vpop.f32.mrf.mxu1  ;;  %v553_v53 = vld [vmem:[#allocation4 + $0xb0] sm:$0xff]  ;;  %v3034_v10 = vpack.c.bf16 %v3015_v50, %v3014_v45  ;;  %v556_v50 = vld [vmem:[#allocation4 + $0xc8] sm:$0xff] }
 0x14b   : > { %821 = vst.msk [vmem:[#allocation4 + $0x60] sm:$0xff] %vm280_vm1, %v789_v4  ;;  %1177 = vst.msk [vmem:[#allocation4 + $0x50] sm:$0xff] %vm280_vm1, %v1145_v27  ;;  %v792_v15 = vadd.f32 %v8334_v25, %v546_v57  ;;  %v1143_v16 = vadd.f32 %v1040_v24, %v897_v36  ;;  %v2659_v11 = vld [vmem:[#allocation2 + $0x1ef] sm:$0xff]  ;;  %v2662_v26 = vld [vmem:[#allocation2 + $0x227] sm:$0xff] }
 0x14c   : > { %v701_v33 = vpop.f32.mrf.mxu0  ;;  %v900_v46 = vld [vmem:[#allocation4 + $0x58] sm:$0xff]  ;;  %v8368_v5 = vpop.f32.mrf.mxu1  ;;  %v2663_v28 = vld [vmem:[#allocation2 + $0x22f] sm:$0xff] }
 0x14d   : > { %824 = vst.msk [vmem:[#allocation4 + $0x78] sm:$0xff] %vm280_vm1, %v792_v15  ;;  %1175 = vst.msk [vmem:[#allocation4 + $0x40] sm:$0xff] %vm280_vm1, %v1143_v16  ;;  %v790_v58 = vadd.f32 %v701_v33, %v544_v30  ;;  %v1146_v18 = vadd.f32 %v8364_v44, %v900_v46  ;;  %v3016_v15 = vld [vmem:[#allocation2 + $0x1e8] sm:$0xff]  ;;  %v3017_v16 = vld [vmem:[#allocation2 + $0x1f0] sm:$0xff] }
 0x14e   : > { %v8337_v12 = vpop.f32.mrf.mxu0  ;;  %v898_v20 = vld [vmem:[#allocation4 + $0x48] sm:$0xff]  ;;  %8540 = vmatmul.mubr.msk.bf16.gmra.mxu0 %vm280_vm1, %v2673_v37  ;;  %v1059_v3 = vpop.f32.mrf.mxu1  ;;  %v554_v37 = vld [vmem:[#allocation4 + $0xb8] sm:$0xff] }
 0x14f   : > { %822 = vst.msk [vmem:[#allocation4 + $0x68] sm:$0xff] %vm280_vm1, %v790_v58  ;;  %1178 = vst.msk [vmem:[#allocation4 + $0x58] sm:$0xff] %vm280_vm1, %v1146_v18  ;;  %v795_v13 = vadd.f32 %v8337_v12, %v549_v54  ;;  %v1144_v17 = vadd.f32 %v1043_v32, %v898_v20  ;;  %8543 = vmatprep.mubr.msk.bf16.mxu0 %vm280_vm1, %v2674_v31  ;;  %v552_v46 = vld [vmem:[#allocation4 + $0xa8] sm:$0xff]  ;;  %v2677_v54 = vpack.c.bf16 %v2659_v11, %v2658_v43  ;;  %v557_v12 = vld [vmem:[#allocation4 + $0xd0] sm:$0xff] }
 0x150   : > { %v714_v21 = vpop.f32.mrf.mxu0  ;;  %v903_v22 = vld [vmem:[#allocation4 + $0x70] sm:$0xff]  ;;  %v8371_v24 = vpop.f32.mrf.mxu1  ;;  %8574 = vmatmul.mubr.msk.bf16.gmra.mxu1 %vm280_vm1, %v3031_v55  ;;  %v562_v43 = vld [vmem:[#allocation4 + $0xf8] sm:$0xff] }
 0x151   : > { %827 = vst.msk [vmem:[#allocation4 + $0x90] sm:$0xff] %vm280_vm1, %v795_v13  ;;  %1176 = vst.msk [vmem:[#allocation4 + $0x48] sm:$0xff] %vm280_vm1, %v1144_v17  ;;  %v793_v29 = vadd.f32 %v714_v21, %v547_v7  ;;  %v1149_v34 = vadd.f32 %v8367_v63, %v903_v22  ;;  %8577 = vmatprep.mubr.msk.bf16.mxu1 %vm280_vm1, %v3032_v9  ;;  %v3035_v7 = vpack.c.bf16 %v3017_v16, %v3016_v15  ;;  %v3348_v39 = vld [vmem:[#allocation2 + $0x49] sm:$0xff] }
 0x152   : > { %v8338_v40 = vpop.f32.mrf.mxu0  ;;  %v901_v44 = vld [vmem:[#allocation4 + $0x60] sm:$0xff]  ;;  %v1072_v42 = vpop.f32.mrf.mxu1  ;;  %v3350_v11 = vld [vmem:[#allocation2 + $0x69] sm:$0xff] }
 0x153   : > { %825 = vst.msk [vmem:[#allocation4 + $0x80] sm:$0xff] %vm280_vm1, %v793_v29  ;;  %1181 = vst.msk [vmem:[#allocation4 + $0x70] sm:$0xff] %vm280_vm1, %v1149_v34  ;;  %v796_v51 = vadd.f32 %v8338_v40, %v550_v6  ;;  %v1147_v47 = vadd.f32 %v1056_v49, %v901_v44 }
 0x154   : > { %v717_v32 = vpop.f32.mrf.mxu0  ;;  %v904_v56 = vld [vmem:[#allocation4 + $0x78] sm:$0xff]  ;;  %v8372_v57 = vpop.f32.mrf.mxu1 }
 0x155   : > { %828 = vst.msk [vmem:[#allocation4 + $0x98] sm:$0xff] %vm280_vm1, %v796_v51  ;;  %1179 = vst.msk [vmem:[#allocation4 + $0x60] sm:$0xff] %vm280_vm1, %v1147_v47  ;;  %v794_v59 = vadd.f32 %v717_v32, %v548_v38  ;;  %v1150_v0 = vadd.f32 %v8368_v5, %v904_v56  ;;  %v2679_v51 = vpack.c.bf16 %v2663_v28, %v2662_v26  ;;  %v3356_v26 = vld [vmem:[#allocation2 + $0xc9] sm:$0xff] }
 0x156   : > { %v8341_v63 = vpop.f32.mrf.mxu0  ;;  %v902_v14 = vld [vmem:[#allocation4 + $0x68] sm:$0xff]  ;;  %8544 = vmatmul.mubr.msk.bf16.gmra.mxu0 %vm280_vm1, %v2675_v41  ;;  %v1075_v4 = vpop.f32.mrf.mxu1  ;;  %v3380_v56 = vpack.c.bf16 %v3349_v35, %v3348_v39  ;;  %v3357_v39 = vld [vmem:[#allocation2 + $0xd1] sm:$0xff] }
 0x157   : > { %826 = vst.msk [vmem:[#allocation4 + $0x88] sm:$0xff] %vm280_vm1, %v794_v59  ;;  %1182 = vst.msk [vmem:[#allocation4 + $0x78] sm:$0xff] %vm280_vm1, %v1150_v0  ;;  %v799_v27 = vadd.f32 %v8341_v63, %v553_v53  ;;  %v1148_v30 = vadd.f32 %v1059_v3, %v902_v14  ;;  %8547 = vmatprep.mubr.msk.bf16.mxu0 %vm280_vm1, %v2676_v52  ;;  %v3020_v41 = vld [vmem:[#allocation2 + $0x228] sm:$0xff] }
 0x158   : > { %v730_v25 = vpop.f32.mrf.mxu0  ;;  %v907_v36 = vld [vmem:[#allocation4 + $0x90] sm:$0xff]  ;;  %v8375_v49 = vpop.f32.mrf.mxu1  ;;  %8578 = vmatmul.mubr.msk.bf16.gmra.mxu1 %vm280_vm1, %v3033_v62 }
 0x159   : > { %831 = vst.msk [vmem:[#allocation4 + $0xb0] sm:$0xff] %vm280_vm1, %v799_v27  ;;  %1180 = vst.msk [vmem:[#allocation4 + $0x68] sm:$0xff] %vm280_vm1, %v1148_v30  ;;  %v797_v60 = vadd.f32 %v730_v25, %v551_v1  ;;  %v1153_v61 = vadd.f32 %v8371_v24, %v907_v36  ;;  %8581 = vmatprep.mubr.msk.bf16.mxu1 %vm280_vm1, %v3034_v10  ;;  %v558_v24 = vld [vmem:[#allocation4 + $0xd8] sm:$0xff]  ;;  %v561_v62 = vld [vmem:[#allocation4 + $0xf0] sm:$0xff] }
 0x15a   : > { %v8342_v31 = vpop.f32.mrf.mxu0  ;;  %v905_v33 = vld [vmem:[#allocation4 + $0x80] sm:$0xff]  ;;  %v1088_v5 = vpop.f32.mrf.mxu1  ;;  %v3351_v25 = vld [vmem:[#allocation2 + $0x71] sm:$0xff] }
 0x15b   : > { %829 = vst.msk [vmem:[#allocation4 + $0xa0] sm:$0xff] %vm280_vm1, %v797_v60  ;;  %1185 = vst.msk [vmem:[#allocation4 + $0x90] sm:$0xff] %vm280_vm1, %v1153_v61  ;;  %v800_v55 = vadd.f32 %v8342_v31, %v554_v37  ;;  %v1151_v58 = vadd.f32 %v1072_v42, %v905_v33  ;;  %v559_v1 = vld [vmem:[#allocation4 + $0xe0] sm:$0xff]  ;;  %v3352_v60 = vld [vmem:[#allocation2 + $0x89] sm:$0xff] }
 0x15c   : > { %v733_v18 = vpop.f32.mrf.mxu0  ;;  %v908_v9 = vld [vmem:[#allocation4 + $0x98] sm:$0xff]  ;;  %v8376_v20 = vpop.f32.mrf.mxu1 }
 0x15d   : > { %832 = vst.msk [vmem:[#allocation4 + $0xb8] sm:$0xff] %vm280_vm1, %v800_v55  ;;  %1183 = vst.msk [vmem:[#allocation4 + $0x80] sm:$0xff] %vm280_vm1, %v1151_v58  ;;  %v798_v3 = vadd.f32 %v733_v18, %v552_v46  ;;  %v1154_v13 = vadd.f32 %v8372_v57, %v908_v9  ;;  %v3353_v61 = vld [vmem:[#allocation2 + $0x91] sm:$0xff]  ;;  %v560_v46 = vld [vmem:[#allocation4 + $0xe8] sm:$0xff] }
 0x15e   : > { %v8345_v17 = vpop.f32.mrf.mxu0  ;;  %v906_v6 = vld [vmem:[#allocation4 + $0x88] sm:$0xff]  ;;  %8548 = vmatmul.mubr.msk.bf16.gmra.mxu0 %vm280_vm1, %v2677_v54  ;;  %v1091_v19 = vpop.f32.mrf.mxu1  ;;  %v3381_v54 = vpack.c.bf16 %v3351_v25, %v3350_v11  ;;  %v3382_v18 = vpack.c.bf16 %v3353_v61, %v3352_v60  ;;  %v1254_v60 = vld [vmem:[#allocation4 + $0x38] sm:$0xff] }
 0x15f   : > { %830 = vst.msk [vmem:[#allocation4 + $0xa8] sm:$0xff] %vm280_vm1, %v798_v3  ;;  %1186 = vst.msk [vmem:[#allocation4 + $0x98] sm:$0xff] %vm280_vm1, %v1154_v13  ;;  %v803_v21 = vadd.f32 %v8345_v17, %v557_v12  ;;  %v1152_v22 = vadd.f32 %v1075_v4, %v906_v6  ;;  %8551 = vmatprep.mubr.msk.bf16.mxu0 %vm280_vm1, %v9685_v8  ;;  %v3021_v8 = vld [vmem:[#allocation2 + $0x230] sm:$0xff] }
 0x160   : > { %v746_v29 = vpop.f32.mrf.mxu0  ;;  %v911_v34 = vld [vmem:[#allocation4 + $0xb0] sm:$0xff]  ;;  %v8379_v38 = vpop.f32.mrf.mxu1  ;;  %8582 = vmatmul.mubr.msk.bf16.gmra.mxu1 %vm280_vm1, %v3035_v7  ;;  %v3037_v0 = vpack.c.bf16 %v3021_v8, %v3020_v41  ;;  %v1250_v41 = vld [vmem:[#allocation4 + $0x18] sm:$0xff] }
 0x161   : > { %835 = vst.msk [vmem:[#allocation4 + $0xd0] sm:$0xff] %vm280_vm1, %v803_v21  ;;  %1184 = vst.msk [vmem:[#allocation4 + $0x88] sm:$0xff] %vm280_vm1, %v1152_v22  ;;  %v801_v40 = vadd.f32 %v746_v29, %v555_v23  ;;  %v1157_v44 = vadd.f32 %v8375_v49, %v911_v34  ;;  %8585 = vmatprep.mubr.msk.bf16.mxu1 %vm280_vm1, %v9751_v48  ;;  %v1249_v17 = vld [vmem:[#allocation4 + $0x10] sm:$0xff]  ;;  %v1247_v29 = vld [vmem:[#allocation4] sm:$0xff] }
 0x162   : > { %v8346_v42 = vpop.f32.mrf.mxu0  ;;  %v909_v45 = vld [vmem:[#allocation4 + $0xa0] sm:$0xff]  ;;  %v1104_v47 = vpop.f32.mrf.mxu1  ;;  %v3354_v22 = vld [vmem:[#allocation2 + $0xa9] sm:$0xff] }
 0x163   : > { %833 = vst.msk [vmem:[#allocation4 + $0xc0] sm:$0xff] %vm280_vm1, %v801_v40  ;;  %1189 = vst.msk [vmem:[#allocation4 + $0xb0] sm:$0xff] %vm280_vm1, %v1157_v44  ;;  %v804_v52 = vadd.f32 %v8346_v42, %v558_v24  ;;  %v1155_v32 = vadd.f32 %v1088_v5, %v909_v45  ;;  %v3355_v24 = vld [vmem:[#allocation2 + $0xb1] sm:$0xff] }
 0x164   : > { %v749_v53 = vpop.f32.mrf.mxu0  ;;  %v912_v57 = vld [vmem:[#allocation4 + $0xb8] sm:$0xff]  ;;  %v8380_v59 = vpop.f32.mrf.mxu1  ;;  %v3383_v42 = vpack.c.bf16 %v3355_v24, %v3354_v22  ;;  %v1255_v22 = vld [vmem:[#allocation4 + $0x40] sm:$0xff] }
 0x165   : > { %836 = vst.msk [vmem:[#allocation4 + $0xd8] sm:$0xff] %vm280_vm1, %v804_v52  ;;  %1187 = vst.msk [vmem:[#allocation4 + $0xa0] sm:$0xff] %vm280_vm1, %v1155_v32  ;;  %v802_v48 = vadd.f32 %v749_v53, %v556_v50  ;;  %v1158_v10 = vadd.f32 %v8376_v20, %v912_v57  ;;  %v1248_v32 = vld [vmem:[#allocation4 + $0x8] sm:$0xff] }
 0x166   : > { %v8349_v63 = vpop.f32.mrf.mxu0  ;;  %v910_v14 = vld [vmem:[#allocation4 + $0xa8] sm:$0xff]  ;;  %8552 = vmatmul.mubr.msk.bf16.gmra.mxu0 %vm280_vm1, %v2679_v51  ;;  %v1107_v4 = vpop.f32.mrf.mxu1 }
 0x167   : > { %834 = vst.msk [vmem:[#allocation4 + $0xc8] sm:$0xff] %vm280_vm1, %v802_v48  ;;  %1190 = vst.msk [vmem:[#allocation4 + $0xb8] sm:$0xff] %vm280_vm1, %v1158_v10  ;;  %v807_v27 = vadd.f32 %v8349_v63, %v561_v62  ;;  %v1156_v30 = vadd.f32 %v1091_v19, %v910_v14  ;;  %8591 = vmatprep.mubr.msk.bf16.mxu0 %vm280_vm1, %v3380_v56 }
 0x168   : > { %v762_v36 = vpop.f32.mrf.mxu0  ;;  %v915_v37 = vld [vmem:[#allocation4 + $0xd0] sm:$0xff]  ;;  %v8383_v49 = vpop.f32.mrf.mxu1  ;;  %8586 = vmatmul.mubr.msk.bf16.gmra.mxu1 %vm280_vm1, %v3037_v0 }
 0x169   : > { %839 = vst.msk [vmem:[#allocation4 + $0xf0] sm:$0xff] %vm280_vm1, %v807_v27  ;;  %1188 = vst.msk [vmem:[#allocation4 + $0xa8] sm:$0xff] %vm280_vm1, %v1156_v30  ;;  %v805_v15 = vadd.f32 %v762_v36, %v559_v1  ;;  %v1161_v16 = vadd.f32 %v8379_v38, %v915_v37  ;;  %v1253_v0 = vld [vmem:[#allocation4 + $0x30] sm:$0xff]  ;;  %v1251_v30 = vld [vmem:[#allocation4 + $0x20] sm:$0xff] }
 0x16a   : > { %v8350_v31 = vpop.f32.mrf.mxu0  ;;  %v913_v33 = vld [vmem:[#allocation4 + $0xc0] sm:$0xff]  ;;  %v1120_v5 = vpop.f32.mrf.mxu1  ;;  %v3358_v1 = vld [vmem:[#allocation2 + $0xe9] sm:$0xff]  ;;  %v3361_v36 = vld [vmem:[#allocation2 + $0x111] sm:$0xff] }
 0x16b   : > { %837 = vst.msk [vmem:[#allocation4 + $0xe0] sm:$0xff] %vm280_vm1, %v805_v15  ;;  %1193 = vst.msk [vmem:[#allocation4 + $0xd0] sm:$0xff] %vm280_vm1, %v1161_v16  ;;  %v808_v55 = vadd.f32 %v8350_v31, %v562_v43  ;;  %v1159_v58 = vadd.f32 %v1104_v47, %v913_v33  ;;  %v3384_v47 = vpack.c.bf16 %v3357_v39, %v3356_v26  ;;  %v3360_v27 = vld [vmem:[#allocation2 + $0x109] sm:$0xff]  ;;  %v1258_v39 = vld [vmem:[#allocation4 + $0x58] sm:$0xff] }
 0x16c   : > { %v765_v9 = vpop.f32.mrf.mxu0  ;;  %v916_v12 = vld [vmem:[#allocation4 + $0xd8] sm:$0xff]  ;;  %v8384_v20 = vpop.f32.mrf.mxu1 }
 0x16d   : > { %840 = vst.msk [vmem:[#allocation4 + $0xf8] sm:$0xff] %vm280_vm1, %v808_v55  ;;  %1191 = vst.msk [vmem:[#allocation4 + $0xc0] sm:$0xff] %vm280_vm1, %v1159_v58  ;;  %v806_v7 = vadd.f32 %v765_v9, %v560_v46  ;;  %v1162_v3 = vadd.f32 %v8380_v59, %v916_v12 }
 0x16e   : > { %v914_v13 = vld [vmem:[#allocation4 + $0xc8] sm:$0xff]  ;;  %v8389_v6 = vpop.f32.mrf.mxu0  ;;  %8592 = vmatmul.mubr.msk.bf16.vlgmr.msra.gmra.mxu0 %vm280_vm1, %v3381_v54  ;;  %v1123_v23 = vpop.f32.mrf.mxu1  ;;  %v3386_v54 = vpack.c.bf16 %v3361_v36, %v3360_v27  ;;  %v1262_v36 = vld [vmem:[#allocation4 + $0x78] sm:$0xff] }
 0x16f   : > { %838 = vst.msk [vmem:[#allocation4 + $0xe8] sm:$0xff] %vm280_vm1, %v806_v7  ;;  %1194 = vst.msk [vmem:[#allocation4 + $0xd8] sm:$0xff] %vm280_vm1, %v1162_v3  ;;  %v1160_v19 = vadd.f32 %v1107_v4, %v914_v13  ;;  %v1495_v21 = vadd.f32 %v8389_v6, %v1249_v17  ;;  %8595 = vmatprep.mubr.msk.bf16.mxu0 %vm280_vm1, %v3382_v18  ;;  %v3359_v4 = vld [vmem:[#allocation2 + $0xf1] sm:$0xff] }
 0x170   : > { %v919_v28 = vld [vmem:[#allocation4 + $0xf0] sm:$0xff]  ;;  %v1366_v34 = vpop.f32.mrf.mxu0  ;;  %v8423_v38 = vpop.f32.mrf.mxu1  ;;  %v3385_v16 = vpack.c.bf16 %v3359_v4, %v3358_v1  ;;  %v1259_v1 = vld [vmem:[#allocation4 + $0x60] sm:$0xff] }
 0x171   : > { %1192 = vst.msk [vmem:[#allocation4 + $0xc8] sm:$0xff] %vm280_vm1, %v1160_v19  ;;  %1527 = vst.msk [vmem:[#allocation4 + $0x10] sm:$0xff] %vm280_vm1, %v1495_v21  ;;  %v1165_v35 = vadd.f32 %v8383_v49, %v919_v28  ;;  %v1493_v40 = vadd.f32 %v1366_v34, %v1247_v29  ;;  %v3363_v19 = vld [vmem:[#allocation2 + $0x131] sm:$0xff]  ;;  %v3364_v21 = vld [vmem:[#allocation2 + $0x149] sm:$0xff] }
 0x172   : > { %v917_v44 = vld [vmem:[#allocation4 + $0xe0] sm:$0xff]  ;;  %v8390_v8 = vpop.f32.mrf.mxu0  ;;  %v1724_v45 = vpop.f32.mrf.mxu1  ;;  %v3365_v29 = vld [vmem:[#allocation2 + $0x151] sm:$0xff] }
 0x173   : > { %1197 = vst.msk [vmem:[#allocation4 + $0xf0] sm:$0xff] %vm280_vm1, %v1165_v35  ;;  %1525 = vst.msk [vmem:[#allocation4] sm:$0xff] %vm280_vm1, %v1493_v40  ;;  %v1163_v50 = vadd.f32 %v1120_v5, %v917_v44  ;;  %v1496_v51 = vadd.f32 %v8390_v8, %v1250_v41  ;;  %v1252_v5 = vld [vmem:[#allocation4 + $0x28] sm:$0xff] }
 0x174   : > { %v920_v52 = vld [vmem:[#allocation4 + $0xf8] sm:$0xff]  ;;  %v1369_v56 = vpop.f32.mrf.mxu0  ;;  %v8424_v53 = vpop.f32.mrf.mxu1 }
 0x175   : > { %1195 = vst.msk [vmem:[#allocation4 + $0xe0] sm:$0xff] %vm280_vm1, %v1163_v50  ;;  %1528 = vst.msk [vmem:[#allocation4 + $0x18] sm:$0xff] %vm280_vm1, %v1496_v51  ;;  %v1166_v57 = vadd.f32 %v8384_v20, %v920_v52  ;;  %v1494_v62 = vadd.f32 %v1369_v56, %v1248_v32  ;;  %v1257_v20 = vld [vmem:[#allocation4 + $0x50] sm:$0xff]  ;;  %v1256_v50 = vld [vmem:[#allocation4 + $0x48] sm:$0xff] }
 0x176   : > { %v918_v59 = vld [vmem:[#allocation4 + $0xe8] sm:$0xff]  ;;  %v8393_v48 = vpop.f32.mrf.mxu0  ;;  %8596 = vmatmul.mubr.msk.bf16.gmra.mxu0 %vm280_vm1, %v3383_v42  ;;  %v1727_v10 = vpop.f32.mrf.mxu1 }
 0x177   : > { %1198 = vst.msk [vmem:[#allocation4 + $0xf8] sm:$0xff] %vm280_vm1, %v1166_v57  ;;  %1526 = vst.msk [vmem:[#allocation4 + $0x8] sm:$0xff] %vm280_vm1, %v1494_v62  ;;  %v1164_v63 = vadd.f32 %v1123_v23, %v918_v59  ;;  %v1499_v14 = vadd.f32 %v8393_v48, %v1253_v0  ;;  %8599 = vmatprep.mubr.msk.bf16.mxu0 %vm280_vm1, %v3384_v47  ;;  %v3362_v23 = vld [vmem:[#allocation2 + $0x129] sm:$0xff] }
 0x178   : > { %v1382_v43 = vpop.f32.mrf.mxu0  ;;  %v1607_v11 = vld [vmem:[#allocation4 + $0x10] sm:$0xff]  ;;  %v8427_v25 = vpop.f32.mrf.mxu1  ;;  %v3387_v44 = vpack.c.bf16 %v3363_v19, %v3362_v23  ;;  %v1263_v23 = vld [vmem:[#allocation4 + $0x80] sm:$0xff] }
 0x179   : > { %1196 = vst.msk [vmem:[#allocation4 + $0xe8] sm:$0xff] %vm280_vm1, %v1164_v63  ;;  %1531 = vst.msk [vmem:[#allocation4 + $0x30] sm:$0xff] %vm280_vm1, %v1499_v14  ;;  %v1497_v37 = vadd.f32 %v1382_v43, %v1251_v30  ;;  %v1853_v49 = vadd.f32 %v8423_v38, %v1607_v11  ;;  %v3367_v63 = vld [vmem:[#allocation2 + $0x171] sm:$0xff]  ;;  %v3368_v14 = vld [vmem:[#allocation2 + $0x189] sm:$0xff] }
 0x17a   : > { %v8394_v61 = vpop.f32.mrf.mxu0  ;;  %v1605_v15 = vld [vmem:[#allocation4] sm:$0xff]  ;;  %v1740_v31 = vpop.f32.mrf.mxu1  ;;  %v3369_v43 = vld [vmem:[#allocation2 + $0x191] sm:$0xff] }
 0x17b   : > { %1529 = vst.msk [vmem:[#allocation4 + $0x20] sm:$0xff] %vm280_vm1, %v1497_v37  ;;  %1885 = vst.msk [vmem:[#allocation4 + $0x10] sm:$0xff] %vm280_vm1, %v1853_v49  ;;  %v1500_v33 = vadd.f32 %v8394_v61, %v1254_v60  ;;  %v1851_v46 = vadd.f32 %v1724_v45, %v1605_v15  ;;  %v3388_v45 = vpack.c.bf16 %v3365_v29, %v3364_v21  ;;  %v4065_v29 = vld [vmem:[%s11158_s4] sm:$0xf] }
 0x17c   : > { %v1385_v55 = vpop.f32.mrf.mxu0  ;;  %v1608_v58 = vld [vmem:[#allocation4 + $0x18] sm:$0xff]  ;;  %v8428_v18 = vpop.f32.mrf.mxu1  ;;  %8938 = vmatprep.subr.msk.bf16.mxu1 %vm612_vm0, %v4065_v29 }
 0x17d   : > { %1532 = vst.msk [vmem:[#allocation4 + $0x38] sm:$0xff] %vm280_vm1, %v1500_v33  ;;  %1883 = vst.msk [vmem:[#allocation4] sm:$0xff] %vm280_vm1, %v1851_v46  ;;  %v1498_v9 = vadd.f32 %v1385_v55, %v1252_v5  ;;  %v1854_v12 = vadd.f32 %v8424_v53, %v1608_v58  ;;  %v1261_v53 = vld [vmem:[#allocation4 + $0x70] sm:$0xff]  ;;  %v1260_v33 = vld [vmem:[#allocation4 + $0x68] sm:$0xff] }
 0x17e   : > { %v8397_v7 = vpop.f32.mrf.mxu0  ;;  %v1606_v3 = vld [vmem:[#allocation4 + $0x8] sm:$0xff]  ;;  %8600 = vmatmul.mubr.msk.bf16.gmra.mxu0 %vm280_vm1, %v3385_v16  ;;  %v1743_v13 = vpop.f32.mrf.mxu1 }
 0x17f   : > { %1530 = vst.msk [vmem:[#allocation4 + $0x28] sm:$0xff] %vm280_vm1, %v1498_v9  ;;  %1886 = vst.msk [vmem:[#allocation4 + $0x18] sm:$0xff] %vm280_vm1, %v1854_v12  ;;  %v1503_v17 = vadd.f32 %v8397_v7, %v1257_v20  ;;  %v1852_v6 = vadd.f32 %v1727_v10, %v1606_v3  ;;  %8603 = vmatprep.mubr.msk.bf16.mxu0 %vm280_vm1, %v3386_v54  ;;  %v3366_v10 = vld [vmem:[#allocation2 + $0x169] sm:$0xff] }
 0x180   : > { %v1398_v24 = vpop.f32.mrf.mxu0  ;;  %v1611_v26 = vld [vmem:[#allocation4 + $0x30] sm:$0xff]  ;;  %v8431_v28 = vpop.f32.mrf.mxu1  ;;  %v3389_v60 = vpack.c.bf16 %v3367_v63, %v3366_v10 }
 0x181   : > { %1535 = vst.msk [vmem:[#allocation4 + $0x50] sm:$0xff] %vm280_vm1, %v1503_v17  ;;  %1884 = vst.msk [vmem:[#allocation4 + $0x8] sm:$0xff] %vm280_vm1, %v1852_v6  ;;  %v1501_v34 = vadd.f32 %v1398_v24, %v1255_v22  ;;  %v1857_v38 = vadd.f32 %v8427_v25, %v1611_v26  ;;  %v3371_v17 = vld [vmem:[#allocation2 + $0x1b1] sm:$0xff]  ;;  %v3372_v6 = vld [vmem:[#allocation2 + $0x1c9] sm:$0xff] }
 0x182   : > { %v8398_v35 = vpop.f32.mrf.mxu0  ;;  %v1609_v40 = vld [vmem:[#allocation4 + $0x20] sm:$0xff]  ;;  %v1756_v41 = vpop.f32.mrf.mxu1  ;;  %v3373_v24 = vld [vmem:[#allocation2 + $0x1d1] sm:$0xff]  ;;  %v3376_v63 = vld [vmem:[#allocation2 + $0x209] sm:$0xff] }
 0x183   : > { %1533 = vst.msk [vmem:[#allocation4 + $0x40] sm:$0xff] %vm280_vm1, %v1501_v34  ;;  %1889 = vst.msk [vmem:[#allocation4 + $0x30] sm:$0xff] %vm280_vm1, %v1857_v38  ;;  %v1504_v8 = vadd.f32 %v8398_v35, %v1258_v39  ;;  %v1855_v42 = vadd.f32 %v1740_v31, %v1609_v40  ;;  %v3390_v31 = vpack.c.bf16 %v3369_v43, %v3368_v14  ;;  %v1266_v34 = vld [vmem:[#allocation4 + $0x98] sm:$0xff]  ;;  %v1267_v14 = vld [vmem:[#allocation4 + $0xa0] sm:$0xff] }
 0x184   : > { %v1401_v51 = vpop.f32.mrf.mxu0  ;;  %v1612_v47 = vld [vmem:[#allocation4 + $0x38] sm:$0xff]  ;;  %v8432_v52 = vpop.f32.mrf.mxu1 }
 0x185   : > { %1536 = vst.msk [vmem:[#allocation4 + $0x58] sm:$0xff] %vm280_vm1, %v1504_v8  ;;  %1887 = vst.msk [vmem:[#allocation4 + $0x20] sm:$0xff] %vm280_vm1, %v1855_v42  ;;  %v1502_v32 = vadd.f32 %v1401_v51, %v1256_v50  ;;  %v1858_v56 = vadd.f32 %v8428_v18, %v1612_v47  ;;  %v1265_v18 = vld [vmem:[#allocation4 + $0x90] sm:$0xff]  ;;  %v3392_v42 = vpack.c.bf16 %v3373_v24, %v3372_v6  ;;  %v1274_v24 = vld [vmem:[#allocation4 + $0xd8] sm:$0xff] }
 0x186   : > { %v8401_v57 = vpop.f32.mrf.mxu0  ;;  %v1610_v62 = vld [vmem:[#allocation4 + $0x28] sm:$0xff]  ;;  %8604 = vmatmul.mubr.msk.bf16.gmra.mxu0 %vm280_vm1, %v3387_v44  ;;  %v1759_v59 = vpop.f32.mrf.mxu1  ;;  %v4115_v44 = vsel %vm612_vm0, %v4065_v29, 0  ;;  %v3375_v10 = vld [vmem:[#allocation2 + $0x1f1] sm:$0xff] }
 0x187   : > { %1534 = vst.msk [vmem:[#allocation4 + $0x48] sm:$0xff] %vm280_vm1, %v1502_v32  ;;  %1890 = vst.msk [vmem:[#allocation4 + $0x38] sm:$0xff] %vm280_vm1, %v1858_v56  ;;  %v1507_v0 = vadd.f32 %v8401_v57, %v1261_v53  ;;  %v1856_v48 = vadd.f32 %v1743_v13, %v1610_v62  ;;  %8607 = vmatprep.mubr.msk.bf16.mxu0 %vm280_vm1, %v3388_v45  ;;  %v3370_v13 = vld [vmem:[#allocation2 + $0x1a9] sm:$0xff]  ;;  %8624 = vmatpush3.bf16.msra.mxu1 %v4115_v44 }
 0x188   : > { %v1414_v4 = vpop.f32.mrf.mxu0  ;;  %v1615_v27 = vld [vmem:[#allocation4 + $0x50] sm:$0xff]  ;;  %v8435_v30 = vpop.f32.mrf.mxu1  ;;  %v3391_v35 = vpack.c.bf16 %v3371_v17, %v3370_v13  ;;  %v1264_v45 = vld [vmem:[#allocation4 + $0x88] sm:$0xff]  ;;  %v1271_v17 = vld [vmem:[#allocation4 + $0xc0] sm:$0xff] }
 0x189   : > { %1539 = vst.msk [vmem:[#allocation4 + $0x70] sm:$0xff] %vm280_vm1, %v1507_v0  ;;  %1888 = vst.msk [vmem:[#allocation4 + $0x28] sm:$0xff] %vm280_vm1, %v1856_v48  ;;  %v1505_v11 = vadd.f32 %v1414_v4, %v1259_v1  ;;  %v1861_v25 = vadd.f32 %v8431_v28, %v1615_v27  ;;  %v1269_v56 = vld [vmem:[#allocation4 + $0xb0] sm:$0xff] }
 0x18a   : > { %v8402_v37 = vpop.f32.mrf.mxu0  ;;  %v1613_v49 = vld [vmem:[#allocation4 + $0x40] sm:$0xff]  ;;  %v1772_v61 = vpop.f32.mrf.mxu1  ;;  %v3374_v48 = vld [vmem:[#allocation2 + $0x1e9] sm:$0xff]  ;;  %v3379_v13 = vld [vmem:[#allocation2 + $0x231] sm:$0xff] }
 0x18b   : > { %1537 = vst.msk [vmem:[#allocation4 + $0x60] sm:$0xff] %vm280_vm1, %v1505_v11  ;;  %1893 = vst.msk [vmem:[#allocation4 + $0x50] sm:$0xff] %vm280_vm1, %v1861_v25  ;;  %v1508_v15 = vadd.f32 %v8402_v37, %v1262_v36  ;;  %v1859_v16 = vadd.f32 %v1756_v41, %v1613_v49  ;;  %v1270_v25 = vld [vmem:[#allocation4 + $0xb8] sm:$0xff]  ;;  %v3393_v49 = vpack.c.bf16 %v3375_v10, %v3374_v48 }
 0x18c   : > { %v1417_v46 = vpop.f32.mrf.mxu0  ;;  %v1616_v54 = vld [vmem:[#allocation4 + $0x58] sm:$0xff]  ;;  %v8436_v5 = vpop.f32.mrf.mxu1 }
 0x18d   : > { %1540 = vst.msk [vmem:[#allocation4 + $0x78] sm:$0xff] %vm280_vm1, %v1508_v15  ;;  %1891 = vst.msk [vmem:[#allocation4 + $0x40] sm:$0xff] %vm280_vm1, %v1859_v16  ;;  %v1506_v55 = vadd.f32 %v1417_v46, %v1260_v33  ;;  %v1862_v58 = vadd.f32 %v8432_v52, %v1616_v54  ;;  %v1278_v48 = vld [vmem:[#allocation4 + $0xf8] sm:$0xff] }
 0x18e   : > { %v8405_v9 = vpop.f32.mrf.mxu0  ;;  %v1614_v12 = vld [vmem:[#allocation4 + $0x48] sm:$0xff]  ;;  %8608 = vmatmul.mubr.msk.bf16.gmra.mxu0 %vm280_vm1, %v3389_v60  ;;  %v1775_v20 = vpop.f32.mrf.mxu1 }
 0x18f   : > { %1538 = vst.msk [vmem:[#allocation4 + $0x68] sm:$0xff] %vm280_vm1, %v1506_v55  ;;  %1894 = vst.msk [vmem:[#allocation4 + $0x58] sm:$0xff] %vm280_vm1, %v1862_v58  ;;  %v1511_v7 = vadd.f32 %v8405_v9, %v1265_v18  ;;  %v1860_v3 = vadd.f32 %v1759_v59, %v1614_v12  ;;  %8611 = vmatprep.mubr.msk.bf16.mxu0 %vm280_vm1, %v3390_v31  ;;  %v1268_v31 = vld [vmem:[#allocation4 + $0xa8] sm:$0xff]  ;;  %v1273_v58 = vld [vmem:[#allocation4 + $0xd0] sm:$0xff] }
 0x190   : > { %v1430_v19 = vpop.f32.mrf.mxu0  ;;  %v1619_v21 = vld [vmem:[#allocation4 + $0x70] sm:$0xff]  ;;  %v8439_v22 = vpop.f32.mrf.mxu1 }
 0x191   : > { %1543 = vst.msk [vmem:[#allocation4 + $0x90] sm:$0xff] %vm280_vm1, %v1511_v7  ;;  %1892 = vst.msk [vmem:[#allocation4 + $0x48] sm:$0xff] %vm280_vm1, %v1860_v3  ;;  %v1509_v26 = vadd.f32 %v1430_v19, %v1263_v23  ;;  %v1865_v28 = vadd.f32 %v8435_v30, %v1619_v21  ;;  %v3377_v30 = vld [vmem:[#allocation2 + $0x211] sm:$0xff]  ;;  %v3378_v3 = vld [vmem:[#allocation2 + $0x229] sm:$0xff] }
 0x192   : > { %v8406_v38 = vpop.f32.mrf.mxu0  ;;  %v1617_v39 = vld [vmem:[#allocation4 + $0x60] sm:$0xff]  ;;  %v1788_v40 = vpop.f32.mrf.mxu1  ;;  %v3394_v16 = vpack.c.bf16 %v3377_v30, %v3376_v63  ;;  %v3395_v29 = vpack.c.bf16 %v3379_v13, %v3378_v3  ;;  %v1964_v13 = vld [vmem:[#allocation4 + $0x8] sm:$0xff] }
 0x193   : > { %1541 = vst.msk [vmem:[#allocation4 + $0x80] sm:$0xff] %vm280_vm1, %v1509_v26  ;;  %1897 = vst.msk [vmem:[#allocation4 + $0x70] sm:$0xff] %vm280_vm1, %v1865_v28  ;;  %v1512_v41 = vadd.f32 %v8406_v38, %v1266_v34  ;;  %v1863_v8 = vadd.f32 %v1772_v61, %v1617_v39 }
 0x194   : > { %v1433_v50 = vpop.f32.mrf.mxu0  ;;  %v1620_v51 = vld [vmem:[#allocation4 + $0x78] sm:$0xff]  ;;  %v8440_v47 = vpop.f32.mrf.mxu1 }
 0x195   : > { %1544 = vst.msk [vmem:[#allocation4 + $0x98] sm:$0xff] %vm280_vm1, %v1512_v41  ;;  %1895 = vst.msk [vmem:[#allocation4 + $0x60] sm:$0xff] %vm280_vm1, %v1863_v8  ;;  %v1510_v52 = vadd.f32 %v1433_v50, %v1264_v45  ;;  %v1866_v32 = vadd.f32 %v8436_v5, %v1620_v51  ;;  %v1277_v45 = vld [vmem:[#allocation4 + $0xf0] sm:$0xff] }
 0x196   : > { %v8409_v53 = vpop.f32.mrf.mxu0  ;;  %v1618_v57 = vld [vmem:[#allocation4 + $0x68] sm:$0xff]  ;;  %8612 = vmatmul.mubr.msk.bf16.gmra.mxu0 %vm280_vm1, %v3391_v35  ;;  %v1791_v62 = vpop.f32.mrf.mxu1 }
 0x197   : > { %1542 = vst.msk [vmem:[#allocation4 + $0x88] sm:$0xff] %vm280_vm1, %v1510_v52  ;;  %1898 = vst.msk [vmem:[#allocation4 + $0x78] sm:$0xff] %vm280_vm1, %v1866_v32  ;;  %v1515_v59 = vadd.f32 %v8409_v53, %v1269_v56  ;;  %v1864_v0 = vadd.f32 %v1775_v20, %v1618_v57  ;;  %8615 = vmatprep.mubr.msk.bf16.mxu0 %vm280_vm1, %v3392_v42  ;;  %v1272_v35 = vld [vmem:[#allocation4 + $0xc8] sm:$0xff]  ;;  %v1275_v56 = vld [vmem:[#allocation4 + $0xe0] sm:$0xff] }
 0x198   : > { %v1446_v1 = vpop.f32.mrf.mxu0  ;;  %v1623_v4 = vld [vmem:[#allocation4 + $0x90] sm:$0xff]  ;;  %v8443_v27 = vpop.f32.mrf.mxu1 }
 0x199   : > { %1547 = vst.msk [vmem:[#allocation4 + $0xb0] sm:$0xff] %vm280_vm1, %v1515_v59  ;;  %1896 = vst.msk [vmem:[#allocation4 + $0x68] sm:$0xff] %vm280_vm1, %v1864_v0  ;;  %v1513_v43 = vadd.f32 %v1446_v1, %v1267_v14  ;;  %v1869_v11 = vadd.f32 %v8439_v22, %v1623_v4 }
 0x19a   : > { %v8410_v36 = vpop.f32.mrf.mxu0  ;;  %v1621_v37 = vld [vmem:[#allocation4 + $0x80] sm:$0xff]  ;;  %v1804_v60 = vpop.f32.mrf.mxu1 }
 0x19b   : > { %1545 = vst.msk [vmem:[#allocation4 + $0xa0] sm:$0xff] %vm280_vm1, %v1513_v43  ;;  %1901 = vst.msk [vmem:[#allocation4 + $0x90] sm:$0xff] %vm280_vm1, %v1869_v11  ;;  %v1516_v61 = vadd.f32 %v8410_v36, %v1270_v25  ;;  %v1867_v15 = vadd.f32 %v1788_v40, %v1621_v37 }
 0x19c   : > { %v1449_v33 = vpop.f32.mrf.mxu0  ;;  %v1624_v46 = vld [vmem:[#allocation4 + $0x98] sm:$0xff]  ;;  %v8444_v54 = vpop.f32.mrf.mxu1 }
 0x19d   : > { %1548 = vst.msk [vmem:[#allocation4 + $0xb8] sm:$0xff] %vm280_vm1, %v1516_v61  ;;  %1899 = vst.msk [vmem:[#allocation4 + $0x80] sm:$0xff] %vm280_vm1, %v1867_v15  ;;  %v1514_v5 = vadd.f32 %v1449_v33, %v1268_v31  ;;  %v1870_v55 = vadd.f32 %v8440_v47, %v1624_v46  ;;  %v1963_v33 = vld [vmem:[#allocation4] sm:$0xff] }
 0x19e   : > { %v8413_v18 = vpop.f32.mrf.mxu0  ;;  %v1622_v9 = vld [vmem:[#allocation4 + $0x88] sm:$0xff]  ;;  %8616 = vmatmul.mubr.msk.bf16.gmra.mxu0 %vm280_vm1, %v3393_v49  ;;  %v1807_v12 = vpop.f32.mrf.mxu1  ;;  %v1965_v49 = vld [vmem:[#allocation4 + $0x10] sm:$0xff] }
 0x19f   : > { %1546 = vst.msk [vmem:[#allocation4 + $0xa8] sm:$0xff] %vm280_vm1, %v1514_v5  ;;  %1902 = vst.msk [vmem:[#allocation4 + $0x98] sm:$0xff] %vm280_vm1, %v1870_v55  ;;  %v1519_v20 = vadd.f32 %v8413_v18, %v1273_v58  ;;  %v1868_v7 = vadd.f32 %v1791_v62, %v1622_v9  ;;  %8619 = vmatprep.mubr.msk.bf16.mxu0 %vm280_vm1, %v3394_v16  ;;  %v1966_v18 = vld [vmem:[#allocation4 + $0x18] sm:$0xff] }
 0x1a0   : > { %v1462_v6 = vpop.f32.mrf.mxu0  ;;  %v1627_v23 = vld [vmem:[#allocation4 + $0xb0] sm:$0xff]  ;;  %v8447_v19 = vpop.f32.mrf.mxu1 }
 0x1a1   : > { %1551 = vst.msk [vmem:[#allocation4 + $0xd0] sm:$0xff] %vm280_vm1, %v1519_v20  ;;  %1900 = vst.msk [vmem:[#allocation4 + $0x88] sm:$0xff] %vm280_vm1, %v1868_v7  ;;  %v1517_v21 = vadd.f32 %v1462_v6, %v1271_v17  ;;  %v1873_v22 = vadd.f32 %v8443_v27, %v1627_v23  ;;  %v1276_v27 = vld [vmem:[#allocation4 + $0xe8] sm:$0xff] }
 0x1a2   : > { %v8414_v26 = vpop.f32.mrf.mxu0  ;;  %v1625_v28 = vld [vmem:[#allocation4 + $0xa0] sm:$0xff]  ;;  %v1820_v34 = vpop.f32.mrf.mxu1 }
 0x1a3   : > { %1549 = vst.msk [vmem:[#allocation4 + $0xc0] sm:$0xff] %vm280_vm1, %v1517_v21  ;;  %1905 = vst.msk [vmem:[#allocation4 + $0xb0] sm:$0xff] %vm280_vm1, %v1873_v22  ;;  %v1520_v38 = vadd.f32 %v8414_v26, %v1274_v24  ;;  %v1871_v39 = vadd.f32 %v1804_v60, %v1625_v28  ;;  %v1969_v22 = vld [vmem:[#allocation4 + $0x30] sm:$0xff] }
 0x1a4   : > { %v1465_v40 = vpop.f32.mrf.mxu0  ;;  %v1628_v44 = vld [vmem:[#allocation4 + $0xb8] sm:$0xff]  ;;  %v8448_v41 = vpop.f32.mrf.mxu1 }
 0x1a5   : > { %1552 = vst.msk [vmem:[#allocation4 + $0xd8] sm:$0xff] %vm280_vm1, %v1520_v38  ;;  %1903 = vst.msk [vmem:[#allocation4 + $0xa0] sm:$0xff] %vm280_vm1, %v1871_v39  ;;  %v1518_v8 = vadd.f32 %v1465_v40, %v1272_v35  ;;  %v1874_v42 = vadd.f32 %v8444_v54, %v1628_v44 }
 0x1a6   : > { %v8417_v50 = vpop.f32.mrf.mxu0  ;;  %v1626_v51 = vld [vmem:[#allocation4 + $0xa8] sm:$0xff]  ;;  %8620 = vmatmul.mubr.msk.bf16.gmra.mxu0 %vm280_vm1, %v3395_v29  ;;  %v1823_v47 = vpop.f32.mrf.mxu1 }
 0x1a7   : > { %1550 = vst.msk [vmem:[#allocation4 + $0xc8] sm:$0xff] %vm280_vm1, %v1518_v8  ;;  %1906 = vst.msk [vmem:[#allocation4 + $0xb8] sm:$0xff] %vm280_vm1, %v1874_v42  ;;  %v1523_v52 = vadd.f32 %v8417_v50, %v1277_v45  ;;  %v1872_v32 = vadd.f32 %v1807_v12, %v1626_v51 }
 0x1a8   : > { %v1478_v53 = vpop.f32.mrf.mxu0  ;;  %v1631_v57 = vld [vmem:[#allocation4 + $0xd0] sm:$0xff]  ;;  %v8451_v62 = vpop.f32.mrf.mxu1 }
 0x1a9   : > { %1555 = vst.msk [vmem:[#allocation4 + $0xf0] sm:$0xff] %vm280_vm1, %v1523_v52  ;;  %1904 = vst.msk [vmem:[#allocation4 + $0xa8] sm:$0xff] %vm280_vm1, %v1872_v32  ;;  %v1521_v59 = vadd.f32 %v1478_v53, %v1275_v56  ;;  %v1877_v0 = vadd.f32 %v8447_v19, %v1631_v57 }
 0x1aa   : > { %v8418_v10 = vpop.f32.mrf.mxu0  ;;  %v1629_v63 = vld [vmem:[#allocation4 + $0xc0] sm:$0xff]  ;;  %v1836_v14 = vpop.f32.mrf.mxu1 }
 0x1ab   : > { %1553 = vst.msk [vmem:[#allocation4 + $0xe0] sm:$0xff] %vm280_vm1, %v1521_v59  ;;  %1909 = vst.msk [vmem:[#allocation4 + $0xd0] sm:$0xff] %vm280_vm1, %v1877_v0  ;;  %v1524_v1 = vadd.f32 %v8418_v10, %v1278_v48  ;;  %v1875_v4 = vadd.f32 %v1820_v34, %v1629_v63  ;;  %v1967_v34 = vld [vmem:[#allocation4 + $0x20] sm:$0xff] }
 0x1ac   : > { %v1481_v30 = vpop.f32.mrf.mxu0  ;;  %v1632_v43 = vld [vmem:[#allocation4 + $0xd8] sm:$0xff]  ;;  %v8452_v11 = vpop.f32.mrf.mxu1 }
 0x1ad   : > { %1556 = vst.msk [vmem:[#allocation4 + $0xf8] sm:$0xff] %vm280_vm1, %v1524_v1  ;;  %1907 = vst.msk [vmem:[#allocation4 + $0xc0] sm:$0xff] %vm280_vm1, %v1875_v4  ;;  %v1522_v25 = vadd.f32 %v1481_v30, %v1276_v27  ;;  %v1878_v36 = vadd.f32 %v8448_v41, %v1632_v43  ;;  %v1970_v41 = vld [vmem:[#allocation4 + $0x38] sm:$0xff] }
 0x1ae   : > { %v1630_v37 = vld [vmem:[#allocation4 + $0xc8] sm:$0xff]  ;;  %v8457_v60 = vpop.f32.mrf.mxu0  ;;  %v1839_v61 = vpop.f32.mrf.mxu1 }
 0x1af   : > { %1554 = vst.msk [vmem:[#allocation4 + $0xe8] sm:$0xff] %vm280_vm1, %v1522_v25  ;;  %1910 = vst.msk [vmem:[#allocation4 + $0xd8] sm:$0xff] %vm280_vm1, %v1878_v36  ;;  %v1876_v15 = vadd.f32 %v1823_v47, %v1630_v37  ;;  %v2211_v16 = vadd.f32 %v8457_v60, %v1965_v49  ;;  %v1968_v47 = vld [vmem:[#allocation4 + $0x28] sm:$0xff] }
 0x1b0   : > { %v1635_v31 = vld [vmem:[#allocation4 + $0xf0] sm:$0xff]  ;;  %v2082_v46 = vpop.f32.mrf.mxu0  ;;  %v8491_v54 = vpop.f32.mrf.mxu1 }
 0x1b1   : > { %1908 = vst.msk [vmem:[#allocation4 + $0xc8] sm:$0xff] %vm280_vm1, %v1876_v15  ;;  %2243 = vst.msk [vmem:[#allocation4 + $0x10] sm:$0xff] %vm280_vm1, %v2211_v16  ;;  %v1881_v5 = vadd.f32 %v8451_v62, %v1635_v31  ;;  %v2209_v55 = vadd.f32 %v2082_v46, %v1963_v33  ;;  %v1973_v62 = vld [vmem:[#allocation4 + $0x50] sm:$0xff] }
 0x1b2   : > { %v1633_v58 = vld [vmem:[#allocation4 + $0xe0] sm:$0xff]  ;;  %v8458_v9 = vpop.f32.mrf.mxu0  ;;  %v2440_v12 = vpop.f32.mrf.mxu1 }
 0x1b3   : > { %1913 = vst.msk [vmem:[#allocation4 + $0xf0] sm:$0xff] %vm280_vm1, %v1881_v5  ;;  %2241 = vst.msk [vmem:[#allocation4] sm:$0xff] %vm280_vm1, %v2209_v55  ;;  %v1879_v20 = vadd.f32 %v1836_v14, %v1633_v58  ;;  %v2212_v7 = vadd.f32 %v8458_v9, %v1966_v18  ;;  %v1971_v14 = vld [vmem:[#allocation4 + $0x40] sm:$0xff] }
 0x1b4   : > { %v1636_v3 = vld [vmem:[#allocation4 + $0xf8] sm:$0xff]  ;;  %v2085_v17 = vpop.f32.mrf.mxu0  ;;  %v8492_v6 = vpop.f32.mrf.mxu1 }
 0x1b5   : > { %1911 = vst.msk [vmem:[#allocation4 + $0xe0] sm:$0xff] %vm280_vm1, %v1879_v20  ;;  %2244 = vst.msk [vmem:[#allocation4 + $0x18] sm:$0xff] %vm280_vm1, %v2212_v7  ;;  %v1882_v23 = vadd.f32 %v8452_v11, %v1636_v3  ;;  %v2210_v19 = vadd.f32 %v2085_v17, %v1964_v13  ;;  %v1974_v11 = vld [vmem:[#allocation4 + $0x58] sm:$0xff] }
 0x1b6   : > { %v1634_v21 = vld [vmem:[#allocation4 + $0xe8] sm:$0xff]  ;;  %v8461_v24 = vpop.f32.mrf.mxu0  ;;  %v2443_v26 = vpop.f32.mrf.mxu1 }
 0x1b7   : > { %1914 = vst.msk [vmem:[#allocation4 + $0xf8] sm:$0xff] %vm280_vm1, %v1882_v23  ;;  %2242 = vst.msk [vmem:[#allocation4 + $0x8] sm:$0xff] %vm280_vm1, %v2210_v19  ;;  %v1880_v28 = vadd.f32 %v1839_v61, %v1634_v21  ;;  %v2215_v29 = vadd.f32 %v8461_v24, %v1969_v22  ;;  %v1972_v61 = vld [vmem:[#allocation4 + $0x48] sm:$0xff]  ;;  %v7711_v22 = vld [vmem:[%s11158_s4 + $0x4] sm:$0xf] }
 0x1b8   : > { %v2098_v38 = vpop.f32.mrf.mxu0  ;;  %v2323_v39 = vld [vmem:[#allocation4 + $0x10] sm:$0xff]  ;;  %v8495_v35 = vpop.f32.mrf.mxu1  ;;  %8939 = vmatprep.subr.msk.bf16.mxu0 %vm612_vm0, %v7711_v22 }
 0x1b9   : > { %1912 = vst.msk [vmem:[#allocation4 + $0xe8] sm:$0xff] %vm280_vm1, %v1880_v28  ;;  %2247 = vst.msk [vmem:[#allocation4 + $0x30] sm:$0xff] %vm280_vm1, %v2215_v29  ;;  %v2213_v40 = vadd.f32 %v2098_v38, %v1967_v34  ;;  %v2569_v44 = vadd.f32 %v8491_v54, %v2323_v39  ;;  %v1977_v54 = vld [vmem:[#allocation4 + $0x70] sm:$0xff]  ;;  %v4473_v28 = vsel %vm612_vm0, %v7711_v22, 0  ;;  %v3985_v29 = vld [vmem:[#allocation3 + $0x7] sm:$0xff] }
 0x1ba   : > { %v8462_v8 = vpop.f32.mrf.mxu0  ;;  %v2321_v42 = vld [vmem:[#allocation4] sm:$0xff]  ;;  %v2456_v45 = vpop.f32.mrf.mxu1  ;;  %v3986_v34 = vld [vmem:[#allocation3 + $0xf] sm:$0xff]  ;;  %8658 = vmatpush3.bf16.msra.mxu0 %v4473_v28 }
 0x1bb   : > { %2245 = vst.msk [vmem:[#allocation4 + $0x20] sm:$0xff] %vm280_vm1, %v2213_v40  ;;  %2601 = vst.msk [vmem:[#allocation4 + $0x10] sm:$0xff] %vm280_vm1, %v2569_v44  ;;  %v2216_v50 = vadd.f32 %v8462_v8, %v1970_v41  ;;  %v2567_v51 = vadd.f32 %v2440_v12, %v2321_v42  ;;  %v1975_v12 = vld [vmem:[#allocation4 + $0x60] sm:$0xff]  ;;  %v4342_v38 = vld [vmem:[#allocation3 + $0x8] sm:$0xff]  ;;  %v4017_v41 = vpack.c.bf16 %v3986_v34, %v3985_v29 }
 0x1bc   : > { %v2101_v52 = vpop.f32.mrf.mxu0  ;;  %v2324_v32 = vld [vmem:[#allocation4 + $0x18] sm:$0xff]  ;;  %v8496_v56 = vpop.f32.mrf.mxu1  ;;  %v1976_v39 = vld [vmem:[#allocation4 + $0x68] sm:$0xff]  ;;  %v4343_v8 = vld [vmem:[#allocation3 + $0x10] sm:$0xff] }
 0x1bd   : > { %2248 = vst.msk [vmem:[#allocation4 + $0x38] sm:$0xff] %vm280_vm1, %v2216_v50  ;;  %2599 = vst.msk [vmem:[#allocation4] sm:$0xff] %vm280_vm1, %v2567_v51  ;;  %v2214_v53 = vadd.f32 %v2101_v52, %v1968_v47  ;;  %v2570_v57 = vadd.f32 %v8492_v6, %v2324_v32  ;;  %v1978_v6 = vld [vmem:[#allocation4 + $0x78] sm:$0xff]  ;;  %v4374_v50 = vpack.c.bf16 %v4343_v8, %v4342_v38  ;;  %v1981_v51 = vld [vmem:[#allocation4 + $0x90] sm:$0xff]  ;;  %8625 = vmatprep.mubr.msk.bf16.mxu1 %vm280_vm1, %v4017_v41 }
 0x1be   : > { %v8465_v59 = vpop.f32.mrf.mxu0  ;;  %v2322_v0 = vld [vmem:[#allocation4 + $0x8] sm:$0xff]  ;;  %v2459_v48 = vpop.f32.mrf.mxu1 }
 0x1bf   : > { %2246 = vst.msk [vmem:[#allocation4 + $0x28] sm:$0xff] %vm280_vm1, %v2214_v53  ;;  %2602 = vst.msk [vmem:[#allocation4 + $0x18] sm:$0xff] %vm280_vm1, %v2570_v57  ;;  %v2219_v10 = vadd.f32 %v8465_v59, %v1973_v62  ;;  %v2568_v63 = vadd.f32 %v2443_v26, %v2322_v0  ;;  %8659 = vmatprep.mubr.msk.bf16.mxu0 %vm280_vm1, %v4374_v50  ;;  %v1979_v57 = vld [vmem:[#allocation4 + $0x80] sm:$0xff] }
 0x1c0   : > { %v2114_v1 = vpop.f32.mrf.mxu0  ;;  %v2327_v4 = vld [vmem:[#allocation4 + $0x30] sm:$0xff]  ;;  %v8499_v27 = vpop.f32.mrf.mxu1 }
 0x1c1   : > { %2251 = vst.msk [vmem:[#allocation4 + $0x50] sm:$0xff] %vm280_vm1, %v2219_v10  ;;  %2600 = vst.msk [vmem:[#allocation4 + $0x8] sm:$0xff] %vm280_vm1, %v2568_v63  ;;  %v2217_v30 = vadd.f32 %v2114_v1, %v1971_v14  ;;  %v2573_v43 = vadd.f32 %v8495_v35, %v2327_v4  ;;  %v1982_v63 = vld [vmem:[#allocation4 + $0x98] sm:$0xff] }
 0x1c2   : > { %v8466_v25 = vpop.f32.mrf.mxu0  ;;  %v2325_v36 = vld [vmem:[#allocation4 + $0x20] sm:$0xff]  ;;  %v2472_v37 = vpop.f32.mrf.mxu1 }
 0x1c3   : > { %2249 = vst.msk [vmem:[#allocation4 + $0x40] sm:$0xff] %vm280_vm1, %v2217_v30  ;;  %2605 = vst.msk [vmem:[#allocation4 + $0x30] sm:$0xff] %vm280_vm1, %v2573_v43  ;;  %v2220_v49 = vadd.f32 %v8466_v25, %v1974_v11  ;;  %v2571_v60 = vadd.f32 %v2456_v45, %v2325_v36  ;;  %v1980_v43 = vld [vmem:[#allocation4 + $0x88] sm:$0xff] }
 0x1c4   : > { %v2117_v15 = vpop.f32.mrf.mxu0  ;;  %v2328_v16 = vld [vmem:[#allocation4 + $0x38] sm:$0xff]  ;;  %v8500_v31 = vpop.f32.mrf.mxu1 }
 0x1c5   : > { %2252 = vst.msk [vmem:[#allocation4 + $0x58] sm:$0xff] %vm280_vm1, %v2220_v49  ;;  %2603 = vst.msk [vmem:[#allocation4 + $0x20] sm:$0xff] %vm280_vm1, %v2571_v60  ;;  %v2218_v33 = vadd.f32 %v2117_v15, %v1972_v61  ;;  %v2574_v46 = vadd.f32 %v8496_v56, %v2328_v16  ;;  %v1985_v60 = vld [vmem:[#allocation4 + $0xb0] sm:$0xff] }
 0x1c6   : > { %v8469_v5 = vpop.f32.mrf.mxu0  ;;  %v2326_v55 = vld [vmem:[#allocation4 + $0x28] sm:$0xff]  ;;  %v2475_v58 = vpop.f32.mrf.mxu1 }
 0x1c7   : > { %2250 = vst.msk [vmem:[#allocation4 + $0x48] sm:$0xff] %vm280_vm1, %v2218_v33  ;;  %2606 = vst.msk [vmem:[#allocation4 + $0x38] sm:$0xff] %vm280_vm1, %v2574_v46  ;;  %v2223_v18 = vadd.f32 %v8469_v5, %v1977_v54  ;;  %v2572_v9 = vadd.f32 %v2459_v48, %v2326_v55  ;;  %v1983_v46 = vld [vmem:[#allocation4 + $0xa0] sm:$0xff] }
 0x1c8   : > { %v2130_v20 = vpop.f32.mrf.mxu0  ;;  %v2331_v7 = vld [vmem:[#allocation4 + $0x50] sm:$0xff]  ;;  %v8503_v3 = vpop.f32.mrf.mxu1 }
 0x1c9   : > { %2255 = vst.msk [vmem:[#allocation4 + $0x70] sm:$0xff] %vm280_vm1, %v2223_v18  ;;  %2604 = vst.msk [vmem:[#allocation4 + $0x28] sm:$0xff] %vm280_vm1, %v2572_v9  ;;  %v2221_v13 = vadd.f32 %v2130_v20, %v1975_v12  ;;  %v2577_v17 = vadd.f32 %v8499_v27, %v2331_v7  ;;  %v1986_v9 = vld [vmem:[#allocation4 + $0xb8] sm:$0xff] }
 0x1ca   : > { %v8470_v23 = vpop.f32.mrf.mxu0  ;;  %v2329_v19 = vld [vmem:[#allocation4 + $0x40] sm:$0xff]  ;;  %v2488_v21 = vpop.f32.mrf.mxu1 }
 0x1cb   : > { %2253 = vst.msk [vmem:[#allocation4 + $0x60] sm:$0xff] %vm280_vm1, %v2221_v13  ;;  %2609 = vst.msk [vmem:[#allocation4 + $0x50] sm:$0xff] %vm280_vm1, %v2577_v17  ;;  %v2224_v24 = vadd.f32 %v8470_v23, %v1978_v6  ;;  %v2575_v26 = vadd.f32 %v2472_v37, %v2329_v19  ;;  %v1984_v17 = vld [vmem:[#allocation4 + $0xa8] sm:$0xff] }
 0x1cc   : > { %v2133_v35 = vpop.f32.mrf.mxu0  ;;  %v2332_v40 = vld [vmem:[#allocation4 + $0x58] sm:$0xff]  ;;  %v8504_v44 = vpop.f32.mrf.mxu1 }
 0x1cd   : > { %2256 = vst.msk [vmem:[#allocation4 + $0x78] sm:$0xff] %vm280_vm1, %v2224_v24  ;;  %2607 = vst.msk [vmem:[#allocation4 + $0x40] sm:$0xff] %vm280_vm1, %v2575_v26  ;;  %v2222_v42 = vadd.f32 %v2133_v35, %v1976_v39  ;;  %v2578_v45 = vadd.f32 %v8500_v31, %v2332_v40  ;;  %v1989_v24 = vld [vmem:[#allocation4 + $0xd0] sm:$0xff]  ;;  %v9999_v39 = vld [vmem:[%s11158_s4 + $0x8] sm:$0xf] }
 0x1ce   : > { %v8473_v47 = vpop.f32.mrf.mxu0  ;;  %v2330_v52 = vld [vmem:[#allocation4 + $0x48] sm:$0xff]  ;;  %v2491_v32 = vpop.f32.mrf.mxu1  ;;  %v1987_v35 = vld [vmem:[#allocation4 + $0xc0] sm:$0xff]  ;;  %8940 = vmatprep.subr.msk.bf16.mxu1 %vm612_vm0, %v9999_v39 }
 0x1cf   : > { %2254 = vst.msk [vmem:[#allocation4 + $0x68] sm:$0xff] %vm280_vm1, %v2222_v42  ;;  %2610 = vst.msk [vmem:[#allocation4 + $0x58] sm:$0xff] %vm280_vm1, %v2578_v45  ;;  %v2227_v56 = vadd.f32 %v8473_v47, %v1981_v51  ;;  %v2576_v53 = vadd.f32 %v2475_v58, %v2330_v52  ;;  %v1990_v45 = vld [vmem:[#allocation4 + $0xd8] sm:$0xff] }
 0x1d0   : > { %v2146_v62 = vpop.f32.mrf.mxu0  ;;  %v2335_v59 = vld [vmem:[#allocation4 + $0x70] sm:$0xff]  ;;  %v8507_v0 = vpop.f32.mrf.mxu1 }
 0x1d1   : > { %2259 = vst.msk [vmem:[#allocation4 + $0x90] sm:$0xff] %vm280_vm1, %v2227_v56  ;;  %2608 = vst.msk [vmem:[#allocation4 + $0x48] sm:$0xff] %vm280_vm1, %v2576_v53  ;;  %v2225_v48 = vadd.f32 %v2146_v62, %v1979_v57  ;;  %v2581_v10 = vadd.f32 %v8503_v3, %v2335_v59  ;;  %v1988_v56 = vld [vmem:[#allocation4 + $0xc8] sm:$0xff] }
 0x1d2   : > { %v8474_v14 = vpop.f32.mrf.mxu0  ;;  %v2333_v1 = vld [vmem:[#allocation4 + $0x60] sm:$0xff]  ;;  %v2504_v4 = vpop.f32.mrf.mxu1 }
 0x1d3   : > { %2257 = vst.msk [vmem:[#allocation4 + $0x80] sm:$0xff] %vm280_vm1, %v2225_v48  ;;  %2613 = vst.msk [vmem:[#allocation4 + $0x70] sm:$0xff] %vm280_vm1, %v2581_v10  ;;  %v2228_v27 = vadd.f32 %v8474_v14, %v1982_v63  ;;  %v2579_v30 = vadd.f32 %v2488_v21, %v2333_v1  ;;  %v1993_v48 = vld [vmem:[#allocation4 + $0xf0] sm:$0xff] }
 0x1d4   : > { %v2149_v11 = vpop.f32.mrf.mxu0  ;;  %v2336_v25 = vld [vmem:[#allocation4 + $0x78] sm:$0xff]  ;;  %v8508_v36 = vpop.f32.mrf.mxu1 }
 0x1d5   : > { %2260 = vst.msk [vmem:[#allocation4 + $0x98] sm:$0xff] %vm280_vm1, %v2228_v27  ;;  %2611 = vst.msk [vmem:[#allocation4 + $0x60] sm:$0xff] %vm280_vm1, %v2579_v30  ;;  %v2226_v37 = vadd.f32 %v2149_v11, %v1980_v43  ;;  %v2582_v49 = vadd.f32 %v8504_v44, %v2336_v25  ;;  %v1991_v27 = vld [vmem:[#allocation4 + $0xe0] sm:$0xff] }
 0x1d6   : > { %v8477_v61 = vpop.f32.mrf.mxu0  ;;  %v2334_v15 = vld [vmem:[#allocation4 + $0x68] sm:$0xff]  ;;  %v2507_v16 = vpop.f32.mrf.mxu1 }
 0x1d7   : > { %2258 = vst.msk [vmem:[#allocation4 + $0x88] sm:$0xff] %vm280_vm1, %v2226_v37  ;;  %2614 = vst.msk [vmem:[#allocation4 + $0x78] sm:$0xff] %vm280_vm1, %v2582_v49  ;;  %v2231_v31 = vadd.f32 %v8477_v61, %v1985_v60  ;;  %v2580_v33 = vadd.f32 %v2491_v32, %v2334_v15  ;;  %v1994_v37 = vld [vmem:[#allocation4 + $0xf8] sm:$0xff] }
 0x1d8   : > { %v2162_v54 = vpop.f32.mrf.mxu0  ;;  %v2339_v5 = vld [vmem:[#allocation4 + $0x90] sm:$0xff]  ;;  %v8511_v55 = vpop.f32.mrf.mxu1 }
 0x1d9   : > { %2263 = vst.msk [vmem:[#allocation4 + $0xb0] sm:$0xff] %vm280_vm1, %v2231_v31  ;;  %2612 = vst.msk [vmem:[#allocation4 + $0x68] sm:$0xff] %vm280_vm1, %v2580_v33  ;;  %v2229_v58 = vadd.f32 %v2162_v54, %v1983_v46  ;;  %v2585_v18 = vadd.f32 %v8507_v0, %v2339_v5  ;;  %v1992_v31 = vld [vmem:[#allocation4 + $0xe8] sm:$0xff] }
 0x1da   : > { %v8478_v12 = vpop.f32.mrf.mxu0  ;;  %v2337_v20 = vld [vmem:[#allocation4 + $0x80] sm:$0xff]  ;;  %v2520_v7 = vpop.f32.mrf.mxu1 }
 0x1db   : > { %2261 = vst.msk [vmem:[#allocation4 + $0xa0] sm:$0xff] %vm280_vm1, %v2229_v58  ;;  %2617 = vst.msk [vmem:[#allocation4 + $0x90] sm:$0xff] %vm280_vm1, %v2585_v18  ;;  %v2232_v3 = vadd.f32 %v8478_v12, %v1986_v9  ;;  %v2583_v13 = vadd.f32 %v2504_v4, %v2337_v20  ;;  %v2682_v18 = vld [vmem:[#allocation4 + $0x10] sm:$0xff] }
 0x1dc   : > { %v2165_v6 = vpop.f32.mrf.mxu0  ;;  %v2340_v23 = vld [vmem:[#allocation4 + $0x98] sm:$0xff]  ;;  %v8512_v19 = vpop.f32.mrf.mxu1 }
 0x1dd   : > { %2264 = vst.msk [vmem:[#allocation4 + $0xb8] sm:$0xff] %vm280_vm1, %v2232_v3  ;;  %2615 = vst.msk [vmem:[#allocation4 + $0x80] sm:$0xff] %vm280_vm1, %v2583_v13  ;;  %v2230_v21 = vadd.f32 %v2165_v6, %v1984_v17  ;;  %v2586_v22 = vadd.f32 %v8508_v36, %v2340_v23  ;;  %v2680_v13 = vld [vmem:[#allocation4] sm:$0xff] }
 0x1de   : > { %v8481_v26 = vpop.f32.mrf.mxu0  ;;  %v2338_v28 = vld [vmem:[#allocation4 + $0x88] sm:$0xff]  ;;  %v2523_v29 = vpop.f32.mrf.mxu1 }
 0x1df   : > { %2262 = vst.msk [vmem:[#allocation4 + $0xa8] sm:$0xff] %vm280_vm1, %v2230_v21  ;;  %2618 = vst.msk [vmem:[#allocation4 + $0x98] sm:$0xff] %vm280_vm1, %v2586_v22  ;;  %v2235_v34 = vadd.f32 %v8481_v26, %v1989_v24  ;;  %v2584_v38 = vadd.f32 %v2507_v16, %v2338_v28  ;;  %v2683_v22 = vld [vmem:[#allocation4 + $0x18] sm:$0xff] }
 0x1e0   : > { %v2178_v40 = vpop.f32.mrf.mxu0  ;;  %v2343_v44 = vld [vmem:[#allocation4 + $0xb0] sm:$0xff]  ;;  %v8515_v41 = vpop.f32.mrf.mxu1 }
 0x1e1   : > { %2267 = vst.msk [vmem:[#allocation4 + $0xd0] sm:$0xff] %vm280_vm1, %v2235_v34  ;;  %2616 = vst.msk [vmem:[#allocation4 + $0x88] sm:$0xff] %vm280_vm1, %v2584_v38  ;;  %v2233_v8 = vadd.f32 %v2178_v40, %v1987_v35  ;;  %v2589_v42 = vadd.f32 %v8511_v55, %v2343_v44  ;;  %v2681_v38 = vld [vmem:[#allocation4 + $0x8] sm:$0xff] }
 0x1e2   : > { %v8482_v50 = vpop.f32.mrf.mxu0  ;;  %v2341_v51 = vld [vmem:[#allocation4 + $0xa0] sm:$0xff]  ;;  %v2536_v47 = vpop.f32.mrf.mxu1 }
 0x1e3   : > { %2265 = vst.msk [vmem:[#allocation4 + $0xc0] sm:$0xff] %vm280_vm1, %v2233_v8  ;;  %2621 = vst.msk [vmem:[#allocation4 + $0xb0] sm:$0xff] %vm280_vm1, %v2589_v42  ;;  %v2236_v52 = vadd.f32 %v8482_v50, %v1990_v45  ;;  %v2587_v32 = vadd.f32 %v2520_v7, %v2341_v51  ;;  %v2686_v42 = vld [vmem:[#allocation4 + $0x30] sm:$0xff] }
 0x1e4   : > { %v2181_v53 = vpop.f32.mrf.mxu0  ;;  %v2344_v57 = vld [vmem:[#allocation4 + $0xb8] sm:$0xff]  ;;  %v8516_v62 = vpop.f32.mrf.mxu1 }
 0x1e5   : > { %2268 = vst.msk [vmem:[#allocation4 + $0xd8] sm:$0xff] %vm280_vm1, %v2236_v52  ;;  %2619 = vst.msk [vmem:[#allocation4 + $0xa0] sm:$0xff] %vm280_vm1, %v2587_v32  ;;  %v2234_v59 = vadd.f32 %v2181_v53, %v1988_v56  ;;  %v2590_v0 = vadd.f32 %v8512_v19, %v2344_v57  ;;  %v2684_v52 = vld [vmem:[#allocation4 + $0x20] sm:$0xff] }
 0x1e6   : > { %v8485_v10 = vpop.f32.mrf.mxu0  ;;  %v2342_v63 = vld [vmem:[#allocation4 + $0xa8] sm:$0xff]  ;;  %v2539_v14 = vpop.f32.mrf.mxu1 }
 0x1e7   : > { %2266 = vst.msk [vmem:[#allocation4 + $0xc8] sm:$0xff] %vm280_vm1, %v2234_v59  ;;  %2622 = vst.msk [vmem:[#allocation4 + $0xb8] sm:$0xff] %vm280_vm1, %v2590_v0  ;;  %v2239_v1 = vadd.f32 %v8485_v10, %v1993_v48  ;;  %v2588_v4 = vadd.f32 %v2523_v29, %v2342_v63  ;;  %v2687_v59 = vld [vmem:[#allocation4 + $0x38] sm:$0xff] }
 0x1e8   : > { %v2194_v30 = vpop.f32.mrf.mxu0  ;;  %v2347_v43 = vld [vmem:[#allocation4 + $0xd0] sm:$0xff]  ;;  %v8519_v11 = vpop.f32.mrf.mxu1 }
 0x1e9   : > { %2271 = vst.msk [vmem:[#allocation4 + $0xf0] sm:$0xff] %vm280_vm1, %v2239_v1  ;;  %2620 = vst.msk [vmem:[#allocation4 + $0xa8] sm:$0xff] %vm280_vm1, %v2588_v4  ;;  %v2237_v25 = vadd.f32 %v2194_v30, %v1991_v27  ;;  %v2593_v36 = vadd.f32 %v8515_v41, %v2347_v43  ;;  %v2685_v1 = vld [vmem:[#allocation4 + $0x28] sm:$0xff] }
 0x1ea   : > { %v8486_v49 = vpop.f32.mrf.mxu0  ;;  %v2345_v60 = vld [vmem:[#allocation4 + $0xc0] sm:$0xff]  ;;  %v2552_v61 = vpop.f32.mrf.mxu1 }
 0x1eb   : > { %2269 = vst.msk [vmem:[#allocation4 + $0xe0] sm:$0xff] %vm280_vm1, %v2237_v25  ;;  %2625 = vst.msk [vmem:[#allocation4 + $0xd0] sm:$0xff] %vm280_vm1, %v2593_v36  ;;  %v2240_v15 = vadd.f32 %v8486_v49, %v1994_v37  ;;  %v2591_v16 = vadd.f32 %v2536_v47, %v2345_v60  ;;  %v2690_v25 = vld [vmem:[#allocation4 + $0x50] sm:$0xff] }
 0x1ec   : > { %v2197_v33 = vpop.f32.mrf.mxu0  ;;  %v2348_v46 = vld [vmem:[#allocation4 + $0xd8] sm:$0xff]  ;;  %v8520_v54 = vpop.f32.mrf.mxu1 }
 0x1ed   : > { %2272 = vst.msk [vmem:[#allocation4 + $0xf8] sm:$0xff] %vm280_vm1, %v2240_v15  ;;  %2623 = vst.msk [vmem:[#allocation4 + $0xc0] sm:$0xff] %vm280_vm1, %v2591_v16  ;;  %v2238_v5 = vadd.f32 %v2197_v33, %v1992_v31  ;;  %v2594_v55 = vadd.f32 %v8516_v62, %v2348_v46  ;;  %v2688_v15 = vld [vmem:[#allocation4 + $0x40] sm:$0xff] }
 0x1ee   : > { %v2346_v58 = vld [vmem:[#allocation4 + $0xc8] sm:$0xff]  ;;  %v8525_v9 = vpop.f32.mrf.mxu0  ;;  %v2555_v12 = vpop.f32.mrf.mxu1 }
 0x1ef   : > { %2270 = vst.msk [vmem:[#allocation4 + $0xe8] sm:$0xff] %vm280_vm1, %v2238_v5  ;;  %2626 = vst.msk [vmem:[#allocation4 + $0xd8] sm:$0xff] %vm280_vm1, %v2594_v55  ;;  %v2592_v20 = vadd.f32 %v2539_v14, %v2346_v58  ;;  %v2928_v7 = vadd.f32 %v8525_v9, %v2682_v18  ;;  %v10040_v5 = vld [vmem:[%s11158_s4 + $0xc] sm:$0xf]  ;;  %v2691_v55 = vld [vmem:[#allocation4 + $0x58] sm:$0xff] }
 0x1f0   : > { %v2351_v3 = vld [vmem:[#allocation4 + $0xf0] sm:$0xff]  ;;  %v2799_v17 = vpop.f32.mrf.mxu0  ;;  %v8559_v6 = vpop.f32.mrf.mxu1  ;;  %8941 = vmatprep.subr.msk.bf16.mxu0 %vm612_vm0, %v10040_v5 }
 0x1f1   : > { %2624 = vst.msk [vmem:[#allocation4 + $0xc8] sm:$0xff] %vm280_vm1, %v2592_v20  ;;  %2960 = vst.msk [vmem:[#allocation4 + $0x10] sm:$0xff] %vm280_vm1, %v2928_v7  ;;  %v2597_v23 = vadd.f32 %v8519_v11, %v2351_v3  ;;  %v2926_v19 = vadd.f32 %v2799_v17, %v2680_v13  ;;  %v2689_v7 = vld [vmem:[#allocation4 + $0x48] sm:$0xff] }
 0x1f2   : > { %v2349_v21 = vld [vmem:[#allocation4 + $0xe0] sm:$0xff]  ;;  %v8526_v24 = vpop.f32.mrf.mxu0  ;;  %v3157_v26 = vpop.f32.mrf.mxu1 }
 0x1f3   : > { %2629 = vst.msk [vmem:[#allocation4 + $0xf0] sm:$0xff] %vm280_vm1, %v2597_v23  ;;  %2958 = vst.msk [vmem:[#allocation4] sm:$0xff] %vm280_vm1, %v2926_v19  ;;  %v2595_v28 = vadd.f32 %v2552_v61, %v2349_v21  ;;  %v2929_v29 = vadd.f32 %v8526_v24, %v2683_v22  ;;  %v2694_v19 = vld [vmem:[#allocation4 + $0x70] sm:$0xff] }
 0x1f4   : > { %v2352_v34 = vld [vmem:[#allocation4 + $0xf8] sm:$0xff]  ;;  %v2802_v35 = vpop.f32.mrf.mxu0  ;;  %v8560_v40 = vpop.f32.mrf.mxu1 }
 0x1f5   : > { %2627 = vst.msk [vmem:[#allocation4 + $0xe0] sm:$0xff] %vm280_vm1, %v2595_v28  ;;  %2961 = vst.msk [vmem:[#allocation4 + $0x18] sm:$0xff] %vm280_vm1, %v2929_v29  ;;  %v2598_v44 = vadd.f32 %v8520_v54, %v2352_v34  ;;  %v2927_v41 = vadd.f32 %v2802_v35, %v2681_v38  ;;  %v2692_v29 = vld [vmem:[#allocation4 + $0x60] sm:$0xff] }
 0x1f6   : > { %v2350_v8 = vld [vmem:[#allocation4 + $0xe8] sm:$0xff]  ;;  %v8529_v45 = vpop.f32.mrf.mxu0  ;;  %v3160_v50 = vpop.f32.mrf.mxu1 }
 0x1f7   : > { %2630 = vst.msk [vmem:[#allocation4 + $0xf8] sm:$0xff] %vm280_vm1, %v2598_v44  ;;  %2959 = vst.msk [vmem:[#allocation4 + $0x8] sm:$0xff] %vm280_vm1, %v2927_v41  ;;  %v2596_v51 = vadd.f32 %v2555_v12, %v2350_v8  ;;  %v2932_v47 = vadd.f32 %v8529_v45, %v2686_v42  ;;  %v2695_v41 = vld [vmem:[#allocation4 + $0x78] sm:$0xff] }
 0x1f8   : > { %v2815_v32 = vpop.f32.mrf.mxu0  ;;  %v3040_v56 = vld [vmem:[#allocation4 + $0x10] sm:$0xff]  ;;  %v8563_v53 = vpop.f32.mrf.mxu1 }
 0x1f9   : > { %2628 = vst.msk [vmem:[#allocation4 + $0xe8] sm:$0xff] %vm280_vm1, %v2596_v51  ;;  %2964 = vst.msk [vmem:[#allocation4 + $0x30] sm:$0xff] %vm280_vm1, %v2932_v47  ;;  %v2930_v57 = vadd.f32 %v2815_v32, %v2684_v52  ;;  %v3286_v62 = vadd.f32 %v8559_v6, %v3040_v56  ;;  %v2693_v47 = vld [vmem:[#allocation4 + $0x68] sm:$0xff] }
 0x1fa   : > { %v8530_v0 = vpop.f32.mrf.mxu0  ;;  %v3038_v48 = vld [vmem:[#allocation4] sm:$0xff]  ;;  %v3173_v10 = vpop.f32.mrf.mxu1 }
 0x1fb   : > { %2962 = vst.msk [vmem:[#allocation4 + $0x20] sm:$0xff] %vm280_vm1, %v2930_v57  ;;  %3318 = vst.msk [vmem:[#allocation4 + $0x10] sm:$0xff] %vm280_vm1, %v3286_v62  ;;  %v2933_v63 = vadd.f32 %v8530_v0, %v2687_v59  ;;  %v3284_v14 = vadd.f32 %v3157_v26, %v3038_v48  ;;  %v2698_v62 = vld [vmem:[#allocation4 + $0x90] sm:$0xff] }
 0x1fc   : > { %v2818_v4 = vpop.f32.mrf.mxu0  ;;  %v3041_v27 = vld [vmem:[#allocation4 + $0x18] sm:$0xff]  ;;  %v8564_v30 = vpop.f32.mrf.mxu1 }
 0x1fd   : > { %2965 = vst.msk [vmem:[#allocation4 + $0x38] sm:$0xff] %vm280_vm1, %v2933_v63  ;;  %3316 = vst.msk [vmem:[#allocation4] sm:$0xff] %vm280_vm1, %v3284_v14  ;;  %v2931_v43 = vadd.f32 %v2818_v4, %v2685_v1  ;;  %v3287_v11 = vadd.f32 %v8560_v40, %v3041_v27  ;;  %v2696_v14 = vld [vmem:[#allocation4 + $0x80] sm:$0xff] }
 0x1fe   : > { %v8533_v36 = vpop.f32.mrf.mxu0  ;;  %v3039_v37 = vld [vmem:[#allocation4 + $0x8] sm:$0xff]  ;;  %v3176_v49 = vpop.f32.mrf.mxu1 }
 0x1ff   : > { %2963 = vst.msk [vmem:[#allocation4 + $0x28] sm:$0xff] %vm280_vm1, %v2931_v43  ;;  %3319 = vst.msk [vmem:[#allocation4 + $0x18] sm:$0xff] %vm280_vm1, %v3287_v11  ;;  %v2936_v60 = vadd.f32 %v8533_v36, %v2690_v25  ;;  %v3285_v61 = vadd.f32 %v3160_v50, %v3039_v37  ;;  %v2699_v11 = vld [vmem:[#allocation4 + $0x98] sm:$0xff] }
 0x200   : > { %v2831_v16 = vpop.f32.mrf.mxu0  ;;  %v3044_v31 = vld [vmem:[#allocation4 + $0x30] sm:$0xff]  ;;  %v8567_v33 = vpop.f32.mrf.mxu1 }
 0x201   : > { %2968 = vst.msk [vmem:[#allocation4 + $0x50] sm:$0xff] %vm280_vm1, %v2936_v60  ;;  %3317 = vst.msk [vmem:[#allocation4 + $0x8] sm:$0xff] %vm280_vm1, %v3285_v61  ;;  %v2934_v46 = vadd.f32 %v2831_v16, %v2688_v15  ;;  %v3290_v54 = vadd.f32 %v8563_v53, %v3044_v31  ;;  %v2697_v61 = vld [vmem:[#allocation4 + $0x88] sm:$0xff] }
 0x202   : > { %v8534_v58 = vpop.f32.mrf.mxu0  ;;  %v3042_v18 = vld [vmem:[#allocation4 + $0x20] sm:$0xff]  ;;  %v3189_v9 = vpop.f32.mrf.mxu1 }
 0x203   : > { %2966 = vst.msk [vmem:[#allocation4 + $0x40] sm:$0xff] %vm280_vm1, %v2934_v46  ;;  %3322 = vst.msk [vmem:[#allocation4 + $0x30] sm:$0xff] %vm280_vm1, %v3290_v54  ;;  %v2937_v12 = vadd.f32 %v8534_v58, %v2691_v55  ;;  %v3288_v20 = vadd.f32 %v3173_v10, %v3042_v18  ;;  %v2702_v54 = vld [vmem:[#allocation4 + $0xb0] sm:$0xff] }
 0x204   : > { %v2834_v3 = vpop.f32.mrf.mxu0  ;;  %v3045_v13 = vld [vmem:[#allocation4 + $0x38] sm:$0xff]  ;;  %v8568_v17 = vpop.f32.mrf.mxu1 }
 0x205   : > { %2969 = vst.msk [vmem:[#allocation4 + $0x58] sm:$0xff] %vm280_vm1, %v2937_v12  ;;  %3320 = vst.msk [vmem:[#allocation4 + $0x20] sm:$0xff] %vm280_vm1, %v3288_v20  ;;  %v2935_v6 = vadd.f32 %v2834_v3, %v2689_v7  ;;  %v3291_v23 = vadd.f32 %v8564_v30, %v3045_v13  ;;  %v2700_v20 = vld [vmem:[#allocation4 + $0xa0] sm:$0xff] }
 0x206   : > { %v8537_v21 = vpop.f32.mrf.mxu0  ;;  %v3043_v22 = vld [vmem:[#allocation4 + $0x28] sm:$0xff]  ;;  %v3192_v24 = vpop.f32.mrf.mxu1 }
 0x207   : > { %2967 = vst.msk [vmem:[#allocation4 + $0x48] sm:$0xff] %vm280_vm1, %v2935_v6  ;;  %3323 = vst.msk [vmem:[#allocation4 + $0x38] sm:$0xff] %vm280_vm1, %v3291_v23  ;;  %v2940_v26 = vadd.f32 %v8537_v21, %v2694_v19  ;;  %v3289_v28 = vadd.f32 %v3176_v49, %v3043_v22  ;;  %v2703_v23 = vld [vmem:[#allocation4 + $0xb8] sm:$0xff] }
 0x208   : > { %v2847_v34 = vpop.f32.mrf.mxu0  ;;  %v3048_v38 = vld [vmem:[#allocation4 + $0x50] sm:$0xff]  ;;  %v8571_v35 = vpop.f32.mrf.mxu1 }
 0x209   : > { %2972 = vst.msk [vmem:[#allocation4 + $0x70] sm:$0xff] %vm280_vm1, %v2940_v26  ;;  %3321 = vst.msk [vmem:[#allocation4 + $0x28] sm:$0xff] %vm280_vm1, %v3289_v28  ;;  %v2938_v40 = vadd.f32 %v2847_v34, %v2692_v29  ;;  %v3294_v44 = vadd.f32 %v8567_v33, %v3048_v38  ;;  %v2701_v28 = vld [vmem:[#allocation4 + $0xa8] sm:$0xff] }
 0x20a   : > { %v8538_v8 = vpop.f32.mrf.mxu0  ;;  %v3046_v42 = vld [vmem:[#allocation4 + $0x40] sm:$0xff]  ;;  %v3205_v45 = vpop.f32.mrf.mxu1 }
 0x20b   : > { %2970 = vst.msk [vmem:[#allocation4 + $0x60] sm:$0xff] %vm280_vm1, %v2938_v40  ;;  %3326 = vst.msk [vmem:[#allocation4 + $0x50] sm:$0xff] %vm280_vm1, %v3294_v44  ;;  %v2941_v50 = vadd.f32 %v8538_v8, %v2695_v41  ;;  %v3292_v51 = vadd.f32 %v3189_v9, %v3046_v42  ;;  %v2706_v44 = vld [vmem:[#allocation4 + $0xd0] sm:$0xff] }
 0x20c   : > { %v2850_v52 = vpop.f32.mrf.mxu0  ;;  %v3049_v32 = vld [vmem:[#allocation4 + $0x58] sm:$0xff]  ;;  %v8572_v56 = vpop.f32.mrf.mxu1 }
 0x20d   : > { %2973 = vst.msk [vmem:[#allocation4 + $0x78] sm:$0xff] %vm280_vm1, %v2941_v50  ;;  %3324 = vst.msk [vmem:[#allocation4 + $0x40] sm:$0xff] %vm280_vm1, %v3292_v51  ;;  %v2939_v53 = vadd.f32 %v2850_v52, %v2693_v47  ;;  %v3295_v57 = vadd.f32 %v8568_v17, %v3049_v32  ;;  %v2704_v51 = vld [vmem:[#allocation4 + $0xc0] sm:$0xff] }
 0x20e   : > { %v8541_v59 = vpop.f32.mrf.mxu0  ;;  %v3047_v0 = vld [vmem:[#allocation4 + $0x48] sm:$0xff]  ;;  %v3208_v48 = vpop.f32.mrf.mxu1 }
 0x20f   : > { %2971 = vst.msk [vmem:[#allocation4 + $0x68] sm:$0xff] %vm280_vm1, %v2939_v53  ;;  %3327 = vst.msk [vmem:[#allocation4 + $0x58] sm:$0xff] %vm280_vm1, %v3295_v57  ;;  %v2944_v10 = vadd.f32 %v8541_v59, %v2698_v62  ;;  %v3293_v63 = vadd.f32 %v3192_v24, %v3047_v0  ;;  %v2707_v57 = vld [vmem:[#allocation4 + $0xd8] sm:$0xff] }
 0x210   : > { %v2863_v1 = vpop.f32.mrf.mxu0  ;;  %v3052_v4 = vld [vmem:[#allocation4 + $0x70] sm:$0xff]  ;;  %v8575_v27 = vpop.f32.mrf.mxu1 }
 0x211   : > { %2976 = vst.msk [vmem:[#allocation4 + $0x90] sm:$0xff] %vm280_vm1, %v2944_v10  ;;  %3325 = vst.msk [vmem:[#allocation4 + $0x48] sm:$0xff] %vm280_vm1, %v3293_v63  ;;  %v2942_v30 = vadd.f32 %v2863_v1, %v2696_v14  ;;  %v3298_v43 = vadd.f32 %v8571_v35, %v3052_v4  ;;  %v2705_v63 = vld [vmem:[#allocation4 + $0xc8] sm:$0xff] }
 0x212   : > { %v8542_v25 = vpop.f32.mrf.mxu0  ;;  %v3050_v36 = vld [vmem:[#allocation4 + $0x60] sm:$0xff]  ;;  %v3221_v37 = vpop.f32.mrf.mxu1 }
 0x213   : > { %2974 = vst.msk [vmem:[#allocation4 + $0x80] sm:$0xff] %vm280_vm1, %v2942_v30  ;;  %3330 = vst.msk [vmem:[#allocation4 + $0x70] sm:$0xff] %vm280_vm1, %v3298_v43  ;;  %v2945_v49 = vadd.f32 %v8542_v25, %v2699_v11  ;;  %v3296_v60 = vadd.f32 %v3205_v45, %v3050_v36  ;;  %v2710_v43 = vld [vmem:[#allocation4 + $0xf0] sm:$0xff] }
 0x214   : > { %v2866_v15 = vpop.f32.mrf.mxu0  ;;  %v3053_v16 = vld [vmem:[#allocation4 + $0x78] sm:$0xff]  ;;  %v8576_v31 = vpop.f32.mrf.mxu1 }
 0x215   : > { %2977 = vst.msk [vmem:[#allocation4 + $0x98] sm:$0xff] %vm280_vm1, %v2945_v49  ;;  %3328 = vst.msk [vmem:[#allocation4 + $0x60] sm:$0xff] %vm280_vm1, %v3296_v60  ;;  %v2943_v33 = vadd.f32 %v2866_v15, %v2697_v61  ;;  %v3299_v46 = vadd.f32 %v8572_v56, %v3053_v16  ;;  %v2708_v60 = vld [vmem:[#allocation4 + $0xe0] sm:$0xff] }
 0x216   : > { %v8545_v55 = vpop.f32.mrf.mxu0  ;;  %v3051_v58 = vld [vmem:[#allocation4 + $0x68] sm:$0xff]  ;;  %v3224_v18 = vpop.f32.mrf.mxu1 }
 0x217   : > { %2975 = vst.msk [vmem:[#allocation4 + $0x88] sm:$0xff] %vm280_vm1, %v2943_v33  ;;  %3331 = vst.msk [vmem:[#allocation4 + $0x78] sm:$0xff] %vm280_vm1, %v3299_v46  ;;  %v2948_v9 = vadd.f32 %v8545_v55, %v2702_v54  ;;  %v3297_v12 = vadd.f32 %v3208_v48, %v3051_v58  ;;  %v2711_v46 = vld [vmem:[#allocation4 + $0xf8] sm:$0xff] }
 0x218   : > { %v2879_v7 = vpop.f32.mrf.mxu0  ;;  %v3056_v3 = vld [vmem:[#allocation4 + $0x90] sm:$0xff]  ;;  %v8579_v13 = vpop.f32.mrf.mxu1 }
 0x219   : > { %2980 = vst.msk [vmem:[#allocation4 + $0xb0] sm:$0xff] %vm280_vm1, %v2948_v9  ;;  %3329 = vst.msk [vmem:[#allocation4 + $0x68] sm:$0xff] %vm280_vm1, %v3297_v12  ;;  %v2946_v17 = vadd.f32 %v2879_v7, %v2700_v20  ;;  %v3302_v6 = vadd.f32 %v8575_v27, %v3056_v3  ;;  %v2709_v9 = vld [vmem:[#allocation4 + $0xe8] sm:$0xff] }
 0x21a   : > { %v8546_v19 = vpop.f32.mrf.mxu0  ;;  %v3054_v21 = vld [vmem:[#allocation4 + $0x80] sm:$0xff]  ;;  %v3237_v22 = vpop.f32.mrf.mxu1 }
 0x21b   : > { %2978 = vst.msk [vmem:[#allocation4 + $0xa0] sm:$0xff] %vm280_vm1, %v2946_v17  ;;  %3334 = vst.msk [vmem:[#allocation4 + $0x90] sm:$0xff] %vm280_vm1, %v3302_v6  ;;  %v2949_v24 = vadd.f32 %v8546_v19, %v2703_v23  ;;  %v3300_v26 = vadd.f32 %v3221_v37, %v3054_v21  ;;  %v3398_v6 = vld [vmem:[#allocation4 + $0x10] sm:$0xff] }
 0x21c   : > { %v2882_v29 = vpop.f32.mrf.mxu0  ;;  %v3057_v34 = vld [vmem:[#allocation4 + $0x98] sm:$0xff]  ;;  %v8580_v38 = vpop.f32.mrf.mxu1 }
 0x21d   : > { %2981 = vst.msk [vmem:[#allocation4 + $0xb8] sm:$0xff] %vm280_vm1, %v2949_v24  ;;  %3332 = vst.msk [vmem:[#allocation4 + $0x80] sm:$0xff] %vm280_vm1, %v3300_v26  ;;  %v2947_v35 = vadd.f32 %v2882_v29, %v2701_v28  ;;  %v3303_v40 = vadd.f32 %v8576_v31, %v3057_v34  ;;  %v3396_v24 = vld [vmem:[#allocation4] sm:$0xff] }
 0x21e   : > { %v8549_v41 = vpop.f32.mrf.mxu0  ;;  %v3055_v8 = vld [vmem:[#allocation4 + $0x88] sm:$0xff]  ;;  %v3240_v42 = vpop.f32.mrf.mxu1 }
 0x21f   : > { %2979 = vst.msk [vmem:[#allocation4 + $0xa8] sm:$0xff] %vm280_vm1, %v2947_v35  ;;  %3335 = vst.msk [vmem:[#allocation4 + $0x98] sm:$0xff] %vm280_vm1, %v3303_v40  ;;  %v2952_v45 = vadd.f32 %v8549_v41, %v2706_v44  ;;  %v3301_v50 = vadd.f32 %v3224_v18, %v3055_v8  ;;  %v3399_v35 = vld [vmem:[#allocation4 + $0x18] sm:$0xff] }
 0x220   : > { %v2895_v47 = vpop.f32.mrf.mxu0  ;;  %v3060_v52 = vld [vmem:[#allocation4 + $0xb0] sm:$0xff]  ;;  %v8583_v32 = vpop.f32.mrf.mxu1 }
 0x221   : > { %2984 = vst.msk [vmem:[#allocation4 + $0xd0] sm:$0xff] %vm280_vm1, %v2952_v45  ;;  %3333 = vst.msk [vmem:[#allocation4 + $0x88] sm:$0xff] %vm280_vm1, %v3301_v50  ;;  %v2950_v56 = vadd.f32 %v2895_v47, %v2704_v51  ;;  %v3306_v53 = vadd.f32 %v8579_v13, %v3060_v52  ;;  %v10099_v52 = vld [vmem:[%s11156_s2] ss:$0 sm:$0xff] }
 0x222   : > { %v8550_v62 = vpop.f32.mrf.mxu0  ;;  %v3058_v59 = vld [vmem:[#allocation4 + $0xa0] sm:$0xff]  ;;  %v3253_v0 = vpop.f32.mrf.mxu1 }
 0x223   : > { %2982 = vst.msk [vmem:[#allocation4 + $0xc0] sm:$0xff] %vm280_vm1, %v2950_v56  ;;  %3338 = vst.msk [vmem:[#allocation4 + $0xb0] sm:$0xff] %vm280_vm1, %v3306_v53  ;;  %v2953_v48 = vadd.f32 %v8550_v62, %v2707_v57  ;;  %v3304_v10 = vadd.f32 %v3237_v22, %v3058_v59  ;;  %v3402_v56 = vld [vmem:[#allocation4 + $0x30] sm:$0xff] }
 0x224   : > { %v2898_v14 = vpop.f32.mrf.mxu0  ;;  %v3061_v1 = vld [vmem:[#allocation4 + $0xb8] sm:$0xff]  ;;  %v8584_v4 = vpop.f32.mrf.mxu1 }
 0x225   : > { %2985 = vst.msk [vmem:[#allocation4 + $0xd8] sm:$0xff] %vm280_vm1, %v2953_v48  ;;  %3336 = vst.msk [vmem:[#allocation4 + $0xa0] sm:$0xff] %vm280_vm1, %v3304_v10  ;;  %v2951_v27 = vadd.f32 %v2898_v14, %v2705_v63  ;;  %v3307_v30 = vadd.f32 %v8580_v38, %v3061_v1  ;;  %v3400_v48 = vld [vmem:[#allocation4 + $0x20] sm:$0xff] }
 0x226   : > { %v8553_v11 = vpop.f32.mrf.mxu0  ;;  %v3059_v25 = vld [vmem:[#allocation4 + $0xa8] sm:$0xff]  ;;  %v3256_v36 = vpop.f32.mrf.mxu1 }
 0x227   : > { %2983 = vst.msk [vmem:[#allocation4 + $0xc8] sm:$0xff] %vm280_vm1, %v2951_v27  ;;  %3339 = vst.msk [vmem:[#allocation4 + $0xb8] sm:$0xff] %vm280_vm1, %v3307_v30  ;;  %v2956_v37 = vadd.f32 %v8553_v11, %v2710_v43  ;;  %v3305_v49 = vadd.f32 %v3240_v42, %v3059_v25  ;;  %v3397_v42 = vld [vmem:[#allocation4 + $0x8] sm:$0xff] }
 0x228   : > { %v2911_v61 = vpop.f32.mrf.mxu0  ;;  %v3064_v15 = vld [vmem:[#allocation4 + $0xd0] sm:$0xff]  ;;  %v8587_v16 = vpop.f32.mrf.mxu1 }
 0x229   : > { %2988 = vst.msk [vmem:[#allocation4 + $0xf0] sm:$0xff] %vm280_vm1, %v2956_v37  ;;  %3337 = vst.msk [vmem:[#allocation4 + $0xa8] sm:$0xff] %vm280_vm1, %v3305_v49  ;;  %v2954_v31 = vadd.f32 %v2911_v61, %v2708_v60  ;;  %v3310_v33 = vadd.f32 %v8583_v32, %v3064_v15 }
 0x22a   : > { %v8554_v54 = vpop.f32.mrf.mxu0  ;;  %v3062_v55 = vld [vmem:[#allocation4 + $0xc0] sm:$0xff]  ;;  %v3269_v7 = vpop.f32.mrf.mxu1 }
 0x22b   : > { %2986 = vst.msk [vmem:[#allocation4 + $0xe0] sm:$0xff] %vm280_vm1, %v2954_v31  ;;  %3342 = vst.msk [vmem:[#allocation4 + $0xd0] sm:$0xff] %vm280_vm1, %v3310_v33  ;;  %v2957_v58 = vadd.f32 %v8554_v54, %v2711_v46  ;;  %v3308_v18 = vadd.f32 %v3253_v0, %v3062_v55  ;;  %v10106_v0 = vld [vmem:[%s11157_s3] ss:$0 sm:$0xff]  ;;  %v3406_v31 = vld [vmem:[#allocation4 + $0x50] sm:$0xff] }
 0x22c   : > { %v2914_v12 = vpop.f32.mrf.mxu0  ;;  %v3065_v20 = vld [vmem:[#allocation4 + $0xd8] sm:$0xff]  ;;  %v8588_v28 = vpop.f32.mrf.mxu1 }
 0x22d   : > { %2989 = vst.msk [vmem:[#allocation4 + $0xf8] sm:$0xff] %vm280_vm1, %v2957_v58  ;;  %3340 = vst.msk [vmem:[#allocation4 + $0xc0] sm:$0xff] %vm280_vm1, %v3308_v18  ;;  %v2955_v3 = vadd.f32 %v2914_v12, %v2709_v9  ;;  %v3311_v13 = vadd.f32 %v8584_v4, %v3065_v20  ;;  %v3403_v4 = vld [vmem:[#allocation4 + $0x38] sm:$0xff]  ;;  %v3404_v9 = vld [vmem:[#allocation4 + $0x40] sm:$0xff] }
 0x22e   : > { %v3063_v17 = vld [vmem:[#allocation4 + $0xc8] sm:$0xff]  ;;  %v8593_v23 = vpop.f32.mrf.mxu0  ;;  %v3272_v50 = vpop.f32.mrf.mxu1 }
 0x22f   : > { %2987 = vst.msk [vmem:[#allocation4 + $0xe8] sm:$0xff] %vm280_vm1, %v2955_v3  ;;  %3343 = vst.msk [vmem:[#allocation4 + $0xd8] sm:$0xff] %vm280_vm1, %v3311_v13  ;;  %v3309_v19 = vadd.f32 %v3256_v36, %v3063_v17  ;;  %v3644_v21 = vadd.f32 %v8593_v23, %v3398_v6  ;;  %v3401_v36 = vld [vmem:[#allocation4 + $0x28] sm:$0xff]  ;;  %v3407_v6 = vld [vmem:[#allocation4 + $0x58] sm:$0xff] }
 0x230   : > { %v3068_v22 = vld [vmem:[#allocation4 + $0xf0] sm:$0xff]  ;;  %v3515_v26 = vpop.f32.mrf.mxu0 }
 0x231   : > { %3341 = vst.msk [vmem:[#allocation4 + $0xc8] sm:$0xff] %vm280_vm1, %v3309_v19  ;;  %3676 = vst.msk [vmem:[#allocation4 + $0x10] sm:$0xff] %vm280_vm1, %v3644_v21  ;;  %v3314_v29 = vadd.f32 %v8587_v16, %v3068_v22  ;;  %v3642_v34 = vadd.f32 %v3515_v26, %v3396_v24 }
 0x232   : > { %v3066_v38 = vld [vmem:[#allocation4 + $0xe0] sm:$0xff]  ;;  %v8594_v40 = vpop.f32.mrf.mxu0 }
 0x233   : > { %3346 = vst.msk [vmem:[#allocation4 + $0xf0] sm:$0xff] %vm280_vm1, %v3314_v29  ;;  %3674 = vst.msk [vmem:[#allocation4] sm:$0xff] %vm280_vm1, %v3642_v34  ;;  %v3312_v44 = vadd.f32 %v3269_v7, %v3066_v38  ;;  %v3645_v41 = vadd.f32 %v8594_v40, %v3399_v35 }
 0x234   : > { %v3069_v8 = vld [vmem:[#allocation4 + $0xf8] sm:$0xff]  ;;  %v3518_v45 = vpop.f32.mrf.mxu0 }
 0x235   : > { %3344 = vst.msk [vmem:[#allocation4 + $0xe0] sm:$0xff] %vm280_vm1, %v3312_v44  ;;  %3677 = vst.msk [vmem:[#allocation4 + $0x18] sm:$0xff] %vm280_vm1, %v3645_v41  ;;  %v3315_v51 = vadd.f32 %v8588_v28, %v3069_v8  ;;  %v3643_v47 = vadd.f32 %v3518_v45, %v3397_v42  ;;  %v3405_v28 = vld [vmem:[#allocation4 + $0x48] sm:$0xff]  ;;  %v3410_v41 = vld [vmem:[#allocation4 + $0x70] sm:$0xff] }
 0x236   : > { %v3067_v32 = vld [vmem:[#allocation4 + $0xe8] sm:$0xff]  ;;  %v8597_v53 = vpop.f32.mrf.mxu0 }
 0x237   : > { %3347 = vst.msk [vmem:[#allocation4 + $0xf8] sm:$0xff] %vm280_vm1, %v3315_v51  ;;  %3675 = vst.msk [vmem:[#allocation4 + $0x8] sm:$0xff] %vm280_vm1, %v3643_v47  ;;  %v3313_v57 = vadd.f32 %v3272_v50, %v3067_v32  ;;  %v3648_v62 = vadd.f32 %v8597_v53, %v3402_v56  ;;  %v3408_v32 = vld [vmem:[#allocation4 + $0x60] sm:$0xff] }
 0x238   : > { %v3708_v59 = vld [vmem:[#allocation4 + $0x10] sm:$0xff]  ;;  %v3531_v10 = vpop.f32.mrf.mxu0 }
 0x239   : > { %v3747_v63 = vmul.f32 %v10099_v52, %v3708_v59  ;;  %3955 = vst.msk [vmem:[#allocation4 + $0x10] sm:$0xff] %vm280_vm1, %v8964_v2  ;;  %3345 = vst.msk [vmem:[#allocation4 + $0xe8] sm:$0xff] %vm280_vm1, %v3313_v57  ;;  %v3646_v14 = vadd.f32 %v3531_v10, %v3400_v48  ;;  %v3411_v10 = vld [vmem:[#allocation4 + $0x78] sm:$0xff] }
 0x23a   : > { %3680 = vst.msk [vmem:[#allocation4 + $0x30] sm:$0xff] %vm280_vm1, %v3648_v62  ;;  %v3706_v1 = vld [vmem:[#allocation4] sm:$0xff]  ;;  %v8598_v27 = vpop.f32.mrf.mxu0 }
 0x23b   : > { %v3786_v30 = vadd.f32 %v10106_v0, %v3747_v63  ;;  %v3745_v43 = vmul.f32 %v10099_v52, %v3706_v1  ;;  %3953 = vst.msk [vmem:[#allocation4] sm:$0xff] %vm280_vm1, %v8964_v2  ;;  %3678 = vst.msk [vmem:[#allocation4 + $0x20] sm:$0xff] %vm280_vm1, %v3646_v14  ;;  %v3649_v11 = vadd.f32 %v8598_v27, %v3403_v4 }
 0x23c   : > { %v3709_v25 = vld [vmem:[#allocation4 + $0x18] sm:$0xff]  ;;  %v3534_v37 = vpop.f32.mrf.mxu0 }
 0x23d   : > { %v3818_v49 = vmax.f32 %v3786_v30, 0.0  ;;  %v3784_v60 = vadd.f32 %v10106_v0, %v3745_v43  ;;  %v3748_v61 = vmul.f32 %v10099_v52, %v3709_v25  ;;  %3956 = vst.msk [vmem:[#allocation4 + $0x18] sm:$0xff] %vm280_vm1, %v8964_v2  ;;  %3681 = vst.msk [vmem:[#allocation4 + $0x38] sm:$0xff] %vm280_vm1, %v3649_v11  ;;  %v3647_v15 = vadd.f32 %v3534_v37, %v3401_v36  ;;  %v3409_v30 = vld [vmem:[#allocation4 + $0x68] sm:$0xff] }
 0x23e   : > { %v3707_v16 = vld [vmem:[#allocation4 + $0x8] sm:$0xff]  ;;  %v8601_v33 = vpop.f32.mrf.mxu0 }
 0x23f   : > { %3923 = vst.msk [vmem:[#allocation3 + $0x48] sm:$0xff] %vm280_vm1, %v3818_v49  ;;  %v3816_v46 = vmax.f32 %v3784_v60, 0.0  ;;  %v3787_v54 = vadd.f32 %v10106_v0, %v3748_v61  ;;  %v3746_v55 = vmul.f32 %v10099_v52, %v3707_v16  ;;  %3954 = vst.msk [vmem:[#allocation4 + $0x8] sm:$0xff] %vm280_vm1, %v8964_v2  ;;  %v3652_v58 = vadd.f32 %v8601_v33, %v3406_v31 }
 0x240   : > { %3679 = vst.msk [vmem:[#allocation4 + $0x28] sm:$0xff] %vm280_vm1, %v3647_v15  ;;  %v3547_v12 = vpop.f32.mrf.mxu0  ;;  %v4831_v60 = vsel %vm612_vm0, %v9999_v39, 0 }
 0x241   : > { %v3712_v18 = vld [vmem:[#allocation4 + $0x30] sm:$0xff]  ;;  %3921 = vst.msk [vmem:[#allocation3 + $0x28] sm:$0xff] %vm280_vm1, %v3816_v46  ;;  %v3819_v20 = vmax.f32 %v3787_v54, 0.0  ;;  %v3785_v7 = vadd.f32 %v10106_v0, %v3746_v55  ;;  %3684 = vst.msk [vmem:[#allocation4 + $0x50] sm:$0xff] %vm280_vm1, %v3652_v58  ;;  %v3650_v13 = vadd.f32 %v3547_v12, %v3404_v9 }
 0x242   : > { %v3751_v3 = vmul.f32 %v10099_v52, %v3712_v18  ;;  %3959 = vst.msk [vmem:[#allocation4 + $0x30] sm:$0xff] %vm280_vm1, %v8964_v2  ;;  %v3710_v17 = vld [vmem:[#allocation4 + $0x20] sm:$0xff]  ;;  %v8602_v23 = vpop.f32.mrf.mxu0  ;;  %v3414_v58 = vld [vmem:[#allocation4 + $0x90] sm:$0xff] }
 0x243   : > { %3924 = vst.msk [vmem:[#allocation3 + $0x50] sm:$0xff] %vm280_vm1, %v3819_v20  ;;  %v3817_v19 = vmax.f32 %v3785_v7, 0.0  ;;  %v3749_v22 = vmul.f32 %v10099_v52, %v3710_v17  ;;  %3957 = vst.msk [vmem:[#allocation4 + $0x20] sm:$0xff] %vm280_vm1, %v8964_v2  ;;  %v3653_v24 = vadd.f32 %v8602_v23, %v3407_v6  ;;  %v5189_v20 = vsel %vm612_vm0, %v10040_v5, 0  ;;  %v10190_v23 = vld [vmem:[%s11158_s4 + $0x10] sm:$0xf] }
 0x244   : > { %v3790_v21 = vadd.f32 %v10106_v0, %v3751_v3  ;;  %3682 = vst.msk [vmem:[#allocation4 + $0x40] sm:$0xff] %vm280_vm1, %v3650_v13  ;;  %v3713_v26 = vld [vmem:[#allocation4 + $0x38] sm:$0xff]  ;;  %v3550_v29 = vpop.f32.mrf.mxu0 }
 0x245   : > { %3922 = vst.msk [vmem:[#allocation3 + $0x30] sm:$0xff] %vm280_vm1, %v3817_v19  ;;  %v3788_v38 = vadd.f32 %v10106_v0, %v3749_v22  ;;  %v3752_v35 = vmul.f32 %v10099_v52, %v3713_v26  ;;  %3960 = vst.msk [vmem:[#allocation4 + $0x38] sm:$0xff] %vm280_vm1, %v8964_v2  ;;  %v3651_v40 = vadd.f32 %v3550_v29, %v3405_v28  ;;  %v3412_v19 = vld [vmem:[#allocation4 + $0x80] sm:$0xff] }
 0x246   : > { %v3822_v34 = vmax.f32 %v3790_v21, 0.0  ;;  %3685 = vst.msk [vmem:[#allocation4 + $0x58] sm:$0xff] %vm280_vm1, %v3653_v24  ;;  %v8605_v8 = vpop.f32.mrf.mxu0  ;;  %v3989_v43 = vld [vmem:[#allocation3 + $0x47] sm:$0xff]  ;;  %v10201_v24 = vld [vmem:[%s11158_s4 + $0x14] sm:$0xf] }
 0x247   : > { %v3711_v44 = vld [vmem:[#allocation4 + $0x28] sm:$0xff]  ;;  %v3820_v42 = vmax.f32 %v3788_v38, 0.0  ;;  %v3791_v45 = vadd.f32 %v10106_v0, %v3752_v35  ;;  %3683 = vst.msk [vmem:[#allocation4 + $0x48] sm:$0xff] %vm280_vm1, %v3651_v40  ;;  %v3656_v51 = vadd.f32 %v8605_v8, %v3410_v41  ;;  %v3415_v35 = vld [vmem:[#allocation4 + $0x98] sm:$0xff] }
 0x248   : > { %3927 = vst.msk [vmem:[#allocation3 + $0x88] sm:$0xff] %vm280_vm1, %v3822_v34  ;;  %v3750_v50 = vmul.f32 %v10099_v52, %v3711_v44  ;;  %3958 = vst.msk [vmem:[#allocation4 + $0x28] sm:$0xff] %vm280_vm1, %v8964_v2  ;;  %v3716_v47 = vld [vmem:[#allocation4 + $0x50] sm:$0xff]  ;;  %v3563_v56 = vpop.f32.mrf.mxu0  ;;  %v3987_v33 = vld [vmem:[#allocation3 + $0x27] sm:$0xff] }
 0x249   : > { %3925 = vst.msk [vmem:[#allocation3 + $0x68] sm:$0xff] %vm280_vm1, %v3820_v42  ;;  %v3823_v53 = vmax.f32 %v3791_v45, 0.0  ;;  %v3755_v62 = vmul.f32 %v10099_v52, %v3716_v47  ;;  %3963 = vst.msk [vmem:[#allocation4 + $0x50] sm:$0xff] %vm280_vm1, %v8964_v2  ;;  %v3654_v59 = vadd.f32 %v3563_v56, %v3408_v32  ;;  %v4344_v46 = vld [vmem:[#allocation3 + $0x28] sm:$0xff] }
 0x24a   : > { %v3789_v57 = vadd.f32 %v10106_v0, %v3750_v50  ;;  %3688 = vst.msk [vmem:[#allocation4 + $0x70] sm:$0xff] %vm280_vm1, %v3656_v51  ;;  %v8606_v63 = vpop.f32.mrf.mxu0  ;;  %v3990_v11 = vld [vmem:[#allocation3 + $0x4f] sm:$0xff] }
 0x24b   : > { %v3714_v48 = vld [vmem:[#allocation4 + $0x40] sm:$0xff]  ;;  %3928 = vst.msk [vmem:[#allocation3 + $0x90] sm:$0xff] %vm280_vm1, %v3823_v53  ;;  %v3794_v1 = vadd.f32 %v10106_v0, %v3755_v62  ;;  %3686 = vst.msk [vmem:[#allocation4 + $0x60] sm:$0xff] %vm280_vm1, %v3654_v59  ;;  %v3657_v27 = vadd.f32 %v8606_v63, %v3411_v10  ;;  %v4347_v54 = vld [vmem:[#allocation3 + $0x50] sm:$0xff]  ;;  %v10177_v12 = vpack.c.bf16 %v3990_v11, %v3989_v43 }
 0x24c   : > { %v3821_v14 = vmax.f32 %v3789_v57, 0.0  ;;  %v3753_v4 = vmul.f32 %v10099_v52, %v3714_v48  ;;  %3961 = vst.msk [vmem:[#allocation4 + $0x40] sm:$0xff] %vm280_vm1, %v8964_v2  ;;  %v3566_v36 = vpop.f32.mrf.mxu0  ;;  %v3988_v37 = vld [vmem:[#allocation3 + $0x2f] sm:$0xff] }
 0x24d   : > { %v3717_v25 = vld [vmem:[#allocation4 + $0x58] sm:$0xff]  ;;  %v4345_v49 = vld [vmem:[#allocation3 + $0x30] sm:$0xff]  ;;  %v3826_v61 = vmax.f32 %v3794_v1, 0.0  ;;  %3689 = vst.msk [vmem:[#allocation4 + $0x78] sm:$0xff] %vm280_vm1, %v3657_v27  ;;  %v3655_v31 = vadd.f32 %v3566_v36, %v3409_v30  ;;  %v10173_v39 = vpack.c.bf16 %v3988_v37, %v3987_v33  ;;  %v4346_v6 = vld [vmem:[#allocation3 + $0x48] sm:$0xff] }
 0x24e   : > { %3926 = vst.msk [vmem:[#allocation3 + $0x70] sm:$0xff] %vm280_vm1, %v3821_v14  ;;  %v3792_v15 = vadd.f32 %v10106_v0, %v3753_v4  ;;  %v3756_v16 = vmul.f32 %v10099_v52, %v3717_v25  ;;  %3964 = vst.msk [vmem:[#allocation4 + $0x58] sm:$0xff] %vm280_vm1, %v8964_v2  ;;  %v3715_v55 = vld [vmem:[#allocation4 + $0x48] sm:$0xff]  ;;  %v8609_v18 = vpop.f32.mrf.mxu0  ;;  %v10175_v9 = vpack.c.bf16 %v4345_v49, %v4344_v46  ;;  %v3418_v27 = vld [vmem:[#allocation4 + $0xb0] sm:$0xff] }
 0x24f   : > { %3931 = vst.msk [vmem:[#allocation3 + $0xc8] sm:$0xff] %vm280_vm1, %v3826_v61  ;;  %v3754_v13 = vmul.f32 %v10099_v52, %v3715_v55  ;;  %3962 = vst.msk [vmem:[#allocation4 + $0x48] sm:$0xff] %vm280_vm1, %v8964_v2  ;;  %v3660_v17 = vadd.f32 %v8609_v18, %v3414_v58  ;;  %8626 = vmatmul.mubr.msk.bf16.vlgmr.msra.gmra.mxu1 %vm280_vm1, %v10173_v39  ;;  %v10196_v22 = vpack.c.bf16 %v4347_v54, %v4346_v6  ;;  %v3413_v44 = vld [vmem:[#allocation4 + $0x88] sm:$0xff]  ;;  %v3419_v18 = vld [vmem:[#allocation4 + $0xb8] sm:$0xff] }
 0x250   : > { %v3824_v7 = vmax.f32 %v3792_v15, 0.0  ;;  %v3795_v3 = vadd.f32 %v10106_v0, %v3756_v16  ;;  %3687 = vst.msk [vmem:[#allocation4 + $0x68] sm:$0xff] %vm280_vm1, %v3655_v31  ;;  %8660 = vmatmul.mubr.msk.bf16.vlgmr.msra.gmra.mxu0 %vm280_vm1, %v10175_v9  ;;  %v3579_v21 = vpop.f32.mrf.mxu0  ;;  %8692 = vmatpush3.bf16.msra.mxu1 %v4831_v60  ;;  %v3993_v50 = vld [vmem:[#allocation3 + $0x87] sm:$0xff] }
 0x251   : > { %v3720_v5 = vld [vmem:[#allocation4 + $0x70] sm:$0xff]  ;;  %v3793_v28 = vadd.f32 %v10106_v0, %v3754_v13  ;;  %3692 = vst.msk [vmem:[#allocation4 + $0x90] sm:$0xff] %vm280_vm1, %v3660_v17  ;;  %v3658_v34 = vadd.f32 %v3579_v21, %v3412_v19  ;;  %8629 = vmatprep.mubr.msk.bf16.mxu1 %vm280_vm1, %v10177_v12  ;;  %8663 = vmatprep.mubr.msk.bf16.mxu0 %vm280_vm1, %v10196_v22  ;;  %v3991_v63 = vld [vmem:[#allocation3 + $0x67] sm:$0xff] }
 0x252   : > { %3929 = vst.msk [vmem:[#allocation3 + $0xa8] sm:$0xff] %vm280_vm1, %v3824_v7  ;;  %v3827_v26 = vmax.f32 %v3795_v3, 0.0  ;;  %v3759_v29 = vmul.f32 %v10099_v52, %v3720_v5  ;;  %3967 = vst.msk [vmem:[#allocation4 + $0x70] sm:$0xff] %vm280_vm1, %v8964_v2  ;;  %v3718_v38 = vld [vmem:[#allocation4 + $0x60] sm:$0xff]  ;;  %v8610_v40 = vpop.f32.mrf.mxu0  ;;  %8726 = vmatpush3.bf16.msra.mxu0 %v5189_v20  ;;  %v3994_v51 = vld [vmem:[#allocation3 + $0x8f] sm:$0xff]  ;;  %8942 = vmatprep.subr.msk.bf16.mxu1 %vm612_vm0, %v10190_v23 }
 0x253   : > { %v3825_v41 = vmax.f32 %v3793_v28, 0.0  ;;  %v3757_v42 = vmul.f32 %v10099_v52, %v3718_v38  ;;  %3965 = vst.msk [vmem:[#allocation4 + $0x60] sm:$0xff] %vm280_vm1, %v8964_v2  ;;  %3690 = vst.msk [vmem:[#allocation4 + $0x80] sm:$0xff] %vm280_vm1, %v3658_v34  ;;  %v3661_v45 = vadd.f32 %v8610_v40, %v3415_v35  ;;  %v4351_v47 = vld [vmem:[#allocation3 + $0x90] sm:$0xff]  ;;  %8943 = vmatprep.subr.msk.bf16.mxu0 %vm612_vm0, %v10201_v24  ;;  %v4348_v14 = vld [vmem:[#allocation3 + $0x68] sm:$0xff] }
 0x254   : > { %3932 = vst.msk [vmem:[#allocation3 + $0xd0] sm:$0xff] %vm280_vm1, %v3827_v26  ;;  %v3798_v8 = vadd.f32 %v10106_v0, %v3759_v29  ;;  %v3721_v32 = vld [vmem:[#allocation4 + $0x78] sm:$0xff]  ;;  %v3582_v56 = vpop.f32.mrf.mxu0  ;;  %v4350_v1 = vld [vmem:[#allocation3 + $0x88] sm:$0xff]  ;;  %v10233_v25 = vpack.c.bf16 %v3994_v51, %v3993_v50  ;;  %v3416_v16 = vld [vmem:[#allocation4 + $0xa0] sm:$0xff] }
 0x255   : > { %v3992_v53 = vld [vmem:[#allocation3 + $0x6f] sm:$0xff]  ;;  %3930 = vst.msk [vmem:[#allocation3 + $0xb0] sm:$0xff] %vm280_vm1, %v3825_v41  ;;  %v3796_v59 = vadd.f32 %v10106_v0, %v3757_v42  ;;  %v3760_v48 = vmul.f32 %v10099_v52, %v3721_v32  ;;  %3968 = vst.msk [vmem:[#allocation4 + $0x78] sm:$0xff] %vm280_vm1, %v8964_v2  ;;  %v3659_v10 = vadd.f32 %v3582_v56, %v3413_v44 }
 0x256   : > { %v4349_v57 = vld [vmem:[#allocation3 + $0x70] sm:$0xff]  ;;  %v3830_v62 = vmax.f32 %v3798_v8, 0.0  ;;  %3693 = vst.msk [vmem:[#allocation4 + $0x98] sm:$0xff] %vm280_vm1, %v3661_v45  ;;  %v8613_v30 = vpop.f32.mrf.mxu0  ;;  %v10229_v43 = vpack.c.bf16 %v3992_v53, %v3991_v63  ;;  %v10235_v36 = vpack.c.bf16 %v4351_v47, %v4350_v1  ;;  %v3417_v7 = vld [vmem:[#allocation4 + $0xa8] sm:$0xff]  ;;  %v3420_v63 = vld [vmem:[#allocation4 + $0xc0] sm:$0xff] }
 0x257   : > { %v3719_v4 = vld [vmem:[#allocation4 + $0x68] sm:$0xff]  ;;  %v10231_v11 = vpack.c.bf16 %v4349_v57, %v4348_v14  ;;  %v3828_v37 = vmax.f32 %v3796_v59, 0.0  ;;  %v3799_v49 = vadd.f32 %v10106_v0, %v3760_v48  ;;  %3691 = vst.msk [vmem:[#allocation4 + $0x88] sm:$0xff] %vm280_vm1, %v3659_v10  ;;  %v3664_v61 = vadd.f32 %v8613_v30, %v3418_v27  ;;  %v3422_v50 = vld [vmem:[#allocation4 + $0xd0] sm:$0xff] }
 0x258   : > { %3935 = vst.msk [vmem:[#allocation3 + $0x108] sm:$0xff] %vm280_vm1, %v3830_v62  ;;  %v3758_v60 = vmul.f32 %v10099_v52, %v3719_v4  ;;  %3966 = vst.msk [vmem:[#allocation4 + $0x68] sm:$0xff] %vm280_vm1, %v8964_v2  ;;  %v3724_v15 = vld [vmem:[#allocation4 + $0x90] sm:$0xff]  ;;  %8630 = vmatmul.mubr.msk.bf16.gmra.mxu1 %vm280_vm1, %v10229_v43  ;;  %v3595_v31 = vpop.f32.mrf.mxu0  ;;  %v3997_v5 = vld [vmem:[#allocation3 + $0xc7] sm:$0xff] }
 0x259   : > { %8664 = vmatmul.mubr.msk.bf16.gmra.mxu0 %vm280_vm1, %v10231_v11  ;;  %3933 = vst.msk [vmem:[#allocation3 + $0xe8] sm:$0xff] %vm280_vm1, %v3828_v37  ;;  %v3831_v33 = vmax.f32 %v3799_v49, 0.0  ;;  %v3763_v54 = vmul.f32 %v10099_v52, %v3724_v15  ;;  %3971 = vst.msk [vmem:[#allocation4 + $0x90] sm:$0xff] %vm280_vm1, %v8964_v2  ;;  %v3662_v55 = vadd.f32 %v3595_v31, %v3416_v16  ;;  %8633 = vmatprep.mubr.msk.bf16.mxu1 %vm280_vm1, %v10233_v25  ;;  %v3995_v41 = vld [vmem:[#allocation3 + $0xa7] sm:$0xff]  ;;  %v3423_v49 = vld [vmem:[#allocation4 + $0xd8] sm:$0xff] }
 0x25a   : > { %v3797_v46 = vadd.f32 %v10106_v0, %v3758_v60  ;;  %3696 = vst.msk [vmem:[#allocation4 + $0xb0] sm:$0xff] %vm280_vm1, %v3664_v61  ;;  %8667 = vmatprep.mubr.msk.bf16.mxu0 %vm280_vm1, %v10235_v36  ;;  %v3722_v58 = vld [vmem:[#allocation4 + $0x80] sm:$0xff]  ;;  %v8614_v20 = vpop.f32.mrf.mxu0  ;;  %v4352_v8 = vld [vmem:[#allocation3 + $0xa8] sm:$0xff] }
 0x25b   : > { %3936 = vst.msk [vmem:[#allocation3 + $0x110] sm:$0xff] %vm280_vm1, %v3831_v33  ;;  %v3802_v13 = vadd.f32 %v10106_v0, %v3763_v54  ;;  %v3761_v17 = vmul.f32 %v10099_v52, %v3722_v58  ;;  %3969 = vst.msk [vmem:[#allocation4 + $0x80] sm:$0xff] %vm280_vm1, %v8964_v2  ;;  %v3665_v6 = vadd.f32 %v8614_v20, %v3419_v18  ;;  %v3998_v19 = vld [vmem:[#allocation3 + $0xcf] sm:$0xff] }
 0x25c   : > { %v3829_v3 = vmax.f32 %v3797_v46, 0.0  ;;  %3694 = vst.msk [vmem:[#allocation4 + $0xa0] sm:$0xff] %vm280_vm1, %v3662_v55  ;;  %v4355_v21 = vld [vmem:[#allocation3 + $0xd0] sm:$0xff]  ;;  %v3598_v28 = vpop.f32.mrf.mxu0  ;;  %v4354_v42 = vld [vmem:[#allocation3 + $0xc8] sm:$0xff]  ;;  %v10273_v56 = vpack.c.bf16 %v3998_v19, %v3997_v5 }
 0x25d   : > { %v3725_v26 = vld [vmem:[#allocation4 + $0x98] sm:$0xff]  ;;  %v3996_v29 = vld [vmem:[#allocation3 + $0xaf] sm:$0xff]  ;;  %v3834_v38 = vmax.f32 %v3802_v13, 0.0  ;;  %v3800_v35 = vadd.f32 %v10106_v0, %v3761_v17  ;;  %3697 = vst.msk [vmem:[#allocation4 + $0xb8] sm:$0xff] %vm280_vm1, %v3665_v6  ;;  %v3663_v44 = vadd.f32 %v3598_v28, %v3417_v7  ;;  %v10275_v53 = vpack.c.bf16 %v4355_v21, %v4354_v42 }
 0x25e   : > { %v4353_v34 = vld [vmem:[#allocation3 + $0xb0] sm:$0xff]  ;;  %3934 = vst.msk [vmem:[#allocation3 + $0xf0] sm:$0xff] %vm280_vm1, %v3829_v3  ;;  %v3764_v40 = vmul.f32 %v10099_v52, %v3725_v26  ;;  %3972 = vst.msk [vmem:[#allocation4 + $0x98] sm:$0xff] %vm280_vm1, %v8964_v2  ;;  %v3723_v45 = vld [vmem:[#allocation4 + $0x88] sm:$0xff]  ;;  %v8617_v51 = vpop.f32.mrf.mxu0  ;;  %v10269_v47 = vpack.c.bf16 %v3996_v29, %v3995_v41 }
 0x25f   : > { %v10271_v32 = vpack.c.bf16 %v4353_v34, %v4352_v8  ;;  %3939 = vst.msk [vmem:[#allocation3 + $0x148] sm:$0xff] %vm280_vm1, %v3834_v38  ;;  %v3832_v57 = vmax.f32 %v3800_v35, 0.0  ;;  %v3762_v59 = vmul.f32 %v10099_v52, %v3723_v45  ;;  %3970 = vst.msk [vmem:[#allocation4 + $0x88] sm:$0xff] %vm280_vm1, %v8964_v2  ;;  %v3668_v48 = vadd.f32 %v8617_v51, %v3422_v50  ;;  %v3421_v61 = vld [vmem:[#allocation4 + $0xc8] sm:$0xff]  ;;  %v3426_v28 = vld [vmem:[#allocation4 + $0xf0] sm:$0xff] }
 0x260   : > { %v3803_v62 = vadd.f32 %v10106_v0, %v3764_v40  ;;  %3695 = vst.msk [vmem:[#allocation4 + $0xa8] sm:$0xff] %vm280_vm1, %v3663_v44  ;;  %8634 = vmatmul.mubr.msk.bf16.gmra.mxu1 %vm280_vm1, %v10269_v47  ;;  %v3611_v14 = vpop.f32.mrf.mxu0  ;;  %v4001_v46 = vld [vmem:[#allocation3 + $0x107] sm:$0xff] }
 0x261   : > { %v3728_v10 = vld [vmem:[#allocation4 + $0xb0] sm:$0xff]  ;;  %8668 = vmatmul.mubr.msk.bf16.gmra.mxu0 %vm280_vm1, %v10271_v32  ;;  %3937 = vst.msk [vmem:[#allocation3 + $0x128] sm:$0xff] %vm280_vm1, %v3832_v57  ;;  %v3801_v4 = vadd.f32 %v10106_v0, %v3762_v59  ;;  %3700 = vst.msk [vmem:[#allocation4 + $0xd0] sm:$0xff] %vm280_vm1, %v3668_v48  ;;  %v3666_v30 = vadd.f32 %v3611_v14, %v3420_v63  ;;  %8637 = vmatprep.mubr.msk.bf16.mxu1 %vm280_vm1, %v10273_v56  ;;  %v3999_v5 = vld [vmem:[#allocation3 + $0xe7] sm:$0xff] }
 0x262   : > { %v3835_v1 = vmax.f32 %v3803_v62, 0.0  ;;  %v3767_v27 = vmul.f32 %v10099_v52, %v3728_v10  ;;  %3975 = vst.msk [vmem:[#allocation4 + $0xb0] sm:$0xff] %vm280_vm1, %v8964_v2  ;;  %8671 = vmatprep.mubr.msk.bf16.mxu0 %vm280_vm1, %v10275_v53  ;;  %v8618_v60 = vpop.f32.mrf.mxu0  ;;  %v4002_v54 = vld [vmem:[#allocation3 + $0x10f] sm:$0xff]  ;;  %v3424_v50 = vld [vmem:[#allocation4 + $0xe0] sm:$0xff]  ;;  %v3427_v63 = vld [vmem:[#allocation4 + $0xf8] sm:$0xff] }
 0x263   : > { %v3726_v37 = vld [vmem:[#allocation4 + $0xa0] sm:$0xff]  ;;  %v3833_v15 = vmax.f32 %v3801_v4, 0.0  ;;  %3698 = vst.msk [vmem:[#allocation4 + $0xc0] sm:$0xff] %vm280_vm1, %v3666_v30  ;;  %v3669_v33 = vadd.f32 %v8618_v60, %v3423_v49  ;;  %v4359_v55 = vld [vmem:[#allocation3 + $0x110] sm:$0xff]  ;;  %v4356_v19 = vld [vmem:[#allocation3 + $0xe8] sm:$0xff]  ;;  %v10313_v35 = vpack.c.bf16 %v4002_v54, %v4001_v46 }
 0x264   : > { %3940 = vst.msk [vmem:[#allocation3 + $0x150] sm:$0xff] %vm280_vm1, %v3835_v1  ;;  %v3806_v16 = vadd.f32 %v10106_v0, %v3767_v27  ;;  %v3765_v31 = vmul.f32 %v10099_v52, %v3726_v37  ;;  %3973 = vst.msk [vmem:[#allocation4 + $0xa0] sm:$0xff] %vm280_vm1, %v8964_v2  ;;  %v3729_v58 = vld [vmem:[#allocation4 + $0xb8] sm:$0xff]  ;;  %v3614_v18 = vpop.f32.mrf.mxu0  ;;  %v4358_v21 = vld [vmem:[#allocation3 + $0x108] sm:$0xff] }
 0x265   : > { %v4000_v20 = vld [vmem:[#allocation3 + $0xef] sm:$0xff]  ;;  %3938 = vst.msk [vmem:[#allocation3 + $0x130] sm:$0xff] %vm280_vm1, %v3833_v15  ;;  %v3768_v17 = vmul.f32 %v10099_v52, %v3729_v58  ;;  %3976 = vst.msk [vmem:[#allocation4 + $0xb8] sm:$0xff] %vm280_vm1, %v8964_v2  ;;  %v3667_v6 = vadd.f32 %v3614_v18, %v3421_v61  ;;  %v10315_v40 = vpack.c.bf16 %v4359_v55, %v4358_v21 }
 0x266   : > { %v4357_v7 = vld [vmem:[#allocation3 + $0xf0] sm:$0xff]  ;;  %v3838_v3 = vmax.f32 %v3806_v16, 0.0  ;;  %v3804_v13 = vadd.f32 %v10106_v0, %v3765_v31  ;;  %3701 = vst.msk [vmem:[#allocation4 + $0xd8] sm:$0xff] %vm280_vm1, %v3669_v33  ;;  %v8621_v29 = vpop.f32.mrf.mxu0  ;;  %v10309_v34 = vpack.c.bf16 %v4000_v20, %v3999_v5  ;;  %v3425_v37 = vld [vmem:[#allocation4 + $0xe8] sm:$0xff] }
 0x267   : > { %v3727_v26 = vld [vmem:[#allocation4 + $0xa8] sm:$0xff]  ;;  %v10311_v38 = vpack.c.bf16 %v4357_v7, %v4356_v19  ;;  %v3807_v41 = vadd.f32 %v10106_v0, %v3768_v17  ;;  %3699 = vst.msk [vmem:[#allocation4 + $0xc8] sm:$0xff] %vm280_vm1, %v3667_v6  ;;  %v3672_v42 = vadd.f32 %v8621_v29, %v3426_v28 }
 0x268   : > { %3943 = vst.msk [vmem:[#allocation3 + $0x188] sm:$0xff] %vm280_vm1, %v3838_v3  ;;  %v3836_v44 = vmax.f32 %v3804_v13, 0.0  ;;  %v3766_v8 = vmul.f32 %v10099_v52, %v3727_v26  ;;  %3974 = vst.msk [vmem:[#allocation4 + $0xa8] sm:$0xff] %vm280_vm1, %v8964_v2  ;;  %v3732_v45 = vld [vmem:[#allocation4 + $0xd0] sm:$0xff]  ;;  %8638 = vmatmul.mubr.msk.bf16.gmra.mxu1 %vm280_vm1, %v10309_v34  ;;  %v3627_v51 = vpop.f32.mrf.mxu0  ;;  %v4003_v58 = vld [vmem:[#allocation3 + $0x127] sm:$0xff] }
 0x269   : > { %8672 = vmatmul.mubr.msk.bf16.gmra.mxu0 %vm280_vm1, %v10311_v38  ;;  %v3839_v57 = vmax.f32 %v3807_v41, 0.0  ;;  %v3771_v59 = vmul.f32 %v10099_v52, %v3732_v45  ;;  %3979 = vst.msk [vmem:[#allocation4 + $0xd0] sm:$0xff] %vm280_vm1, %v8964_v2  ;;  %3704 = vst.msk [vmem:[#allocation4 + $0xf0] sm:$0xff] %vm280_vm1, %v3672_v42  ;;  %v3670_v48 = vadd.f32 %v3627_v51, %v3424_v50  ;;  %8641 = vmatprep.mubr.msk.bf16.mxu1 %vm280_vm1, %v10313_v35  ;;  %v4360_v18 = vld [vmem:[#allocation3 + $0x128] sm:$0xff] }
 0x26a   : > { %3941 = vst.msk [vmem:[#allocation3 + $0x168] sm:$0xff] %vm280_vm1, %v3836_v44  ;;  %v3805_v62 = vadd.f32 %v10106_v0, %v3766_v8  ;;  %8675 = vmatprep.mubr.msk.bf16.mxu0 %vm280_vm1, %v10315_v40  ;;  %v3730_v10 = vld [vmem:[#allocation4 + $0xc0] sm:$0xff]  ;;  %v8622_v14 = vpop.f32.mrf.mxu0  ;;  %v4362_v6 = vld [vmem:[#allocation3 + $0x148] sm:$0xff] }
 0x26b   : > { %3944 = vst.msk [vmem:[#allocation3 + $0x190] sm:$0xff] %vm280_vm1, %v3839_v57  ;;  %v3810_v4 = vadd.f32 %v10106_v0, %v3771_v59  ;;  %v3769_v27 = vmul.f32 %v10099_v52, %v3730_v10  ;;  %3977 = vst.msk [vmem:[#allocation4 + $0xc0] sm:$0xff] %vm280_vm1, %v8964_v2  ;;  %v3673_v30 = vadd.f32 %v8622_v14, %v3427_v63  ;;  %v4006_v49 = vld [vmem:[#allocation3 + $0x14f] sm:$0xff]  ;;  %v4005_v20 = vld [vmem:[#allocation3 + $0x147] sm:$0xff] }
 0x26c   : > { %v3837_v1 = vmax.f32 %v3805_v62, 0.0  ;;  %3702 = vst.msk [vmem:[#allocation4 + $0xe0] sm:$0xff] %vm280_vm1, %v3670_v48  ;;  %v4363_v60 = vld [vmem:[#allocation3 + $0x150] sm:$0xff]  ;;  %v3630_v15 = vpop.f32.mrf.mxu0  ;;  %v10353_v17 = vpack.c.bf16 %v4006_v49, %v4005_v20 }
 0x26d   : > { %v3733_v61 = vld [vmem:[#allocation4 + $0xd8] sm:$0xff]  ;;  %v4004_v16 = vld [vmem:[#allocation3 + $0x12f] sm:$0xff]  ;;  %v3842_v33 = vmax.f32 %v3810_v4, 0.0  ;;  %v3808_v46 = vadd.f32 %v10106_v0, %v3769_v27  ;;  %3705 = vst.msk [vmem:[#allocation4 + $0xf8] sm:$0xff] %vm280_vm1, %v3673_v30  ;;  %v3671_v55 = vadd.f32 %v3630_v15, %v3425_v37  ;;  %v10361_v26 = vpack.c.bf16 %v4363_v60, %v4362_v6 }
 0x26e   : > { %v4361_v31 = vld [vmem:[#allocation3 + $0x130] sm:$0xff]  ;;  %3942 = vst.msk [vmem:[#allocation3 + $0x170] sm:$0xff] %vm280_vm1, %v3837_v1  ;;  %v3772_v54 = vmul.f32 %v10099_v52, %v3733_v61  ;;  %3980 = vst.msk [vmem:[#allocation4 + $0xd8] sm:$0xff] %vm280_vm1, %v8964_v2  ;;  %v3731_v7 = vld [vmem:[#allocation4 + $0xc8] sm:$0xff]  ;;  %v10349_v3 = vpack.c.bf16 %v4004_v16, %v4003_v58 }
 0x26f   : > { %v10351_v13 = vpack.c.bf16 %v4361_v31, %v4360_v18  ;;  %3947 = vst.msk [vmem:[#allocation3 + $0x1c8] sm:$0xff] %vm280_vm1, %v3842_v33  ;;  %v3840_v5 = vmax.f32 %v3808_v46, 0.0  ;;  %v3770_v21 = vmul.f32 %v10099_v52, %v3731_v7  ;;  %3978 = vst.msk [vmem:[#allocation4 + $0xc8] sm:$0xff] %vm280_vm1, %v8964_v2  ;;  %v4009_v30 = vld [vmem:[#allocation3 + $0x187] sm:$0xff] }
 0x270   : > { %v3811_v19 = vadd.f32 %v10106_v0, %v3772_v54  ;;  %3703 = vst.msk [vmem:[#allocation4 + $0xe8] sm:$0xff] %vm280_vm1, %v3671_v55  ;;  %v3736_v28 = vld [vmem:[#allocation4 + $0xf0] sm:$0xff]  ;;  %8642 = vmatmul.mubr.msk.bf16.gmra.mxu1 %vm280_vm1, %v10349_v3  ;;  %v4366_v61 = vld [vmem:[#allocation3 + $0x188] sm:$0xff] }
 0x271   : > { %8676 = vmatmul.mubr.msk.bf16.gmra.mxu0 %vm280_vm1, %v10351_v13  ;;  %3945 = vst.msk [vmem:[#allocation3 + $0x1a8] sm:$0xff] %vm280_vm1, %v3840_v5  ;;  %v3809_v44 = vadd.f32 %v10106_v0, %v3770_v21  ;;  %v3775_v41 = vmul.f32 %v10099_v52, %v3736_v28  ;;  %3983 = vst.msk [vmem:[#allocation4 + $0xf0] sm:$0xff] %vm280_vm1, %v8964_v2  ;;  %8645 = vmatprep.mubr.msk.bf16.mxu1 %vm280_vm1, %v10353_v17  ;;  %v4007_v51 = vld [vmem:[#allocation3 + $0x167] sm:$0xff] }
 0x272   : > { %v3843_v29 = vmax.f32 %v3811_v19, 0.0  ;;  %8679 = vmatprep.mubr.msk.bf16.mxu0 %vm280_vm1, %v10361_v26  ;;  %v4010_v57 = vld [vmem:[#allocation3 + $0x18f] sm:$0xff] }
 0x273   : > { %v3734_v8 = vld [vmem:[#allocation4 + $0xe0] sm:$0xff]  ;;  %v3841_v42 = vmax.f32 %v3809_v44, 0.0  ;;  %v3814_v45 = vadd.f32 %v10106_v0, %v3775_v41  ;;  %v4367_v62 = vld [vmem:[#allocation3 + $0x190] sm:$0xff]  ;;  %v4364_v27 = vld [vmem:[#allocation3 + $0x168] sm:$0xff]  ;;  %v10390_v60 = vpack.c.bf16 %v4010_v57, %v4009_v30 }
 0x274   : > { %3948 = vst.msk [vmem:[#allocation3 + $0x1d0] sm:$0xff] %vm280_vm1, %v3843_v29  ;;  %v3773_v50 = vmul.f32 %v10099_v52, %v3734_v8  ;;  %3981 = vst.msk [vmem:[#allocation4 + $0xe0] sm:$0xff] %vm280_vm1, %v8964_v2  ;;  %v3737_v59 = vld [vmem:[#allocation4 + $0xf8] sm:$0xff]  ;;  %v10397_v33 = vpack.c.bf16 %v4367_v62, %v4366_v61  ;;  %v4700_v29 = vld [vmem:[#allocation3 + $0x9] sm:$0xff] }
 0x275   : > { %v4008_v48 = vld [vmem:[#allocation3 + $0x16f] sm:$0xff]  ;;  %3946 = vst.msk [vmem:[#allocation3 + $0x1b0] sm:$0xff] %vm280_vm1, %v3841_v42  ;;  %v3846_v63 = vmax.f32 %v3814_v45, 0.0  ;;  %v3776_v1 = vmul.f32 %v10099_v52, %v3737_v59  ;;  %3984 = vst.msk [vmem:[#allocation4 + $0xf8] sm:$0xff] %vm280_vm1, %v8964_v2 }
 0x276   : > { %v4365_v10 = vld [vmem:[#allocation3 + $0x170] sm:$0xff]  ;;  %v3812_v14 = vadd.f32 %v10106_v0, %v3773_v50  ;;  %v10386_v4 = vpack.c.bf16 %v4008_v48, %v4007_v51  ;;  %v4013_v5 = vld [vmem:[#allocation3 + $0x1c7] sm:$0xff] }
 0x277   : > { %v3735_v37 = vld [vmem:[#allocation4 + $0xe8] sm:$0xff]  ;;  %v10388_v49 = vpack.c.bf16 %v4365_v10, %v4364_v27  ;;  %3951 = vst.msk [vmem:[#allocation3 + $0x208] sm:$0xff] %vm280_vm1, %v3846_v63  ;;  %v3815_v16 = vadd.f32 %v10106_v0, %v3776_v1  ;;  %v4701_v44 = vld [vmem:[#allocation3 + $0x11] sm:$0xff]  ;;  %v5905_v27 = vsel %vm612_vm0, %v10201_v24, 0 }
 0x278   : > { %v3844_v15 = vmax.f32 %v3812_v14, 0.0  ;;  %v3774_v31 = vmul.f32 %v10099_v52, %v3735_v37  ;;  %3982 = vst.msk [vmem:[#allocation4 + $0xe8] sm:$0xff] %vm280_vm1, %v8964_v2  ;;  %8646 = vmatmul.mubr.msk.bf16.gmra.mxu1 %vm280_vm1, %v10386_v4  ;;  %v4011_v52 = vld [vmem:[#allocation3 + $0x1a7] sm:$0xff]  ;;  %v4732_v57 = vpack.c.bf16 %v4701_v44, %v4700_v29  ;;  %v4703_v59 = vld [vmem:[#allocation3 + $0x31] sm:$0xff]  ;;  %v5547_v14 = vsel %vm612_vm0, %v10190_v23, 0 }
 0x279   : > { %8680 = vmatmul.mubr.msk.bf16.gmra.mxu0 %vm280_vm1, %v10388_v49  ;;  %v3847_v46 = vmax.f32 %v3815_v16, 0.0  ;;  %8649 = vmatprep.mubr.msk.bf16.mxu1 %vm280_vm1, %v10390_v60  ;;  %v4368_v55 = vld [vmem:[#allocation3 + $0x1a8] sm:$0xff]  ;;  %v4705_v10 = vld [vmem:[#allocation3 + $0x51] sm:$0xff]  ;;  %v10458_v23 = vld [vmem:[%s11158_s4 + $0x1c] sm:$0xf] }
 0x27a   : > { %3949 = vst.msk [vmem:[#allocation3 + $0x1e8] sm:$0xff] %vm280_vm1, %v3844_v15  ;;  %v3813_v54 = vadd.f32 %v10106_v0, %v3774_v31  ;;  %8683 = vmatprep.mubr.msk.bf16.mxu0 %vm280_vm1, %v10397_v33  ;;  %v4370_v19 = vld [vmem:[#allocation3 + $0x1c8] sm:$0xff]  ;;  %v4709_v37 = vld [vmem:[#allocation3 + $0x91] sm:$0xff] }
 0x27b   : > { %3952 = vst.msk [vmem:[#allocation3 + $0x210] sm:$0xff] %vm280_vm1, %v3847_v46  ;;  %v4014_v58 = vld [vmem:[#allocation3 + $0x1cf] sm:$0xff] }
 0x27c   : > { %v3845_v2 = vmax.f32 %v3813_v54, 0.0  ;;  %v4012_v18 = vld [vmem:[#allocation3 + $0x1af] sm:$0xff]  ;;  %v10415_v21 = vpack.c.bf16 %v4014_v58, %v4013_v5 }
 0x27d   : > { %v4369_v20 = vld [vmem:[#allocation3 + $0x1b0] sm:$0xff]  ;;  %v10411_v6 = vpack.c.bf16 %v4012_v18, %v4011_v52 }
 0x27e   : > { %v4371_v7 = vld [vmem:[#allocation3 + $0x1d0] sm:$0xff]  ;;  %3950 = vst.msk [vmem:[#allocation3 + $0x1f0] sm:$0xff] %vm280_vm1, %v3845_v2  ;;  %v10413_v0 = vpack.c.bf16 %v4369_v20, %v4368_v55 }
 0x27f   : > { %v10417_v28 = vpack.c.bf16 %v4371_v7, %v4370_v19  ;;  %v4702_v62 = vld [vmem:[#allocation3 + $0x29] sm:$0xff]  ;;  %v4711_v31 = vld [vmem:[#allocation3 + $0xb1] sm:$0xff] }
 0x280   : > { %8650 = vmatmul.mubr.msk.bf16.gmra.mxu1 %vm280_vm1, %v10411_v6  ;;  %v4704_v48 = vld [vmem:[#allocation3 + $0x49] sm:$0xff]  ;;  %v10438_v63 = vpack.c.bf16 %v4703_v59, %v4702_v62  ;;  %v4713_v54 = vld [vmem:[#allocation3 + $0xd1] sm:$0xff] }
 0x281   : > { %8684 = vmatmul.mubr.msk.bf16.gmra.mxu0 %vm280_vm1, %v10413_v0  ;;  %8653 = vmatprep.mubr.msk.bf16.mxu1 %vm280_vm1, %v10415_v21  ;;  %v4015_v41 = vld [vmem:[#allocation3 + $0x1e7] sm:$0xff]  ;;  %v10442_v1 = vpack.c.bf16 %v4705_v10, %v4704_v48  ;;  %v4715_v58 = vld [vmem:[#allocation3 + $0xf1] sm:$0xff] }
 0x282   : > { %8687 = vmatprep.mubr.msk.bf16.mxu0 %vm280_vm1, %v10417_v28  ;;  %v4372_v42 = vld [vmem:[#allocation3 + $0x1e8] sm:$0xff]  ;;  %v4717_v20 = vld [vmem:[#allocation3 + $0x111] sm:$0xff] }
 0x283   : > { %v4706_v24 = vld [vmem:[#allocation3 + $0x69] sm:$0xff]  ;;  %v4719_v29 = vld [vmem:[#allocation3 + $0x131] sm:$0xff] }
 0x284   : > { %v4708_v30 = vld [vmem:[#allocation3 + $0x89] sm:$0xff]  ;;  %v4725_v59 = vld [vmem:[#allocation3 + $0x191] sm:$0xff] }
 0x285   : > { %v4016_v8 = vld [vmem:[#allocation3 + $0x1ef] sm:$0xff]  ;;  %v10470_v15 = vpack.c.bf16 %v4709_v37, %v4708_v30 }
 0x286   : > { %v4373_v45 = vld [vmem:[#allocation3 + $0x1f0] sm:$0xff]  ;;  %v10427_v50 = vpack.c.bf16 %v4016_v8, %v4015_v41 }
 0x287   : > { %v10429_v51 = vpack.c.bf16 %v4373_v45, %v4372_v42  ;;  %v4710_v16 = vld [vmem:[#allocation3 + $0xa9] sm:$0xff]  ;;  %v4721_v41 = vld [vmem:[#allocation3 + $0x151] sm:$0xff] }
 0x288   : > { %8654 = vmatmul.mubr.msk.bf16.gmra.mxu1 %vm280_vm1, %v10427_v50  ;;  %v4712_v46 = vld [vmem:[#allocation3 + $0xc9] sm:$0xff]  ;;  %v10480_v2 = vpack.c.bf16 %v4711_v31, %v4710_v16  ;;  %v4731_v37 = vld [vmem:[#allocation3 + $0x1f1] sm:$0xff] }
 0x289   : > { %8688 = vmatmul.mubr.msk.bf16.gmra.mxu0 %vm280_vm1, %v10429_v51  ;;  %8693 = vmatprep.mubr.msk.bf16.mxu1 %vm280_vm1, %v4732_v57  ;;  %v10482_v52 = vpack.c.bf16 %v4713_v54, %v4712_v46  ;;  %v4714_v55 = vld [vmem:[#allocation3 + $0xe9] sm:$0xff]  ;;  %v4723_v57 = vld [vmem:[#allocation3 + $0x171] sm:$0xff]  ;;  %v7830_v54 = vld [vmem:[%s11158_s4 + $0x20] sm:$0xf] }
 0x28a   : > { %8727 = vmatprep.mubr.msk.bf16.mxu0 %vm280_vm1, %v10173_v39  ;;  %v10453_v39 = vld [vmem:[%s11158_s4 + $0x18] sm:$0xf]  ;;  %v4716_v18 = vld [vmem:[#allocation3 + $0x109] sm:$0xff]  ;;  %v10492_v7 = vpack.c.bf16 %v4715_v58, %v4714_v55  ;;  %v4033_v58 = vld [vmem:[#allocation4] sm:$0xff] }
 0x28b   : > { %v10494_v5 = vpack.c.bf16 %v4717_v20, %v4716_v18  ;;  %v4718_v19 = vld [vmem:[#allocation3 + $0x129] sm:$0xff] }
 0x28c   : > { %v4720_v44 = vld [vmem:[#allocation3 + $0x149] sm:$0xff]  ;;  %v4741_v8 = vpack.c.bf16 %v4719_v29, %v4718_v19 }
 0x28d   : > { %v4742_v42 = vpack.c.bf16 %v4721_v41, %v4720_v44  ;;  %v4722_v45 = vld [vmem:[#allocation3 + $0x169] sm:$0xff] }
 0x28e   : > { %v4724_v62 = vld [vmem:[#allocation3 + $0x189] sm:$0xff]  ;;  %v4743_v48 = vpack.c.bf16 %v4723_v57, %v4722_v45  ;;  %v4037_v57 = vld [vmem:[#allocation4 + $0x20] sm:$0xff] }
 0x28f   : > { %v4744_v10 = vpack.c.bf16 %v4725_v59, %v4724_v62  ;;  %v5089_v16 = vld [vmem:[#allocation3 + $0x20f] sm:$0xff] }
 0x290   : > { %8694 = vmatmul.mubr.msk.bf16.vlgmr.msra.gmra.mxu1 %vm280_vm1, %v10438_v63  ;;  %v4034_v44 = vld [vmem:[#allocation4 + $0x8] sm:$0xff] }
 0x291   : > { %8728 = vmatmul.mubr.msk.bf16.vlgmr.msra.gmra.mxu0 %vm280_vm1, %v10177_v12  ;;  %8760 = vmatpush3.bf16.msra.mxu1 %v5547_v14  ;;  %v4707_v12 = vld [vmem:[#allocation3 + $0x71] sm:$0xff]  ;;  %v4726_v14 = vld [vmem:[#allocation3 + $0x1a9] sm:$0xff] }
 0x292   : > { %8697 = vmatprep.mubr.msk.bf16.mxu1 %vm280_vm1, %v10442_v1  ;;  %8731 = vmatprep.mubr.msk.bf16.mxu0 %vm280_vm1, %v10229_v43  ;;  %v10468_v61 = vpack.c.bf16 %v4707_v12, %v4706_v24  ;;  %v4728_v24 = vld [vmem:[#allocation3 + $0x1c9] sm:$0xff] }
 0x293   : > { %8794 = vmatpush3.bf16.msra.mxu0 %v5905_v27  ;;  %8944 = vmatprep.subr.msk.bf16.mxu1 %vm612_vm0, %v10453_v39  ;;  %v4727_v27 = vld [vmem:[#allocation3 + $0x1b1] sm:$0xff] }
 0x294   : > { %8945 = vmatprep.subr.msk.bf16.mxu0 %vm612_vm0, %v10458_v23  ;;  %v4745_v12 = vpack.c.bf16 %v4727_v27, %v4726_v14  ;;  %v4040_v14 = vld [vmem:[#allocation4 + $0x38] sm:$0xff] }
 0x298   : > { %8698 = vmatmul.mubr.msk.bf16.gmra.mxu1 %vm280_vm1, %v10468_v61 }
 0x299   : > { %8732 = vmatmul.mubr.msk.bf16.gmra.mxu0 %vm280_vm1, %v10233_v25  ;;  %8701 = vmatprep.mubr.msk.bf16.mxu1 %vm280_vm1, %v10470_v15 }
 0x29a   : > { %8735 = vmatprep.mubr.msk.bf16.mxu0 %vm280_vm1, %v10269_v47 }
 0x2a0   : > { %8702 = vmatmul.mubr.msk.bf16.gmra.mxu1 %vm280_vm1, %v10480_v2 }
 0x2a1   : > { %8736 = vmatmul.mubr.msk.bf16.gmra.mxu0 %vm280_vm1, %v10273_v56  ;;  %8705 = vmatprep.mubr.msk.bf16.mxu1 %vm280_vm1, %v10482_v52 }
 0x2a2   : > { %8739 = vmatprep.mubr.msk.bf16.mxu0 %vm280_vm1, %v10309_v34 }
 0x2a8   : > { %8706 = vmatmul.mubr.msk.bf16.gmra.mxu1 %vm280_vm1, %v10492_v7 }
 0x2a9   : > { %8740 = vmatmul.mubr.msk.bf16.gmra.mxu0 %vm280_vm1, %v10313_v35  ;;  %8709 = vmatprep.mubr.msk.bf16.mxu1 %vm280_vm1, %v10494_v5 }
 0x2aa   : > { %8743 = vmatprep.mubr.msk.bf16.mxu0 %vm280_vm1, %v10349_v3 }
 0x2b0   : > { %8710 = vmatmul.mubr.msk.bf16.gmra.mxu1 %vm280_vm1, %v4741_v8 }
 0x2b1   : > { %8744 = vmatmul.mubr.msk.bf16.gmra.mxu0 %vm280_vm1, %v10353_v17  ;;  %8713 = vmatprep.mubr.msk.bf16.mxu1 %vm280_vm1, %v4742_v42 }
 0x2b2   : > { %8747 = vmatprep.mubr.msk.bf16.mxu0 %vm280_vm1, %v10386_v4  ;;  %v4729_v4 = vld [vmem:[#allocation3 + $0x1d1] sm:$0xff] }
 0x2b3   : > { %v4746_v30 = vpack.c.bf16 %v4729_v4, %v4728_v24 }
 0x2b8   : > { %8714 = vmatmul.mubr.msk.bf16.gmra.mxu1 %vm280_vm1, %v4743_v48 }
 0x2b9   : > { %8748 = vmatmul.mubr.msk.bf16.gmra.mxu0 %vm280_vm1, %v10390_v60  ;;  %8717 = vmatprep.mubr.msk.bf16.mxu1 %vm280_vm1, %v4744_v10  ;;  %v4730_v60 = vld [vmem:[#allocation3 + $0x1e9] sm:$0xff] }
 0x2ba   : > { %8751 = vmatprep.mubr.msk.bf16.mxu0 %vm280_vm1, %v10411_v6  ;;  %v5088_v6 = vld [vmem:[#allocation3 + $0x207] sm:$0xff]  ;;  %v4747_v31 = vpack.c.bf16 %v4731_v37, %v4730_v60 }
 0x2bb   : > { %v10522_v46 = vpack.c.bf16 %v5089_v16, %v5088_v6  ;;  %v4043_v16 = vld [vmem:[#allocation4 + $0x50] sm:$0xff] }
 0x2c0   : > { %8718 = vmatmul.mubr.msk.bf16.gmra.mxu1 %vm280_vm1, %v4745_v12 }
 0x2c1   : > { %8752 = vmatmul.mubr.msk.bf16.gmra.mxu0 %vm280_vm1, %v10415_v21  ;;  %8721 = vmatprep.mubr.msk.bf16.mxu1 %vm280_vm1, %v4746_v30  ;;  %v6264_v21 = vsel %vm612_vm0, %v10453_v39, 0 }
 0x2c2   : > { %8755 = vmatprep.mubr.msk.bf16.mxu0 %vm280_vm1, %v10427_v50  ;;  %v6622_v50 = vsel %vm612_vm0, %v10458_v23, 0  ;;  %v6133_v23 = vld [vmem:[#allocation3 + $0x47] sm:$0xff] }
 0x2c8   : > { %8722 = vmatmul.mubr.msk.bf16.gmra.mxu1 %vm280_vm1, %v4747_v31 }
 0x2c9   : > { %8756 = vmatmul.mubr.msk.bf16.gmra.mxu0 %vm280_vm1, %v10522_v46  ;;  %8761 = vmatprep.mubr.msk.bf16.mxu1 %vm280_vm1, %v10175_v9  ;;  %v5447_v9 = vld [vmem:[#allocation3 + $0x210] sm:$0xff] }
 0x2ca   : > { %8795 = vmatprep.mubr.msk.bf16.mxu0 %vm280_vm1, %v10438_v63  ;;  %v6492_v63 = vld [vmem:[#allocation3 + $0x50] sm:$0xff] }
 0x2d0   : > { %8762 = vmatmul.mubr.msk.bf16.vlgmr.msra.gmra.mxu1 %vm280_vm1, %v10196_v22  ;;  %v5804_v22 = vld [vmem:[#allocation3 + $0x209] sm:$0xff] }
 0x2d1   : > { %8796 = vmatmul.mubr.msk.bf16.vlgmr.msra.gmra.mxu0 %vm280_vm1, %v10442_v1  ;;  %8828 = vmatpush3.bf16.msra.mxu1 %v6264_v21  ;;  %v5446_v1 = vld [vmem:[#allocation3 + $0x208] sm:$0xff] }
 0x2d2   : > { %8765 = vmatprep.mubr.msk.bf16.mxu1 %vm280_vm1, %v10231_v11  ;;  %8799 = vmatprep.mubr.msk.bf16.mxu0 %vm280_vm1, %v10468_v61  ;;  %v10588_v39 = vpack.c.bf16 %v5447_v9, %v5446_v1  ;;  %v6491_v61 = vld [vmem:[#allocation3 + $0x48] sm:$0xff]  ;;  %v4041_v9 = vld [vmem:[#allocation4 + $0x40] sm:$0xff] }
 0x2d3   : > { %8862 = vmatpush3.bf16.msra.mxu0 %v6622_v50  ;;  %8946 = vmatprep.subr.msk.bf16.mxu1 %vm612_vm0, %v7830_v54 }
 0x2d8   : > { %8766 = vmatmul.mubr.msk.bf16.gmra.mxu1 %vm280_vm1, %v10235_v36 }
 0x2d9   : > { %8800 = vmatmul.mubr.msk.bf16.gmra.mxu0 %vm280_vm1, %v10470_v15  ;;  %8769 = vmatprep.mubr.msk.bf16.mxu1 %vm280_vm1, %v10271_v32 }
 0x2da   : > { %8803 = vmatprep.mubr.msk.bf16.mxu0 %vm280_vm1, %v10480_v2  ;;  %v6980_v2 = vsel %vm612_vm0, %v7830_v54, 0 }
 0x2e0   : > { %8770 = vmatmul.mubr.msk.bf16.gmra.mxu1 %vm280_vm1, %v10275_v53 }
 0x2e1   : > { %8804 = vmatmul.mubr.msk.bf16.gmra.mxu0 %vm280_vm1, %v10482_v52  ;;  %8773 = vmatprep.mubr.msk.bf16.mxu1 %vm280_vm1, %v10311_v38 }
 0x2e2   : > { %8807 = vmatprep.mubr.msk.bf16.mxu0 %vm280_vm1, %v10492_v7 }
 0x2e8   : > { %8774 = vmatmul.mubr.msk.bf16.gmra.mxu1 %vm280_vm1, %v10315_v40 }
 0x2e9   : > { %8808 = vmatmul.mubr.msk.bf16.gmra.mxu0 %vm280_vm1, %v10494_v5  ;;  %8777 = vmatprep.mubr.msk.bf16.mxu1 %vm280_vm1, %v10351_v13  ;;  %v4036_v5 = vld [vmem:[#allocation4 + $0x18] sm:$0xff] }
 0x2ea   : > { %8811 = vmatprep.mubr.msk.bf16.mxu0 %vm280_vm1, %v4741_v8 }
 0x2f0   : > { %8778 = vmatmul.mubr.msk.bf16.gmra.mxu1 %vm280_vm1, %v10361_v26 }
 0x2f1   : > { %8812 = vmatmul.mubr.msk.bf16.gmra.mxu0 %vm280_vm1, %v4742_v42  ;;  %8781 = vmatprep.mubr.msk.bf16.mxu1 %vm280_vm1, %v10388_v49  ;;  %v5805_v49 = vld [vmem:[#allocation3 + $0x211] sm:$0xff] }
 0x2f2   : > { %8815 = vmatprep.mubr.msk.bf16.mxu0 %vm280_vm1, %v4743_v48  ;;  %v4039_v42 = vld [vmem:[#allocation4 + $0x30] sm:$0xff] }
 0x2f8   : > { %8782 = vmatmul.mubr.msk.bf16.gmra.mxu1 %vm280_vm1, %v10397_v33  ;;  %v6134_v33 = vld [vmem:[#allocation3 + $0x4f] sm:$0xff] }
 0x2f9   : > { %8816 = vmatmul.mubr.msk.bf16.gmra.mxu0 %vm280_vm1, %v4744_v10  ;;  %8785 = vmatprep.mubr.msk.bf16.mxu1 %vm280_vm1, %v10413_v0  ;;  %v5821_v0 = vpack.c.bf16 %v5805_v49, %v5804_v22  ;;  %v6165_v15 = vpack.c.bf16 %v6134_v33, %v6133_v23 }
 0x2fa   : > { %8819 = vmatprep.mubr.msk.bf16.mxu0 %vm280_vm1, %v4745_v12  ;;  %v4038_v12 = vld [vmem:[#allocation4 + $0x28] sm:$0xff] }
 0x300   : > { %8786 = vmatmul.mubr.msk.bf16.gmra.mxu1 %vm280_vm1, %v10417_v28  ;;  %v6523_v28 = vpack.c.bf16 %v6492_v63, %v6491_v61 }
 0x301   : > { %8820 = vmatmul.mubr.msk.bf16.gmra.mxu0 %vm280_vm1, %v4746_v30  ;;  %8789 = vmatprep.mubr.msk.bf16.mxu1 %vm280_vm1, %v10429_v51  ;;  %v4035_v51 = vld [vmem:[#allocation4 + $0x10] sm:$0xff] }
 0x302   : > { %8823 = vmatprep.mubr.msk.bf16.mxu0 %vm280_vm1, %v4747_v31 }
 0x308   : > { %8790 = vmatmul.mubr.msk.bf16.gmra.mxu1 %vm280_vm1, %v10588_v39 }
 0x309   : > { %8824 = vmatmul.mubr.msk.bf16.gmra.mxu0 %vm280_vm1, %v5821_v0  ;;  %8829 = vmatprep.mubr.msk.bf16.mxu1 %vm280_vm1, %v6165_v15 }
 0x30a   : > { %8863 = vmatprep.mubr.msk.bf16.mxu0 %vm280_vm1, %v6523_v28  ;;  %v4042_v28 = vld [vmem:[#allocation4 + $0x48] sm:$0xff] }
 0x30f   : > { %v8627_v52 = vpop.f32.mrf.mxu1 }
 0x310   : > { %v8661_v55 = vpop.f32.mrf.mxu0  ;;  %8830 = vmatmul.mubr.msk.bf16.vlgmr.msra.gmra.mxu1 %vm280_vm1, %v10229_v43  ;;  %v4280_v18 = vadd.f32 %v8627_v52, %v4035_v51 }
 0x311   : > { %8864 = vmatmul.mubr.msk.bf16.vlgmr.msra.gmra.mxu0 %vm280_vm1, %v10231_v11  ;;  %8896 = vmatpush3.bf16.msra.mxu1 %v6980_v2  ;;  %v4151_v20 = vpop.f32.mrf.mxu1 }
 0x312   : > { %8833 = vmatprep.mubr.msk.bf16.mxu1 %vm280_vm1, %v10233_v25  ;;  %8867 = vmatprep.mubr.msk.bf16.mxu0 %vm280_vm1, %v10235_v36  ;;  %v4509_v7 = vpop.f32.mrf.mxu0  ;;  %4312 = vst.msk [vmem:[#allocation4 + $0x10] sm:$0xff] %vm280_vm1, %v4280_v18  ;;  %v4278_v19 = vadd.f32 %v4151_v20, %v4033_v58 }
 0x313   : > { %v8628_v29 = vpop.f32.mrf.mxu1 }
 0x314   : > { %v8662_v43 = vpop.f32.mrf.mxu0  ;;  %4310 = vst.msk [vmem:[#allocation4] sm:$0xff] %vm280_vm1, %v4278_v19  ;;  %v4281_v11 = vadd.f32 %v8628_v29, %v4036_v5  ;;  %v4045_v19 = vld [vmem:[#allocation4 + $0x60] sm:$0xff] }
 0x315   : > { %v4154_v41 = vpop.f32.mrf.mxu1 }
 0x316   : > { %v4512_v8 = vpop.f32.mrf.mxu0  ;;  %4313 = vst.msk [vmem:[#allocation4 + $0x18] sm:$0xff] %vm280_vm1, %v4281_v11  ;;  %v4279_v25 = vadd.f32 %v4154_v41, %v4034_v44 }
 0x318   : > { %v8631_v45 = vpop.f32.mrf.mxu1  ;;  %8834 = vmatmul.mubr.msk.bf16.gmra.mxu1 %vm280_vm1, %v10269_v47  ;;  %4311 = vst.msk [vmem:[#allocation4 + $0x8] sm:$0xff] %vm280_vm1, %v4279_v25  ;;  %v6510_v25 = vld [vmem:[#allocation3 + $0x170] sm:$0xff] }
 0x319   : > { %v8665_v36 = vpop.f32.mrf.mxu0  ;;  %8868 = vmatmul.mubr.msk.bf16.gmra.mxu0 %vm280_vm1, %v10271_v32  ;;  %v4284_v62 = vadd.f32 %v8631_v45, %v4039_v42  ;;  %8837 = vmatprep.mubr.msk.bf16.mxu1 %vm280_vm1, %v10273_v56  ;;  %v4392_v59 = vld [vmem:[#allocation4 + $0x10] sm:$0xff] }
 0x31a   : > { %8871 = vmatprep.mubr.msk.bf16.mxu0 %vm280_vm1, %v10275_v53  ;;  %v4167_v48 = vpop.f32.mrf.mxu1  ;;  %v4638_v27 = vadd.f32 %v8661_v55, %v4392_v59  ;;  %v4047_v55 = vld [vmem:[#allocation4 + $0x70] sm:$0xff] }
 0x31b   : > { %v4525_v10 = vpop.f32.mrf.mxu0  ;;  %4316 = vst.msk [vmem:[#allocation4 + $0x30] sm:$0xff] %vm280_vm1, %v4284_v62  ;;  %v4282_v47 = vadd.f32 %v4167_v48, %v4037_v57  ;;  %v4390_v24 = vld [vmem:[#allocation4] sm:$0xff]  ;;  %v6152_v42 = vld [vmem:[#allocation3 + $0x16f] sm:$0xff] }
 0x31c   : > { %v8632_v32 = vpop.f32.mrf.mxu1  ;;  %4670 = vst.msk [vmem:[#allocation4 + $0x10] sm:$0xff] %vm280_vm1, %v4638_v27  ;;  %v4636_v30 = vadd.f32 %v4509_v7, %v4390_v24  ;;  %v6154_v45 = vld [vmem:[#allocation3 + $0x18f] sm:$0xff]  ;;  %v6153_v27 = vld [vmem:[#allocation3 + $0x187] sm:$0xff] }
 0x31d   : > { %v8666_v4 = vpop.f32.mrf.mxu0  ;;  %4314 = vst.msk [vmem:[#allocation4 + $0x20] sm:$0xff] %vm280_vm1, %v4282_v47  ;;  %v4285_v56 = vadd.f32 %v8632_v32, %v4040_v14  ;;  %v4393_v60 = vld [vmem:[#allocation4 + $0x18] sm:$0xff]  ;;  %v4046_v62 = vld [vmem:[#allocation4 + $0x68] sm:$0xff] }
 0x31e   : > { %v4170_v53 = vpop.f32.mrf.mxu1  ;;  %4668 = vst.msk [vmem:[#allocation4] sm:$0xff] %vm280_vm1, %v4636_v30  ;;  %v4639_v6 = vadd.f32 %v8662_v43, %v4393_v60  ;;  %v6509_v14 = vld [vmem:[#allocation3 + $0x168] sm:$0xff] }
 0x31f   : > { %v4528_v37 = vpop.f32.mrf.mxu0  ;;  %4317 = vst.msk [vmem:[#allocation4 + $0x38] sm:$0xff] %vm280_vm1, %v4285_v56  ;;  %v4283_v31 = vadd.f32 %v4170_v53, %v4038_v12  ;;  %v4391_v21 = vld [vmem:[#allocation4 + $0x8] sm:$0xff]  ;;  %v6532_v30 = vpack.c.bf16 %v6510_v25, %v6509_v14  ;;  %v4053_v25 = vld [vmem:[#allocation4 + $0xa0] sm:$0xff]  ;;  %v6518_v14 = vld [vmem:[#allocation3 + $0x1f0] sm:$0xff] }
 0x320   : > { %v8635_v50 = vpop.f32.mrf.mxu1  ;;  %8838 = vmatmul.mubr.msk.bf16.gmra.mxu1 %vm280_vm1, %v10309_v34  ;;  %4671 = vst.msk [vmem:[#allocation4 + $0x18] sm:$0xff] %vm280_vm1, %v4639_v6  ;;  %v4637_v22 = vadd.f32 %v4512_v8, %v4391_v21  ;;  %v4044_v34 = vld [vmem:[#allocation4 + $0x58] sm:$0xff]  ;;  %v6511_v56 = vld [vmem:[#allocation3 + $0x188] sm:$0xff] }
 0x321   : > { %v8669_v54 = vpop.f32.mrf.mxu0  ;;  %8872 = vmatmul.mubr.msk.bf16.gmra.mxu0 %vm280_vm1, %v10311_v38  ;;  %4315 = vst.msk [vmem:[#allocation4 + $0x28] sm:$0xff] %vm280_vm1, %v4283_v31  ;;  %v4288_v49 = vadd.f32 %v8635_v50, %v4043_v16  ;;  %8841 = vmatprep.mubr.msk.bf16.mxu1 %vm280_vm1, %v10313_v35  ;;  %v4049_v50 = vld [vmem:[#allocation4 + $0x80] sm:$0xff] }
 0x322   : > { %8875 = vmatprep.mubr.msk.bf16.mxu0 %vm280_vm1, %v10315_v40  ;;  %v4396_v33 = vld [vmem:[#allocation4 + $0x30] sm:$0xff]  ;;  %v4183_v63 = vpop.f32.mrf.mxu1  ;;  %4669 = vst.msk [vmem:[#allocation4 + $0x8] sm:$0xff] %vm280_vm1, %v4637_v22 }
 0x323   : > { %v4541_v1 = vpop.f32.mrf.mxu0  ;;  %v4642_v38 = vadd.f32 %v8665_v36, %v4396_v33  ;;  %4320 = vst.msk [vmem:[#allocation4 + $0x50] sm:$0xff] %vm280_vm1, %v4288_v49  ;;  %v4286_v0 = vadd.f32 %v4183_v63, %v4041_v9  ;;  %v4052_v63 = vld [vmem:[#allocation4 + $0x98] sm:$0xff] }
 0x324   : > { %v4394_v23 = vld [vmem:[#allocation4 + $0x20] sm:$0xff]  ;;  %v8636_v61 = vpop.f32.mrf.mxu1 }
 0x325   : > { %v8670_v15 = vpop.f32.mrf.mxu0  ;;  %4674 = vst.msk [vmem:[#allocation4 + $0x30] sm:$0xff] %vm280_vm1, %v4642_v38  ;;  %v4640_v35 = vadd.f32 %v4525_v10, %v4394_v23  ;;  %4318 = vst.msk [vmem:[#allocation4 + $0x40] sm:$0xff] %vm280_vm1, %v4286_v0  ;;  %v4289_v40 = vadd.f32 %v8636_v61, %v4044_v34  ;;  %v6151_v10 = vld [vmem:[#allocation3 + $0x167] sm:$0xff]  ;;  %v6156_v38 = vld [vmem:[#allocation3 + $0x1af] sm:$0xff] }
 0x326   : > { %v4397_v51 = vld [vmem:[#allocation4 + $0x38] sm:$0xff]  ;;  %v4186_v2 = vpop.f32.mrf.mxu1  ;;  %v6174_v12 = vpack.c.bf16 %v6152_v42, %v6151_v10  ;;  %v6514_v0 = vld [vmem:[#allocation3 + $0x1b0] sm:$0xff] }
 0x327   : > { %v4544_v52 = vpop.f32.mrf.mxu0  ;;  %4672 = vst.msk [vmem:[#allocation4 + $0x20] sm:$0xff] %vm280_vm1, %v4640_v35  ;;  %v4643_v58 = vadd.f32 %v8666_v4, %v4397_v51  ;;  %4321 = vst.msk [vmem:[#allocation4 + $0x58] sm:$0xff] %vm280_vm1, %v4289_v40  ;;  %v4287_v18 = vadd.f32 %v4186_v2, %v4042_v28  ;;  %v4051_v4 = vld [vmem:[#allocation4 + $0x90] sm:$0xff]  ;;  %v4050_v35 = vld [vmem:[#allocation4 + $0x88] sm:$0xff] }
 0x328   : > { %v4395_v20 = vld [vmem:[#allocation4 + $0x28] sm:$0xff]  ;;  %v8639_v7 = vpop.f32.mrf.mxu1  ;;  %8842 = vmatmul.mubr.msk.bf16.gmra.mxu1 %vm280_vm1, %v10349_v3  ;;  %v4048_v3 = vld [vmem:[#allocation4 + $0x78] sm:$0xff]  ;;  %v6516_v40 = vld [vmem:[#allocation3 + $0x1d0] sm:$0xff] }
 0x329   : > { %v10637_v5 = vpop.f32.mrf.mxu0  ;;  %8876 = vmatmul.mubr.msk.bf16.gmra.mxu0 %vm280_vm1, %v10351_v13  ;;  %4675 = vst.msk [vmem:[#allocation4 + $0x38] sm:$0xff] %vm280_vm1, %v4643_v58  ;;  %v4641_v29 = vadd.f32 %v4528_v37, %v4395_v20  ;;  %4319 = vst.msk [vmem:[#allocation4 + $0x48] sm:$0xff] %vm280_vm1, %v4287_v18  ;;  %v4292_v43 = vadd.f32 %v8639_v7, %v4047_v55  ;;  %8845 = vmatprep.mubr.msk.bf16.mxu1 %vm280_vm1, %v10353_v17  ;;  %v6158_v23 = vld [vmem:[#allocation3 + $0x1cf] sm:$0xff]  ;;  %v6157_v58 = vld [vmem:[#allocation3 + $0x1c7] sm:$0xff] }
 0x32a   : > { %8879 = vmatprep.mubr.msk.bf16.mxu0 %vm280_vm1, %v10361_v26  ;;  %v4400_v44 = vld [vmem:[#allocation4 + $0x50] sm:$0xff]  ;;  %v4199_v11 = vpop.f32.mrf.mxu1  ;;  %v6175_v37 = vpack.c.bf16 %v6154_v45, %v6153_v27  ;;  %v6513_v55 = vld [vmem:[#allocation3 + $0x1a8] sm:$0xff] }
 0x32b   : > { %v10649_v41 = vpop.f32.mrf.mxu0  ;;  %4673 = vst.msk [vmem:[#allocation4 + $0x28] sm:$0xff] %vm280_vm1, %v4641_v29  ;;  %v4646_v13 = vadd.f32 %v8669_v54, %v4400_v44  ;;  %4324 = vst.msk [vmem:[#allocation4 + $0x70] sm:$0xff] %vm280_vm1, %v4292_v43  ;;  %v4290_v8 = vadd.f32 %v4199_v11, %v4045_v19  ;;  %v6512_v26 = vld [vmem:[#allocation3 + $0x190] sm:$0xff]  ;;  %v6534_v29 = vpack.c.bf16 %v6514_v0, %v6513_v55  ;;  %v6515_v43 = vld [vmem:[#allocation3 + $0x1c8] sm:$0xff] }
 0x32c   : > { %v4398_v36 = vld [vmem:[#allocation4 + $0x40] sm:$0xff]  ;;  %v8640_v57 = vpop.f32.mrf.mxu1  ;;  %v6533_v16 = vpack.c.bf16 %v6512_v26, %v6511_v56  ;;  %v4056_v26 = vld [vmem:[#allocation4 + $0xb8] sm:$0xff]  ;;  %v6160_v10 = vld [vmem:[#allocation3 + $0x1ef] sm:$0xff] }
 0x32d   : > { %v10653_v17 = vpop.f32.mrf.mxu0  ;;  %4678 = vst.msk [vmem:[#allocation4 + $0x50] sm:$0xff] %vm280_vm1, %v4646_v13  ;;  %v4644_v59 = vadd.f32 %v4541_v1, %v4398_v36  ;;  %4322 = vst.msk [vmem:[#allocation4 + $0x60] sm:$0xff] %vm280_vm1, %v4290_v8  ;;  %v4293_v48 = vadd.f32 %v8640_v57, %v4048_v3  ;;  %v6535_v3 = vpack.c.bf16 %v6516_v40, %v6515_v43  ;;  %v6517_v56 = vld [vmem:[#allocation3 + $0x1e8] sm:$0xff]  ;;  %v6522_v0 = vld [vmem:[#allocation3 + $0x230] sm:$0xff] }
 0x32e   : > { %v4401_v47 = vld [vmem:[#allocation4 + $0x58] sm:$0xff]  ;;  %v4202_v24 = vpop.f32.mrf.mxu1  ;;  %v4058_v55 = vld [vmem:[#allocation4 + $0xc8] sm:$0xff]  ;;  %v4063_v43 = vld [vmem:[#allocation4 + $0xf0] sm:$0xff] }
 0x32f   : > { %v10657_v32 = vpop.f32.mrf.mxu0  ;;  %4676 = vst.msk [vmem:[#allocation4 + $0x40] sm:$0xff] %vm280_vm1, %v4644_v59  ;;  %v4647_v60 = vadd.f32 %v8670_v15, %v4401_v47  ;;  %4325 = vst.msk [vmem:[#allocation4 + $0x78] sm:$0xff] %vm280_vm1, %v4293_v48  ;;  %v4291_v53 = vadd.f32 %v4202_v24, %v4046_v62 }
 0x330   : > { %v4399_v6 = vld [vmem:[#allocation4 + $0x48] sm:$0xff]  ;;  %v8643_v31 = vpop.f32.mrf.mxu1  ;;  %8846 = vmatmul.mubr.msk.bf16.gmra.mxu1 %vm280_vm1, %v6174_v12 }
 0x331   : > { %v10661_v21 = vpop.f32.mrf.mxu0  ;;  %8880 = vmatmul.mubr.msk.bf16.gmra.mxu0 %vm280_vm1, %v6532_v30  ;;  %4679 = vst.msk [vmem:[#allocation4 + $0x58] sm:$0xff] %vm280_vm1, %v4647_v60  ;;  %v4645_v54 = vadd.f32 %v4544_v52, %v4399_v6  ;;  %4323 = vst.msk [vmem:[#allocation4 + $0x68] sm:$0xff] %vm280_vm1, %v4291_v53  ;;  %v4296_v9 = vadd.f32 %v8643_v31, %v4051_v4  ;;  %8849 = vmatprep.mubr.msk.bf16.mxu1 %vm280_vm1, %v6175_v37  ;;  %v6155_v52 = vld [vmem:[#allocation3 + $0x1a7] sm:$0xff] }
 0x332   : > { %8883 = vmatprep.mubr.msk.bf16.mxu0 %vm280_vm1, %v6533_v16  ;;  %v4404_v22 = vld [vmem:[#allocation4 + $0x70] sm:$0xff]  ;;  %v4215_v49 = vpop.f32.mrf.mxu1  ;;  %v6176_v19 = vpack.c.bf16 %v6156_v38, %v6155_v52  ;;  %v6159_v30 = vld [vmem:[#allocation3 + $0x1e7] sm:$0xff]  ;;  %v6536_v31 = vpack.c.bf16 %v6518_v14, %v6517_v56 }
 0x333   : > { %v4573_v33 = vpop.f32.mrf.mxu0  ;;  %4677 = vst.msk [vmem:[#allocation4 + $0x48] sm:$0xff] %vm280_vm1, %v4645_v54  ;;  %v4650_v1 = vadd.f32 %v10637_v5, %v4404_v22  ;;  %4328 = vst.msk [vmem:[#allocation4 + $0x90] sm:$0xff] %vm280_vm1, %v4296_v9  ;;  %v4294_v34 = vadd.f32 %v4215_v49, %v4049_v50  ;;  %v4055_v5 = vld [vmem:[#allocation4 + $0xb0] sm:$0xff]  ;;  %v6178_v6 = vpack.c.bf16 %v6160_v10, %v6159_v30  ;;  %v4057_v49 = vld [vmem:[#allocation4 + $0xc0] sm:$0xff] }
 0x334   : > { %v4402_v61 = vld [vmem:[#allocation4 + $0x60] sm:$0xff]  ;;  %v8644_v15 = vpop.f32.mrf.mxu1  ;;  %v4059_v16 = vld [vmem:[#allocation4 + $0xd0] sm:$0xff]  ;;  %v6521_v38 = vld [vmem:[#allocation3 + $0x228] sm:$0xff] }
 0x335   : > { %v8678_v28 = vpop.f32.mrf.mxu0  ;;  %4682 = vst.msk [vmem:[#allocation4 + $0x70] sm:$0xff] %vm280_vm1, %v4650_v1  ;;  %v4648_v51 = vadd.f32 %v10649_v41, %v4402_v61  ;;  %4326 = vst.msk [vmem:[#allocation4 + $0x80] sm:$0xff] %vm280_vm1, %v4294_v34  ;;  %v4297_v2 = vadd.f32 %v8644_v15, %v4052_v63  ;;  %v6177_v41 = vpack.c.bf16 %v6158_v23, %v6157_v58  ;;  %v6164_v34 = vld [vmem:[#allocation3 + $0x22f] sm:$0xff] }
 0x336   : > { %v4405_v18 = vld [vmem:[#allocation4 + $0x78] sm:$0xff]  ;;  %v4218_v20 = vpop.f32.mrf.mxu1  ;;  %v6853_v14 = vld [vmem:[#allocation3 + $0x89] sm:$0xff] }
 0x337   : > { %v4576_v7 = vpop.f32.mrf.mxu0  ;;  %4680 = vst.msk [vmem:[#allocation4 + $0x60] sm:$0xff] %vm280_vm1, %v4648_v51  ;;  %v4651_v44 = vadd.f32 %v10653_v17, %v4405_v18  ;;  %4329 = vst.msk [vmem:[#allocation4 + $0x98] sm:$0xff] %vm280_vm1, %v4297_v2  ;;  %v4295_v11 = vadd.f32 %v4218_v20, %v4050_v35  ;;  %v6849_v51 = vld [vmem:[#allocation3 + $0x49] sm:$0xff]  ;;  %v6538_v18 = vpack.c.bf16 %v6522_v0, %v6521_v38  ;;  %v6852_v10 = vld [vmem:[#allocation3 + $0x71] sm:$0xff] }
 0x338   : > { %v4403_v13 = vld [vmem:[#allocation4 + $0x68] sm:$0xff]  ;;  %v8647_v8 = vpop.f32.mrf.mxu1  ;;  %8850 = vmatmul.mubr.msk.bf16.gmra.mxu1 %vm280_vm1, %v6176_v19 }
 0x339   : > { %v8681_v42 = vpop.f32.mrf.mxu0  ;;  %8884 = vmatmul.mubr.msk.bf16.gmra.mxu0 %vm280_vm1, %v6534_v29  ;;  %4683 = vst.msk [vmem:[#allocation4 + $0x78] sm:$0xff] %vm280_vm1, %v4651_v44  ;;  %v4649_v45 = vadd.f32 %v10657_v32, %v4403_v13  ;;  %4327 = vst.msk [vmem:[#allocation4 + $0x88] sm:$0xff] %vm280_vm1, %v4295_v11  ;;  %v4300_v36 = vadd.f32 %v8647_v8, %v4055_v5  ;;  %8853 = vmatprep.mubr.msk.bf16.mxu1 %vm280_vm1, %v6177_v41  ;;  %v4054_v32 = vld [vmem:[#allocation4 + $0xa8] sm:$0xff] }
 0x33a   : > { %8887 = vmatprep.mubr.msk.bf16.mxu0 %vm280_vm1, %v6535_v3  ;;  %v4408_v57 = vld [vmem:[#allocation4 + $0x90] sm:$0xff]  ;;  %v4231_v17 = vpop.f32.mrf.mxu1 }
 0x33b   : > { %v4589_v62 = vpop.f32.mrf.mxu0  ;;  %4681 = vst.msk [vmem:[#allocation4 + $0x68] sm:$0xff] %vm280_vm1, %v4649_v45  ;;  %v4654_v59 = vadd.f32 %v10661_v21, %v4408_v57  ;;  %4332 = vst.msk [vmem:[#allocation4 + $0xb0] sm:$0xff] %vm280_vm1, %v4300_v36  ;;  %v4298_v48 = vadd.f32 %v4231_v17, %v4053_v25 }
 0x33c   : > { %v4406_v27 = vld [vmem:[#allocation4 + $0x80] sm:$0xff]  ;;  %v8648_v47 = vpop.f32.mrf.mxu1 }
 0x33d   : > { %v8682_v24 = vpop.f32.mrf.mxu0  ;;  %4686 = vst.msk [vmem:[#allocation4 + $0x90] sm:$0xff] %vm280_vm1, %v4654_v59  ;;  %v4652_v4 = vadd.f32 %v4573_v33, %v4406_v27  ;;  %4330 = vst.msk [vmem:[#allocation4 + $0xa0] sm:$0xff] %vm280_vm1, %v4298_v48  ;;  %v4301_v12 = vadd.f32 %v8648_v47, %v4056_v26  ;;  %v6163_v33 = vld [vmem:[#allocation3 + $0x227] sm:$0xff] }
 0x33e   : > { %v4409_v60 = vld [vmem:[#allocation4 + $0x98] sm:$0xff]  ;;  %v4234_v53 = vpop.f32.mrf.mxu1  ;;  %v6180_v58 = vpack.c.bf16 %v6164_v34, %v6163_v33  ;;  %v6851_v48 = vld [vmem:[#allocation3 + $0x69] sm:$0xff] }
 0x33f   : > { %v4592_v37 = vpop.f32.mrf.mxu0  ;;  %4684 = vst.msk [vmem:[#allocation4 + $0x80] sm:$0xff] %vm280_vm1, %v4652_v4  ;;  %v4655_v21 = vadd.f32 %v8678_v28, %v4409_v60  ;;  %4333 = vst.msk [vmem:[#allocation4 + $0xb8] sm:$0xff] %vm280_vm1, %v4301_v12  ;;  %v4299_v50 = vadd.f32 %v4234_v53, %v4054_v32  ;;  %v4060_v28 = vld [vmem:[#allocation4 + $0xd8] sm:$0xff]  ;;  %v4062_v32 = vld [vmem:[#allocation4 + $0xe8] sm:$0xff] }
 0x340   : > { %v4407_v54 = vld [vmem:[#allocation4 + $0x88] sm:$0xff]  ;;  %v8651_v9 = vpop.f32.mrf.mxu1  ;;  %8854 = vmatmul.mubr.msk.bf16.gmra.mxu1 %vm280_vm1, %v6178_v6  ;;  %v6854_v4 = vld [vmem:[#allocation3 + $0x91] sm:$0xff] }
 0x341   : > { %v8685_v22 = vpop.f32.mrf.mxu0  ;;  %8888 = vmatmul.mubr.msk.bf16.gmra.mxu0 %vm280_vm1, %v6536_v31  ;;  %4687 = vst.msk [vmem:[#allocation4 + $0x98] sm:$0xff] %vm280_vm1, %v4655_v21  ;;  %v4653_v63 = vadd.f32 %v4576_v7, %v4407_v54  ;;  %4331 = vst.msk [vmem:[#allocation4 + $0xa8] sm:$0xff] %vm280_vm1, %v4299_v50  ;;  %v4304_v1 = vadd.f32 %v8651_v9, %v4059_v16  ;;  %8857 = vmatprep.mubr.msk.bf16.mxu1 %vm280_vm1, %v10522_v46  ;;  %v4750_v50 = vld [vmem:[#allocation4 + $0x10] sm:$0xff] }
 0x342   : > { %8891 = vmatprep.mubr.msk.bf16.mxu0 %vm280_vm1, %v10588_v39  ;;  %v4412_v23 = vld [vmem:[#allocation4 + $0xb0] sm:$0xff]  ;;  %v4247_v61 = vpop.f32.mrf.mxu1  ;;  %v6883_v31 = vpack.c.bf16 %v6854_v4, %v6853_v14 }
 0x343   : > { %v4605_v15 = vpop.f32.mrf.mxu0  ;;  %4685 = vst.msk [vmem:[#allocation4 + $0x88] sm:$0xff] %vm280_vm1, %v4653_v63  ;;  %v4658_v35 = vadd.f32 %v8681_v42, %v4412_v23  ;;  %4336 = vst.msk [vmem:[#allocation4 + $0xd0] sm:$0xff] %vm280_vm1, %v4304_v1  ;;  %v4302_v40 = vadd.f32 %v4247_v61, %v4057_v49  ;;  %v6850_v39 = vld [vmem:[#allocation3 + $0x51] sm:$0xff]  ;;  %v4061_v42 = vld [vmem:[#allocation4 + $0xe0] sm:$0xff] }
 0x344   : > { %v4410_v2 = vld [vmem:[#allocation4 + $0xa0] sm:$0xff]  ;;  %v8652_v52 = vpop.f32.mrf.mxu1  ;;  %v6881_v41 = vpack.c.bf16 %v6850_v39, %v6849_v51  ;;  %v6855_v23 = vld [vmem:[#allocation3 + $0xa9] sm:$0xff]  ;;  %v6856_v61 = vld [vmem:[#allocation3 + $0xb1] sm:$0xff] }
 0x345   : > { %v8686_v46 = vpop.f32.mrf.mxu0  ;;  %4690 = vst.msk [vmem:[#allocation4 + $0xb0] sm:$0xff] %vm280_vm1, %v4658_v35  ;;  %v4656_v20 = vadd.f32 %v4589_v62, %v4410_v2  ;;  %4334 = vst.msk [vmem:[#allocation4 + $0xc0] sm:$0xff] %vm280_vm1, %v4302_v40  ;;  %v4305_v7 = vadd.f32 %v8652_v52, %v4060_v28  ;;  %v4064_v62 = vld [vmem:[#allocation4 + $0xf8] sm:$0xff]  ;;  %v4748_v63 = vld [vmem:[#allocation4] sm:$0xff] }
 0x346   : > { %v4413_v5 = vld [vmem:[#allocation4 + $0xb8] sm:$0xff]  ;;  %v4250_v19 = vpop.f32.mrf.mxu1 }
 0x347   : > { %v4608_v29 = vpop.f32.mrf.mxu0  ;;  %4688 = vst.msk [vmem:[#allocation4 + $0xa0] sm:$0xff] %vm280_vm1, %v4656_v20  ;;  %v4659_v44 = vadd.f32 %v8682_v24, %v4413_v5  ;;  %4337 = vst.msk [vmem:[#allocation4 + $0xd8] sm:$0xff] %vm280_vm1, %v4305_v7  ;;  %v4303_v11 = vadd.f32 %v4250_v19, %v4058_v55  ;;  %v4751_v35 = vld [vmem:[#allocation4 + $0x18] sm:$0xff]  ;;  %v6884_v20 = vpack.c.bf16 %v6856_v61, %v6855_v23 }
 0x348   : > { %v4411_v3 = vld [vmem:[#allocation4 + $0xa8] sm:$0xff]  ;;  %v8655_v13 = vpop.f32.mrf.mxu1  ;;  %8858 = vmatmul.mubr.msk.bf16.gmra.mxu1 %vm280_vm1, %v6180_v58  ;;  %v6858_v2 = vld [vmem:[#allocation3 + $0xd1] sm:$0xff] }
 0x349   : > { %v8689_v8 = vpop.f32.mrf.mxu0  ;;  %8892 = vmatmul.mubr.msk.bf16.gmra.mxu0 %vm280_vm1, %v6538_v18  ;;  %4691 = vst.msk [vmem:[#allocation4 + $0xb8] sm:$0xff] %vm280_vm1, %v4659_v44  ;;  %v4657_v25 = vadd.f32 %v4592_v37, %v4411_v3  ;;  %4335 = vst.msk [vmem:[#allocation4 + $0xc8] sm:$0xff] %vm280_vm1, %v4303_v11  ;;  %v4308_v45 = vadd.f32 %v8655_v13, %v4063_v43  ;;  %8897 = vmatprep.mubr.msk.bf16.mxu1 %vm280_vm1, %v6881_v41  ;;  %v4749_v58 = vld [vmem:[#allocation4 + $0x8] sm:$0xff]  ;;  %v4754_v43 = vld [vmem:[#allocation4 + $0x30] sm:$0xff] }
 0x34a   : > { %v4416_v36 = vld [vmem:[#allocation4 + $0xd0] sm:$0xff]  ;;  %v4263_v57 = vpop.f32.mrf.mxu1  ;;  %v6882_v37 = vpack.c.bf16 %v6852_v10, %v6851_v48  ;;  %v4759_v23 = vld [vmem:[#allocation4 + $0x58] sm:$0xff] }
 0x34b   : > { %v4621_v17 = vpop.f32.mrf.mxu0  ;;  %4689 = vst.msk [vmem:[#allocation4 + $0xa8] sm:$0xff] %vm280_vm1, %v4657_v25  ;;  %v4662_v26 = vadd.f32 %v8685_v22, %v4416_v36  ;;  %4340 = vst.msk [vmem:[#allocation4 + $0xf0] sm:$0xff] %vm280_vm1, %v4308_v45  ;;  %v4306_v59 = vadd.f32 %v4263_v57, %v4061_v42  ;;  %v6859_v57 = vld [vmem:[#allocation3 + $0xe9] sm:$0xff]  ;;  %v6862_v14 = vld [vmem:[#allocation3 + $0x111] sm:$0xff] }
 0x34c   : > { %v4414_v27 = vld [vmem:[#allocation4 + $0xc0] sm:$0xff]  ;;  %v8656_v47 = vpop.f32.mrf.mxu1 }
 0x34d   : > { %v8690_v24 = vpop.f32.mrf.mxu0  ;;  %4694 = vst.msk [vmem:[#allocation4 + $0xd0] sm:$0xff] %vm280_vm1, %v4662_v26  ;;  %v4660_v12 = vadd.f32 %v4605_v15, %v4414_v27  ;;  %4338 = vst.msk [vmem:[#allocation4 + $0xe0] sm:$0xff] %vm280_vm1, %v4306_v59  ;;  %v4309_v30 = vadd.f32 %v8656_v47, %v4064_v62  ;;  %v6857_v15 = vld [vmem:[#allocation3 + $0xc9] sm:$0xff]  ;;  %v4755_v59 = vld [vmem:[#allocation4 + $0x38] sm:$0xff] }
 0x34e   : > { %v4417_v56 = vld [vmem:[#allocation4 + $0xd8] sm:$0xff]  ;;  %v4266_v60 = vpop.f32.mrf.mxu1  ;;  %v6885_v19 = vpack.c.bf16 %v6858_v2, %v6857_v15  ;;  %v6861_v62 = vld [vmem:[#allocation3 + $0x109] sm:$0xff] }
 0x34f   : > { %v4624_v53 = vpop.f32.mrf.mxu0  ;;  %4692 = vst.msk [vmem:[#allocation4 + $0xc0] sm:$0xff] %vm280_vm1, %v4660_v12  ;;  %v4663_v16 = vadd.f32 %v8686_v46, %v4417_v56  ;;  %4341 = vst.msk [vmem:[#allocation4 + $0xf8] sm:$0xff] %vm280_vm1, %v4309_v30  ;;  %v4307_v6 = vadd.f32 %v4266_v60, %v4062_v32  ;;  %v4753_v32 = vld [vmem:[#allocation4 + $0x28] sm:$0xff] }
 0x350   : > { %v4415_v21 = vld [vmem:[#allocation4 + $0xc8] sm:$0xff]  ;;  %v8695_v54 = vpop.f32.mrf.mxu1  ;;  %8898 = vmatmul.mubr.msk.bf16.vlgmr.msra.gmra.mxu1 %vm280_vm1, %v6882_v37 }
 0x351   : > { %v8729_v9 = vpop.f32.mrf.mxu0  ;;  %4695 = vst.msk [vmem:[#allocation4 + $0xd8] sm:$0xff] %vm280_vm1, %v4663_v16  ;;  %v4661_v22 = vadd.f32 %v4608_v29, %v4415_v21  ;;  %4339 = vst.msk [vmem:[#allocation4 + $0xe8] sm:$0xff] %vm280_vm1, %v4307_v6  ;;  %v4996_v49 = vadd.f32 %v8695_v54, %v4750_v50  ;;  %8901 = vmatprep.mubr.msk.bf16.mxu1 %vm280_vm1, %v6883_v31  ;;  %v4758_v16 = vld [vmem:[#allocation4 + $0x50] sm:$0xff]  ;;  %v4757_v2 = vld [vmem:[#allocation4 + $0x48] sm:$0xff] }
 0x352   : > { %v4420_v33 = vld [vmem:[#allocation4 + $0xf0] sm:$0xff]  ;;  %v4867_v1 = vpop.f32.mrf.mxu1 }
 0x353   : > { %v5225_v34 = vpop.f32.mrf.mxu0  ;;  %4693 = vst.msk [vmem:[#allocation4 + $0xc8] sm:$0xff] %vm280_vm1, %v4661_v22  ;;  %v4666_v38 = vadd.f32 %v8689_v8, %v4420_v33  ;;  %5028 = vst.msk [vmem:[#allocation4 + $0x10] sm:$0xff] %vm280_vm1, %v4996_v49  ;;  %v4994_v0 = vadd.f32 %v4867_v1, %v4748_v63  ;;  %v4752_v8 = vld [vmem:[#allocation4 + $0x20] sm:$0xff]  ;;  %v6863_v1 = vld [vmem:[#allocation3 + $0x129] sm:$0xff] }
 0x354   : > { %v4418_v28 = vld [vmem:[#allocation4 + $0xe0] sm:$0xff]  ;;  %v8696_v40 = vpop.f32.mrf.mxu1 }
 0x355   : > { %v8730_v51 = vpop.f32.mrf.mxu0  ;;  %4698 = vst.msk [vmem:[#allocation4 + $0xf0] sm:$0xff] %vm280_vm1, %v4666_v38  ;;  %v4664_v52 = vadd.f32 %v4621_v17, %v4418_v28  ;;  %5026 = vst.msk [vmem:[#allocation4] sm:$0xff] %vm280_vm1, %v4994_v0  ;;  %v4997_v46 = vadd.f32 %v8696_v40, %v4751_v35  ;;  %v6860_v17 = vld [vmem:[#allocation3 + $0xf1] sm:$0xff]  ;;  %v6865_v38 = vld [vmem:[#allocation3 + $0x149] sm:$0xff] }
 0x356   : > { %v4421_v55 = vld [vmem:[#allocation4 + $0xf8] sm:$0xff]  ;;  %v4870_v39 = vpop.f32.mrf.mxu1  ;;  %v6886_v30 = vpack.c.bf16 %v6860_v17, %v6859_v57 }
 0x357   : > { %v5228_v18 = vpop.f32.mrf.mxu0  ;;  %4696 = vst.msk [vmem:[#allocation4 + $0xe0] sm:$0xff] %vm280_vm1, %v4664_v52  ;;  %v4667_v7 = vadd.f32 %v8690_v24, %v4421_v55  ;;  %5029 = vst.msk [vmem:[#allocation4 + $0x18] sm:$0xff] %vm280_vm1, %v4997_v46  ;;  %v4995_v5 = vadd.f32 %v4870_v39, %v4749_v58  ;;  %v6866_v28 = vld [vmem:[#allocation3 + $0x151] sm:$0xff] }
 0x358   : > { %v4419_v29 = vld [vmem:[#allocation4 + $0xe8] sm:$0xff]  ;;  %v8699_v44 = vpop.f32.mrf.mxu1  ;;  %8902 = vmatmul.mubr.msk.bf16.gmra.mxu1 %vm280_vm1, %v6884_v20  ;;  %v4763_v57 = vld [vmem:[#allocation4 + $0x78] sm:$0xff] }
 0x359   : > { %v8733_v11 = vpop.f32.mrf.mxu0  ;;  %4699 = vst.msk [vmem:[#allocation4 + $0xf8] sm:$0xff] %vm280_vm1, %v4667_v7  ;;  %v4665_v41 = vadd.f32 %v4624_v53, %v4419_v29  ;;  %5027 = vst.msk [vmem:[#allocation4 + $0x8] sm:$0xff] %vm280_vm1, %v4995_v5  ;;  %v5000_v3 = vadd.f32 %v8699_v44, %v4754_v43  ;;  %8905 = vmatprep.mubr.msk.bf16.mxu1 %vm280_vm1, %v6885_v19  ;;  %v6887_v53 = vpack.c.bf16 %v6862_v14, %v6861_v62  ;;  %v4762_v7 = vld [vmem:[#allocation4 + $0x70] sm:$0xff]  ;;  %v4761_v14 = vld [vmem:[#allocation4 + $0x68] sm:$0xff] }
 0x35a   : > { %v5108_v13 = vld [vmem:[#allocation4 + $0x10] sm:$0xff]  ;;  %v4883_v42 = vpop.f32.mrf.mxu1 }
 0x35b   : > { %v5241_v25 = vpop.f32.mrf.mxu0  ;;  %4697 = vst.msk [vmem:[#allocation4 + $0xe8] sm:$0xff] %vm280_vm1, %v4665_v41  ;;  %v5354_v45 = vadd.f32 %v8729_v9, %v5108_v13  ;;  %5032 = vst.msk [vmem:[#allocation4 + $0x30] sm:$0xff] %vm280_vm1, %v5000_v3  ;;  %v4998_v36 = vadd.f32 %v4883_v42, %v4752_v8  ;;  %v4756_v9 = vld [vmem:[#allocation4 + $0x40] sm:$0xff]  ;;  %v6867_v42 = vld [vmem:[#allocation3 + $0x169] sm:$0xff] }
 0x35c   : > { %v5106_v26 = vld [vmem:[#allocation4] sm:$0xff]  ;;  %v8700_v48 = vpop.f32.mrf.mxu1 }
 0x35d   : > { %v8734_v10 = vpop.f32.mrf.mxu0  ;;  %5386 = vst.msk [vmem:[#allocation4 + $0x10] sm:$0xff] %vm280_vm1, %v5354_v45  ;;  %v5352_v27 = vadd.f32 %v5225_v34, %v5106_v26  ;;  %5030 = vst.msk [vmem:[#allocation4 + $0x20] sm:$0xff] %vm280_vm1, %v4998_v36  ;;  %v5001_v47 = vadd.f32 %v8700_v48, %v4755_v59  ;;  %v6864_v34 = vld [vmem:[#allocation3 + $0x131] sm:$0xff]  ;;  %v6869_v45 = vld [vmem:[#allocation3 + $0x189] sm:$0xff] }
 0x35e   : > { %v5109_v24 = vld [vmem:[#allocation4 + $0x18] sm:$0xff]  ;;  %v4886_v4 = vpop.f32.mrf.mxu1  ;;  %v6888_v55 = vpack.c.bf16 %v6864_v34, %v6863_v1 }
 0x35f   : > { %v5244_v12 = vpop.f32.mrf.mxu0  ;;  %5384 = vst.msk [vmem:[#allocation4] sm:$0xff] %vm280_vm1, %v5352_v27  ;;  %v5355_v56 = vadd.f32 %v8730_v51, %v5109_v24  ;;  %5033 = vst.msk [vmem:[#allocation4 + $0x38] sm:$0xff] %vm280_vm1, %v5001_v47  ;;  %v4999_v60 = vadd.f32 %v4886_v4, %v4753_v32  ;;  %v6870_v26 = vld [vmem:[#allocation3 + $0x191] sm:$0xff] }
 0x360   : > { %v5107_v37 = vld [vmem:[#allocation4 + $0x8] sm:$0xff]  ;;  %v8703_v6 = vpop.f32.mrf.mxu1  ;;  %8906 = vmatmul.mubr.msk.bf16.gmra.mxu1 %vm280_vm1, %v6886_v30  ;;  %v4767_v1 = vld [vmem:[#allocation4 + $0x98] sm:$0xff] }
 0x361   : > { %v8737_v31 = vpop.f32.mrf.mxu0  ;;  %5387 = vst.msk [vmem:[#allocation4 + $0x18] sm:$0xff] %vm280_vm1, %v5355_v56  ;;  %v5353_v21 = vadd.f32 %v5228_v18, %v5107_v37  ;;  %5031 = vst.msk [vmem:[#allocation4 + $0x28] sm:$0xff] %vm280_vm1, %v4999_v60  ;;  %v5004_v50 = vadd.f32 %v8703_v6, %v4758_v16  ;;  %8909 = vmatprep.mubr.msk.bf16.mxu1 %vm280_vm1, %v6887_v53  ;;  %v6889_v18 = vpack.c.bf16 %v6866_v28, %v6865_v38  ;;  %v4766_v56 = vld [vmem:[#allocation4 + $0x90] sm:$0xff]  ;;  %v4765_v28 = vld [vmem:[#allocation4 + $0x88] sm:$0xff] }
 0x362   : > { %v5112_v54 = vld [vmem:[#allocation4 + $0x30] sm:$0xff]  ;;  %v4899_v22 = vpop.f32.mrf.mxu1 }
 0x363   : > { %v5257_v49 = vpop.f32.mrf.mxu0  ;;  %5385 = vst.msk [vmem:[#allocation4 + $0x8] sm:$0xff] %vm280_vm1, %v5353_v21  ;;  %v5358_v33 = vadd.f32 %v8733_v11, %v5112_v54  ;;  %5036 = vst.msk [vmem:[#allocation4 + $0x50] sm:$0xff] %vm280_vm1, %v5004_v50  ;;  %v5002_v63 = vadd.f32 %v4899_v22, %v4756_v9  ;;  %v4760_v11 = vld [vmem:[#allocation4 + $0x60] sm:$0xff]  ;;  %v6871_v22 = vld [vmem:[#allocation3 + $0x1a9] sm:$0xff] }
 0x364   : > { %v5110_v0 = vld [vmem:[#allocation4 + $0x20] sm:$0xff]  ;;  %v8704_v61 = vpop.f32.mrf.mxu1 }
 0x365   : > { %v8738_v15 = vpop.f32.mrf.mxu0  ;;  %5390 = vst.msk [vmem:[#allocation4 + $0x30] sm:$0xff] %vm280_vm1, %v5358_v33  ;;  %v5356_v35 = vadd.f32 %v5241_v25, %v5110_v0  ;;  %5034 = vst.msk [vmem:[#allocation4 + $0x40] sm:$0xff] %vm280_vm1, %v5002_v63  ;;  %v5005_v40 = vadd.f32 %v8704_v61, %v4759_v23  ;;  %v6868_v25 = vld [vmem:[#allocation3 + $0x171] sm:$0xff]  ;;  %v6873_v33 = vld [vmem:[#allocation3 + $0x1c9] sm:$0xff] }
 0x366   : > { %v5113_v51 = vld [vmem:[#allocation4 + $0x38] sm:$0xff]  ;;  %v4902_v52 = vpop.f32.mrf.mxu1  ;;  %v6890_v24 = vpack.c.bf16 %v6868_v25, %v6867_v42 }
 0x367   : > { %v5260_v46 = vpop.f32.mrf.mxu0  ;;  %5388 = vst.msk [vmem:[#allocation4 + $0x20] sm:$0xff] %vm280_vm1, %v5356_v35  ;;  %v5359_v58 = vadd.f32 %v8734_v10, %v5113_v51  ;;  %5037 = vst.msk [vmem:[#allocation4 + $0x58] sm:$0xff] %vm280_vm1, %v5005_v40  ;;  %v5003_v39 = vadd.f32 %v4902_v52, %v4757_v2  ;;  %v6874_v0 = vld [vmem:[#allocation3 + $0x1d1] sm:$0xff] }
 0x368   : > { %v5111_v20 = vld [vmem:[#allocation4 + $0x28] sm:$0xff]  ;;  %v8707_v5 = vpop.f32.mrf.mxu1  ;;  %8910 = vmatmul.mubr.msk.bf16.gmra.mxu1 %vm280_vm1, %v6888_v55  ;;  %v4771_v42 = vld [vmem:[#allocation4 + $0xb8] sm:$0xff] }
 0x369   : > { %v8741_v19 = vpop.f32.mrf.mxu0  ;;  %5391 = vst.msk [vmem:[#allocation4 + $0x38] sm:$0xff] %vm280_vm1, %v5359_v58  ;;  %v5357_v29 = vadd.f32 %v5244_v12, %v5111_v20  ;;  %5035 = vst.msk [vmem:[#allocation4 + $0x48] sm:$0xff] %vm280_vm1, %v5003_v39  ;;  %v5008_v43 = vadd.f32 %v8707_v5, %v4762_v7  ;;  %8913 = vmatprep.mubr.msk.bf16.mxu1 %vm280_vm1, %v6889_v18  ;;  %v6891_v12 = vpack.c.bf16 %v6870_v26, %v6869_v45  ;;  %v4770_v58 = vld [vmem:[#allocation4 + $0xb0] sm:$0xff]  ;;  %v4769_v26 = vld [vmem:[#allocation4 + $0xa8] sm:$0xff] }
 0x36a   : > { %v5116_v44 = vld [vmem:[#allocation4 + $0x50] sm:$0xff]  ;;  %v4915_v41 = vpop.f32.mrf.mxu1 }
 0x36b   : > { %v5273_v3 = vpop.f32.mrf.mxu0  ;;  %5389 = vst.msk [vmem:[#allocation4 + $0x28] sm:$0xff] %vm280_vm1, %v5357_v29  ;;  %v5362_v13 = vadd.f32 %v8737_v31, %v5116_v44  ;;  %5040 = vst.msk [vmem:[#allocation4 + $0x70] sm:$0xff] %vm280_vm1, %v5008_v43  ;;  %v5006_v8 = vadd.f32 %v4915_v41, %v4760_v11  ;;  %v4764_v31 = vld [vmem:[#allocation4 + $0x80] sm:$0xff]  ;;  %v6875_v41 = vld [vmem:[#allocation3 + $0x1e9] sm:$0xff] }
 0x36c   : > { %v5114_v36 = vld [vmem:[#allocation4 + $0x40] sm:$0xff]  ;;  %v8708_v17 = vpop.f32.mrf.mxu1 }
 0x36d   : > { %v8742_v62 = vpop.f32.mrf.mxu0  ;;  %5394 = vst.msk [vmem:[#allocation4 + $0x50] sm:$0xff] %vm280_vm1, %v5362_v13  ;;  %v5360_v59 = vadd.f32 %v5257_v49, %v5114_v36  ;;  %5038 = vst.msk [vmem:[#allocation4 + $0x60] sm:$0xff] %vm280_vm1, %v5006_v8  ;;  %v5009_v48 = vadd.f32 %v8708_v17, %v4763_v57  ;;  %v6872_v49 = vld [vmem:[#allocation3 + $0x1b1] sm:$0xff]  ;;  %v6877_v13 = vld [vmem:[#allocation3 + $0x209] sm:$0xff] }
 0x36e   : > { %v5117_v10 = vld [vmem:[#allocation4 + $0x58] sm:$0xff]  ;;  %v4918_v27 = vpop.f32.mrf.mxu1  ;;  %v6892_v51 = vpack.c.bf16 %v6872_v49, %v6871_v22 }
 0x36f   : > { %v5276_v47 = vpop.f32.mrf.mxu0  ;;  %5392 = vst.msk [vmem:[#allocation4 + $0x40] sm:$0xff] %vm280_vm1, %v5360_v59  ;;  %v5363_v32 = vadd.f32 %v8738_v15, %v5117_v10  ;;  %5041 = vst.msk [vmem:[#allocation4 + $0x78] sm:$0xff] %vm280_vm1, %v5009_v48  ;;  %v5007_v4 = vadd.f32 %v4918_v27, %v4761_v14  ;;  %v6878_v36 = vld [vmem:[#allocation3 + $0x211] sm:$0xff] }
 0x370   : > { %v5115_v30 = vld [vmem:[#allocation4 + $0x48] sm:$0xff]  ;;  %v8711_v60 = vpop.f32.mrf.mxu1  ;;  %8914 = vmatmul.mubr.msk.bf16.gmra.mxu1 %vm280_vm1, %v6890_v24 }
 0x371   : > { %v8745_v53 = vpop.f32.mrf.mxu0  ;;  %5395 = vst.msk [vmem:[#allocation4 + $0x58] sm:$0xff] %vm280_vm1, %v5363_v32  ;;  %v5361_v37 = vadd.f32 %v5260_v46, %v5115_v30  ;;  %5039 = vst.msk [vmem:[#allocation4 + $0x68] sm:$0xff] %vm280_vm1, %v5007_v4  ;;  %v5012_v16 = vadd.f32 %v8711_v60, %v4766_v56  ;;  %8917 = vmatprep.mubr.msk.bf16.mxu1 %vm280_vm1, %v6891_v12  ;;  %v6893_v46 = vpack.c.bf16 %v6874_v0, %v6873_v33  ;;  %v4774_v32 = vld [vmem:[#allocation4 + $0xd0] sm:$0xff] }
 0x372   : > { %v5120_v6 = vld [vmem:[#allocation4 + $0x70] sm:$0xff]  ;;  %v4931_v21 = vpop.f32.mrf.mxu1 }
 0x373   : > { %v5289_v50 = vpop.f32.mrf.mxu0  ;;  %5393 = vst.msk [vmem:[#allocation4 + $0x48] sm:$0xff] %vm280_vm1, %v5361_v37  ;;  %v5366_v54 = vadd.f32 %v8741_v19, %v5120_v6  ;;  %5044 = vst.msk [vmem:[#allocation4 + $0x90] sm:$0xff] %vm280_vm1, %v5012_v16  ;;  %v5010_v9 = vadd.f32 %v4931_v21, %v4764_v31  ;;  %v4768_v19 = vld [vmem:[#allocation4 + $0xa0] sm:$0xff]  ;;  %v6879_v60 = vld [vmem:[#allocation3 + $0x229] sm:$0xff] }
 0x374   : > { %v5118_v63 = vld [vmem:[#allocation4 + $0x60] sm:$0xff]  ;;  %v8712_v34 = vpop.f32.mrf.mxu1 }
 0x375   : > { %v8746_v38 = vpop.f32.mrf.mxu0  ;;  %5398 = vst.msk [vmem:[#allocation4 + $0x70] sm:$0xff] %vm280_vm1, %v5366_v54  ;;  %v5364_v23 = vadd.f32 %v5273_v3, %v5118_v63  ;;  %5042 = vst.msk [vmem:[#allocation4 + $0x80] sm:$0xff] %vm280_vm1, %v5010_v9  ;;  %v5013_v61 = vadd.f32 %v8712_v34, %v4767_v1  ;;  %v6876_v3 = vld [vmem:[#allocation3 + $0x1f1] sm:$0xff]  ;;  %v4772_v16 = vld [vmem:[#allocation4 + $0xc0] sm:$0xff] }
 0x376   : > { %v5121_v15 = vld [vmem:[#allocation4 + $0x78] sm:$0xff]  ;;  %v4934_v35 = vpop.f32.mrf.mxu1  ;;  %v6894_v10 = vpack.c.bf16 %v6876_v3, %v6875_v41  ;;  %v4777_v41 = vld [vmem:[#allocation4 + $0xe8] sm:$0xff] }
 0x377   : > { %v5292_v40 = vpop.f32.mrf.mxu0  ;;  %5396 = vst.msk [vmem:[#allocation4 + $0x60] sm:$0xff] %vm280_vm1, %v5364_v23  ;;  %v5367_v2 = vadd.f32 %v8742_v62, %v5121_v15  ;;  %5045 = vst.msk [vmem:[#allocation4 + $0x98] sm:$0xff] %vm280_vm1, %v5013_v61  ;;  %v5011_v52 = vadd.f32 %v4934_v35, %v4765_v28  ;;  %v4775_v9 = vld [vmem:[#allocation4 + $0xd8] sm:$0xff]  ;;  %v4778_v35 = vld [vmem:[#allocation4 + $0xf0] sm:$0xff] }
 0x378   : > { %v5119_v55 = vld [vmem:[#allocation4 + $0x68] sm:$0xff]  ;;  %v8715_v39 = vpop.f32.mrf.mxu1  ;;  %8918 = vmatmul.mubr.msk.bf16.gmra.mxu1 %vm280_vm1, %v6892_v51 }
 0x379   : > { %v8749_v18 = vpop.f32.mrf.mxu0  ;;  %5399 = vst.msk [vmem:[#allocation4 + $0x78] sm:$0xff] %vm280_vm1, %v5367_v2  ;;  %v5365_v20 = vadd.f32 %v5276_v47, %v5119_v55  ;;  %5043 = vst.msk [vmem:[#allocation4 + $0x88] sm:$0xff] %vm280_vm1, %v5011_v52  ;;  %v5016_v7 = vadd.f32 %v8715_v39, %v4770_v58  ;;  %8921 = vmatprep.mubr.msk.bf16.mxu1 %vm280_vm1, %v6893_v46  ;;  %v6895_v47 = vpack.c.bf16 %v6878_v36, %v6877_v13  ;;  %v4776_v55 = vld [vmem:[#allocation4 + $0xe0] sm:$0xff] }
 0x37a   : > { %v5124_v5 = vld [vmem:[#allocation4 + $0x90] sm:$0xff]  ;;  %v4947_v29 = vpop.f32.mrf.mxu1 }
 0x37b   : > { %v5305_v43 = vpop.f32.mrf.mxu0  ;;  %5397 = vst.msk [vmem:[#allocation4 + $0x68] sm:$0xff] %vm280_vm1, %v5365_v20  ;;  %v5370_v44 = vadd.f32 %v8745_v53, %v5124_v5  ;;  %5048 = vst.msk [vmem:[#allocation4 + $0xb0] sm:$0xff] %vm280_vm1, %v5016_v7  ;;  %v5014_v11 = vadd.f32 %v4947_v29, %v4768_v19  ;;  %v6880_v53 = vld [vmem:[#allocation3 + $0x231] sm:$0xff] }
 0x37c   : > { %v5122_v8 = vld [vmem:[#allocation4 + $0x80] sm:$0xff]  ;;  %v8716_v25 = vpop.f32.mrf.mxu1  ;;  %v6896_v33 = vpack.c.bf16 %v6880_v53, %v6879_v60  ;;  %v4779_v5 = vld [vmem:[#allocation4 + $0xf8] sm:$0xff]  ;;  %v5465_v60 = vld [vmem:[#allocation4 + $0x8] sm:$0xff] }
 0x37d   : > { %v8750_v45 = vpop.f32.mrf.mxu0  ;;  %5402 = vst.msk [vmem:[#allocation4 + $0x90] sm:$0xff] %vm280_vm1, %v5370_v44  ;;  %v5368_v57 = vadd.f32 %v5289_v50, %v5122_v8  ;;  %5046 = vst.msk [vmem:[#allocation4 + $0xa0] sm:$0xff] %vm280_vm1, %v5014_v11  ;;  %v5017_v17 = vadd.f32 %v8716_v25, %v4771_v42 }
 0x37e   : > { %v5125_v62 = vld [vmem:[#allocation4 + $0x98] sm:$0xff]  ;;  %v4950_v59 = vpop.f32.mrf.mxu1 }
 0x37f   : > { %v5308_v48 = vpop.f32.mrf.mxu0  ;;  %5400 = vst.msk [vmem:[#allocation4 + $0x80] sm:$0xff] %vm280_vm1, %v5368_v57  ;;  %v5371_v14 = vadd.f32 %v8746_v38, %v5125_v62  ;;  %5049 = vst.msk [vmem:[#allocation4 + $0xb8] sm:$0xff] %vm280_vm1, %v5017_v17  ;;  %v5015_v27 = vadd.f32 %v4950_v59, %v4769_v26  ;;  %v4773_v38 = vld [vmem:[#allocation4 + $0xc8] sm:$0xff]  ;;  %v5464_v59 = vld [vmem:[#allocation4] sm:$0xff] }
 0x380   : > { %v5123_v24 = vld [vmem:[#allocation4 + $0x88] sm:$0xff]  ;;  %v8719_v4 = vpop.f32.mrf.mxu1  ;;  %8922 = vmatmul.mubr.msk.bf16.gmra.mxu1 %vm280_vm1, %v6894_v10 }
 0x381   : > { %v8753_v12 = vpop.f32.mrf.mxu0  ;;  %5403 = vst.msk [vmem:[#allocation4 + $0x98] sm:$0xff] %vm280_vm1, %v5371_v14  ;;  %v5369_v30 = vadd.f32 %v5292_v40, %v5123_v24  ;;  %5047 = vst.msk [vmem:[#allocation4 + $0xa8] sm:$0xff] %vm280_vm1, %v5015_v27  ;;  %v5020_v56 = vadd.f32 %v8719_v4, %v4774_v32  ;;  %8925 = vmatprep.mubr.msk.bf16.mxu1 %vm280_vm1, %v6895_v47  ;;  %v5467_v24 = vld [vmem:[#allocation4 + $0x18] sm:$0xff] }
 0x382   : > { %v5128_v37 = vld [vmem:[#allocation4 + $0xb0] sm:$0xff]  ;;  %v4963_v6 = vpop.f32.mrf.mxu1 }
 0x383   : > { %v5321_v31 = vpop.f32.mrf.mxu0  ;;  %5401 = vst.msk [vmem:[#allocation4 + $0x88] sm:$0xff] %vm280_vm1, %v5369_v30  ;;  %v5374_v21 = vadd.f32 %v8749_v18, %v5128_v37  ;;  %5052 = vst.msk [vmem:[#allocation4 + $0xd0] sm:$0xff] %vm280_vm1, %v5020_v56  ;;  %v5018_v50 = vadd.f32 %v4963_v6, %v4772_v16 }
 0x384   : > { %v5126_v54 = vld [vmem:[#allocation4 + $0xa0] sm:$0xff]  ;;  %v8720_v22 = vpop.f32.mrf.mxu1 }
 0x385   : > { %v8754_v49 = vpop.f32.mrf.mxu0  ;;  %5406 = vst.msk [vmem:[#allocation4 + $0xb0] sm:$0xff] %vm280_vm1, %v5374_v21  ;;  %v5372_v63 = vadd.f32 %v5305_v43, %v5126_v54  ;;  %5050 = vst.msk [vmem:[#allocation4 + $0xc0] sm:$0xff] %vm280_vm1, %v5018_v50  ;;  %v5021_v1 = vadd.f32 %v8720_v22, %v4775_v9  ;;  %v5470_v21 = vld [vmem:[#allocation4 + $0x30] sm:$0xff] }
 0x386   : > { %v5129_v34 = vld [vmem:[#allocation4 + $0xb8] sm:$0xff]  ;;  %v4966_v0 = vpop.f32.mrf.mxu1 }
 0x387   : > { %v5324_v23 = vpop.f32.mrf.mxu0  ;;  %5404 = vst.msk [vmem:[#allocation4 + $0xa0] sm:$0xff] %vm280_vm1, %v5372_v63  ;;  %v5375_v61 = vadd.f32 %v8750_v45, %v5129_v34  ;;  %5053 = vst.msk [vmem:[#allocation4 + $0xd8] sm:$0xff] %vm280_vm1, %v5021_v1  ;;  %v5019_v15 = vadd.f32 %v4966_v0, %v4773_v38  ;;  %v5466_v45 = vld [vmem:[#allocation4 + $0x10] sm:$0xff] }
 0x388   : > { %v5127_v28 = vld [vmem:[#allocation4 + $0xa8] sm:$0xff]  ;;  %v8723_v40 = vpop.f32.mrf.mxu1  ;;  %8926 = vmatmul.mubr.msk.bf16.gmra.mxu1 %vm280_vm1, %v6896_v33  ;;  %v5468_v33 = vld [vmem:[#allocation4 + $0x20] sm:$0xff] }
 0x389   : > { %v8757_v51 = vpop.f32.mrf.mxu0  ;;  %5407 = vst.msk [vmem:[#allocation4 + $0xb8] sm:$0xff] %vm280_vm1, %v5375_v61  ;;  %v5373_v2 = vadd.f32 %v5308_v48, %v5127_v28  ;;  %5051 = vst.msk [vmem:[#allocation4 + $0xc8] sm:$0xff] %vm280_vm1, %v5019_v15  ;;  %v5024_v52 = vadd.f32 %v8723_v40, %v4778_v35 }
 0x38a   : > { %v5132_v46 = vld [vmem:[#allocation4 + $0xd0] sm:$0xff]  ;;  %v4979_v58 = vpop.f32.mrf.mxu1 }
 0x38b   : > { %v5337_v39 = vpop.f32.mrf.mxu0  ;;  %5405 = vst.msk [vmem:[#allocation4 + $0xa8] sm:$0xff] %vm280_vm1, %v5373_v2  ;;  %v5378_v18 = vadd.f32 %v8753_v12, %v5132_v46  ;;  %5056 = vst.msk [vmem:[#allocation4 + $0xf0] sm:$0xff] %vm280_vm1, %v5024_v52  ;;  %v5022_v20 = vadd.f32 %v4979_v58, %v4776_v55 }
 0x38c   : > { %v5130_v7 = vld [vmem:[#allocation4 + $0xc0] sm:$0xff]  ;;  %v8724_v19 = vpop.f32.mrf.mxu1 }
 0x38d   : > { %v8758_v29 = vpop.f32.mrf.mxu0  ;;  %5410 = vst.msk [vmem:[#allocation4 + $0xd0] sm:$0xff] %vm280_vm1, %v5378_v18  ;;  %v5376_v43 = vadd.f32 %v5321_v31, %v5130_v7  ;;  %5054 = vst.msk [vmem:[#allocation4 + $0xe0] sm:$0xff] %vm280_vm1, %v5022_v20  ;;  %v5025_v44 = vadd.f32 %v8724_v19, %v4779_v5 }
 0x38e   : > { %v5133_v11 = vld [vmem:[#allocation4 + $0xd8] sm:$0xff]  ;;  %v4982_v3 = vpop.f32.mrf.mxu1 }
 0x38f   : > { %v5340_v13 = vpop.f32.mrf.mxu0  ;;  %5408 = vst.msk [vmem:[#allocation4 + $0xc0] sm:$0xff] %vm280_vm1, %v5376_v43  ;;  %v5379_v8 = vadd.f32 %v8754_v49, %v5133_v11  ;;  %5057 = vst.msk [vmem:[#allocation4 + $0xf8] sm:$0xff] %vm280_vm1, %v5025_v44  ;;  %v5023_v42 = vadd.f32 %v4982_v3, %v4777_v41 }
 0x390   : > { %v5131_v25 = vld [vmem:[#allocation4 + $0xc8] sm:$0xff]  ;;  %v8763_v36 = vpop.f32.mrf.mxu1 }
 0x391   : > { %v8797_v57 = vpop.f32.mrf.mxu0  ;;  %5411 = vst.msk [vmem:[#allocation4 + $0xd8] sm:$0xff] %vm280_vm1, %v5379_v8  ;;  %v5377_v17 = vadd.f32 %v5324_v23, %v5131_v25  ;;  %5055 = vst.msk [vmem:[#allocation4 + $0xe8] sm:$0xff] %vm280_vm1, %v5023_v42  ;;  %v5712_v62 = vadd.f32 %v8763_v36, %v5466_v45  ;;  %v5471_v23 = vld [vmem:[#allocation4 + $0x38] sm:$0xff] }
 0x392   : > { %v5136_v26 = vld [vmem:[#allocation4 + $0xf0] sm:$0xff]  ;;  %v5583_v48 = vpop.f32.mrf.mxu1 }
 0x393   : > { %v5941_v10 = vpop.f32.mrf.mxu0  ;;  %5409 = vst.msk [vmem:[#allocation4 + $0xc8] sm:$0xff] %vm280_vm1, %v5377_v17  ;;  %v5382_v14 = vadd.f32 %v8757_v51, %v5136_v26  ;;  %5744 = vst.msk [vmem:[#allocation4 + $0x10] sm:$0xff] %vm280_vm1, %v5712_v62  ;;  %v5710_v27 = vadd.f32 %v5583_v48, %v5464_v59  ;;  %v5469_v51 = vld [vmem:[#allocation4 + $0x28] sm:$0xff] }
 0x394   : > { %v5134_v47 = vld [vmem:[#allocation4 + $0xe0] sm:$0xff]  ;;  %v8764_v32 = vpop.f32.mrf.mxu1 }
 0x395   : > { %v8798_v4 = vpop.f32.mrf.mxu0  ;;  %5414 = vst.msk [vmem:[#allocation4 + $0xf0] sm:$0xff] %vm280_vm1, %v5382_v14  ;;  %v5380_v12 = vadd.f32 %v5337_v39, %v5134_v47  ;;  %5742 = vst.msk [vmem:[#allocation4] sm:$0xff] %vm280_vm1, %v5710_v27  ;;  %v5713_v30 = vadd.f32 %v8764_v32, %v5467_v24  ;;  %v5474_v39 = vld [vmem:[#allocation4 + $0x50] sm:$0xff] }
 0x396   : > { %v5137_v56 = vld [vmem:[#allocation4 + $0xf8] sm:$0xff]  ;;  %v5586_v53 = vpop.f32.mrf.mxu1 }
 0x397   : > { %v5944_v37 = vpop.f32.mrf.mxu0  ;;  %5412 = vst.msk [vmem:[#allocation4 + $0xe0] sm:$0xff] %vm280_vm1, %v5380_v12  ;;  %v5383_v16 = vadd.f32 %v8758_v29, %v5137_v56  ;;  %5745 = vst.msk [vmem:[#allocation4 + $0x18] sm:$0xff] %vm280_vm1, %v5713_v30  ;;  %v5711_v6 = vadd.f32 %v5586_v53, %v5465_v60  ;;  %v5472_v29 = vld [vmem:[#allocation4 + $0x40] sm:$0xff] }
 0x398   : > { %v5135_v31 = vld [vmem:[#allocation4 + $0xe8] sm:$0xff]  ;;  %v8767_v50 = vpop.f32.mrf.mxu1 }
 0x399   : > { %v8801_v54 = vpop.f32.mrf.mxu0  ;;  %5415 = vst.msk [vmem:[#allocation4 + $0xf8] sm:$0xff] %vm280_vm1, %v5383_v16  ;;  %v5381_v9 = vadd.f32 %v5340_v13, %v5135_v31  ;;  %5743 = vst.msk [vmem:[#allocation4 + $0x8] sm:$0xff] %vm280_vm1, %v5711_v6  ;;  %v5716_v22 = vadd.f32 %v8767_v50, %v5470_v21  ;;  %v5475_v13 = vld [vmem:[#allocation4 + $0x58] sm:$0xff] }
 0x39a   : > { %v5824_v49 = vld [vmem:[#allocation4 + $0x10] sm:$0xff]  ;;  %v5599_v63 = vpop.f32.mrf.mxu1 }
 0x39b   : > { %v5957_v1 = vpop.f32.mrf.mxu0  ;;  %5413 = vst.msk [vmem:[#allocation4 + $0xe8] sm:$0xff] %vm280_vm1, %v5381_v9  ;;  %v6070_v34 = vadd.f32 %v8797_v57, %v5824_v49  ;;  %5748 = vst.msk [vmem:[#allocation4 + $0x30] sm:$0xff] %vm280_vm1, %v5716_v22  ;;  %v5714_v38 = vadd.f32 %v5599_v63, %v5468_v33  ;;  %v5473_v57 = vld [vmem:[#allocation4 + $0x48] sm:$0xff] }
 0x39c   : > { %v5822_v0 = vld [vmem:[#allocation4] sm:$0xff]  ;;  %v8768_v61 = vpop.f32.mrf.mxu1 }
 0x39d   : > { %v8802_v15 = vpop.f32.mrf.mxu0  ;;  %6102 = vst.msk [vmem:[#allocation4 + $0x10] sm:$0xff] %vm280_vm1, %v6070_v34  ;;  %v6068_v28 = vadd.f32 %v5941_v10, %v5822_v0  ;;  %5746 = vst.msk [vmem:[#allocation4 + $0x20] sm:$0xff] %vm280_vm1, %v5714_v38  ;;  %v5717_v35 = vadd.f32 %v8768_v61, %v5471_v23  ;;  %v5478_v10 = vld [vmem:[#allocation4 + $0x70] sm:$0xff] }
 0x39e   : > { %v5825_v40 = vld [vmem:[#allocation4 + $0x18] sm:$0xff]  ;;  %v5602_v2 = vpop.f32.mrf.mxu1 }
 0x39f   : > { %v5960_v52 = vpop.f32.mrf.mxu0  ;;  %6100 = vst.msk [vmem:[#allocation4] sm:$0xff] %vm280_vm1, %v6068_v28  ;;  %v6071_v46 = vadd.f32 %v8798_v4, %v5825_v40  ;;  %5749 = vst.msk [vmem:[#allocation4 + $0x38] sm:$0xff] %vm280_vm1, %v5717_v35  ;;  %v5715_v55 = vadd.f32 %v5602_v2, %v5469_v51  ;;  %v5476_v4 = vld [vmem:[#allocation4 + $0x60] sm:$0xff] }
 0x3a0   : > { %v5823_v58 = vld [vmem:[#allocation4 + $0x8] sm:$0xff]  ;;  %v8771_v18 = vpop.f32.mrf.mxu1 }
 0x3a1   : > { %v8805_v20 = vpop.f32.mrf.mxu0  ;;  %6103 = vst.msk [vmem:[#allocation4 + $0x18] sm:$0xff] %vm280_vm1, %v6071_v46  ;;  %v6069_v7 = vadd.f32 %v5944_v37, %v5823_v58  ;;  %5747 = vst.msk [vmem:[#allocation4 + $0x28] sm:$0xff] %vm280_vm1, %v5715_v55  ;;  %v5720_v5 = vadd.f32 %v8771_v18, %v5474_v39  ;;  %v5479_v37 = vld [vmem:[#allocation4 + $0x78] sm:$0xff] }
 0x3a2   : > { %v5828_v19 = vld [vmem:[#allocation4 + $0x30] sm:$0xff]  ;;  %v5615_v43 = vpop.f32.mrf.mxu1 }
 0x3a3   : > { %v5973_v44 = vpop.f32.mrf.mxu0  ;;  %6101 = vst.msk [vmem:[#allocation4 + $0x8] sm:$0xff] %vm280_vm1, %v6069_v7  ;;  %v6074_v11 = vadd.f32 %v8801_v54, %v5828_v19  ;;  %5752 = vst.msk [vmem:[#allocation4 + $0x50] sm:$0xff] %vm280_vm1, %v5720_v5  ;;  %v5718_v41 = vadd.f32 %v5615_v43, %v5472_v29  ;;  %v5477_v54 = vld [vmem:[#allocation4 + $0x68] sm:$0xff] }
 0x3a4   : > { %v5826_v3 = vld [vmem:[#allocation4 + $0x20] sm:$0xff]  ;;  %v8772_v8 = vpop.f32.mrf.mxu1 }
 0x3a5   : > { %v8806_v42 = vpop.f32.mrf.mxu0  ;;  %6106 = vst.msk [vmem:[#allocation4 + $0x30] sm:$0xff] %vm280_vm1, %v6074_v11  ;;  %v6072_v25 = vadd.f32 %v5957_v1, %v5826_v3  ;;  %5750 = vst.msk [vmem:[#allocation4 + $0x40] sm:$0xff] %vm280_vm1, %v5718_v41  ;;  %v5721_v45 = vadd.f32 %v8772_v8, %v5475_v13  ;;  %v5482_v1 = vld [vmem:[#allocation4 + $0x90] sm:$0xff] }
 0x3a6   : > { %v5829_v36 = vld [vmem:[#allocation4 + $0x38] sm:$0xff]  ;;  %v5618_v17 = vpop.f32.mrf.mxu1 }
 0x3a7   : > { %v5976_v62 = vpop.f32.mrf.mxu0  ;;  %6104 = vst.msk [vmem:[#allocation4 + $0x20] sm:$0xff] %vm280_vm1, %v6072_v25  ;;  %v6075_v26 = vadd.f32 %v8802_v15, %v5829_v36  ;;  %5753 = vst.msk [vmem:[#allocation4 + $0x58] sm:$0xff] %vm280_vm1, %v5721_v45  ;;  %v5719_v59 = vadd.f32 %v5618_v17, %v5473_v57  ;;  %v5480_v15 = vld [vmem:[#allocation4 + $0x80] sm:$0xff] }
 0x3a8   : > { %v5827_v48 = vld [vmem:[#allocation4 + $0x28] sm:$0xff]  ;;  %v8775_v14 = vpop.f32.mrf.mxu1 }
 0x3a9   : > { %v8809_v27 = vpop.f32.mrf.mxu0  ;;  %6107 = vst.msk [vmem:[#allocation4 + $0x38] sm:$0xff] %vm280_vm1, %v6075_v26  ;;  %v6073_v47 = vadd.f32 %v5960_v52, %v5827_v48  ;;  %5751 = vst.msk [vmem:[#allocation4 + $0x48] sm:$0xff] %vm280_vm1, %v5719_v59  ;;  %v5724_v24 = vadd.f32 %v8775_v14, %v5478_v10  ;;  %v5483_v52 = vld [vmem:[#allocation4 + $0x98] sm:$0xff] }
 0x3aa   : > { %v5832_v32 = vld [vmem:[#allocation4 + $0x50] sm:$0xff]  ;;  %v5631_v12 = vpop.f32.mrf.mxu1 }
 0x3ab   : > { %v5989_v30 = vpop.f32.mrf.mxu0  ;;  %6105 = vst.msk [vmem:[#allocation4 + $0x28] sm:$0xff] %vm280_vm1, %v6073_v47  ;;  %v6078_v56 = vadd.f32 %v8805_v20, %v5832_v32  ;;  %5756 = vst.msk [vmem:[#allocation4 + $0x70] sm:$0xff] %vm280_vm1, %v5724_v24  ;;  %v5722_v60 = vadd.f32 %v5631_v12, %v5476_v4  ;;  %v5481_v20 = vld [vmem:[#allocation4 + $0x88] sm:$0xff] }
 0x3ac   : > { %v5830_v53 = vld [vmem:[#allocation4 + $0x40] sm:$0xff]  ;;  %v8776_v16 = vpop.f32.mrf.mxu1 }
 0x3ad   : > { %v8810_v6 = vpop.f32.mrf.mxu0  ;;  %6110 = vst.msk [vmem:[#allocation4 + $0x50] sm:$0xff] %vm280_vm1, %v6078_v56  ;;  %v6076_v31 = vadd.f32 %v5973_v44, %v5830_v53  ;;  %5754 = vst.msk [vmem:[#allocation4 + $0x60] sm:$0xff] %vm280_vm1, %v5722_v60  ;;  %v5725_v21 = vadd.f32 %v8776_v16, %v5479_v37  ;;  %v5486_v44 = vld [vmem:[#allocation4 + $0xb0] sm:$0xff] }
 0x3ae   : > { %v5833_v50 = vld [vmem:[#allocation4 + $0x58] sm:$0xff]  ;;  %v5634_v9 = vpop.f32.mrf.mxu1 }
 0x3af   : > { %v5992_v22 = vpop.f32.mrf.mxu0  ;;  %6108 = vst.msk [vmem:[#allocation4 + $0x40] sm:$0xff] %vm280_vm1, %v6076_v31  ;;  %v6079_v49 = vadd.f32 %v8806_v42, %v5833_v50  ;;  %5757 = vst.msk [vmem:[#allocation4 + $0x78] sm:$0xff] %vm280_vm1, %v5725_v21  ;;  %v5723_v33 = vadd.f32 %v5634_v9, %v5477_v54  ;;  %v5484_v42 = vld [vmem:[#allocation4 + $0xa0] sm:$0xff] }
 0x3b0   : > { %v5831_v63 = vld [vmem:[#allocation4 + $0x48] sm:$0xff]  ;;  %v8779_v34 = vpop.f32.mrf.mxu1 }
 0x3b1   : > { %v8813_v38 = vpop.f32.mrf.mxu0  ;;  %6111 = vst.msk [vmem:[#allocation4 + $0x58] sm:$0xff] %vm280_vm1, %v6079_v49  ;;  %v6077_v0 = vadd.f32 %v5976_v62, %v5831_v63  ;;  %5755 = vst.msk [vmem:[#allocation4 + $0x68] sm:$0xff] %vm280_vm1, %v5723_v33  ;;  %v5728_v23 = vadd.f32 %v8779_v34, %v5482_v1  ;;  %v5487_v62 = vld [vmem:[#allocation4 + $0xb8] sm:$0xff] }
 0x3b2   : > { %v5836_v61 = vld [vmem:[#allocation4 + $0x70] sm:$0xff]  ;;  %v5647_v28 = vpop.f32.mrf.mxu1 }
 0x3b3   : > { %v6005_v35 = vpop.f32.mrf.mxu0  ;;  %6109 = vst.msk [vmem:[#allocation4 + $0x48] sm:$0xff] %vm280_vm1, %v6077_v0  ;;  %v6082_v40 = vadd.f32 %v8809_v27, %v5836_v61  ;;  %5760 = vst.msk [vmem:[#allocation4 + $0x90] sm:$0xff] %vm280_vm1, %v5728_v23  ;;  %v5726_v51 = vadd.f32 %v5647_v28, %v5480_v15  ;;  %v5485_v27 = vld [vmem:[#allocation4 + $0xa8] sm:$0xff] }
 0x3b4   : > { %v5834_v2 = vld [vmem:[#allocation4 + $0x60] sm:$0xff]  ;;  %v8780_v46 = vpop.f32.mrf.mxu1 }
 0x3b5   : > { %v8814_v55 = vpop.f32.mrf.mxu0  ;;  %6114 = vst.msk [vmem:[#allocation4 + $0x70] sm:$0xff] %vm280_vm1, %v6082_v40  ;;  %v6080_v58 = vadd.f32 %v5989_v30, %v5834_v2  ;;  %5758 = vst.msk [vmem:[#allocation4 + $0x80] sm:$0xff] %vm280_vm1, %v5726_v51  ;;  %v5729_v39 = vadd.f32 %v8780_v46, %v5483_v52  ;;  %v5490_v30 = vld [vmem:[#allocation4 + $0xd0] sm:$0xff] }
 0x3b6   : > { %v5837_v18 = vld [vmem:[#allocation4 + $0x78] sm:$0xff]  ;;  %v5650_v7 = vpop.f32.mrf.mxu1 }
 0x3b7   : > { %v6008_v5 = vpop.f32.mrf.mxu0  ;;  %6112 = vst.msk [vmem:[#allocation4 + $0x60] sm:$0xff] %vm280_vm1, %v6080_v58  ;;  %v6083_v19 = vadd.f32 %v8810_v6, %v5837_v18  ;;  %5761 = vst.msk [vmem:[#allocation4 + $0x98] sm:$0xff] %vm280_vm1, %v5729_v39  ;;  %v5727_v29 = vadd.f32 %v5650_v7, %v5481_v20  ;;  %v5488_v6 = vld [vmem:[#allocation4 + $0xc0] sm:$0xff] }
 0x3b8   : > { %v5835_v43 = vld [vmem:[#allocation4 + $0x68] sm:$0xff]  ;;  %v8783_v11 = vpop.f32.mrf.mxu1 }
 0x3b9   : > { %v8817_v41 = vpop.f32.mrf.mxu0  ;;  %6115 = vst.msk [vmem:[#allocation4 + $0x78] sm:$0xff] %vm280_vm1, %v6083_v19  ;;  %v6081_v3 = vadd.f32 %v5992_v22, %v5835_v43  ;;  %5759 = vst.msk [vmem:[#allocation4 + $0x88] sm:$0xff] %vm280_vm1, %v5727_v29  ;;  %v5732_v13 = vadd.f32 %v8783_v11, %v5486_v44  ;;  %v5491_v22 = vld [vmem:[#allocation4 + $0xd8] sm:$0xff] }
 0x3ba   : > { %v5840_v8 = vld [vmem:[#allocation4 + $0x90] sm:$0xff]  ;;  %v5663_v25 = vpop.f32.mrf.mxu1 }
 0x3bb   : > { %v6021_v45 = vpop.f32.mrf.mxu0  ;;  %6113 = vst.msk [vmem:[#allocation4 + $0x68] sm:$0xff] %vm280_vm1, %v6081_v3  ;;  %v6086_v36 = vadd.f32 %v8813_v38, %v5840_v8  ;;  %5764 = vst.msk [vmem:[#allocation4 + $0xb0] sm:$0xff] %vm280_vm1, %v5732_v13  ;;  %v5730_v57 = vadd.f32 %v5663_v25, %v5484_v42  ;;  %v5489_v38 = vld [vmem:[#allocation4 + $0xc8] sm:$0xff] }
 0x3bc   : > { %v5838_v17 = vld [vmem:[#allocation4 + $0x80] sm:$0xff]  ;;  %v8784_v26 = vpop.f32.mrf.mxu1 }
 0x3bd   : > { %v8818_v59 = vpop.f32.mrf.mxu0  ;;  %6118 = vst.msk [vmem:[#allocation4 + $0x90] sm:$0xff] %vm280_vm1, %v6086_v36  ;;  %v6084_v48 = vadd.f32 %v6005_v35, %v5838_v17  ;;  %5762 = vst.msk [vmem:[#allocation4 + $0xa0] sm:$0xff] %vm280_vm1, %v5730_v57  ;;  %v5733_v10 = vadd.f32 %v8784_v26, %v5487_v62  ;;  %v5494_v35 = vld [vmem:[#allocation4 + $0xf0] sm:$0xff] }
 0x3be   : > { %v5841_v14 = vld [vmem:[#allocation4 + $0x98] sm:$0xff]  ;;  %v5666_v47 = vpop.f32.mrf.mxu1 }
 0x3bf   : > { %v6024_v24 = vpop.f32.mrf.mxu0  ;;  %6116 = vst.msk [vmem:[#allocation4 + $0x80] sm:$0xff] %vm280_vm1, %v6084_v48  ;;  %v6087_v32 = vadd.f32 %v8814_v55, %v5841_v14  ;;  %5765 = vst.msk [vmem:[#allocation4 + $0xb8] sm:$0xff] %vm280_vm1, %v5733_v10  ;;  %v5731_v4 = vadd.f32 %v5666_v47, %v5485_v27  ;;  %v5492_v55 = vld [vmem:[#allocation4 + $0xe0] sm:$0xff] }
 0x3c0   : > { %v5839_v12 = vld [vmem:[#allocation4 + $0x88] sm:$0xff]  ;;  %v8787_v56 = vpop.f32.mrf.mxu1 }
 0x3c1   : > { %v8821_v60 = vpop.f32.mrf.mxu0  ;;  %6119 = vst.msk [vmem:[#allocation4 + $0x98] sm:$0xff] %vm280_vm1, %v6087_v32  ;;  %v6085_v53 = vadd.f32 %v6008_v5, %v5839_v12  ;;  %5763 = vst.msk [vmem:[#allocation4 + $0xa8] sm:$0xff] %vm280_vm1, %v5731_v4  ;;  %v5736_v37 = vadd.f32 %v8787_v56, %v5490_v30  ;;  %v5495_v5 = vld [vmem:[#allocation4 + $0xf8] sm:$0xff] }
 0x3c2   : > { %v5844_v16 = vld [vmem:[#allocation4 + $0xb0] sm:$0xff]  ;;  %v5679_v31 = vpop.f32.mrf.mxu1 }
 0x3c3   : > { %v6037_v21 = vpop.f32.mrf.mxu0  ;;  %6117 = vst.msk [vmem:[#allocation4 + $0x88] sm:$0xff] %vm280_vm1, %v6085_v53  ;;  %v6090_v50 = vadd.f32 %v8817_v41, %v5844_v16  ;;  %5768 = vst.msk [vmem:[#allocation4 + $0xd0] sm:$0xff] %vm280_vm1, %v5736_v37  ;;  %v5734_v54 = vadd.f32 %v5679_v31, %v5488_v6  ;;  %v5493_v41 = vld [vmem:[#allocation4 + $0xe8] sm:$0xff] }
 0x3c4   : > { %v5842_v9 = vld [vmem:[#allocation4 + $0xa0] sm:$0xff]  ;;  %v8788_v49 = vpop.f32.mrf.mxu1 }
 0x3c5   : > { %v8822_v33 = vpop.f32.mrf.mxu0  ;;  %6122 = vst.msk [vmem:[#allocation4 + $0xb0] sm:$0xff] %vm280_vm1, %v6090_v50  ;;  %v6088_v63 = vadd.f32 %v6021_v45, %v5842_v9  ;;  %5766 = vst.msk [vmem:[#allocation4 + $0xc0] sm:$0xff] %vm280_vm1, %v5734_v54  ;;  %v5737_v1 = vadd.f32 %v8788_v49, %v5491_v22  ;;  %v6183_v45 = vld [vmem:[#allocation4 + $0x10] sm:$0xff] }
 0x3c6   : > { %v5845_v34 = vld [vmem:[#allocation4 + $0xb8] sm:$0xff]  ;;  %v5682_v0 = vpop.f32.mrf.mxu1 }
 0x3c7   : > { %v6040_v23 = vpop.f32.mrf.mxu0  ;;  %6120 = vst.msk [vmem:[#allocation4 + $0xa0] sm:$0xff] %vm280_vm1, %v6088_v63  ;;  %v6091_v61 = vadd.f32 %v8818_v59, %v5845_v34  ;;  %5769 = vst.msk [vmem:[#allocation4 + $0xd8] sm:$0xff] %vm280_vm1, %v5737_v1  ;;  %v5735_v15 = vadd.f32 %v5682_v0, %v5489_v38  ;;  %v6181_v59 = vld [vmem:[#allocation4] sm:$0xff] }
 0x3c8   : > { %v5843_v28 = vld [vmem:[#allocation4 + $0xa8] sm:$0xff]  ;;  %v8791_v40 = vpop.f32.mrf.mxu1 }
 0x3c9   : > { %v8825_v51 = vpop.f32.mrf.mxu0  ;;  %6123 = vst.msk [vmem:[#allocation4 + $0xb8] sm:$0xff] %vm280_vm1, %v6091_v61  ;;  %v6089_v2 = vadd.f32 %v6024_v24, %v5843_v28  ;;  %5767 = vst.msk [vmem:[#allocation4 + $0xc8] sm:$0xff] %vm280_vm1, %v5735_v15  ;;  %v5740_v52 = vadd.f32 %v8791_v40, %v5494_v35  ;;  %v6184_v24 = vld [vmem:[#allocation4 + $0x18] sm:$0xff] }
 0x3ca   : > { %v5848_v46 = vld [vmem:[#allocation4 + $0xd0] sm:$0xff]  ;;  %v5695_v58 = vpop.f32.mrf.mxu1 }
 0x3cb   : > { %v6053_v39 = vpop.f32.mrf.mxu0  ;;  %6121 = vst.msk [vmem:[#allocation4 + $0xa8] sm:$0xff] %vm280_vm1, %v6089_v2  ;;  %v6094_v18 = vadd.f32 %v8821_v60, %v5848_v46  ;;  %5772 = vst.msk [vmem:[#allocation4 + $0xf0] sm:$0xff] %vm280_vm1, %v5740_v52  ;;  %v5738_v20 = vadd.f32 %v5695_v58, %v5492_v55  ;;  %v6182_v60 = vld [vmem:[#allocation4 + $0x8] sm:$0xff] }
 0x3cc   : > { %v5846_v7 = vld [vmem:[#allocation4 + $0xc0] sm:$0xff]  ;;  %v8792_v19 = vpop.f32.mrf.mxu1 }
 0x3cd   : > { %v8826_v29 = vpop.f32.mrf.mxu0  ;;  %6126 = vst.msk [vmem:[#allocation4 + $0xd0] sm:$0xff] %vm280_vm1, %v6094_v18  ;;  %v6092_v43 = vadd.f32 %v6037_v21, %v5846_v7  ;;  %5770 = vst.msk [vmem:[#allocation4 + $0xe0] sm:$0xff] %vm280_vm1, %v5738_v20  ;;  %v5741_v44 = vadd.f32 %v8792_v19, %v5495_v5  ;;  %v6187_v21 = vld [vmem:[#allocation4 + $0x30] sm:$0xff] }
 0x3ce   : > { %v5849_v11 = vld [vmem:[#allocation4 + $0xd8] sm:$0xff]  ;;  %v5698_v3 = vpop.f32.mrf.mxu1 }
 0x3cf   : > { %v6056_v13 = vpop.f32.mrf.mxu0  ;;  %6124 = vst.msk [vmem:[#allocation4 + $0xc0] sm:$0xff] %vm280_vm1, %v6092_v43  ;;  %v6095_v8 = vadd.f32 %v8822_v33, %v5849_v11  ;;  %5773 = vst.msk [vmem:[#allocation4 + $0xf8] sm:$0xff] %vm280_vm1, %v5741_v44  ;;  %v5739_v42 = vadd.f32 %v5698_v3, %v5493_v41  ;;  %v6185_v33 = vld [vmem:[#allocation4 + $0x20] sm:$0xff] }
 0x3d0   : > { %v5847_v25 = vld [vmem:[#allocation4 + $0xc8] sm:$0xff]  ;;  %v8831_v36 = vpop.f32.mrf.mxu1 }
 0x3d1   : > { %v8865_v57 = vpop.f32.mrf.mxu0  ;;  %6127 = vst.msk [vmem:[#allocation4 + $0xd8] sm:$0xff] %vm280_vm1, %v6095_v8  ;;  %v6093_v17 = vadd.f32 %v6040_v23, %v5847_v25  ;;  %5771 = vst.msk [vmem:[#allocation4 + $0xe8] sm:$0xff] %vm280_vm1, %v5739_v42  ;;  %v6429_v62 = vadd.f32 %v8831_v36, %v6183_v45  ;;  %v6188_v23 = vld [vmem:[#allocation4 + $0x38] sm:$0xff] }
 0x3d2   : > { %v5852_v26 = vld [vmem:[#allocation4 + $0xf0] sm:$0xff]  ;;  %v6300_v48 = vpop.f32.mrf.mxu1 }
 0x3d3   : > { %v6658_v10 = vpop.f32.mrf.mxu0  ;;  %6125 = vst.msk [vmem:[#allocation4 + $0xc8] sm:$0xff] %vm280_vm1, %v6093_v17  ;;  %v6098_v14 = vadd.f32 %v8825_v51, %v5852_v26  ;;  %6461 = vst.msk [vmem:[#allocation4 + $0x10] sm:$0xff] %vm280_vm1, %v6429_v62  ;;  %v6427_v27 = vadd.f32 %v6300_v48, %v6181_v59  ;;  %v6186_v51 = vld [vmem:[#allocation4 + $0x28] sm:$0xff] }
 0x3d4   : > { %v5850_v47 = vld [vmem:[#allocation4 + $0xe0] sm:$0xff]  ;;  %v8832_v32 = vpop.f32.mrf.mxu1 }
 0x3d5   : > { %v8866_v4 = vpop.f32.mrf.mxu0  ;;  %6130 = vst.msk [vmem:[#allocation4 + $0xf0] sm:$0xff] %vm280_vm1, %v6098_v14  ;;  %v6096_v12 = vadd.f32 %v6053_v39, %v5850_v47  ;;  %6459 = vst.msk [vmem:[#allocation4] sm:$0xff] %vm280_vm1, %v6427_v27  ;;  %v6430_v30 = vadd.f32 %v8832_v32, %v6184_v24  ;;  %v6191_v39 = vld [vmem:[#allocation4 + $0x50] sm:$0xff] }
 0x3d6   : > { %v5853_v56 = vld [vmem:[#allocation4 + $0xf8] sm:$0xff]  ;;  %v6303_v53 = vpop.f32.mrf.mxu1 }
 0x3d7   : > { %v6661_v37 = vpop.f32.mrf.mxu0  ;;  %6128 = vst.msk [vmem:[#allocation4 + $0xe0] sm:$0xff] %vm280_vm1, %v6096_v12  ;;  %v6099_v16 = vadd.f32 %v8826_v29, %v5853_v56  ;;  %6462 = vst.msk [vmem:[#allocation4 + $0x18] sm:$0xff] %vm280_vm1, %v6430_v30  ;;  %v6428_v6 = vadd.f32 %v6303_v53, %v6182_v60  ;;  %v6189_v29 = vld [vmem:[#allocation4 + $0x40] sm:$0xff] }
 0x3d8   : > { %v5851_v31 = vld [vmem:[#allocation4 + $0xe8] sm:$0xff]  ;;  %v8835_v50 = vpop.f32.mrf.mxu1 }
 0x3d9   : > { %v8869_v54 = vpop.f32.mrf.mxu0  ;;  %6131 = vst.msk [vmem:[#allocation4 + $0xf8] sm:$0xff] %vm280_vm1, %v6099_v16  ;;  %v6097_v9 = vadd.f32 %v6056_v13, %v5851_v31  ;;  %6460 = vst.msk [vmem:[#allocation4 + $0x8] sm:$0xff] %vm280_vm1, %v6428_v6  ;;  %v6433_v22 = vadd.f32 %v8835_v50, %v6187_v21  ;;  %v6192_v13 = vld [vmem:[#allocation4 + $0x58] sm:$0xff] }
 0x3da   : > { %v6541_v49 = vld [vmem:[#allocation4 + $0x10] sm:$0xff]  ;;  %v6316_v63 = vpop.f32.mrf.mxu1 }
 0x3db   : > { %v6674_v1 = vpop.f32.mrf.mxu0  ;;  %6129 = vst.msk [vmem:[#allocation4 + $0xe8] sm:$0xff] %vm280_vm1, %v6097_v9  ;;  %v6787_v34 = vadd.f32 %v8865_v57, %v6541_v49  ;;  %6465 = vst.msk [vmem:[#allocation4 + $0x30] sm:$0xff] %vm280_vm1, %v6433_v22  ;;  %v6431_v38 = vadd.f32 %v6316_v63, %v6185_v33  ;;  %v6190_v57 = vld [vmem:[#allocation4 + $0x48] sm:$0xff] }
 0x3dc   : > { %v6539_v0 = vld [vmem:[#allocation4] sm:$0xff]  ;;  %v8836_v61 = vpop.f32.mrf.mxu1 }
 0x3dd   : > { %v8870_v15 = vpop.f32.mrf.mxu0  ;;  %6819 = vst.msk [vmem:[#allocation4 + $0x10] sm:$0xff] %vm280_vm1, %v6787_v34  ;;  %v6785_v28 = vadd.f32 %v6658_v10, %v6539_v0  ;;  %6463 = vst.msk [vmem:[#allocation4 + $0x20] sm:$0xff] %vm280_vm1, %v6431_v38  ;;  %v6434_v35 = vadd.f32 %v8836_v61, %v6188_v23  ;;  %v6195_v10 = vld [vmem:[#allocation4 + $0x70] sm:$0xff] }
 0x3de   : > { %v6542_v40 = vld [vmem:[#allocation4 + $0x18] sm:$0xff]  ;;  %v6319_v2 = vpop.f32.mrf.mxu1 }
 0x3df   : > { %v6677_v52 = vpop.f32.mrf.mxu0  ;;  %6817 = vst.msk [vmem:[#allocation4] sm:$0xff] %vm280_vm1, %v6785_v28  ;;  %v6788_v46 = vadd.f32 %v8866_v4, %v6542_v40  ;;  %6466 = vst.msk [vmem:[#allocation4 + $0x38] sm:$0xff] %vm280_vm1, %v6434_v35  ;;  %v6432_v55 = vadd.f32 %v6319_v2, %v6186_v51  ;;  %v6193_v4 = vld [vmem:[#allocation4 + $0x60] sm:$0xff] }
 0x3e0   : > { %v6540_v58 = vld [vmem:[#allocation4 + $0x8] sm:$0xff]  ;;  %v8839_v18 = vpop.f32.mrf.mxu1 }
 0x3e1   : > { %v8873_v20 = vpop.f32.mrf.mxu0  ;;  %6820 = vst.msk [vmem:[#allocation4 + $0x18] sm:$0xff] %vm280_vm1, %v6788_v46  ;;  %v6786_v7 = vadd.f32 %v6661_v37, %v6540_v58  ;;  %6464 = vst.msk [vmem:[#allocation4 + $0x28] sm:$0xff] %vm280_vm1, %v6432_v55  ;;  %v6437_v5 = vadd.f32 %v8839_v18, %v6191_v39  ;;  %v6196_v37 = vld [vmem:[#allocation4 + $0x78] sm:$0xff] }
 0x3e2   : > { %v6545_v19 = vld [vmem:[#allocation4 + $0x30] sm:$0xff]  ;;  %v6332_v43 = vpop.f32.mrf.mxu1 }
 0x3e3   : > { %v6690_v44 = vpop.f32.mrf.mxu0  ;;  %6818 = vst.msk [vmem:[#allocation4 + $0x8] sm:$0xff] %vm280_vm1, %v6786_v7  ;;  %v6791_v11 = vadd.f32 %v8869_v54, %v6545_v19  ;;  %6469 = vst.msk [vmem:[#allocation4 + $0x50] sm:$0xff] %vm280_vm1, %v6437_v5  ;;  %v6435_v41 = vadd.f32 %v6332_v43, %v6189_v29  ;;  %v6194_v54 = vld [vmem:[#allocation4 + $0x68] sm:$0xff] }
 0x3e4   : > { %v6543_v3 = vld [vmem:[#allocation4 + $0x20] sm:$0xff]  ;;  %v8840_v8 = vpop.f32.mrf.mxu1 }
 0x3e5   : > { %v8874_v42 = vpop.f32.mrf.mxu0  ;;  %6823 = vst.msk [vmem:[#allocation4 + $0x30] sm:$0xff] %vm280_vm1, %v6791_v11  ;;  %v6789_v25 = vadd.f32 %v6674_v1, %v6543_v3  ;;  %6467 = vst.msk [vmem:[#allocation4 + $0x40] sm:$0xff] %vm280_vm1, %v6435_v41  ;;  %v6438_v45 = vadd.f32 %v8840_v8, %v6192_v13  ;;  %v6199_v1 = vld [vmem:[#allocation4 + $0x90] sm:$0xff] }
 0x3e6   : > { %v6546_v36 = vld [vmem:[#allocation4 + $0x38] sm:$0xff]  ;;  %v6335_v17 = vpop.f32.mrf.mxu1 }
 0x3e7   : > { %v6693_v62 = vpop.f32.mrf.mxu0  ;;  %6821 = vst.msk [vmem:[#allocation4 + $0x20] sm:$0xff] %vm280_vm1, %v6789_v25  ;;  %v6792_v26 = vadd.f32 %v8870_v15, %v6546_v36  ;;  %6470 = vst.msk [vmem:[#allocation4 + $0x58] sm:$0xff] %vm280_vm1, %v6438_v45  ;;  %v6436_v59 = vadd.f32 %v6335_v17, %v6190_v57  ;;  %v6197_v15 = vld [vmem:[#allocation4 + $0x80] sm:$0xff] }
 0x3e8   : > { %v6544_v48 = vld [vmem:[#allocation4 + $0x28] sm:$0xff]  ;;  %v8843_v14 = vpop.f32.mrf.mxu1 }
 0x3e9   : > { %v8877_v27 = vpop.f32.mrf.mxu0  ;;  %6824 = vst.msk [vmem:[#allocation4 + $0x38] sm:$0xff] %vm280_vm1, %v6792_v26  ;;  %v6790_v47 = vadd.f32 %v6677_v52, %v6544_v48  ;;  %6468 = vst.msk [vmem:[#allocation4 + $0x48] sm:$0xff] %vm280_vm1, %v6436_v59  ;;  %v6441_v24 = vadd.f32 %v8843_v14, %v6195_v10  ;;  %v6200_v52 = vld [vmem:[#allocation4 + $0x98] sm:$0xff] }
 0x3ea   : > { %v6549_v32 = vld [vmem:[#allocation4 + $0x50] sm:$0xff]  ;;  %v6348_v12 = vpop.f32.mrf.mxu1 }
 0x3eb   : > { %v6706_v30 = vpop.f32.mrf.mxu0  ;;  %6822 = vst.msk [vmem:[#allocation4 + $0x28] sm:$0xff] %vm280_vm1, %v6790_v47  ;;  %v6795_v56 = vadd.f32 %v8873_v20, %v6549_v32  ;;  %6473 = vst.msk [vmem:[#allocation4 + $0x70] sm:$0xff] %vm280_vm1, %v6441_v24  ;;  %v6439_v60 = vadd.f32 %v6348_v12, %v6193_v4  ;;  %v6198_v20 = vld [vmem:[#allocation4 + $0x88] sm:$0xff] }
 0x3ec   : > { %v6547_v53 = vld [vmem:[#allocation4 + $0x40] sm:$0xff]  ;;  %v8844_v16 = vpop.f32.mrf.mxu1 }
 0x3ed   : > { %v8878_v6 = vpop.f32.mrf.mxu0  ;;  %6827 = vst.msk [vmem:[#allocation4 + $0x50] sm:$0xff] %vm280_vm1, %v6795_v56  ;;  %v6793_v31 = vadd.f32 %v6690_v44, %v6547_v53  ;;  %6471 = vst.msk [vmem:[#allocation4 + $0x60] sm:$0xff] %vm280_vm1, %v6439_v60  ;;  %v6442_v21 = vadd.f32 %v8844_v16, %v6196_v37  ;;  %v6203_v44 = vld [vmem:[#allocation4 + $0xb0] sm:$0xff] }
 0x3ee   : > { %v6550_v50 = vld [vmem:[#allocation4 + $0x58] sm:$0xff]  ;;  %v6351_v9 = vpop.f32.mrf.mxu1 }
 0x3ef   : > { %v6709_v22 = vpop.f32.mrf.mxu0  ;;  %6825 = vst.msk [vmem:[#allocation4 + $0x40] sm:$0xff] %vm280_vm1, %v6793_v31  ;;  %v6796_v49 = vadd.f32 %v8874_v42, %v6550_v50  ;;  %6474 = vst.msk [vmem:[#allocation4 + $0x78] sm:$0xff] %vm280_vm1, %v6442_v21  ;;  %v6440_v33 = vadd.f32 %v6351_v9, %v6194_v54  ;;  %v6201_v42 = vld [vmem:[#allocation4 + $0xa0] sm:$0xff] }
 0x3f0   : > { %v6548_v63 = vld [vmem:[#allocation4 + $0x48] sm:$0xff]  ;;  %v8847_v34 = vpop.f32.mrf.mxu1 }
 0x3f1   : > { %v8881_v38 = vpop.f32.mrf.mxu0  ;;  %6828 = vst.msk [vmem:[#allocation4 + $0x58] sm:$0xff] %vm280_vm1, %v6796_v49  ;;  %v6794_v0 = vadd.f32 %v6693_v62, %v6548_v63  ;;  %6472 = vst.msk [vmem:[#allocation4 + $0x68] sm:$0xff] %vm280_vm1, %v6440_v33  ;;  %v6445_v23 = vadd.f32 %v8847_v34, %v6199_v1  ;;  %v6204_v62 = vld [vmem:[#allocation4 + $0xb8] sm:$0xff] }
 0x3f2   : > { %v6553_v61 = vld [vmem:[#allocation4 + $0x70] sm:$0xff]  ;;  %v6364_v28 = vpop.f32.mrf.mxu1 }
 0x3f3   : > { %v6722_v35 = vpop.f32.mrf.mxu0  ;;  %6826 = vst.msk [vmem:[#allocation4 + $0x48] sm:$0xff] %vm280_vm1, %v6794_v0  ;;  %v6799_v40 = vadd.f32 %v8877_v27, %v6553_v61  ;;  %6477 = vst.msk [vmem:[#allocation4 + $0x90] sm:$0xff] %vm280_vm1, %v6445_v23  ;;  %v6443_v51 = vadd.f32 %v6364_v28, %v6197_v15  ;;  %v6202_v27 = vld [vmem:[#allocation4 + $0xa8] sm:$0xff] }
 0x3f4   : > { %v6551_v2 = vld [vmem:[#allocation4 + $0x60] sm:$0xff]  ;;  %v8848_v46 = vpop.f32.mrf.mxu1 }
 0x3f5   : > { %v8882_v55 = vpop.f32.mrf.mxu0  ;;  %6831 = vst.msk [vmem:[#allocation4 + $0x70] sm:$0xff] %vm280_vm1, %v6799_v40  ;;  %v6797_v58 = vadd.f32 %v6706_v30, %v6551_v2  ;;  %6475 = vst.msk [vmem:[#allocation4 + $0x80] sm:$0xff] %vm280_vm1, %v6443_v51  ;;  %v6446_v39 = vadd.f32 %v8848_v46, %v6200_v52  ;;  %v6207_v30 = vld [vmem:[#allocation4 + $0xd0] sm:$0xff]  ;;  %v6209_v46 = vld [vmem:[#allocation4 + $0xe0] sm:$0xff] }
 0x3f6   : > { %v6554_v18 = vld [vmem:[#allocation4 + $0x78] sm:$0xff]  ;;  %v6367_v7 = vpop.f32.mrf.mxu1 }
 0x3f7   : > { %v6725_v5 = vpop.f32.mrf.mxu0  ;;  %6829 = vst.msk [vmem:[#allocation4 + $0x60] sm:$0xff] %vm280_vm1, %v6797_v58  ;;  %v6800_v19 = vadd.f32 %v8878_v6, %v6554_v18  ;;  %6478 = vst.msk [vmem:[#allocation4 + $0x98] sm:$0xff] %vm280_vm1, %v6446_v39  ;;  %v6444_v29 = vadd.f32 %v6367_v7, %v6198_v20  ;;  %v6205_v6 = vld [vmem:[#allocation4 + $0xc0] sm:$0xff]  ;;  %v6212_v7 = vld [vmem:[#allocation4 + $0xf8] sm:$0xff] }
 0x3f8   : > { %v6552_v43 = vld [vmem:[#allocation4 + $0x68] sm:$0xff]  ;;  %v8851_v11 = vpop.f32.mrf.mxu1 }
 0x3f9   : > { %v8885_v41 = vpop.f32.mrf.mxu0  ;;  %6832 = vst.msk [vmem:[#allocation4 + $0x78] sm:$0xff] %vm280_vm1, %v6800_v19  ;;  %v6798_v3 = vadd.f32 %v6709_v22, %v6552_v43  ;;  %6476 = vst.msk [vmem:[#allocation4 + $0x88] sm:$0xff] %vm280_vm1, %v6444_v29  ;;  %v6449_v13 = vadd.f32 %v8851_v11, %v6203_v44  ;;  %v6208_v22 = vld [vmem:[#allocation4 + $0xd8] sm:$0xff]  ;;  %v6210_v44 = vld [vmem:[#allocation4 + $0xe8] sm:$0xff] }
 0x3fa   : > { %v6557_v8 = vld [vmem:[#allocation4 + $0x90] sm:$0xff]  ;;  %v6380_v25 = vpop.f32.mrf.mxu1 }
 0x3fb   : > { %v6738_v45 = vpop.f32.mrf.mxu0  ;;  %6830 = vst.msk [vmem:[#allocation4 + $0x68] sm:$0xff] %vm280_vm1, %v6798_v3  ;;  %v6803_v36 = vadd.f32 %v8881_v38, %v6557_v8  ;;  %6481 = vst.msk [vmem:[#allocation4 + $0xb0] sm:$0xff] %vm280_vm1, %v6449_v13  ;;  %v6447_v57 = vadd.f32 %v6380_v25, %v6201_v42  ;;  %v6206_v38 = vld [vmem:[#allocation4 + $0xc8] sm:$0xff]  ;;  %v6899_v42 = vld [vmem:[#allocation4 + $0x10] sm:$0xff] }
 0x3fc   : > { %v6555_v17 = vld [vmem:[#allocation4 + $0x80] sm:$0xff]  ;;  %v8852_v26 = vpop.f32.mrf.mxu1 }
 0x3fd   : > { %v8886_v59 = vpop.f32.mrf.mxu0  ;;  %6835 = vst.msk [vmem:[#allocation4 + $0x90] sm:$0xff] %vm280_vm1, %v6803_v36  ;;  %v6801_v48 = vadd.f32 %v6722_v35, %v6555_v17  ;;  %6479 = vst.msk [vmem:[#allocation4 + $0xa0] sm:$0xff] %vm280_vm1, %v6447_v57  ;;  %v6450_v10 = vadd.f32 %v8852_v26, %v6204_v62  ;;  %v6211_v35 = vld [vmem:[#allocation4 + $0xf0] sm:$0xff]  ;;  %v6897_v17 = vld [vmem:[#allocation4] sm:$0xff] }
 0x3fe   : > { %v6558_v14 = vld [vmem:[#allocation4 + $0x98] sm:$0xff]  ;;  %v6383_v47 = vpop.f32.mrf.mxu1 }
 0x3ff   : > { %v6741_v24 = vpop.f32.mrf.mxu0  ;;  %6833 = vst.msk [vmem:[#allocation4 + $0x80] sm:$0xff] %vm280_vm1, %v6801_v48  ;;  %v6804_v32 = vadd.f32 %v8882_v55, %v6558_v14  ;;  %6482 = vst.msk [vmem:[#allocation4 + $0xb8] sm:$0xff] %vm280_vm1, %v6450_v10  ;;  %v6448_v4 = vadd.f32 %v6383_v47, %v6202_v27  ;;  %v6900_v14 = vld [vmem:[#allocation4 + $0x18] sm:$0xff] }
 0x400   : > { %v6556_v12 = vld [vmem:[#allocation4 + $0x88] sm:$0xff]  ;;  %v8855_v56 = vpop.f32.mrf.mxu1 }
 0x401   : > { %v8889_v60 = vpop.f32.mrf.mxu0  ;;  %6836 = vst.msk [vmem:[#allocation4 + $0x98] sm:$0xff] %vm280_vm1, %v6804_v32  ;;  %v6802_v53 = vadd.f32 %v6725_v5, %v6556_v12  ;;  %6480 = vst.msk [vmem:[#allocation4 + $0xa8] sm:$0xff] %vm280_vm1, %v6448_v4  ;;  %v6453_v37 = vadd.f32 %v8855_v56, %v6207_v30  ;;  %v6898_v4 = vld [vmem:[#allocation4 + $0x8] sm:$0xff]  ;;  %v10933_v56 = vld [vmem:[%s11159_s5] ss:$0 sm:$0xff] }
 0x402   : > { %v6561_v16 = vld [vmem:[#allocation4 + $0xb0] sm:$0xff]  ;;  %v6396_v31 = vpop.f32.mrf.mxu1 }
 0x403   : > { %v6754_v21 = vpop.f32.mrf.mxu0  ;;  %6834 = vst.msk [vmem:[#allocation4 + $0x88] sm:$0xff] %vm280_vm1, %v6802_v53  ;;  %v6807_v50 = vadd.f32 %v8885_v41, %v6561_v16  ;;  %6485 = vst.msk [vmem:[#allocation4 + $0xd0] sm:$0xff] %vm280_vm1, %v6453_v37  ;;  %v6451_v54 = vadd.f32 %v6396_v31, %v6205_v6  ;;  %v7996_v37 = vld [vmem:[%s9408_s15 + $0x8] sm:$0xff]   ;;  %v6903_v6 = vld [vmem:[#allocation4 + $0x30] sm:$0xff] }
 0x404   : > { %v6559_v9 = vld [vmem:[#allocation4 + $0xa0] sm:$0xff]  ;;  %v8856_v49 = vpop.f32.mrf.mxu1 }
 0x405   : > { %v8890_v33 = vpop.f32.mrf.mxu0  ;;  %6839 = vst.msk [vmem:[#allocation4 + $0xb0] sm:$0xff] %vm280_vm1, %v6807_v50  ;;  %v6805_v63 = vadd.f32 %v6738_v45, %v6559_v9  ;;  %6483 = vst.msk [vmem:[#allocation4 + $0xc0] sm:$0xff] %vm280_vm1, %v6451_v54  ;;  %v6454_v1 = vadd.f32 %v8856_v49, %v6208_v22  ;;  %v7918_v22 = vld [vmem:[%s9408_s15] sm:$0xff]  }
 0x406   : > { %v6562_v34 = vld [vmem:[#allocation4 + $0xb8] sm:$0xff]  ;;  %v6399_v0 = vpop.f32.mrf.mxu1  ;;  %v6901_v49 = vld [vmem:[#allocation4 + $0x20] sm:$0xff] }
 0x407   : > { %6837 = vst.msk [vmem:[#allocation4 + $0xa0] sm:$0xff] %vm280_vm1, %v6805_v63  ;;  %v6808_v23 = vadd.f32 %v8886_v59, %v6562_v34  ;;  %6486 = vst.msk [vmem:[#allocation4 + $0xd8] sm:$0xff] %vm280_vm1, %v6454_v1  ;;  %v6452_v61 = vadd.f32 %v6399_v0, %v6206_v38  ;;  %v6757_v28 = vpop.f32.mrf.mxu0  ;;  %v7923_v1 = vunpack.c.l.bf16 %v7996_v37  ;;  %v6904_v0 = vld [vmem:[#allocation4 + $0x38] sm:$0xff] }
 0x408   : > { %v6560_v15 = vld [vmem:[#allocation4 + $0xa8] sm:$0xff]  ;;  %v8859_v40 = vpop.f32.mrf.mxu1 }
 0x409   : > { %6840 = vst.msk [vmem:[#allocation4 + $0xb8] sm:$0xff] %vm280_vm1, %v6808_v23  ;;  %v6806_v51 = vadd.f32 %v6741_v24, %v6560_v15  ;;  %6484 = vst.msk [vmem:[#allocation4 + $0xc8] sm:$0xff] %vm280_vm1, %v6452_v61  ;;  %v6457_v2 = vadd.f32 %v8859_v40, %v6211_v35  ;;  %v8893_v58 = vpop.f32.mrf.mxu0 }
 0x40a   : > { %v6565_v52 = vld [vmem:[#allocation4 + $0xd0] sm:$0xff]  ;;  %v6412_v55 = vpop.f32.mrf.mxu1 }
 0x40b   : > { %6838 = vst.msk [vmem:[#allocation4 + $0xa8] sm:$0xff] %vm280_vm1, %v6806_v51  ;;  %v6811_v39 = vadd.f32 %v8889_v60, %v6565_v52  ;;  %6489 = vst.msk [vmem:[#allocation4 + $0xf0] sm:$0xff] %vm280_vm1, %v6457_v2  ;;  %v6455_v18 = vadd.f32 %v6412_v55, %v6209_v46  ;;  %v6770_v41 = vpop.f32.mrf.mxu0  ;;  %v7924_v51 = vunpack.c.h.bf16 %v7996_v37  ;;  %v6902_v2 = vld [vmem:[#allocation4 + $0x28] sm:$0xff] }
 0x40c   : > { %v6563_v20 = vld [vmem:[#allocation4 + $0xc0] sm:$0xff]  ;;  %v8860_v5 = vpop.f32.mrf.mxu1 }
 0x40d   : > { %6843 = vst.msk [vmem:[#allocation4 + $0xd0] sm:$0xff] %vm280_vm1, %v6811_v39  ;;  %v6809_v19 = vadd.f32 %v6754_v21, %v6563_v20  ;;  %6487 = vst.msk [vmem:[#allocation4 + $0xe0] sm:$0xff] %vm280_vm1, %v6455_v18  ;;  %v6458_v29 = vadd.f32 %v8860_v5, %v6212_v7  ;;  %v8894_v26 = vpop.f32.mrf.mxu0  ;;  %v10941_v21 = vld [vmem:[%s11160_s6] ss:$0 sm:$0xff]  ;;  %v10956_v39 = vld [vmem:[%s9408_s15 + $0x18] sm:$0xff]   ;;  %v7920_v7 = vunpack.c.h.bf16 %v7918_v22 }
 0x40e   : > { %v6566_v43 = vld [vmem:[#allocation4 + $0xd8] sm:$0xff]  ;;  %v6415_v11 = vpop.f32.mrf.mxu1 }
 0x40f   : > { %6841 = vst.msk [vmem:[#allocation4 + $0xc0] sm:$0xff] %vm280_vm1, %v6809_v19  ;;  %v6812_v3 = vadd.f32 %v8890_v33, %v6566_v43  ;;  %6490 = vst.msk [vmem:[#allocation4 + $0xf8] sm:$0xff] %vm280_vm1, %v6458_v29  ;;  %v6456_v13 = vadd.f32 %v6415_v11, %v6210_v44  ;;  %v6773_v30 = vpop.f32.mrf.mxu0  ;;  %v10967_v11 = vld [vmem:[%s9408_s15 + $0x10] sm:$0xff]  }
 0x410   : > { %v6564_v8 = vld [vmem:[#allocation4 + $0xc8] sm:$0xff]  ;;  %v8899_v25 = vpop.f32.mrf.mxu1 }
 0x411   : > { %6844 = vst.msk [vmem:[#allocation4 + $0xd8] sm:$0xff] %vm280_vm1, %v6812_v3  ;;  %v6810_v45 = vadd.f32 %v6757_v28, %v6564_v8  ;;  %6488 = vst.msk [vmem:[#allocation4 + $0xe8] sm:$0xff] %vm280_vm1, %v6456_v13  ;;  %v7145_v36 = vadd.f32 %v8899_v25, %v6899_v42  ;;  %v7919_v28 = vunpack.c.l.bf16 %v7918_v22  ;;  %v7931_v13 = vunpack.c.l.bf16 %v10956_v39 }
 0x412   : > { %v6569_v57 = vld [vmem:[#allocation4 + $0xf0] sm:$0xff]  ;;  %v7016_v62 = vpop.f32.mrf.mxu1 }
 0x413   : > { %6842 = vst.msk [vmem:[#allocation4 + $0xc8] sm:$0xff] %vm280_vm1, %v6810_v45  ;;  %7177 = vst.msk [vmem:[#allocation4 + $0x10] sm:$0xff] %vm280_vm1, %v7145_v36  ;;  %v6815_v59 = vadd.f32 %v8893_v58, %v6569_v57  ;;  %v7143_v48 = vadd.f32 %v7016_v62, %v6897_v17  ;;  %v6905_v17 = vld [vmem:[#allocation4 + $0x40] sm:$0xff] }
 0x414   : > { %v6567_v10 = vld [vmem:[#allocation4 + $0xe0] sm:$0xff]  ;;  %v8900_v27 = vpop.f32.mrf.mxu1 }
 0x415   : > { %6847 = vst.msk [vmem:[#allocation4 + $0xf0] sm:$0xff] %vm280_vm1, %v6815_v59  ;;  %7175 = vst.msk [vmem:[#allocation4] sm:$0xff] %vm280_vm1, %v7143_v48  ;;  %v6813_v47 = vadd.f32 %v6770_v41, %v6567_v10  ;;  %v7146_v24 = vadd.f32 %v8900_v27, %v6900_v14  ;;  %v6907_v41 = vld [vmem:[#allocation4 + $0x50] sm:$0xff] }
 0x416   : > { %v6570_v32 = vld [vmem:[#allocation4 + $0xf8] sm:$0xff]  ;;  %v7019_v12 = vpop.f32.mrf.mxu1 }
 0x417   : > { %6845 = vst.msk [vmem:[#allocation4 + $0xe0] sm:$0xff] %vm280_vm1, %v6813_v47  ;;  %7178 = vst.msk [vmem:[#allocation4 + $0x18] sm:$0xff] %vm280_vm1, %v7146_v24  ;;  %v6816_v60 = vadd.f32 %v8894_v26, %v6570_v32  ;;  %v7144_v53 = vadd.f32 %v7019_v12, %v6898_v4  ;;  %v7927_v26 = vunpack.c.l.bf16 %v10967_v11  ;;  %v6908_v24 = vld [vmem:[#allocation4 + $0x58] sm:$0xff]  ;;  %v7932_v4 = vunpack.c.h.bf16 %v10956_v39 }
 0x418   : > { %v6568_v16 = vld [vmem:[#allocation4 + $0xe8] sm:$0xff]  ;;  %v8903_v31 = vpop.f32.mrf.mxu1 }
 0x419   : > { %6848 = vst.msk [vmem:[#allocation4 + $0xf8] sm:$0xff] %vm280_vm1, %v6816_v60  ;;  %7176 = vst.msk [vmem:[#allocation4 + $0x8] sm:$0xff] %vm280_vm1, %v7144_v53  ;;  %v6814_v50 = vadd.f32 %v6773_v30, %v6568_v16  ;;  %v7149_v54 = vadd.f32 %v8903_v31, %v6903_v6  ;;  %v6906_v6 = vld [vmem:[#allocation4 + $0x48] sm:$0xff] }
 0x41a   : > { %v7209_v9 = vld [vmem:[#allocation4 + $0x10] sm:$0xff]  ;;  %v7032_v33 = vpop.f32.mrf.mxu1 }
 0x41b   : > { %v7248_v63 = vmul.f32 %v10933_v56, %v7209_v9  ;;  %6846 = vst.msk [vmem:[#allocation4 + $0xe8] sm:$0xff] %vm280_vm1, %v6814_v50  ;;  %7181 = vst.msk [vmem:[#allocation4 + $0x30] sm:$0xff] %vm280_vm1, %v7149_v54  ;;  %v7147_v34 = vadd.f32 %v7032_v33, %v6901_v49  ;;  %v7928_v50 = vunpack.c.h.bf16 %v10967_v11 }
 0x41c   : > { %v7207_v38 = vld [vmem:[#allocation4] sm:$0xff]  ;;  %v8904_v23 = vpop.f32.mrf.mxu1 }
 0x41d   : > { %v7287_v61 = vadd.f32 %v10941_v21, %v7248_v63  ;;  %v7246_v15 = vmul.f32 %v10933_v56, %v7207_v38  ;;  %7179 = vst.msk [vmem:[#allocation4 + $0x20] sm:$0xff] %vm280_vm1, %v7147_v34  ;;  %v7150_v35 = vadd.f32 %v8904_v23, %v6904_v0  ;;  %v6911_v34 = vld [vmem:[#allocation4 + $0x70] sm:$0xff]  ;;  %v6909_v0 = vld [vmem:[#allocation4 + $0x60] sm:$0xff] }
 0x41e   : > { %v7210_v40 = vld [vmem:[#allocation4 + $0x18] sm:$0xff]  ;;  %v7035_v52 = vpop.f32.mrf.mxu1 }
 0x41f   : > { %v7383_v46 = vadd.f32 %v7923_v1, %v7287_v61  ;;  %v7285_v55 = vadd.f32 %v10941_v21, %v7246_v15  ;;  %v7249_v58 = vmul.f32 %v10933_v56, %v7210_v40  ;;  %7182 = vst.msk [vmem:[#allocation4 + $0x38] sm:$0xff] %vm280_vm1, %v7150_v35  ;;  %v7148_v18 = vadd.f32 %v7035_v52, %v6902_v2  ;;  %v8000_v1 = vld [vmem:[%s9408_s15 + $0x28] sm:$0xff]   ;;  %v7999_v40 = vld [vmem:[%s9408_s15 + $0x20] sm:$0xff]  }
 0x420   : > { %v7208_v20 = vld [vmem:[#allocation4 + $0x8] sm:$0xff]  ;;  %v8907_v5 = vpop.f32.mrf.mxu1  ;;  %v7939_v52 = vunpack.c.l.bf16 %v8000_v1 }
 0x421   : > { %v7415_v19 = vmax.f32 %v7383_v46, 0.0  ;;  %v7381_v29 = vadd.f32 %v7919_v28, %v7285_v55  ;;  %v7288_v43 = vadd.f32 %v10941_v21, %v7249_v58  ;;  %v7247_v44 = vmul.f32 %v10933_v56, %v7208_v20  ;;  %7180 = vst.msk [vmem:[#allocation4 + $0x28] sm:$0xff] %vm280_vm1, %v7148_v18  ;;  %v6912_v46 = vld [vmem:[#allocation4 + $0x78] sm:$0xff] }
 0x422   : > { %v7213_v3 = vld [vmem:[#allocation4 + $0x30] sm:$0xff]  ;;  %v7153_v8 = vadd.f32 %v8907_v5, %v6907_v41  ;;  %v7048_v42 = vpop.f32.mrf.mxu1 }
 0x423   : > { %7447 = vst.msk [vmem:[%s10962_s13 + $0x10] sm:$0xff] %vm280_vm1, %v7415_v19  ;;  %v7413_v25 = vmax.f32 %v7381_v29, 0.0  ;;  %v7384_v45 = vadd.f32 %v7924_v51, %v7288_v43  ;;  %v7286_v36 = vadd.f32 %v10941_v21, %v7247_v44  ;;  %v7252_v57 = vmul.f32 %v10933_v56, %v7213_v3  ;;  %v6910_v29 = vld [vmem:[#allocation4 + $0x68] sm:$0xff] }
 0x424   : > { %v7211_v62 = vld [vmem:[#allocation4 + $0x20] sm:$0xff]  ;;  %7185 = vst.msk [vmem:[#allocation4 + $0x50] sm:$0xff] %vm280_vm1, %v7153_v8  ;;  %v7151_v59 = vadd.f32 %v7048_v42, %v6905_v17  ;;  %v8908_v48 = vpop.f32.mrf.mxu1  ;;  %v7935_v19 = vunpack.c.l.bf16 %v7999_v40  ;;  %v7940_v42 = vunpack.c.h.bf16 %v8000_v1  ;;  %v7936_v17 = vunpack.c.h.bf16 %v7999_v40 }
 0x425   : > { %7445 = vst.msk [vmem:[%s10962_s13] sm:$0xff] %vm280_vm1, %v7413_v25  ;;  %v7416_v10 = vmax.f32 %v7384_v45, 0.0  ;;  %v7382_v14 = vadd.f32 %v7920_v7, %v7286_v36  ;;  %v7291_v27 = vadd.f32 %v10941_v21, %v7252_v57  ;;  %v7250_v47 = vmul.f32 %v10933_v56, %v7211_v62  ;;  %v11012_v25 = vld [vmem:[%s9408_s15 + $0x38] sm:$0xff]   ;;  %v6915_v45 = vld [vmem:[#allocation4 + $0x90] sm:$0xff] }
 0x426   : > { %v7214_v32 = vld [vmem:[#allocation4 + $0x38] sm:$0xff]  ;;  %7183 = vst.msk [vmem:[#allocation4 + $0x40] sm:$0xff] %vm280_vm1, %v7151_v59  ;;  %v7154_v12 = vadd.f32 %v8908_v48, %v6908_v24  ;;  %v7051_v30 = vpop.f32.mrf.mxu1 }
 0x427   : > { %7448 = vst.msk [vmem:[%s10962_s13 + $0x18] sm:$0xff] %vm280_vm1, %v7416_v10  ;;  %v7414_v60 = vmax.f32 %v7382_v14, 0.0  ;;  %v7387_v53 = vadd.f32 %v7931_v13, %v7291_v27  ;;  %v7289_v37 = vadd.f32 %v10941_v21, %v7250_v47  ;;  %v7253_v16 = vmul.f32 %v10933_v56, %v7214_v32  ;;  %v11020_v14 = vld [vmem:[%s9408_s15 + $0x30] sm:$0xff]   ;;  %v6913_v27 = vld [vmem:[#allocation4 + $0x80] sm:$0xff] }
 0x428   : > { %v7212_v31 = vld [vmem:[#allocation4 + $0x28] sm:$0xff]  ;;  %7186 = vst.msk [vmem:[#allocation4 + $0x58] sm:$0xff] %vm280_vm1, %v7154_v12  ;;  %v7152_v54 = vadd.f32 %v7051_v30, %v6906_v6  ;;  %v8911_v9 = vpop.f32.mrf.mxu1  ;;  %v7947_v32 = vunpack.c.l.bf16 %v11012_v25  ;;  %v7944_v40 = vunpack.c.h.bf16 %v11020_v14 }
 0x429   : > { %7446 = vst.msk [vmem:[%s10962_s13 + $0x8] sm:$0xff] %vm280_vm1, %v7414_v60  ;;  %v7419_v22 = vmax.f32 %v7387_v53, 0.0  ;;  %v7385_v49 = vadd.f32 %v7927_v26, %v7289_v37  ;;  %v7292_v33 = vadd.f32 %v10941_v21, %v7253_v16  ;;  %v7251_v63 = vmul.f32 %v10933_v56, %v7212_v31  ;;  %v6916_v16 = vld [vmem:[#allocation4 + $0x98] sm:$0xff] }
 0x42a   : > { %7184 = vst.msk [vmem:[#allocation4 + $0x48] sm:$0xff] %vm280_vm1, %v7152_v54  ;;  %v7157_v38 = vadd.f32 %v8911_v9, %v6911_v34  ;;  %v7064_v23 = vpop.f32.mrf.mxu1 }
 0x42b   : > { %7451 = vst.msk [vmem:[%s10962_s13 + $0x30] sm:$0xff] %vm280_vm1, %v7419_v22  ;;  %v7417_v61 = vmax.f32 %v7385_v49, 0.0  ;;  %v7388_v15 = vadd.f32 %v7932_v4, %v7292_v33  ;;  %v7290_v28 = vadd.f32 %v10941_v21, %v7251_v63  ;;  %v7217_v35 = vld [vmem:[#allocation4 + $0x50] sm:$0xff]  ;;  %v7155_v51 = vadd.f32 %v7064_v23, %v6909_v0  ;;  %v6914_v63 = vld [vmem:[#allocation4 + $0x88] sm:$0xff] }
 0x42c   : > { %v7256_v2 = vmul.f32 %v10933_v56, %v7217_v35  ;;  %7189 = vst.msk [vmem:[#allocation4 + $0x70] sm:$0xff] %vm280_vm1, %v7157_v38  ;;  %v8912_v55 = vpop.f32.mrf.mxu1  ;;  %v7948_v0 = vunpack.c.h.bf16 %v11012_v25  ;;  %v11038_v23 = vld [vmem:[%s9408_s15 + $0x48] sm:$0xff]  }
 0x42d   : > { %7449 = vst.msk [vmem:[%s10962_s13 + $0x20] sm:$0xff] %vm280_vm1, %v7417_v61  ;;  %v7420_v58 = vmax.f32 %v7388_v15, 0.0  ;;  %v7386_v39 = vadd.f32 %v7928_v50, %v7290_v28  ;;  %v7215_v18 = vld [vmem:[#allocation4 + $0x40] sm:$0xff]  ;;  %7187 = vst.msk [vmem:[#allocation4 + $0x60] sm:$0xff] %vm280_vm1, %v7155_v51  ;;  %v7158_v20 = vadd.f32 %v8912_v55, %v6912_v46  ;;  %v7943_v50 = vunpack.c.l.bf16 %v11020_v14  ;;  %v6919_v51 = vld [vmem:[#allocation4 + $0xb0] sm:$0xff] }
 0x42e   : > { %v7295_v7 = vadd.f32 %v10941_v21, %v7256_v2  ;;  %v7254_v5 = vmul.f32 %v10933_v56, %v7215_v18  ;;  %v7067_v43 = vpop.f32.mrf.mxu1 }
 0x42f   : > { %7452 = vst.msk [vmem:[%s10962_s13 + $0x38] sm:$0xff] %vm280_vm1, %v7420_v58  ;;  %v7418_v44 = vmax.f32 %v7386_v39, 0.0  ;;  %v7218_v11 = vld [vmem:[#allocation4 + $0x58] sm:$0xff]  ;;  %7190 = vst.msk [vmem:[#allocation4 + $0x78] sm:$0xff] %vm280_vm1, %v7158_v20  ;;  %v7156_v41 = vadd.f32 %v7067_v43, %v6910_v29  ;;  %v11047_v58 = vld [vmem:[%s9408_s15 + $0x40] sm:$0xff]  }
 0x430   : > { %v7391_v3 = vadd.f32 %v7939_v52, %v7295_v7  ;;  %v7293_v13 = vadd.f32 %v10941_v21, %v7254_v5  ;;  %v7257_v8 = vmul.f32 %v10933_v56, %v7218_v11  ;;  %v8915_v36 = vpop.f32.mrf.mxu1  ;;  %v7955_v7 = vunpack.c.l.bf16 %v11038_v23  ;;  %v6917_v11 = vld [vmem:[#allocation4 + $0xa0] sm:$0xff] }
 0x431   : > { %7450 = vst.msk [vmem:[%s10962_s13 + $0x28] sm:$0xff] %vm280_vm1, %v7418_v44  ;;  %v7216_v57 = vld [vmem:[#allocation4 + $0x48] sm:$0xff]  ;;  %7188 = vst.msk [vmem:[#allocation4 + $0x68] sm:$0xff] %vm280_vm1, %v7156_v41  ;;  %v7161_v62 = vadd.f32 %v8915_v36, %v6915_v45 }
 0x432   : > { %v7423_v26 = vmax.f32 %v7391_v3, 0.0  ;;  %v7389_v59 = vadd.f32 %v7935_v19, %v7293_v13  ;;  %v7296_v48 = vadd.f32 %v10941_v21, %v7257_v8  ;;  %v7255_v10 = vmul.f32 %v10933_v56, %v7216_v57  ;;  %v7080_v47 = vpop.f32.mrf.mxu1  ;;  %v6920_v57 = vld [vmem:[#allocation4 + $0xb8] sm:$0xff] }
 0x433   : > { %v7221_v24 = vld [vmem:[#allocation4 + $0x70] sm:$0xff]  ;;  %7193 = vst.msk [vmem:[#allocation4 + $0x90] sm:$0xff] %vm280_vm1, %v7161_v62  ;;  %v7159_v4 = vadd.f32 %v7080_v47, %v6913_v27  ;;  %v7951_v3 = vunpack.c.l.bf16 %v11047_v58  ;;  %v7956_v62 = vunpack.c.h.bf16 %v11038_v23  ;;  %v11070_v47 = vld [vmem:[%s9408_s15 + $0x58] sm:$0xff]  }
 0x434   : > { %7455 = vst.msk [vmem:[%s10962_s13 + $0x50] sm:$0xff] %vm280_vm1, %v7423_v26  ;;  %v7421_v12 = vmax.f32 %v7389_v59, 0.0  ;;  %v7392_v30 = vadd.f32 %v7940_v42, %v7296_v48  ;;  %v7294_v60 = vadd.f32 %v10941_v21, %v7255_v10  ;;  %v7260_v53 = vmul.f32 %v10933_v56, %v7221_v24  ;;  %v7219_v37 = vld [vmem:[#allocation4 + $0x60] sm:$0xff]  ;;  %v8916_v6 = vpop.f32.mrf.mxu1  ;;  %v6918_v24 = vld [vmem:[#allocation4 + $0xa8] sm:$0xff] }
 0x435   : > { %v7258_v31 = vmul.f32 %v10933_v56, %v7219_v37  ;;  %7191 = vst.msk [vmem:[#allocation4 + $0x80] sm:$0xff] %vm280_vm1, %v7159_v4  ;;  %v7162_v54 = vadd.f32 %v8916_v6, %v6916_v16  ;;  %v7952_v4 = vunpack.c.h.bf16 %v11047_v58  ;;  %v6923_v6 = vld [vmem:[#allocation4 + $0xd0] sm:$0xff] }
 0x436   : > { %7453 = vst.msk [vmem:[%s10962_s13 + $0x40] sm:$0xff] %vm280_vm1, %v7421_v12  ;;  %v7424_v9 = vmax.f32 %v7392_v30, 0.0  ;;  %v7390_v22 = vadd.f32 %v7936_v17, %v7294_v60  ;;  %v7299_v49 = vadd.f32 %v10941_v21, %v7260_v53  ;;  %v7222_v33 = vld [vmem:[#allocation4 + $0x78] sm:$0xff]  ;;  %v7083_v1 = vpop.f32.mrf.mxu1 }
 0x437   : > { %v7297_v34 = vadd.f32 %v10941_v21, %v7258_v31  ;;  %v7261_v38 = vmul.f32 %v10933_v56, %v7222_v33  ;;  %7194 = vst.msk [vmem:[#allocation4 + $0x98] sm:$0xff] %vm280_vm1, %v7162_v54  ;;  %v7160_v61 = vadd.f32 %v7083_v1, %v6914_v63  ;;  %v8005_v1 = vld [vmem:[%s9408_s15 + $0x50] sm:$0xff]  }
 0x438   : > { %7456 = vst.msk [vmem:[%s10962_s13 + $0x58] sm:$0xff] %vm280_vm1, %v7424_v9  ;;  %v7422_v15 = vmax.f32 %v7390_v22, 0.0  ;;  %v7395_v28 = vadd.f32 %v7947_v32, %v7299_v49  ;;  %v7220_v35 = vld [vmem:[#allocation4 + $0x68] sm:$0xff]  ;;  %v8919_v2 = vpop.f32.mrf.mxu1 }
 0x439   : > { %v7393_v52 = vadd.f32 %v7943_v50, %v7297_v34  ;;  %v7300_v46 = vadd.f32 %v10941_v21, %v7261_v38  ;;  %v7259_v55 = vmul.f32 %v10933_v56, %v7220_v35  ;;  %7192 = vst.msk [vmem:[#allocation4 + $0x88] sm:$0xff] %vm280_vm1, %v7160_v61  ;;  %v7165_v39 = vadd.f32 %v8919_v2, %v6919_v51  ;;  %v6921_v34 = vld [vmem:[#allocation4 + $0xc0] sm:$0xff] }
 0x43a   : > { %7454 = vst.msk [vmem:[%s10962_s13 + $0x48] sm:$0xff] %vm280_vm1, %v7422_v15  ;;  %v7427_v18 = vmax.f32 %v7395_v28, 0.0  ;;  %v7225_v20 = vld [vmem:[#allocation4 + $0x90] sm:$0xff]  ;;  %v7096_v5 = vpop.f32.mrf.mxu1  ;;  %v7963_v50 = vunpack.c.l.bf16 %v11070_v47  ;;  %v7959_v2 = vunpack.c.l.bf16 %v8005_v1 }
 0x43b   : > { %v7425_v19 = vmax.f32 %v7393_v52, 0.0  ;;  %v7396_v29 = vadd.f32 %v7948_v0, %v7300_v46  ;;  %v7298_v43 = vadd.f32 %v10941_v21, %v7259_v55  ;;  %v7264_v44 = vmul.f32 %v10933_v56, %v7225_v20  ;;  %7197 = vst.msk [vmem:[#allocation4 + $0xb0] sm:$0xff] %vm280_vm1, %v7165_v39  ;;  %v6924_v0 = vld [vmem:[#allocation4 + $0xd8] sm:$0xff]  ;;  %v6922_v52 = vld [vmem:[#allocation4 + $0xc8] sm:$0xff] }
 0x43c   : > { %7459 = vst.msk [vmem:[%s10962_s13 + $0x70] sm:$0xff] %vm280_vm1, %v7427_v18  ;;  %v7223_v41 = vld [vmem:[#allocation4 + $0x80] sm:$0xff]  ;;  %v7163_v13 = vadd.f32 %v7096_v5, %v6917_v11  ;;  %v8920_v8 = vpop.f32.mrf.mxu1  ;;  %v7964_v5 = vunpack.c.h.bf16 %v11070_v47 }
 0x43d   : > { %7457 = vst.msk [vmem:[%s10962_s13 + $0x60] sm:$0xff] %vm280_vm1, %v7425_v19  ;;  %v7428_v42 = vmax.f32 %v7396_v29, 0.0  ;;  %v7394_v25 = vadd.f32 %v7944_v40, %v7298_v43  ;;  %v7303_v45 = vadd.f32 %v10941_v21, %v7264_v44  ;;  %v7262_v36 = vmul.f32 %v10933_v56, %v7223_v41  ;;  %v8008_v19 = vld [vmem:[%s9408_s15 + $0x68] sm:$0xff]   ;;  %v6927_v29 = vld [vmem:[#allocation4 + $0xf0] sm:$0xff] }
 0x43e   : > { %v7226_v17 = vld [vmem:[#allocation4 + $0x98] sm:$0xff]  ;;  %7195 = vst.msk [vmem:[#allocation4 + $0xa0] sm:$0xff] %vm280_vm1, %v7163_v13  ;;  %v7166_v26 = vadd.f32 %v8920_v8, %v6920_v57  ;;  %v7099_v59 = vpop.f32.mrf.mxu1 }
 0x43f   : > { %7460 = vst.msk [vmem:[%s10962_s13 + $0x78] sm:$0xff] %vm280_vm1, %v7428_v42  ;;  %v7426_v48 = vmax.f32 %v7394_v25, 0.0  ;;  %v7399_v10 = vadd.f32 %v7955_v7, %v7303_v45  ;;  %v7301_v14 = vadd.f32 %v10941_v21, %v7262_v36  ;;  %v7265_v27 = vmul.f32 %v10933_v56, %v7226_v17  ;;  %v8007_v25 = vld [vmem:[%s9408_s15 + $0x60] sm:$0xff]  }
 0x440   : > { %v7224_v32 = vld [vmem:[#allocation4 + $0x88] sm:$0xff]  ;;  %7198 = vst.msk [vmem:[#allocation4 + $0xb8] sm:$0xff] %vm280_vm1, %v7166_v26  ;;  %v7164_v12 = vadd.f32 %v7099_v59, %v6918_v24  ;;  %v8923_v30 = vpop.f32.mrf.mxu1  ;;  %v7960_v42 = vunpack.c.h.bf16 %v8005_v1  ;;  %v6925_v45 = vld [vmem:[#allocation4 + $0xe0] sm:$0xff]  ;;  %v7971_v17 = vunpack.c.l.bf16 %v8008_v19  ;;  %v7967_v24 = vunpack.c.l.bf16 %v8007_v25 }
 0x441   : > { %7458 = vst.msk [vmem:[%s10962_s13 + $0x68] sm:$0xff] %vm280_vm1, %v7426_v48  ;;  %v7431_v60 = vmax.f32 %v7399_v10, 0.0  ;;  %v7397_v53 = vadd.f32 %v7951_v3, %v7301_v14  ;;  %v7304_v37 = vadd.f32 %v10941_v21, %v7265_v27  ;;  %v7263_v16 = vmul.f32 %v10933_v56, %v7224_v32  ;;  %v6928_v14 = vld [vmem:[#allocation4 + $0xf8] sm:$0xff] }
 0x442   : > { %v7229_v31 = vld [vmem:[#allocation4 + $0xb0] sm:$0xff]  ;;  %7196 = vst.msk [vmem:[#allocation4 + $0xa8] sm:$0xff] %vm280_vm1, %v7164_v12  ;;  %v7169_v54 = vadd.f32 %v8923_v30, %v6923_v6  ;;  %v7112_v9 = vpop.f32.mrf.mxu1 }
 0x443   : > { %7463 = vst.msk [vmem:[%s10962_s13 + $0x90] sm:$0xff] %vm280_vm1, %v7431_v60  ;;  %v7429_v22 = vmax.f32 %v7397_v53, 0.0  ;;  %v7400_v49 = vadd.f32 %v7956_v62, %v7304_v37  ;;  %v7302_v33 = vadd.f32 %v10941_v21, %v7263_v16  ;;  %v7268_v63 = vmul.f32 %v10933_v56, %v7229_v31  ;;  %v6926_v37 = vld [vmem:[#allocation4 + $0xe8] sm:$0xff] }
 0x444   : > { %7201 = vst.msk [vmem:[#allocation4 + $0xd0] sm:$0xff] %vm280_vm1, %v7169_v54  ;;  %v7167_v38 = vadd.f32 %v7112_v9, %v6921_v34  ;;  %v8924_v23 = vpop.f32.mrf.mxu1  ;;  %v7972_v31 = vunpack.c.h.bf16 %v8008_v19  ;;  %v7968_v34 = vunpack.c.h.bf16 %v8007_v25 }
 0x445   : > { %7461 = vst.msk [vmem:[%s10962_s13 + $0x80] sm:$0xff] %vm280_vm1, %v7429_v22  ;;  %v7432_v61 = vmax.f32 %v7400_v49, 0.0  ;;  %v7398_v15 = vadd.f32 %v7952_v4, %v7302_v33  ;;  %v7307_v28 = vadd.f32 %v10941_v21, %v7268_v63  ;;  %v7227_v35 = vld [vmem:[#allocation4 + $0xa0] sm:$0xff]  ;;  %v7170_v40 = vadd.f32 %v8924_v23, %v6924_v0  ;;  %v8010_v33 = vld [vmem:[%s9408_s15 + $0x78] sm:$0xff]  }
 0x446   : > { %v7266_v51 = vmul.f32 %v10933_v56, %v7227_v35  ;;  %7199 = vst.msk [vmem:[#allocation4 + $0xc0] sm:$0xff] %vm280_vm1, %v7167_v38  ;;  %v7115_v46 = vpop.f32.mrf.mxu1  ;;  %v8009_v38 = vld [vmem:[%s9408_s15 + $0x70] sm:$0xff]  }
 0x447   : > { %7464 = vst.msk [vmem:[%s10962_s13 + $0x98] sm:$0xff] %vm280_vm1, %v7432_v61  ;;  %v7430_v55 = vmax.f32 %v7398_v15, 0.0  ;;  %v7403_v58 = vadd.f32 %v7963_v50, %v7307_v28  ;;  %v7230_v39 = vld [vmem:[#allocation4 + $0xb8] sm:$0xff]  ;;  %7202 = vst.msk [vmem:[#allocation4 + $0xd8] sm:$0xff] %vm280_vm1, %v7170_v40  ;;  %v7168_v18 = vadd.f32 %v7115_v46, %v6922_v52  ;;  %v7979_v40 = vunpack.c.l.bf16 %v8010_v33 }
 0x448   : > { %v7305_v20 = vadd.f32 %v10941_v21, %v7266_v51  ;;  %v7269_v7 = vmul.f32 %v10933_v56, %v7230_v39  ;;  %v8927_v43 = vpop.f32.mrf.mxu1  ;;  %v7975_v52 = vunpack.c.l.bf16 %v8009_v38 }
 0x449   : > { %7462 = vst.msk [vmem:[%s10962_s13 + $0x88] sm:$0xff] %vm280_vm1, %v7430_v55  ;;  %v7435_v44 = vmax.f32 %v7403_v58, 0.0  ;;  %v7228_v11 = vld [vmem:[#allocation4 + $0xa8] sm:$0xff]  ;;  %7200 = vst.msk [vmem:[#allocation4 + $0xc8] sm:$0xff] %vm280_vm1, %v7168_v18  ;;  %v7173_v41 = vadd.f32 %v8927_v43, %v6927_v29 }
 0x44a   : > { %v7401_v3 = vadd.f32 %v7959_v2, %v7305_v20  ;;  %v7308_v13 = vadd.f32 %v10941_v21, %v7269_v7  ;;  %v7267_v8 = vmul.f32 %v10933_v56, %v7228_v11  ;;  %v7128_v36 = vpop.f32.mrf.mxu1  ;;  %v7980_v20 = vunpack.c.h.bf16 %v8010_v33 }
 0x44b   : > { %7467 = vst.msk [vmem:[%s10962_s13 + $0xb0] sm:$0xff] %vm280_vm1, %v7435_v44  ;;  %v7233_v57 = vld [vmem:[#allocation4 + $0xd0] sm:$0xff]  ;;  %7205 = vst.msk [vmem:[#allocation4 + $0xf0] sm:$0xff] %vm280_vm1, %v7173_v41  ;;  %v7171_v62 = vadd.f32 %v7128_v36, %v6925_v45  ;;  %v7976_v44 = vunpack.c.h.bf16 %v8009_v38 }
 0x44c   : > { %v7433_v26 = vmax.f32 %v7401_v3, 0.0  ;;  %v7404_v59 = vadd.f32 %v7964_v5, %v7308_v13  ;;  %v7306_v48 = vadd.f32 %v10941_v21, %v7267_v8  ;;  %v7272_v10 = vmul.f32 %v10933_v56, %v7233_v57  ;;  %v8928_v27 = vpop.f32.mrf.mxu1 }
 0x44d   : > { %v7231_v47 = vld [vmem:[#allocation4 + $0xc0] sm:$0xff]  ;;  %7203 = vst.msk [vmem:[#allocation4 + $0xe0] sm:$0xff] %vm280_vm1, %v7171_v62  ;;  %v7174_v32 = vadd.f32 %v8928_v27, %v6928_v14 }
 0x44e   : > { %7465 = vst.msk [vmem:[%s10962_s13 + $0xa0] sm:$0xff] %vm280_vm1, %v7433_v26  ;;  %v7436_v4 = vmax.f32 %v7404_v59, 0.0  ;;  %v7402_v12 = vadd.f32 %v7960_v42, %v7306_v48  ;;  %v7311_v30 = vadd.f32 %v10941_v21, %v7272_v10  ;;  %v7270_v60 = vmul.f32 %v10933_v56, %v7231_v47  ;;  %v7234_v53 = vld [vmem:[#allocation4 + $0xd8] sm:$0xff]  ;;  %v7131_v16 = vpop.f32.mrf.mxu1 }
 0x44f   : > { %v7273_v6 = vmul.f32 %v10933_v56, %v7234_v53  ;;  %7206 = vst.msk [vmem:[#allocation4 + $0xf8] sm:$0xff] %vm280_vm1, %v7174_v32  ;;  %v7172_v50 = vadd.f32 %v7131_v16, %v6926_v37 }
 0x450   : > { %7468 = vst.msk [vmem:[%s10962_s13 + $0xb8] sm:$0xff] %vm280_vm1, %v7436_v4  ;;  %v7434_v54 = vmax.f32 %v7402_v12, 0.0  ;;  %v7407_v9 = vadd.f32 %v7971_v17, %v7311_v30  ;;  %v7309_v22 = vadd.f32 %v10941_v21, %v7270_v60  ;;  %v7232_v49 = vld [vmem:[#allocation4 + $0xc8] sm:$0xff] }
 0x451   : > { %v7312_v63 = vadd.f32 %v10941_v21, %v7273_v6  ;;  %v7271_v1 = vmul.f32 %v10933_v56, %v7232_v49  ;;  %7204 = vst.msk [vmem:[#allocation4 + $0xe8] sm:$0xff] %vm280_vm1, %v7172_v50 }
 0x452   : > { %7466 = vst.msk [vmem:[%s10962_s13 + $0xa8] sm:$0xff] %vm280_vm1, %v7434_v54  ;;  %v7439_v0 = vmax.f32 %v7407_v9, 0.0  ;;  %v7405_v23 = vadd.f32 %v7967_v24, %v7309_v22  ;;  %v7237_v61 = vld [vmem:[#allocation4 + $0xf0] sm:$0xff] }
 0x453   : > { %v7408_v15 = vadd.f32 %v7972_v31, %v7312_v63  ;;  %v7310_v28 = vadd.f32 %v10941_v21, %v7271_v1  ;;  %v7276_v35 = vmul.f32 %v10933_v56, %v7237_v61 }
 0x454   : > { %7471 = vst.msk [vmem:[%s10962_s13 + $0xd0] sm:$0xff] %vm280_vm1, %v7439_v0  ;;  %v7437_v51 = vmax.f32 %v7405_v23, 0.0  ;;  %v7235_v2 = vld [vmem:[#allocation4 + $0xe0] sm:$0xff] }
 0x455   : > { %v7440_v46 = vmax.f32 %v7408_v15, 0.0  ;;  %v7406_v55 = vadd.f32 %v7968_v34, %v7310_v28  ;;  %v7315_v58 = vadd.f32 %v10941_v21, %v7276_v35  ;;  %v7274_v39 = vmul.f32 %v10933_v56, %v7235_v2 }
 0x456   : > { %7469 = vst.msk [vmem:[%s10962_s13 + $0xc0] sm:$0xff] %vm280_vm1, %v7437_v51  ;;  %v7238_v18 = vld [vmem:[#allocation4 + $0xf8] sm:$0xff] }
 0x457   : > { %7472 = vst.msk [vmem:[%s10962_s13 + $0xd8] sm:$0xff] %vm280_vm1, %v7440_v46  ;;  %v7438_v7 = vmax.f32 %v7406_v55, 0.0  ;;  %v7411_v5 = vadd.f32 %v7979_v40, %v7315_v58  ;;  %v7313_v19 = vadd.f32 %v10941_v21, %v7274_v39  ;;  %v7277_v29 = vmul.f32 %v10933_v56, %v7238_v18 }
 0x458   : > { %v7236_v43 = vld [vmem:[#allocation4 + $0xe8] sm:$0xff] }
 0x459   : > { %7470 = vst.msk [vmem:[%s10962_s13 + $0xc8] sm:$0xff] %vm280_vm1, %v7438_v7  ;;  %v7443_v11 = vmax.f32 %v7411_v5, 0.0  ;;  %v7409_v41 = vadd.f32 %v7975_v52, %v7313_v19  ;;  %v7316_v3 = vadd.f32 %v10941_v21, %v7277_v29  ;;  %v7275_v13 = vmul.f32 %v10933_v56, %v7236_v43 }
 0x45b   : > { %7475 = vst.msk [vmem:[%s10962_s13 + $0xf0] sm:$0xff] %vm280_vm1, %v7443_v11  ;;  %v7441_v8 = vmax.f32 %v7409_v41, 0.0  ;;  %v7412_v42 = vadd.f32 %v7980_v20, %v7316_v3  ;;  %v7314_v25 = vadd.f32 %v10941_v21, %v7275_v13 }
 0x45d   : > { %7473 = vst.msk [vmem:[%s10962_s13 + $0xe0] sm:$0xff] %vm280_vm1, %v7441_v8  ;;  %v7444_v45 = vmax.f32 %v7412_v42, 0.0  ;;  %v7410_v36 = vadd.f32 %v7976_v44, %v7314_v25 }
 0x45f   : > { %7476 = vst.msk [vmem:[%s10962_s13 + $0xf8] sm:$0xff] %vm280_vm1, %v7444_v45  ;;  %v7442_v57 = vmax.f32 %v7410_v36, 0.0 }
 0x461   : > { %7474 = vst.msk [vmem:[%s10962_s13 + $0xe8] sm:$0xff] %vm280_vm1, %v7442_v57 }
 0x462 PF: > { %s17_s24 = sadd.s32 1, %s8962_s24  }
 0x463   : > { %p14_p4 = scmp.ge.s32.totalorder %s17_s24, 4  }
 0x465   :  { %16 = sbr.rel (!%p14_p4) target bundleno = 1 (0x1), region = 98 }

</bundles_post_ra>
